<compile_context>
chip_gen: v5e
topology: v5e:2x2
jax: 0.10.0
libtpu: 0.0.40
codegen_flags: <defaults>
</compile_context>

<pallas_src>
import math

import numpy as np
import jax
import jax.numpy as jnp
from jax.experimental import pallas as pl
from jax.experimental.pallas import tpu as pltpu

# ---------------- small config consistent with the module (scaled down) -------
SEQ_LEN = 32
LATENT = 16
NUM_CH = [1, 32, 16, 8]          # [1] + num_channels
KW = [7, 5, 3]                   # kernel_widths
POOL = [2, 2, 2]                 # pooling_widths
OUT_PAD = [1, 1, 1]              # out_paddings (decoder reconstructs SEQ_LEN)
PADS = [(k - 1) // 2 for k in KW]
FC = [32]                        # fc_layers
IN_H = 4                         # first conv kernel height -> input H must be 4
BN_EPS = 1e-5
LEAKY = 0.01

COMPRESSED = SEQ_LEN
for _p in POOL:
    COMPRESSED = math.ceil(COMPRESSED / _p)
FC_INPUT = COMPRESSED * NUM_CH[-1]          # 32
FEAT = IN_H * SEQ_LEN                       # 128


# ------------------------------- Pallas kernel --------------------------------
def _leaky(y):
    return jnp.where(y >= 0.0, y, LEAKY * y)


def _autoencoder_kernel(x_ref,
                        we1, wo1, b1, we2, wo2, b2, we3, wo3, b3,
                        wfe1, bfe1, wfe2, bfe2, wfd1, bfd1, wfd2, bfd2,
                        m0, bm0, m1, bm1, m2, bm2,
                        o_ref):
    def mm(a_bf16, w_ref):
        return jnp.dot(a_bf16, w_ref[...], preferred_element_type=jnp.float32)

    def conv_pool(a_f32, we_ref, wo_ref, b_ref):
        # conv+BN folded into the dense matrices; MaxPool(1,2) = max of the
        # even/odd phase matmuls (legal: LeakyReLU is monotone, applied after).
        a = a_f32.astype(jnp.bfloat16)
        y = jnp.maximum(mm(a, we_ref), mm(a, wo_ref)) + b_ref[...]
        return _leaky(y)

    def dense(a_f32, w_ref, b_ref, act=True):
        y = mm(a_f32.astype(jnp.bfloat16), w_ref[...]) + b_ref[...]
        return _leaky(y) if act else y

    h = x_ref[...]                           # (TB, 128) f32, layout h*SEQ_LEN+w

    # encoder convs (flatten is implicit: rows stay channel-major features)
    h = conv_pool(h, we1, wo1, b1)           # (TB, 512)
    h = conv_pool(h, we2, wo2, b2)           # (TB, 128)
    h = conv_pool(h, we3, wo3, b3)           # (TB, 32) == torch .view order

    # encoder / decoder FC
    h = dense(h, wfe1, bfe1)                 # (TB, 32)
    h = dense(h, wfe2, bfe2)                 # (TB, 16) latent
    h = dense(h, wfd1, bfd1)                 # (TB, 32)
    h = dense(h, wfd2, bfd2)                 # (TB, 32)

    # decoder transposed convs (exact dense linear maps, BN folded)
    h = dense(h, m0, bm0)                    # (TB, 128)
    h = dense(h, m1, bm1)                    # (TB, 512)
    z = dense(h, m2, bm2, act=False)         # (TB, 128) logits, layout h*32+w

    # softmax over dim=2 (H axis; groups of SEQ_LEN lanes)
    rows = [z[:, i * SEQ_LEN:(i + 1) * SEQ_LEN] for i in range(IN_H)]
    mx = rows[0]
    for r in rows[1:]:
        mx = jnp.maximum(mx, r)
    es = [jnp.exp(r - mx) for r in rows]
    den = es[0]
    for e in es[1:]:
        den = den + e
    inv = pl.reciprocal(den, approx=True)
    o_ref[...] = jnp.concatenate([e * inv for e in es], axis=1)   # (TB, 128)


# ------------------------------ forward wrapper --------------------------------
def autoencoder_forward(packed, x, tb=128):
    B = x.shape[0]
    xf = x.reshape(B, FEAT).astype(jnp.float32)
    TB = min(tb, B)
    Bp = ((B + TB - 1) // TB) * TB
    if Bp != B:
        xf = jnp.pad(xf, ((0, Bp - B), (0, 0)))
    out = pl.pallas_call(
        _autoencoder_kernel,
        grid=(Bp // TB,),
        out_shape=jax.ShapeDtypeStruct((Bp, FEAT), jnp.float32),
        in_specs=[pl.BlockSpec((TB, FEAT), lambda b: (b, 0))]
                 + [pl.BlockSpec(p.shape, lambda b: (0, 0)) for p in packed],
        out_specs=pl.BlockSpec((TB, FEAT), lambda b: (b, 0)),
        compiler_params=pltpu.CompilerParams(
            dimension_semantics=("parallel",)),
    )(xf, *packed)
    return out[:B].reshape(B, 1, IN_H, SEQ_LEN)


# ------------------------------ parameter setup --------------------------------
def _xavier(key, shape, fan_in, fan_out):
    a = math.sqrt(6.0 / (fan_in + fan_out))
    return jax.random.uniform(key, shape, jnp.float32, minval=-a, maxval=a)


def init_params(key):
    keys = iter(jax.random.split(key, 32))

    def bn(cout):
        return dict(
            gamma=jax.random.uniform(next(keys), (cout,), jnp.float32, 0.5, 1.5),
            beta=0.1 * jax.random.normal(next(keys), (cout,), jnp.float32),
            mean=0.1 * jax.random.normal(next(keys), (cout,), jnp.float32),
            var=jax.random.uniform(next(keys), (cout,), jnp.float32, 0.5, 1.5))

    p = {}
    for i in range(3):                                   # encoder convs
        kh = IN_H if i == 0 else 1
        cin, cout, kw = NUM_CH[i], NUM_CH[i + 1], KW[i]
        w = _xavier(next(keys), (cout, cin, kh, kw), cin * kh * kw, cout * kh * kw)
        p[f"conv{i}"] = dict(w=w, b=jnp.zeros((cout,), jnp.float32), **bn(cout))
    dims = [FC_INPUT] + FC + [LATENT]
    for i, (di, do) in enumerate(zip(dims[:-1], dims[1:])):
        p[f"enc_fc{i}"] = dict(w=_xavier(next(keys), (di, do), di, do),
                               b=jnp.zeros((do,), jnp.float32))
    for i, (di, do) in enumerate(zip(reversed(dims[1:]), reversed(dims[:-1]))):
        p[f"dec_fc{i}"] = dict(w=_xavier(next(keys), (di, do), di, do),
                               b=jnp.zeros((do,), jnp.float32))
    dec_specs = [(NUM_CH[3], NUM_CH[2], 1, KW[2]),
                 (NUM_CH[2], NUM_CH[1], 1, KW[1]),
                 (NUM_CH[1], NUM_CH[0], IN_H, KW[0])]
    for i, (cin, cout, kh, kw) in enumerate(dec_specs):  # decoder ConvTranspose
        w = _xavier(next(keys), (cin, cout, kh, kw), cout * kh * kw, cin * kh * kw)
        d = dict(w=w, b=jnp.zeros((cout,), jnp.float32))
        if i < 2:
            d.update(bn(cout))
        p[f"deconv{i}"] = d
    return p


def _bn_fold(gamma, beta, mean, var):
    scale = np.asarray(gamma, np.float32) / np.sqrt(np.asarray(var, np.float32) + BN_EPS)
    shift = np.asarray(beta, np.float32) - np.asarray(mean, np.float32) * scale
    return scale, shift


def _conv_dense_pooled(layer, h_in, w_len, pool):
    """Conv2d(Cin,Cout,(kh,kw), same-W pad) + eval BN + MaxPool(1,2) as TWO dense
    matrices (even/odd pool phases) of shape (Cin*h_in*w_len, Cout*w_len//2)."""
    w = np.asarray(layer["w"], np.float32)               # (cout, cin, kh, kw)
    cout, cin, kh, kw = w.shape
    assert kh == h_in                                    # output H collapses to 1
    # TODO(synk): pool widths other than 2 / odd w_len (ceil_mode) not handled.
    assert pool == 2 and w_len % pool == 0
    pad = (kw - 1) // 2
    scale, shift = _bn_fold(layer["gamma"], layer["beta"], layer["mean"], layer["var"])
    M = np.zeros((cin * h_in * w_len, cout * w_len), np.float32)
    cols0 = np.arange(cout) * w_len
    for k in range(kw):
        for wo in range(w_len):
            wi = wo - pad + k
            if 0 <= wi < w_len:
                for ci in range(cin):
                    for h in range(h_in):
                        M[(ci * h_in + h) * w_len + wi, cols0 + wo] += w[:, ci, h, k] * scale
    w_out = w_len // pool
    Se = np.zeros((cout * w_len, cout * w_out), np.float32)
    So = np.zeros_like(Se)
    for co in range(cout):
        for j in range(w_out):
            Se[co * w_len + pool * j, co * w_out + j] = 1.0
            So[co * w_len + pool * j + 1, co * w_out + j] = 1.0
    b = np.asarray(layer["b"], np.float32) * scale + shift
    bias = np.repeat(b, w_out)[None, :]                  # (1, cout*w_out)
    return M @ Se, M @ So, bias


def _deconv_dense(layer, stride, pad, w_in, w_out, use_bn):
    """Exact linear map of ConvTranspose2d (stride/padding/output_padding),
    eval BN folded, as a dense (Cin*w_in, Cout*kh*w_out) matrix + bias row."""
    wt = np.asarray(layer["w"], np.float32)              # (cin, cout, kh, kw)
    cin, cout, kh, kw = wt.shape
    if use_bn:
        scale, shift = _bn_fold(layer["gamma"], layer["beta"], layer["mean"], layer["var"])
    else:
        scale, shift = np.ones((cout,), np.float32), np.zeros((cout,), np.float32)
    b = np.asarray(layer["b"], np.float32) * scale + shift
    M = np.zeros((cin * w_in, cout * kh * w_out), np.float32)
    for i in range(w_in):
        for k in range(kw):
            j = i * stride - pad + k
            if 0 <= j < w_out:
                blk = wt[:, :, :, k] * scale[None, :, None]           # (cin,cout,kh)
                rows = np.arange(cin) * w_in + i
                cols = (np.arange(cout)[:, None] * kh + np.arange(kh)[None, :]) * w_out + j
                M[np.ix_(rows, cols.reshape(-1))] += blk.reshape(cin, cout * kh)
    bias = np.zeros((1, cout * kh * w_out), np.float32)
    for co in range(cout):
        for hh in range(kh):
            s = (co * kh + hh) * w_out
            bias[0, s:s + w_out] = b[co]
    return M, bias


def prepare_params(params):
    """One-time packing: BN folding, conv+pool and ConvTranspose dense matrices
    (hoisted out of the jitted forward). MXU matrices in bf16, biases f32."""
    ops = []
    w_len, h_in = SEQ_LEN, IN_H
    for i in range(3):
        we, wo, bias = _conv_dense_pooled(params[f"conv{i}"], h_in, w_len, POOL[i])
        ops += [(we, jnp.bfloat16), (wo, jnp.bfloat16), (bias, jnp.float32)]
        w_len //= POOL[i]
        h_in = 1
    for name in ["enc_fc0", "enc_fc1", "dec_fc0", "dec_fc1"]:
        ops += [(np.asarray(params[name]["w"], np.float32), jnp.bfloat16),
                (np.asarray(params[name]["b"], np.float32)[None, :], jnp.float32)]
    w_in = COMPRESSED
    for i, (kw, stride, op) in enumerate(zip(reversed(KW), reversed(POOL), OUT_PAD)):
        pad = (kw - 1) // 2
        w_out = (w_in - 1) * stride - 2 * pad + kw + op
        M, bias = _deconv_dense(params[f"deconv{i}"], stride, pad, w_in, w_out,
                                use_bn=(i < 2))
        ops += [(M, jnp.bfloat16), (bias, jnp.float32)]
        w_in = w_out
    return tuple(jnp.asarray(a, dtype=dt) for a, dt in ops)


# --------------------- independent float64 numpy reference ---------------------
def _np_reference(params, x):
    a = np.asarray(x, np.float64)                        # (B, 1, IN_H, SEQ_LEN)
    B = a.shape[0]

    def bn_eval(y, lay):
        g, be = np.asarray(lay["gamma"], np.float64), np.asarray(lay["beta"], np.float64)
        mu, var = np.asarray(lay["mean"], np.float64), np.asarray(lay["var"], np.float64)
        return (y - mu[None, :, None, None]) / np.sqrt(var[None, :, None, None] + BN_EPS) \
            * g[None, :, None, None] + be[None, :, None, None]

    leaky = lambda y: np.where(y >= 0, y, LEAKY * y)

    for i in range(3):                                   # encoder
        lay = params[f"conv{i}"]
        w = np.asarray(lay["w"], np.float64); b = np.asarray(lay["b"], np.float64)
        cout, cin, kh, kw = w.shape
        pad = (kw - 1) // 2
        Bn, Ci, H, W = a.shape
        ap = np.pad(a, ((0, 0), (0, 0), (0, 0), (pad, pad)))
        Ho = H - kh + 1
        out = np.zeros((Bn, cout, Ho, W), np.float64)
        wf = w.reshape(cout, -1)
        for ho in range(Ho):
            for wo in range(W):
                patch = ap[:, :, ho:ho + kh, wo:wo + kw].reshape(Bn, -1)
                out[:, :, ho, wo] = patch @ wf.T + b
        out = leaky(bn_eval(out, lay))
        p = POOL[i]
        Wn = out.shape[3]; Wp = math.ceil(Wn / p)
        pooled = np.empty((Bn, cout, Ho, Wp), np.float64)
        for j in range(Wp):
            pooled[..., j] = out[..., j * p:min((j + 1) * p, Wn)].max(axis=-1)
        a = pooled

    z = a.reshape(B, -1)
    for name in ["enc_fc0", "enc_fc1", "dec_fc0", "dec_fc1"]:
        w = np.asarray(params[name]["w"], np.float64)
        b = np.asarray(params[name]["b"], np.float64)
        z = z @ w + b
        z = np.where(z >= 0, z, LEAKY * z)

    a = z.reshape(B, NUM_CH[3], 1, COMPRESSED)
    for i in range(3):                                   # decoder
        lay = params[f"deconv{i}"]
        w = np.asarray(lay["w"], np.float64); b = np.asarray(lay["b"], np.float64)
        cin, cout, kh, kw = w.shape
        stride = list(reversed(POOL))[i]
        pad = (kw - 1) // 2
        opad = OUT_PAD[i]
        Bn, Ci, H, W = a.shape
        Ho = H - 1 + kh
        Wo = (W - 1) * stride - 2 * pad + kw + opad
        out = np.zeros((Bn, cout, Ho, Wo), np.float64)
        for hi in range(H):
            for wi in range(W):
                for hk in range(kh):
                    for k in range(kw):
                        j = wi * stride - pad + k
                        if 0 <= j < Wo:
                            out[:, :, hi + hk, j] += a[:, :, hi, wi] @ w[:, :, hk, k]
        out += b[None, :, None, None]
        if i < 2:
            out = leaky(bn_eval(out, lay))
        a = out

    m = a.max(axis=2, keepdims=True)
    e = np.exp(a - m)
    return e / e.sum(axis=2, keepdims=True)


# ------------------------------------ main --------------------------------------
if __name__ == "__main__":
    key = jax.random.PRNGKey(0)
    k_param, k_x = jax.random.split(key)
    params = init_params(k_param)
    packed = prepare_params(params)          # one-time packing (outside jit)

    B = 256                                   # TB=128 -> grid=2 (fills both v7x TCs)
    x = jax.random.normal(k_x, (B, 1, IN_H, SEQ_LEN), dtype=jnp.float32)   # NCHW

    fwd = jax.jit(autoencoder_forward)
    recon = fwd(packed, x)
    jax.block_until_ready(recon)

    recon_np = np.asarray(recon)
    assert recon_np.shape == (B, 1, IN_H, SEQ_LEN), recon_np.shape
    assert np.all(np.isfinite(recon_np))
    assert np.allclose(recon_np.sum(axis=2), 1.0, atol=1e-2)       # softmax rows
    ref = _np_reference(params, x)                                  # float64 reference
    assert np.allclose(recon_np, ref, rtol=2e-2, atol=2e-2), \
        float(np.abs(recon_np - ref).max())
    print("KERNEL_OK")
</pallas_src>

<mosaic_0001>
module attributes {stable_mosaic.version = 11 : i64} {
  func.func @_autoencoder_kernel(%arg0: i32, %arg1: memref<128x128xf32, #tpu.memory_space<vmem>>, %arg2: memref<128x512xbf16, #tpu.memory_space<vmem>>, %arg3: memref<128x512xbf16, #tpu.memory_space<vmem>>, %arg4: memref<1x512xf32, #tpu.memory_space<vmem>>, %arg5: memref<512x128xbf16, #tpu.memory_space<vmem>>, %arg6: memref<512x128xbf16, #tpu.memory_space<vmem>>, %arg7: memref<1x128xf32, #tpu.memory_space<vmem>>, %arg8: memref<128x32xbf16, #tpu.memory_space<vmem>>, %arg9: memref<128x32xbf16, #tpu.memory_space<vmem>>, %arg10: memref<1x32xf32, #tpu.memory_space<vmem>>, %arg11: memref<32x32xbf16, #tpu.memory_space<vmem>>, %arg12: memref<1x32xf32, #tpu.memory_space<vmem>>, %arg13: memref<32x16xbf16, #tpu.memory_space<vmem>>, %arg14: memref<1x16xf32, #tpu.memory_space<vmem>>, %arg15: memref<16x32xbf16, #tpu.memory_space<vmem>>, %arg16: memref<1x32xf32, #tpu.memory_space<vmem>>, %arg17: memref<32x32xbf16, #tpu.memory_space<vmem>>, %arg18: memref<1x32xf32, #tpu.memory_space<vmem>>, %arg19: memref<32x128xbf16, #tpu.memory_space<vmem>>, %arg20: memref<1x128xf32, #tpu.memory_space<vmem>>, %arg21: memref<128x512xbf16, #tpu.memory_space<vmem>>, %arg22: memref<1x512xf32, #tpu.memory_space<vmem>>, %arg23: memref<512x128xbf16, #tpu.memory_space<vmem>>, %arg24: memref<1x128xf32, #tpu.memory_space<vmem>>, %arg25: memref<128x128xf32, #tpu.memory_space<vmem>>) attributes {dimension_semantics = [#tpu.dimension_semantics<parallel>], iteration_bounds = array<i64: 2>, scalar_prefetch = 0 : i64, scratch_operands = 0 : i64, tpu.core_type = #tpu.core_type<tc>, window_params = [{transform_indices = @transform_0, window_bounds = array<i64: 128, 128>}, {pipeline_mode = #tpu.pipeline_mode<synchronous>, transform_indices = @transform_1, window_bounds = array<i64: 128, 512>}, {pipeline_mode = #tpu.pipeline_mode<synchronous>, transform_indices = @transform_2, window_bounds = array<i64: 128, 512>}, {pipeline_mode = #tpu.pipeline_mode<synchronous>, transform_indices = @transform_3, window_bounds = array<i64: 1, 512>}, {pipeline_mode = #tpu.pipeline_mode<synchronous>, transform_indices = @transform_4, window_bounds = array<i64: 512, 128>}, {pipeline_mode = #tpu.pipeline_mode<synchronous>, transform_indices = @transform_5, window_bounds = array<i64: 512, 128>}, {pipeline_mode = #tpu.pipeline_mode<synchronous>, transform_indices = @transform_6, window_bounds = array<i64: 1, 128>}, {pipeline_mode = #tpu.pipeline_mode<synchronous>, transform_indices = @transform_7, window_bounds = array<i64: 128, 32>}, {pipeline_mode = #tpu.pipeline_mode<synchronous>, transform_indices = @transform_8, window_bounds = array<i64: 128, 32>}, {pipeline_mode = #tpu.pipeline_mode<synchronous>, transform_indices = @transform_9, window_bounds = array<i64: 1, 32>}, {pipeline_mode = #tpu.pipeline_mode<synchronous>, transform_indices = @transform_10, window_bounds = array<i64: 32, 32>}, {pipeline_mode = #tpu.pipeline_mode<synchronous>, transform_indices = @transform_11, window_bounds = array<i64: 1, 32>}, {pipeline_mode = #tpu.pipeline_mode<synchronous>, transform_indices = @transform_12, window_bounds = array<i64: 32, 16>}, {pipeline_mode = #tpu.pipeline_mode<synchronous>, transform_indices = @transform_13, window_bounds = array<i64: 1, 16>}, {pipeline_mode = #tpu.pipeline_mode<synchronous>, transform_indices = @transform_14, window_bounds = array<i64: 16, 32>}, {pipeline_mode = #tpu.pipeline_mode<synchronous>, transform_indices = @transform_15, window_bounds = array<i64: 1, 32>}, {pipeline_mode = #tpu.pipeline_mode<synchronous>, transform_indices = @transform_16, window_bounds = array<i64: 32, 32>}, {pipeline_mode = #tpu.pipeline_mode<synchronous>, transform_indices = @transform_17, window_bounds = array<i64: 1, 32>}, {pipeline_mode = #tpu.pipeline_mode<synchronous>, transform_indices = @transform_18, window_bounds = array<i64: 32, 128>}, {pipeline_mode = #tpu.pipeline_mode<synchronous>, transform_indices = @transform_19, window_bounds = array<i64: 1, 128>}, {pipeline_mode = #tpu.pipeline_mode<synchronous>, transform_indices = @transform_20, window_bounds = array<i64: 128, 512>}, {pipeline_mode = #tpu.pipeline_mode<synchronous>, transform_indices = @transform_21, window_bounds = array<i64: 1, 512>}, {pipeline_mode = #tpu.pipeline_mode<synchronous>, transform_indices = @transform_22, window_bounds = array<i64: 512, 128>}, {pipeline_mode = #tpu.pipeline_mode<synchronous>, transform_indices = @transform_23, window_bounds = array<i64: 1, 128>}, {transform_indices = @transform_24, window_bounds = array<i64: 128, 128>}]} {
    %c0 = arith.constant 0 : index
    %c0_0 = arith.constant 0 : index
    %0 = vector.load %arg1[%c0, %c0_0] : memref<128x128xf32, #tpu.memory_space<vmem>>, vector<128x128xf32>
    %1 = arith.truncf %0 : vector<128x128xf32> to vector<128x128xbf16>
    %c0_1 = arith.constant 0 : index
    %c0_2 = arith.constant 0 : index
    %2 = vector.load %arg2[%c0_1, %c0_2] : memref<128x512xbf16, #tpu.memory_space<vmem>>, vector<128x512xbf16>
    %cst = arith.constant dense<0.000000e+00> : vector<128x512xf32>
    %3 = tpu.matmul %1, %2, %cst {dimension_numbers = #tpu.dot_dimension_numbers<[1], [0], [0], [1], [0, 0, 1, 1], [], []>} : vector<128x128xbf16>, vector<128x512xbf16>, vector<128x512xf32> -> vector<128x512xf32>
    %c0_3 = arith.constant 0 : index
    %c0_4 = arith.constant 0 : index
    %4 = vector.load %arg3[%c0_3, %c0_4] : memref<128x512xbf16, #tpu.memory_space<vmem>>, vector<128x512xbf16>
    %cst_5 = arith.constant dense<0.000000e+00> : vector<128x512xf32>
    %5 = tpu.matmul %1, %4, %cst_5 {dimension_numbers = #tpu.dot_dimension_numbers<[1], [0], [0], [1], [0, 0, 1, 1], [], []>} : vector<128x128xbf16>, vector<128x512xbf16>, vector<128x512xf32> -> vector<128x512xf32>
    %6 = arith.maximumf %3, %5 : vector<128x512xf32>
    %c0_6 = arith.constant 0 : index
    %c0_7 = arith.constant 0 : index
    %7 = vector.load %arg4[%c0_6, %c0_7] : memref<1x512xf32, #tpu.memory_space<vmem>>, vector<1x512xf32>
    %8 = vector.broadcast %7 : vector<1x512xf32> to vector<128x512xf32>
    %9 = arith.addf %6, %8 : vector<128x512xf32>
    %cst_8 = arith.constant 0.000000e+00 : f32
    %10 = vector.broadcast %cst_8 : f32 to vector<128x512xf32>
    %11 = arith.cmpf oge, %9, %10 : vector<128x512xf32>
    %cst_9 = arith.constant 0.00999999977 : f32
    %12 = vector.broadcast %cst_9 : f32 to vector<128x512xf32>
    %13 = arith.mulf %12, %9 : vector<128x512xf32>
    %14 = arith.select %11, %9, %13 : vector<128x512xi1>, vector<128x512xf32>
    %15 = arith.truncf %14 : vector<128x512xf32> to vector<128x512xbf16>
    %c0_10 = arith.constant 0 : index
    %c0_11 = arith.constant 0 : index
    %16 = vector.load %arg5[%c0_10, %c0_11] : memref<512x128xbf16, #tpu.memory_space<vmem>>, vector<512x128xbf16>
    %cst_12 = arith.constant dense<0.000000e+00> : vector<128x128xf32>
    %17 = tpu.matmul %15, %16, %cst_12 {dimension_numbers = #tpu.dot_dimension_numbers<[1], [0], [0], [1], [0, 0, 1, 1], [], []>} : vector<128x512xbf16>, vector<512x128xbf16>, vector<128x128xf32> -> vector<128x128xf32>
    %c0_13 = arith.constant 0 : index
    %c0_14 = arith.constant 0 : index
    %18 = vector.load %arg6[%c0_13, %c0_14] : memref<512x128xbf16, #tpu.memory_space<vmem>>, vector<512x128xbf16>
    %cst_15 = arith.constant dense<0.000000e+00> : vector<128x128xf32>
    %19 = tpu.matmul %15, %18, %cst_15 {dimension_numbers = #tpu.dot_dimension_numbers<[1], [0], [0], [1], [0, 0, 1, 1], [], []>} : vector<128x512xbf16>, vector<512x128xbf16>, vector<128x128xf32> -> vector<128x128xf32>
    %20 = arith.maximumf %17, %19 : vector<128x128xf32>
    %c0_16 = arith.constant 0 : index
    %c0_17 = arith.constant 0 : index
    %21 = vector.load %arg7[%c0_16, %c0_17] : memref<1x128xf32, #tpu.memory_space<vmem>>, vector<1x128xf32>
    %22 = vector.broadcast %21 : vector<1x128xf32> to vector<128x128xf32>
    %23 = arith.addf %20, %22 : vector<128x128xf32>
    %cst_18 = arith.constant 0.000000e+00 : f32
    %24 = vector.broadcast %cst_18 : f32 to vector<128x128xf32>
    %25 = arith.cmpf oge, %23, %24 : vector<128x128xf32>
    %cst_19 = arith.constant 0.00999999977 : f32
    %26 = vector.broadcast %cst_19 : f32 to vector<128x128xf32>
    %27 = arith.mulf %26, %23 : vector<128x128xf32>
    %28 = arith.select %25, %23, %27 : vector<128x128xi1>, vector<128x128xf32>
    %29 = arith.truncf %28 : vector<128x128xf32> to vector<128x128xbf16>
    %c0_20 = arith.constant 0 : index
    %c0_21 = arith.constant 0 : index
    %30 = vector.load %arg8[%c0_20, %c0_21] : memref<128x32xbf16, #tpu.memory_space<vmem>>, vector<128x32xbf16>
    %cst_22 = arith.constant dense<0.000000e+00> : vector<128x32xf32>
    %31 = tpu.matmul %29, %30, %cst_22 {dimension_numbers = #tpu.dot_dimension_numbers<[1], [0], [0], [1], [0, 0, 1, 1], [], []>} : vector<128x128xbf16>, vector<128x32xbf16>, vector<128x32xf32> -> vector<128x32xf32>
    %c0_23 = arith.constant 0 : index
    %c0_24 = arith.constant 0 : index
    %32 = vector.load %arg9[%c0_23, %c0_24] : memref<128x32xbf16, #tpu.memory_space<vmem>>, vector<128x32xbf16>
    %cst_25 = arith.constant dense<0.000000e+00> : vector<128x32xf32>
    %33 = tpu.matmul %29, %32, %cst_25 {dimension_numbers = #tpu.dot_dimension_numbers<[1], [0], [0], [1], [0, 0, 1, 1], [], []>} : vector<128x128xbf16>, vector<128x32xbf16>, vector<128x32xf32> -> vector<128x32xf32>
    %34 = arith.maximumf %31, %33 : vector<128x32xf32>
    %c0_26 = arith.constant 0 : index
    %c0_27 = arith.constant 0 : index
    %35 = vector.load %arg10[%c0_26, %c0_27] : memref<1x32xf32, #tpu.memory_space<vmem>>, vector<1x32xf32>
    %36 = vector.broadcast %35 : vector<1x32xf32> to vector<128x32xf32>
    %37 = arith.addf %34, %36 : vector<128x32xf32>
    %cst_28 = arith.constant 0.000000e+00 : f32
    %38 = vector.broadcast %cst_28 : f32 to vector<128x32xf32>
    %39 = arith.cmpf oge, %37, %38 : vector<128x32xf32>
    %cst_29 = arith.constant 0.00999999977 : f32
    %40 = vector.broadcast %cst_29 : f32 to vector<128x32xf32>
    %41 = arith.mulf %40, %37 : vector<128x32xf32>
    %42 = arith.select %39, %37, %41 : vector<128x32xi1>, vector<128x32xf32>
    %43 = arith.truncf %42 : vector<128x32xf32> to vector<128x32xbf16>
    %c0_30 = arith.constant 0 : index
    %c0_31 = arith.constant 0 : index
    %44 = vector.load %arg11[%c0_30, %c0_31] : memref<32x32xbf16, #tpu.memory_space<vmem>>, vector<32x32xbf16>
    %cst_32 = arith.constant dense<0.000000e+00> : vector<128x32xf32>
    %45 = tpu.matmul %43, %44, %cst_32 {dimension_numbers = #tpu.dot_dimension_numbers<[1], [0], [0], [1], [0, 0, 1, 1], [], []>} : vector<128x32xbf16>, vector<32x32xbf16>, vector<128x32xf32> -> vector<128x32xf32>
    %c0_33 = arith.constant 0 : index
    %c0_34 = arith.constant 0 : index
    %46 = vector.load %arg12[%c0_33, %c0_34] : memref<1x32xf32, #tpu.memory_space<vmem>>, vector<1x32xf32>
    %47 = vector.broadcast %46 : vector<1x32xf32> to vector<128x32xf32>
    %48 = arith.addf %45, %47 : vector<128x32xf32>
    %cst_35 = arith.constant 0.000000e+00 : f32
    %49 = vector.broadcast %cst_35 : f32 to vector<128x32xf32>
    %50 = arith.cmpf oge, %48, %49 : vector<128x32xf32>
    %cst_36 = arith.constant 0.00999999977 : f32
    %51 = vector.broadcast %cst_36 : f32 to vector<128x32xf32>
    %52 = arith.mulf %51, %48 : vector<128x32xf32>
    %53 = arith.select %50, %48, %52 : vector<128x32xi1>, vector<128x32xf32>
    %54 = arith.truncf %53 : vector<128x32xf32> to vector<128x32xbf16>
    %c0_37 = arith.constant 0 : index
    %c0_38 = arith.constant 0 : index
    %55 = vector.load %arg13[%c0_37, %c0_38] : memref<32x16xbf16, #tpu.memory_space<vmem>>, vector<32x16xbf16>
    %cst_39 = arith.constant dense<0.000000e+00> : vector<128x16xf32>
    %56 = tpu.matmul %54, %55, %cst_39 {dimension_numbers = #tpu.dot_dimension_numbers<[1], [0], [0], [1], [0, 0, 1, 1], [], []>} : vector<128x32xbf16>, vector<32x16xbf16>, vector<128x16xf32> -> vector<128x16xf32>
    %c0_40 = arith.constant 0 : index
    %c0_41 = arith.constant 0 : index
    %57 = vector.load %arg14[%c0_40, %c0_41] : memref<1x16xf32, #tpu.memory_space<vmem>>, vector<1x16xf32>
    %58 = vector.broadcast %57 : vector<1x16xf32> to vector<128x16xf32>
    %59 = arith.addf %56, %58 : vector<128x16xf32>
    %cst_42 = arith.constant 0.000000e+00 : f32
    %60 = vector.broadcast %cst_42 : f32 to vector<128x16xf32>
    %61 = arith.cmpf oge, %59, %60 : vector<128x16xf32>
    %cst_43 = arith.constant 0.00999999977 : f32
    %62 = vector.broadcast %cst_43 : f32 to vector<128x16xf32>
    %63 = arith.mulf %62, %59 : vector<128x16xf32>
    %64 = arith.select %61, %59, %63 : vector<128x16xi1>, vector<128x16xf32>
    %65 = arith.truncf %64 : vector<128x16xf32> to vector<128x16xbf16>
    %c0_44 = arith.constant 0 : index
    %c0_45 = arith.constant 0 : index
    %66 = vector.load %arg15[%c0_44, %c0_45] : memref<16x32xbf16, #tpu.memory_space<vmem>>, vector<16x32xbf16>
    %cst_46 = arith.constant dense<0.000000e+00> : vector<128x32xf32>
    %67 = tpu.matmul %65, %66, %cst_46 {dimension_numbers = #tpu.dot_dimension_numbers<[1], [0], [0], [1], [0, 0, 1, 1], [], []>} : vector<128x16xbf16>, vector<16x32xbf16>, vector<128x32xf32> -> vector<128x32xf32>
    %c0_47 = arith.constant 0 : index
    %c0_48 = arith.constant 0 : index
    %68 = vector.load %arg16[%c0_47, %c0_48] : memref<1x32xf32, #tpu.memory_space<vmem>>, vector<1x32xf32>
    %69 = vector.broadcast %68 : vector<1x32xf32> to vector<128x32xf32>
    %70 = arith.addf %67, %69 : vector<128x32xf32>
    %cst_49 = arith.constant 0.000000e+00 : f32
    %71 = vector.broadcast %cst_49 : f32 to vector<128x32xf32>
    %72 = arith.cmpf oge, %70, %71 : vector<128x32xf32>
    %cst_50 = arith.constant 0.00999999977 : f32
    %73 = vector.broadcast %cst_50 : f32 to vector<128x32xf32>
    %74 = arith.mulf %73, %70 : vector<128x32xf32>
    %75 = arith.select %72, %70, %74 : vector<128x32xi1>, vector<128x32xf32>
    %76 = arith.truncf %75 : vector<128x32xf32> to vector<128x32xbf16>
    %c0_51 = arith.constant 0 : index
    %c0_52 = arith.constant 0 : index
    %77 = vector.load %arg17[%c0_51, %c0_52] : memref<32x32xbf16, #tpu.memory_space<vmem>>, vector<32x32xbf16>
    %cst_53 = arith.constant dense<0.000000e+00> : vector<128x32xf32>
    %78 = tpu.matmul %76, %77, %cst_53 {dimension_numbers = #tpu.dot_dimension_numbers<[1], [0], [0], [1], [0, 0, 1, 1], [], []>} : vector<128x32xbf16>, vector<32x32xbf16>, vector<128x32xf32> -> vector<128x32xf32>
    %c0_54 = arith.constant 0 : index
    %c0_55 = arith.constant 0 : index
    %79 = vector.load %arg18[%c0_54, %c0_55] : memref<1x32xf32, #tpu.memory_space<vmem>>, vector<1x32xf32>
    %80 = vector.broadcast %79 : vector<1x32xf32> to vector<128x32xf32>
    %81 = arith.addf %78, %80 : vector<128x32xf32>
    %cst_56 = arith.constant 0.000000e+00 : f32
    %82 = vector.broadcast %cst_56 : f32 to vector<128x32xf32>
    %83 = arith.cmpf oge, %81, %82 : vector<128x32xf32>
    %cst_57 = arith.constant 0.00999999977 : f32
    %84 = vector.broadcast %cst_57 : f32 to vector<128x32xf32>
    %85 = arith.mulf %84, %81 : vector<128x32xf32>
    %86 = arith.select %83, %81, %85 : vector<128x32xi1>, vector<128x32xf32>
    %87 = arith.truncf %86 : vector<128x32xf32> to vector<128x32xbf16>
    %c0_58 = arith.constant 0 : index
    %c0_59 = arith.constant 0 : index
    %88 = vector.load %arg19[%c0_58, %c0_59] : memref<32x128xbf16, #tpu.memory_space<vmem>>, vector<32x128xbf16>
    %cst_60 = arith.constant dense<0.000000e+00> : vector<128x128xf32>
    %89 = tpu.matmul %87, %88, %cst_60 {dimension_numbers = #tpu.dot_dimension_numbers<[1], [0], [0], [1], [0, 0, 1, 1], [], []>} : vector<128x32xbf16>, vector<32x128xbf16>, vector<128x128xf32> -> vector<128x128xf32>
    %c0_61 = arith.constant 0 : index
    %c0_62 = arith.constant 0 : index
    %90 = vector.load %arg20[%c0_61, %c0_62] : memref<1x128xf32, #tpu.memory_space<vmem>>, vector<1x128xf32>
    %91 = vector.broadcast %90 : vector<1x128xf32> to vector<128x128xf32>
    %92 = arith.addf %89, %91 : vector<128x128xf32>
    %cst_63 = arith.constant 0.000000e+00 : f32
    %93 = vector.broadcast %cst_63 : f32 to vector<128x128xf32>
    %94 = arith.cmpf oge, %92, %93 : vector<128x128xf32>
    %cst_64 = arith.constant 0.00999999977 : f32
    %95 = vector.broadcast %cst_64 : f32 to vector<128x128xf32>
    %96 = arith.mulf %95, %92 : vector<128x128xf32>
    %97 = arith.select %94, %92, %96 : vector<128x128xi1>, vector<128x128xf32>
    %98 = arith.truncf %97 : vector<128x128xf32> to vector<128x128xbf16>
    %c0_65 = arith.constant 0 : index
    %c0_66 = arith.constant 0 : index
    %99 = vector.load %arg21[%c0_65, %c0_66] : memref<128x512xbf16, #tpu.memory_space<vmem>>, vector<128x512xbf16>
    %cst_67 = arith.constant dense<0.000000e+00> : vector<128x512xf32>
    %100 = tpu.matmul %98, %99, %cst_67 {dimension_numbers = #tpu.dot_dimension_numbers<[1], [0], [0], [1], [0, 0, 1, 1], [], []>} : vector<128x128xbf16>, vector<128x512xbf16>, vector<128x512xf32> -> vector<128x512xf32>
    %c0_68 = arith.constant 0 : index
    %c0_69 = arith.constant 0 : index
    %101 = vector.load %arg22[%c0_68, %c0_69] : memref<1x512xf32, #tpu.memory_space<vmem>>, vector<1x512xf32>
    %102 = vector.broadcast %101 : vector<1x512xf32> to vector<128x512xf32>
    %103 = arith.addf %100, %102 : vector<128x512xf32>
    %cst_70 = arith.constant 0.000000e+00 : f32
    %104 = vector.broadcast %cst_70 : f32 to vector<128x512xf32>
    %105 = arith.cmpf oge, %103, %104 : vector<128x512xf32>
    %cst_71 = arith.constant 0.00999999977 : f32
    %106 = vector.broadcast %cst_71 : f32 to vector<128x512xf32>
    %107 = arith.mulf %106, %103 : vector<128x512xf32>
    %108 = arith.select %105, %103, %107 : vector<128x512xi1>, vector<128x512xf32>
    %109 = arith.truncf %108 : vector<128x512xf32> to vector<128x512xbf16>
    %c0_72 = arith.constant 0 : index
    %c0_73 = arith.constant 0 : index
    %110 = vector.load %arg23[%c0_72, %c0_73] : memref<512x128xbf16, #tpu.memory_space<vmem>>, vector<512x128xbf16>
    %cst_74 = arith.constant dense<0.000000e+00> : vector<128x128xf32>
    %111 = tpu.matmul %109, %110, %cst_74 {dimension_numbers = #tpu.dot_dimension_numbers<[1], [0], [0], [1], [0, 0, 1, 1], [], []>} : vector<128x512xbf16>, vector<512x128xbf16>, vector<128x128xf32> -> vector<128x128xf32>
    %c0_75 = arith.constant 0 : index
    %c0_76 = arith.constant 0 : index
    %112 = vector.load %arg24[%c0_75, %c0_76] : memref<1x128xf32, #tpu.memory_space<vmem>>, vector<1x128xf32>
    %113 = vector.broadcast %112 : vector<1x128xf32> to vector<128x128xf32>
    %114 = arith.addf %111, %113 : vector<128x128xf32>
    %115 = vector.extract_strided_slice %114 {offsets = [0, 0], sizes = [128, 32], strides = [1, 1]} : vector<128x128xf32> to vector<128x32xf32>
    %116 = vector.extract_strided_slice %114 {offsets = [0, 32], sizes = [128, 32], strides = [1, 1]} : vector<128x128xf32> to vector<128x32xf32>
    %117 = vector.extract_strided_slice %114 {offsets = [0, 64], sizes = [128, 32], strides = [1, 1]} : vector<128x128xf32> to vector<128x32xf32>
    %118 = vector.extract_strided_slice %114 {offsets = [0, 96], sizes = [128, 32], strides = [1, 1]} : vector<128x128xf32> to vector<128x32xf32>
    %119 = arith.maximumf %115, %116 : vector<128x32xf32>
    %120 = arith.maximumf %119, %117 : vector<128x32xf32>
    %121 = arith.maximumf %120, %118 : vector<128x32xf32>
    %122 = arith.subf %115, %121 : vector<128x32xf32>
    %123 = math.exp %122 : vector<128x32xf32>
    %124 = arith.subf %116, %121 : vector<128x32xf32>
    %125 = math.exp %124 : vector<128x32xf32>
    %126 = arith.subf %117, %121 : vector<128x32xf32>
    %127 = math.exp %126 : vector<128x32xf32>
    %128 = arith.subf %118, %121 : vector<128x32xf32>
    %129 = math.exp %128 : vector<128x32xf32>
    %130 = arith.addf %123, %125 : vector<128x32xf32>
    %131 = arith.addf %130, %127 : vector<128x32xf32>
    %132 = arith.addf %131, %129 : vector<128x32xf32>
    %133 = tpu.reciprocal %132 {approx = true} : vector<128x32xf32> -> vector<128x32xf32>
    %134 = arith.mulf %123, %133 : vector<128x32xf32>
    %135 = arith.mulf %125, %133 : vector<128x32xf32>
    %136 = arith.mulf %127, %133 : vector<128x32xf32>
    %137 = arith.mulf %129, %133 : vector<128x32xf32>
    %138 = tpu.concatenate %134, %135, %136, %137 in 1 : vector<128x32xf32>, vector<128x32xf32>, vector<128x32xf32>, vector<128x32xf32> -> vector<128x128xf32>
    %c0_77 = arith.constant 0 : index
    %c0_78 = arith.constant 0 : index
    %139 = vector.load %arg25[%c0_77, %c0_78] : memref<128x128xf32, #tpu.memory_space<vmem>>, vector<128x128xf32>
    tpu.vector_store %arg25[%c0_77, %c0_78], %138 {strides = array<i32>} : memref<128x128xf32, #tpu.memory_space<vmem>>, vector<128x128xf32>,
    return
  }
  func.func @transform_0(%arg0: i32) -> (i32, i32) {
    %c0_i32 = arith.constant 0 : i32
    %c0_i32_0 = arith.constant 0 : i32
    return %arg0, %c0_i32 : i32, i32
  }
  func.func @transform_1(%arg0: i32) -> (i32, i32) {
    %c0_i32 = arith.constant 0 : i32
    %c0_i32_0 = arith.constant 0 : i32
    %c0_i32_1 = arith.constant 0 : i32
    return %c0_i32, %c0_i32_0 : i32, i32
  }
  func.func @transform_2(%arg0: i32) -> (i32, i32) {
    %c0_i32 = arith.constant 0 : i32
    %c0_i32_0 = arith.constant 0 : i32
    %c0_i32_1 = arith.constant 0 : i32
    return %c0_i32, %c0_i32_0 : i32, i32
  }
  func.func @transform_3(%arg0: i32) -> (i32, i32) {
    %c0_i32 = arith.constant 0 : i32
    %c0_i32_0 = arith.constant 0 : i32
    %c0_i32_1 = arith.constant 0 : i32
    return %c0_i32, %c0_i32_0 : i32, i32
  }
  func.func @transform_4(%arg0: i32) -> (i32, i32) {
    %c0_i32 = arith.constant 0 : i32
    %c0_i32_0 = arith.constant 0 : i32
    %c0_i32_1 = arith.constant 0 : i32
    return %c0_i32, %c0_i32_0 : i32, i32
  }
  func.func @transform_5(%arg0: i32) -> (i32, i32) {
    %c0_i32 = arith.constant 0 : i32
    %c0_i32_0 = arith.constant 0 : i32
    %c0_i32_1 = arith.constant 0 : i32
    return %c0_i32, %c0_i32_0 : i32, i32
  }
  func.func @transform_6(%arg0: i32) -> (i32, i32) {
    %c0_i32 = arith.constant 0 : i32
    %c0_i32_0 = arith.constant 0 : i32
    %c0_i32_1 = arith.constant 0 : i32
    return %c0_i32, %c0_i32_0 : i32, i32
  }
  func.func @transform_7(%arg0: i32) -> (i32, i32) {
    %c0_i32 = arith.constant 0 : i32
    %c0_i32_0 = arith.constant 0 : i32
    %c0_i32_1 = arith.constant 0 : i32
    return %c0_i32, %c0_i32_0 : i32, i32
  }
  func.func @transform_8(%arg0: i32) -> (i32, i32) {
    %c0_i32 = arith.constant 0 : i32
    %c0_i32_0 = arith.constant 0 : i32
    %c0_i32_1 = arith.constant 0 : i32
    return %c0_i32, %c0_i32_0 : i32, i32
  }
  func.func @transform_9(%arg0: i32) -> (i32, i32) {
    %c0_i32 = arith.constant 0 : i32
    %c0_i32_0 = arith.constant 0 : i32
    %c0_i32_1 = arith.constant 0 : i32
    return %c0_i32, %c0_i32_0 : i32, i32
  }
  func.func @transform_10(%arg0: i32) -> (i32, i32) {
    %c0_i32 = arith.constant 0 : i32
    %c0_i32_0 = arith.constant 0 : i32
    %c0_i32_1 = arith.constant 0 : i32
    return %c0_i32, %c0_i32_0 : i32, i32
  }
  func.func @transform_11(%arg0: i32) -> (i32, i32) {
    %c0_i32 = arith.constant 0 : i32
    %c0_i32_0 = arith.constant 0 : i32
    %c0_i32_1 = arith.constant 0 : i32
    return %c0_i32, %c0_i32_0 : i32, i32
  }
  func.func @transform_12(%arg0: i32) -> (i32, i32) {
    %c0_i32 = arith.constant 0 : i32
    %c0_i32_0 = arith.constant 0 : i32
    %c0_i32_1 = arith.constant 0 : i32
    return %c0_i32, %c0_i32_0 : i32, i32
  }
  func.func @transform_13(%arg0: i32) -> (i32, i32) {
    %c0_i32 = arith.constant 0 : i32
    %c0_i32_0 = arith.constant 0 : i32
    %c0_i32_1 = arith.constant 0 : i32
    return %c0_i32, %c0_i32_0 : i32, i32
  }
  func.func @transform_14(%arg0: i32) -> (i32, i32) {
    %c0_i32 = arith.constant 0 : i32
    %c0_i32_0 = arith.constant 0 : i32
    %c0_i32_1 = arith.constant 0 : i32
    return %c0_i32, %c0_i32_0 : i32, i32
  }
  func.func @transform_15(%arg0: i32) -> (i32, i32) {
    %c0_i32 = arith.constant 0 : i32
    %c0_i32_0 = arith.constant 0 : i32
    %c0_i32_1 = arith.constant 0 : i32
    return %c0_i32, %c0_i32_0 : i32, i32
  }
  func.func @transform_16(%arg0: i32) -> (i32, i32) {
    %c0_i32 = arith.constant 0 : i32
    %c0_i32_0 = arith.constant 0 : i32
    %c0_i32_1 = arith.constant 0 : i32
    return %c0_i32, %c0_i32_0 : i32, i32
  }
  func.func @transform_17(%arg0: i32) -> (i32, i32) {
    %c0_i32 = arith.constant 0 : i32
    %c0_i32_0 = arith.constant 0 : i32
    %c0_i32_1 = arith.constant 0 : i32
    return %c0_i32, %c0_i32_0 : i32, i32
  }
  func.func @transform_18(%arg0: i32) -> (i32, i32) {
    %c0_i32 = arith.constant 0 : i32
    %c0_i32_0 = arith.constant 0 : i32
    %c0_i32_1 = arith.constant 0 : i32
    return %c0_i32, %c0_i32_0 : i32, i32
  }
  func.func @transform_19(%arg0: i32) -> (i32, i32) {
    %c0_i32 = arith.constant 0 : i32
    %c0_i32_0 = arith.constant 0 : i32
    %c0_i32_1 = arith.constant 0 : i32
    return %c0_i32, %c0_i32_0 : i32, i32
  }
  func.func @transform_20(%arg0: i32) -> (i32, i32) {
    %c0_i32 = arith.constant 0 : i32
    %c0_i32_0 = arith.constant 0 : i32
    %c0_i32_1 = arith.constant 0 : i32
    return %c0_i32, %c0_i32_0 : i32, i32
  }
  func.func @transform_21(%arg0: i32) -> (i32, i32) {
    %c0_i32 = arith.constant 0 : i32
    %c0_i32_0 = arith.constant 0 : i32
    %c0_i32_1 = arith.constant 0 : i32
    return %c0_i32, %c0_i32_0 : i32, i32
  }
  func.func @transform_22(%arg0: i32) -> (i32, i32) {
    %c0_i32 = arith.constant 0 : i32
    %c0_i32_0 = arith.constant 0 : i32
    %c0_i32_1 = arith.constant 0 : i32
    return %c0_i32, %c0_i32_0 : i32, i32
  }
  func.func @transform_23(%arg0: i32) -> (i32, i32) {
    %c0_i32 = arith.constant 0 : i32
    %c0_i32_0 = arith.constant 0 : i32
    %c0_i32_1 = arith.constant 0 : i32
    return %c0_i32, %c0_i32_0 : i32, i32
  }
  func.func @transform_24(%arg0: i32) -> (i32, i32) {
    %c0_i32 = arith.constant 0 : i32
    %c0_i32_0 = arith.constant 0 : i32
    return %arg0, %c0_i32 : i32, i32
  }
}

</mosaic_0001>

<bundles_post_ra>
// kernel: autoencoder_forward.1
= control target key start
LH: loop header
LB: loop body
LE: loop exit
PB: predicated region body
PF: predicated region fallthrough
CT: control target
= control target key end

     0   :  { %s10234_s0 = inlined_call_operand.vmem [shape: f32[256,128], index: 0, kind: input, shape index: {}]   ;;  %s10235_s1 = inlined_call_operand.vmem [shape: bf16[128,512], index: 1, kind: input, shape index: {}]   ;;  %s10236_s2 = inlined_call_operand.vmem [shape: bf16[128,512], index: 2, kind: input, shape index: {}]   ;;  %s10237_s3 = inlined_call_operand.vmem [shape: f32[1,512], index: 3, kind: input, shape index: {}]   ;;  %s10238_s4 = inlined_call_operand.hbm [shape: bf16[512,128], index: 4, kind: input, shape index: {}]   ;;  %s10239_s5 = inlined_call_operand.hbm [shape: bf16[512,128], index: 5, kind: input, shape index: {}]   ;;  %s10240_s6 = inlined_call_operand.vmem [shape: f32[1,128], index: 6, kind: input, shape index: {}]   ;;  %s10241_s7 = inlined_call_operand.vmem [shape: bf16[128,32], index: 7, kind: input, shape index: {}]   ;;  %s10242_s8 = inlined_call_operand.vmem [shape: bf16[128,32], index: 8, kind: input, shape index: {}]   ;;  %s10243_s9 = inlined_call_operand.vmem [shape: f32[1,32], index: 9, kind: input, shape index: {}]   ;;  %s10244_s10 = inlined_call_operand.vmem [shape: bf16[32,32], index: 10, kind: input, shape index: {}]   ;;  %s10245_s11 = inlined_call_operand.vmem [shape: f32[1,32], index: 11, kind: input, shape index: {}]   ;;  %s10246_s12 = inlined_call_operand.vmem [shape: bf16[32,16], index: 12, kind: input, shape index: {}]   ;;  %s10247_s13 = inlined_call_operand.vmem [shape: f32[1,16], index: 13, kind: input, shape index: {}]   ;;  %s10248_s14 = inlined_call_operand.vmem [shape: bf16[16,32], index: 14, kind: input, shape index: {}]   ;;  %s10249_s15 = inlined_call_operand.vmem [shape: f32[1,32], index: 15, kind: input, shape index: {}]   ;;  %s10250_s16 = inlined_call_operand.vmem [shape: bf16[32,32], index: 16, kind: input, shape index: {}]   ;;  %s10251_s17 = inlined_call_operand.vmem [shape: f32[1,32], index: 17, kind: input, shape index: {}]   ;;  %s10252_s18 = inlined_call_operand.vmem [shape: bf16[32,128], index: 18, kind: input, shape index: {}]   ;;  %s10253_s19 = inlined_call_operand.vmem [shape: f32[1,128], index: 19, kind: input, shape index: {}]   ;;  %s10254_s20 = inlined_call_operand.hbm [shape: bf16[128,512], index: 20, kind: input, shape index: {}]   ;;  %s10255_s21 = inlined_call_operand.vmem [shape: f32[1,512], index: 21, kind: input, shape index: {}]   ;;  %s10256_s22 = inlined_call_operand.hbm [shape: bf16[512,128], index: 22, kind: input, shape index: {}]   ;;  %s10257_s23 = inlined_call_operand.vmem [shape: f32[1,128], index: 23, kind: input, shape index: {}]   ;;  %s10258_s24 = inlined_call_operand.vmem [shape: f32[256,128], index: 24, kind: output, shape index: {}]  }
   0x1   :  { %10296 = sst [smem:[#allocation42_spill]] %s10234_s0 }
   0x2   :  { %10297 = sst [smem:[#allocation43_spill]] %s10235_s1 }
   0x3   :  { %10298 = sst [smem:[#allocation44_spill]] %s10236_s2 }
   0x4   :  { %10299 = sst [smem:[#allocation45_spill]] %s10237_s3 }
   0x5   :  { %10300 = sst [smem:[#allocation46_spill]] %s10238_s4 }
   0x6   :  { %10301 = sst [smem:[#allocation47_spill]] %s10239_s5 }
   0x7   :  { %10302 = sst [smem:[#allocation48_spill]] %s10240_s6 }
   0x8   :  { %10303 = sst [smem:[#allocation49_spill]] %s10241_s7 }
   0x9   :  { %10304 = sst [smem:[#allocation50_spill]] %s10242_s8 }
   0xa   :  { %10305 = sst [smem:[#allocation51_spill]] %s10253_s19 }
   0xb   :  { %10306 = sst [smem:[#allocation52_spill]] %s10254_s20 }
   0xc   :  { %10307 = sst [smem:[#allocation53_spill]] %s10255_s21 }
   0xd   :  { %10308 = sst [smem:[#allocation54_spill]] %s10257_s23 }
   0xe   :  { %10309 = sst [smem:[#allocation55_spill]] %s10258_s24 }
   0xf   :  { %29 = vsyncpa [#allocation3], 0 }
  0x10   :  { %30 = vsyncpa [#allocation5], 0 }
  0x11   :  { %31 = vsyncpa [#allocation8], 0  ;;  %s7973_s5 = smov 0  }
  0x12 LB: > { %s10263_s26 = sadd.s32 4294967295, %s7835_s5   ;;  %p6307_p0 = scmp.ge.s32.totalorder %s7835_s5, 1  ;;  %s7835_s5 = sphi %s7973_s5, %s37_s5  }
  0x13   : > { %p577_p1 = scmp.lt.s32.totalorder %s7835_s5, 3  ;;  %p7983_p2 = scmp.eq.s32.totalorder %s10263_s26, 0 }
  0x14   : > { %s10311_s2 = sld [smem:[#allocation47_spill]]  ;;  %s7837_s8 = smov [#allocation4]  }
  0x15   : > { %p7990_p3 = pnand %p6307_p0, %p577_p1  ;;  %s10313_s3 = sld [smem:[#allocation46_spill]] }
  0x16   : > { %s613_s4 = sshll.u32 %s7837_s8, 4  ;;  %s7838_s28 = smov [#allocation2]   ;;  %s614_s4 = int_to_ptr.vmem [resolvable:$true] %s613_s4 }
  0x17   : > { %p7489_p4 = pneg %p7990_p3  ;;  %s599_s6 = sshll.u32 %s7838_s28, 4  ;;  %s600_s6 = int_to_ptr.vmem [resolvable:$true] %s599_s6 }
  0x18   : > { %s10315_s20 = sld [smem:[#allocation52_spill]]  ;;  %s7839_s30 = smov 64  }
  0x19   : > { %p8001_p5 = pnand %p7983_p2, %p7489_p4  ;;  %s7841_s8 = smov [#allocation6]  }
  0x1a   : > { %s611_s29 = sshll.u32 %s10311_s2, 4  ;;  %s669_s24 = sshll.u32 %s7841_s8, 4  ;;  %s612_s29 = int_to_ptr.hbm [resolvable:$true] %s611_s29  ;;  %s670_s24 = int_to_ptr.vmem [resolvable:$true] %s669_s24 }
  0x1b   : > { %s597_s25 = sshll.u32 %s10313_s3, 4  ;;  %s7840_s3 = smov 4   ;;  %s598_s25 = int_to_ptr.hbm [resolvable:$true] %s597_s25 }
  0x1c   : > { %7495 = dma.hbm_to_vmem [thread:$0]  (!%p8001_p5), %s612_s29, 4096, %s614_s4, [#allocation5], %s7839_s30, %s7839_s30, %s7840_s3  }
  0x1d   : > { %7492 = dma.hbm_to_vmem [thread:$0]  (!%p8001_p5), %s598_s25, 4096, %s600_s6, [#allocation3], %s7839_s30, %s7839_s30, %s7840_s3  }
  0x1e   : > { %s667_s7 = sshll.u32 %s10315_s20, 4  ;;  %s7842_s23 = smov 256   ;;  %s668_s7 = int_to_ptr.hbm [resolvable:$true] %s667_s7 }
  0x1f   : > { %s7843_s21 = smov 16   ;;  %s684_s26 = sshll.u32 %s10256_s22, 4  ;;  %s685_s26 = int_to_ptr.hbm [resolvable:$true] %s684_s26 }
  0x20   : > { %7498 = dma.hbm_to_vmem [thread:$0]  (!%p8001_p5), %s668_s7, 4096, %s670_s24, [#allocation5], %s7842_s23, %s7842_s23, %s7843_s21  }
  0x21   : > { %s7844_s2 = smov [#allocation7]   ;;  %714 = sbr.rel (%p7990_p3) target bundleno = 2527 (0x9df), region = 116 }
  0x22   : > { %s686_s20 = sshll.u32 %s7844_s2, 4  ;;  %s687_s20 = int_to_ptr.vmem [resolvable:$true] %s686_s20 }
  0x23   : > { %7501 = dma.hbm_to_vmem [thread:$0]  (!%p8001_p5), %s685_s26, 4096, %s687_s20, [#allocation8], %s7839_s30, %s7839_s30, %s7840_s3  }
  0x26   : > { %7822 = dma.done.wait (%p7983_p2), [#allocation3], 4096  }
  0x27   : > { %7824 = vsyncadd (%p7983_p2), [#allocation3], 4294963200 }
  0x28   : > { %7826 = dma.done.wait (%p7983_p2), [#allocation5], 8192  }
  0x29   : > { %7828 = vsyncadd (%p7983_p2), [#allocation5], 4294959104 }
  0x2a   : > { %7830 = dma.done.wait (%p7983_p2), [#allocation8], 4096  }
  0x2b   : > { %7832 = vsyncadd (%p7983_p2), [#allocation8], 4294963200  ;;  %s10316_s21 = sld [smem:[#allocation43_spill]]  ;;  %s10317_s19 = sadd.s32 4294967295, %s7835_s5  }
  0x2c   : > { %s6318_s20 = sshll.u32 %s10317_s19, 4  ;;  %s10318_s23 = sld [smem:[#allocation42_spill]] }
  0x2d   : > { %p797_p6 = scmp.lt.s32.totalorder %s6318_s20, 31  ;;  %s10319_s3 = sld [smem:[#allocation44_spill]] }
  0x2e   : > { %s10329_s0 = sld [smem:[#allocation45_spill]]  ;;  %s7845_s2 = smov 32  }
  0x2f   : > { %s10413_s20 = smov (!%p797_p6, %s6318_s20), 31  ;;  %s10345_s27 = sld [smem:[#allocation49_spill]] }
  0x30   : > { %s6319_s25 = sshll.u32 %s10413_s20, 3  ;;  %s10346_s30 = sld [smem:[#allocation50_spill]] }
  0x31   : > { %v6436_v0 = vld [vmem:[%s10316_s21 + $0xe0] sm:$0xf]  ;;  %v7262_v1 = vld [vmem:[%s10316_s21 + $0xec] sm:$0xf0]  ;;  %v7260_v2 = vld [vmem:[%s10316_s21 + $0xe4] sm:$0xf] }
  0x32   : > { %v6437_v3 = vor.u32 %v7262_v1, %v6436_v0  ;;  %v6438_v4 = vld [vmem:[%s10316_s21 + $0xf0] sm:$0xf0]  ;;  %v6444_v5 = vld [vmem:[%s10316_s21 + $0xe8] sm:$0xf]  ;;  %v7263_v6 = vld [vmem:[%s10316_s21 + $0xf4] sm:$0xf0]  ;;  %s8204_s24 = scalar_lea.vmem %s10318_s23, %s6319_s25 }
  0x33   : > { %v8051_v7 = vor.u32 %v7260_v2, %v6438_v4  ;;  %v8053_v8 = vor.u32 %v7263_v6, %v6444_v5  ;;  %v6420_v9 = vld [vmem:[%s10316_s21 + $0xc0] sm:$0xf]  ;;  %v7258_v10 = vld [vmem:[%s10316_s21 + $0xcc] sm:$0xf0]  ;;  %v7256_v11 = vld [vmem:[%s10316_s21 + $0xc4] sm:$0xf] }
  0x34   : > { %1025 = vmatpush.bf16.msra.mxu0 %v6437_v3  ;;  %7449 = vmatpush.bf16.msra.mxu3 %v6437_v3  ;;  %v6421_v12 = vor.u32 %v7258_v10, %v6420_v9  ;;  %v6422_v13 = vld [vmem:[%s10316_s21 + $0xd0] sm:$0xf0]  ;;  %v6428_v14 = vld [vmem:[%s10316_s21 + $0xc8] sm:$0xf]  ;;  %v7259_v15 = vld [vmem:[%s10316_s21 + $0xd4] sm:$0xf0] }
  0x35   : > { %7457 = vmatpush.bf16.msra.mxu1 %v8051_v7  ;;  %7465 = vmatpush.bf16.msra.mxu2 %v8053_v8  ;;  %v8075_v16 = vor.u32 %v7256_v11, %v6422_v13  ;;  %v8077_v17 = vor.u32 %v7259_v15, %v6428_v14  ;;  %v6404_v18 = vld [vmem:[%s10316_s21 + $0xa0] sm:$0xf]  ;;  %v7254_v19 = vld [vmem:[%s10316_s21 + $0xac] sm:$0xf0]  ;;  %v7252_v20 = vld [vmem:[%s10316_s21 + $0xa4] sm:$0xf] }
  0x36   : > { %v6406_v21 = vld [vmem:[%s10316_s21 + $0xb0] sm:$0xf0]  ;;  %v6412_v22 = vld [vmem:[%s10316_s21 + $0xa8] sm:$0xf]  ;;  %v7255_v23 = vld [vmem:[%s10316_s21 + $0xb4] sm:$0xf0]  ;;  %v6405_v24 = vor.u32 %v7254_v19, %v6404_v18 }
  0x37   : > { %v8101_v25 = vor.u32 %v7252_v20, %v6406_v21  ;;  %v8103_v26 = vor.u32 %v7255_v23, %v6412_v22  ;;  %v6388_v27 = vld [vmem:[%s10316_s21 + $0x80] sm:$0xf]  ;;  %v7250_v28 = vld [vmem:[%s10316_s21 + $0x8c] sm:$0xf0]  ;;  %v7248_v29 = vld [vmem:[%s10316_s21 + $0x84] sm:$0xf] }
  0x38   : > { %1026 = vmatpush.bf16.msra.mxu0 %v6421_v12  ;;  %7450 = vmatpush.bf16.msra.mxu3 %v6421_v12  ;;  %v6390_v30 = vld [vmem:[%s10316_s21 + $0x90] sm:$0xf0]  ;;  %v6396_v31 = vld [vmem:[%s10316_s21 + $0x88] sm:$0xf]  ;;  %v7251_v32 = vld [vmem:[%s10316_s21 + $0x94] sm:$0xf0]  ;;  %v6389_v33 = vor.u32 %v7250_v28, %v6388_v27 }
  0x39   : > { %7458 = vmatpush.bf16.msra.mxu1 %v8075_v16  ;;  %7466 = vmatpush.bf16.msra.mxu2 %v8077_v17  ;;  %v8125_v34 = vor.u32 %v7248_v29, %v6390_v30  ;;  %v8127_v35 = vor.u32 %v7251_v32, %v6396_v31  ;;  %v6372_v36 = vld [vmem:[%s10316_s21 + $0x60] sm:$0xf]  ;;  %v7246_v37 = vld [vmem:[%s10316_s21 + $0x6c] sm:$0xf0]  ;;  %v7244_v38 = vld [vmem:[%s10316_s21 + $0x64] sm:$0xf] }
  0x3a   : > { %v6374_v39 = vld [vmem:[%s10316_s21 + $0x70] sm:$0xf0]  ;;  %v6380_v40 = vld [vmem:[%s10316_s21 + $0x68] sm:$0xf]  ;;  %v7247_v41 = vld [vmem:[%s10316_s21 + $0x74] sm:$0xf0]  ;;  %v6373_v42 = vor.u32 %v7246_v37, %v6372_v36 }
  0x3b   : > { %v8152_v43 = vor.u32 %v7244_v38, %v6374_v39  ;;  %v8154_v44 = vor.u32 %v7247_v41, %v6380_v40  ;;  %v6356_v45 = vld [vmem:[%s10316_s21 + $0x40] sm:$0xf]  ;;  %v7242_v46 = vld [vmem:[%s10316_s21 + $0x4c] sm:$0xf0]  ;;  %v7240_v47 = vld [vmem:[%s10316_s21 + $0x44] sm:$0xf] }
  0x3c   : > { %1027 = vmatpush.bf16.msra.mxu0 %v6405_v24  ;;  %7451 = vmatpush.bf16.msra.mxu3 %v6405_v24  ;;  %v6358_v48 = vld [vmem:[%s10316_s21 + $0x50] sm:$0xf0]  ;;  %v6364_v49 = vld [vmem:[%s10316_s21 + $0x48] sm:$0xf]  ;;  %v7243_v50 = vld [vmem:[%s10316_s21 + $0x54] sm:$0xf0]  ;;  %v6357_v52 = vor.u32 %v7242_v46, %v6356_v45 }
  0x3d   : > { %7459 = vmatpush.bf16.msra.mxu1 %v8101_v25  ;;  %7467 = vmatpush.bf16.msra.mxu2 %v8103_v26  ;;  %v6340_v51 = vld [vmem:[%s10316_s21 + $0x20] sm:$0xf]  ;;  %v7238_v53 = vld [vmem:[%s10316_s21 + $0x2c] sm:$0xf0]  ;;  %v7236_v54 = vld [vmem:[%s10316_s21 + $0x24] sm:$0xf]  ;;  %v8189_v56 = vor.u32 %v7240_v47, %v6358_v48  ;;  %v8191_v57 = vor.u32 %v7243_v50, %v6364_v49 }
  0x3e   : > { %v6342_v55 = vld [vmem:[%s10316_s21 + $0x30] sm:$0xf0]  ;;  %v6348_v58 = vld [vmem:[%s10316_s21 + $0x28] sm:$0xf]  ;;  %v7239_v59 = vld [vmem:[%s10316_s21 + $0x34] sm:$0xf0]  ;;  %v6341_v60 = vor.u32 %v7238_v53, %v6340_v51 }
  0x3f   : > { %v8208_v61 = vor.u32 %v7236_v54, %v6342_v55  ;;  %v8210_v62 = vor.u32 %v7239_v59, %v6348_v58  ;;  %v6324_v63 = vld [vmem:[%s10316_s21] sm:$0xf]  ;;  %v7234_v0 = vld [vmem:[%s10316_s21 + $0xc] sm:$0xf0]  ;;  %v7232_v1 = vld [vmem:[%s10316_s21 + $0x4] sm:$0xf] }
  0x40   : > { %1028 = vmatpush.bf16.msra.mxu0 %v6389_v33  ;;  %7452 = vmatpush.bf16.msra.mxu3 %v6389_v33  ;;  %v6326_v2 = vld [vmem:[%s10316_s21 + $0x10] sm:$0xf0]  ;;  %v6332_v3 = vld [vmem:[%s10316_s21 + $0x8] sm:$0xf]  ;;  %v7235_v4 = vld [vmem:[%s10316_s21 + $0x14] sm:$0xf0]  ;;  %v6325_v10 = vor.u32 %v7234_v0, %v6324_v63 }
  0x41   : > { %7460 = vmatpush.bf16.msra.mxu1 %v8125_v34  ;;  %7468 = vmatpush.bf16.msra.mxu2 %v8127_v35  ;;  %v809_v5 = vld [vmem:[%s8204_s24] sm:$0xff]  ;;  %v7261_v6 = vld [vmem:[%s10316_s21 + $0xec] sm:$0xf]  ;;  %v6446_v9 = vld [vmem:[%s10316_s21 + $0xf8] sm:$0xf0]  ;;  %v6329_v14 = vor.u32 %v7232_v1, %v6326_v2  ;;  %v8242_v15 = vor.u32 %v7235_v4, %v6332_v3  ;;  %s10347_s19 = sld [smem:[#allocation48_spill]] }
  0x42   : > { %v810_v11 = vld [vmem:[%s8204_s24 + $0x8] sm:$0xff]  ;;  %v813_v12 = vld [vmem:[%s8204_s24 + $0x20] sm:$0xff]  ;;  %v6449_v18 = vor.u32 %v7261_v6, %v6446_v9  ;;  %v6430_v22 = vld [vmem:[%s10316_s21 + $0xd8] sm:$0xf0]  ;;  %s10348_s4 = sld [smem:[#allocation51_spill]] }
  0x43   : > { %v814_v13 = vld [vmem:[%s8204_s24 + $0x28] sm:$0xff]  ;;  %v8244_v19 = vpack.c.bf16 %v810_v11, %v809_v5  ;;  %v6414_v27 = vld [vmem:[%s10316_s21 + $0xb8] sm:$0xf0]  ;;  %v811_v31 = vld [vmem:[%s8204_s24 + $0x10] sm:$0xff]  ;;  %s10349_s7 = sld [smem:[#allocation53_spill]] }
  0x44   : > { %1029 = vmatpush.bf16.msra.mxu0 %v6373_v42  ;;  %7453 = vmatpush.bf16.msra.mxu3 %v6373_v42  ;;  %v8246_v20 = vpack.c.bf16 %v814_v13, %v813_v12  ;;  %v7257_v21 = vld [vmem:[%s10316_s21 + $0xcc] sm:$0xf]  ;;  %v6398_v29 = vld [vmem:[%s10316_s21 + $0x98] sm:$0xf0]  ;;  %v815_v33 = vld [vmem:[%s8204_s24 + $0x30] sm:$0xff]  ;;  %s10350_s26 = sld [smem:[#allocation54_spill]] }
  0x45   : > { %7461 = vmatpush.bf16.msra.mxu1 %v8152_v43  ;;  %7469 = vmatpush.bf16.msra.mxu2 %v8154_v44  ;;  %v6433_v23 = vor.u32 %v7257_v21, %v6430_v22  ;;  %v7253_v24 = vld [vmem:[%s10316_s21 + $0xac] sm:$0xf]  ;;  %v812_v32 = vld [vmem:[%s8204_s24 + $0x18] sm:$0xff]  ;;  %v817_v42 = vld [vmem:[%s8204_s24 + $0x40] sm:$0xff] }
  0x46   : > { %v7249_v28 = vld [vmem:[%s10316_s21 + $0x8c] sm:$0xf]  ;;  %v816_v36 = vld [vmem:[%s8204_s24 + $0x38] sm:$0xff]  ;;  %v7292_v46 = vld [vmem:[%s10319_s3 + $0xe4] sm:$0xf] }
  0x47   : > { %v6401_v30 = vor.u32 %v7249_v28, %v6398_v29  ;;  %v8281_v37 = vpack.c.bf16 %v816_v36, %v815_v33  ;;  %v7241_v39 = vld [vmem:[%s10316_s21 + $0x4c] sm:$0xf]  ;;  %v6366_v40 = vld [vmem:[%s10316_s21 + $0x58] sm:$0xf0]  ;;  %v6566_v47 = vld [vmem:[%s10319_s3 + $0xf0] sm:$0xf0] }
  0x48   : > { %1030 = vmatpush.bf16.msra.mxu0 %v6357_v52  ;;  %7454 = vmatpush.bf16.msra.mxu3 %v6357_v52  ;;  %v6369_v41 = vor.u32 %v7241_v39, %v6366_v40  ;;  %v6572_v48 = vld [vmem:[%s10319_s3 + $0xe8] sm:$0xf]  ;;  %v6569_v49 = vor.u32 %v7292_v46, %v6566_v47  ;;  %v7288_v51 = vld [vmem:[%s10319_s3 + $0xc4] sm:$0xf]  ;;  %v6550_v52 = vld [vmem:[%s10319_s3 + $0xd0] sm:$0xf0] }
  0x49   : > { %7462 = vmatpush.bf16.msra.mxu1 %v8189_v56  ;;  %7470 = vmatpush.bf16.msra.mxu2 %v8191_v57  ;;  %v6556_v53 = vld [vmem:[%s10319_s3 + $0xc8] sm:$0xf]  ;;  %v7291_v54 = vld [vmem:[%s10319_s3 + $0xd4] sm:$0xf0]  ;;  %v6553_v55 = vor.u32 %v7288_v51, %v6550_v52  ;;  %v6350_v58 = vld [vmem:[%s10316_s21 + $0x38] sm:$0xf0] }
  0x4a   : > { %v6540_v63 = vld [vmem:[%s10319_s3 + $0xa8] sm:$0xf]  ;;  %v7287_v0 = vld [vmem:[%s10319_s3 + $0xb4] sm:$0xf0]  ;;  %v7280_v3 = vld [vmem:[%s10319_s3 + $0x84] sm:$0xf] }
  0x4b   : > { %v6541_v2 = vor.u32 %v7287_v0, %v6540_v63  ;;  %v6518_v4 = vld [vmem:[%s10319_s3 + $0x90] sm:$0xf0]  ;;  %v6524_v5 = vld [vmem:[%s10319_s3 + $0x88] sm:$0xf]  ;;  %v820_v9 = vld [vmem:[%s8204_s24 + $0x58] sm:$0xff] }
  0x4c   : > { %1031 = vmatpush.bf16.msra.mxu0 %v6341_v60  ;;  %7455 = vmatpush.bf16.msra.mxu3 %v6341_v60  ;;  %v7284_v60 = vld [vmem:[%s10319_s3 + $0xa4] sm:$0xf]  ;;  %v819_v6 = vld [vmem:[%s8204_s24 + $0x50] sm:$0xff]  ;;  %v7233_v22 = vld [vmem:[%s10316_s21 + $0xc] sm:$0xf] }
  0x4d   : > { %7463 = vmatpush.bf16.msra.mxu1 %v8208_v61  ;;  %7471 = vmatpush.bf16.msra.mxu2 %v8210_v62  ;;  %v8370_v12 = vpack.c.bf16 %v820_v9, %v819_v6  ;;  %v7276_v13 = vld [vmem:[%s10319_s3 + $0x64] sm:$0xf]  ;;  %v6564_v28 = vld [vmem:[%s10319_s3 + $0xe0] sm:$0xf]  ;;  %v6470_v36 = vld [vmem:[%s10319_s3 + $0x30] sm:$0xf0] }
  0x4e   : > { %v7268_v33 = vld [vmem:[%s10319_s3 + $0x24] sm:$0xf]  ;;  %v6548_v39 = vld [vmem:[%s10319_s3 + $0xc0] sm:$0xf]  ;;  %v822_v47 = vld [vmem:[%s8204_s24 + $0x68] sm:$0xff] }
  0x4f   : > { %v6473_v40 = vor.u32 %v7268_v33, %v6470_v36  ;;  %v821_v46 = vld [vmem:[%s8204_s24 + $0x60] sm:$0xff]  ;;  %v7278_v63 = vld [vmem:[%s10319_s3 + $0x6c] sm:$0xf0] }
  0x50   : > { %1032 = vmatpush.bf16.msra.mxu0 %v6325_v10  ;;  %7456 = vmatpush.bf16.msra.mxu3 %v6325_v10  ;;  %v6521_v10 = vor.u32 %v7280_v3, %v6518_v4  ;;  %v8448_v51 = vpack.c.bf16 %v822_v47, %v821_v46  ;;  %v6532_v52 = vld [vmem:[%s10319_s3 + $0xa0] sm:$0xf]  ;;  %v823_v3 = vld [vmem:[%s8204_s24 + $0x70] sm:$0xff]  ;;  %v824_v4 = vld [vmem:[%s8204_s24 + $0x78] sm:$0xff] }
  0x51   : > { %7464 = vmatpush.bf16.msra.mxu1 %v6329_v14  ;;  %7472 = vmatpush.bf16.msra.mxu2 %v8242_v15  ;;  %v6468_v6 = vld [vmem:[%s10319_s3 + $0x20] sm:$0xf]  ;;  %v7270_v9 = vld [vmem:[%s10319_s3 + $0x2c] sm:$0xf0] }
  0x53   : > { %1033 = vmatmul.bf16.vlgmr.msra.gmra.mxu0 %v8244_v19  ;;  %1043 = vmatmul.bf16.vlgmr.msra.gmra.mxu3 %v8246_v20 }
  0x54   : > { %1172 = vmatpush.bf16.msrb.mxu3 %v6449_v18  ;;  %1074 = vmatpush.bf16.msrb.mxu0 %v8051_v7  ;;  %v6417_v7 = vor.u32 %v7253_v24, %v6414_v27  ;;  %v7272_v27 = vld [vmem:[%s10319_s3 + $0x44] sm:$0xf] }
  0x55   : > { %1092 = vmatmul.bf16.vlgmr.msra.gmra.mxu1 %v8246_v20  ;;  %1141 = vmatmul.bf16.vlgmr.msra.gmra.mxu2 %v8246_v20 }
  0x56   : > { %1462 = vmatpush.bf16.msrb.mxu1 %v6569_v49  ;;  %v6460_v49 = vld [vmem:[%s10319_s3 + $0x8] sm:$0xf] }
  0x58   : > { %1075 = vmatpush.bf16.msrb.mxu0 %v8075_v16  ;;  %1173 = vmatpush.bf16.msrb.mxu3 %v6433_v23  ;;  %v8279_v16 = vpack.c.bf16 %v812_v32, %v811_v31  ;;  %v6334_v23 = vld [vmem:[%s10316_s21 + $0x18] sm:$0xf0]  ;;  %v7294_v31 = vld [vmem:[%s10319_s3 + $0xec] sm:$0xf0] }
  0x59   : > { %v6337_v24 = vor.u32 %v7233_v22, %v6334_v23  ;;  %v6542_v22 = vld [vmem:[%s10319_s3 + $0xb8] sm:$0xf0] }
  0x5a   : > { %1463 = vmatpush.bf16.msrb.mxu1 %v6553_v55  ;;  %v6516_v55 = vld [vmem:[%s10319_s3 + $0x80] sm:$0xf] }
  0x5c   : > { %1076 = vmatpush.bf16.msrb.mxu0 %v8101_v25  ;;  %1174 = vmatpush.bf16.msrb.mxu3 %v6417_v7  ;;  %v7245_v25 = vld [vmem:[%s10316_s21 + $0x6c] sm:$0xf]  ;;  %v6486_v7 = vld [vmem:[%s10319_s3 + $0x50] sm:$0xf0] }
  0x5d   : > { %v6489_v29 = vor.u32 %v7272_v27, %v6486_v7  ;;  %v6526_v27 = vld [vmem:[%s10319_s3 + $0x98] sm:$0xf0] }
  0x60   : > { %1077 = vmatpush.bf16.msrb.mxu0 %v8125_v34  ;;  %1175 = vmatpush.bf16.msrb.mxu3 %v6401_v30  ;;  %v6382_v34 = vld [vmem:[%s10316_s21 + $0x78] sm:$0xf0]  ;;  %v7275_v30 = vld [vmem:[%s10319_s3 + $0x54] sm:$0xf0] }
  0x61   : > { %v6385_v38 = vor.u32 %v7245_v25, %v6382_v34  ;;  %v6476_v25 = vld [vmem:[%s10319_s3 + $0x28] sm:$0xf]  ;;  %v7271_v34 = vld [vmem:[%s10319_s3 + $0x34] sm:$0xf0] }
  0x63   : > { %1038 = vmatmul.bf16.gmra.mxu0 %v8279_v16  ;;  %1048 = vmatmul.bf16.gmra.mxu3 %v8281_v37 }
  0x64   : > { %1078 = vmatpush.bf16.msrb.mxu0 %v8152_v43  ;;  %1176 = vmatpush.bf16.msrb.mxu3 %v6385_v38  ;;  %v818_v43 = vld [vmem:[%s8204_s24 + $0x48] sm:$0xff]  ;;  %v6565_v38 = vor.u32 %v7294_v31, %v6564_v28  ;;  %s7847_s24 = smov 96  }
  0x65   : > { %1097 = vmatmul.bf16.gmra.mxu1 %v8281_v37  ;;  %1146 = vmatmul.bf16.gmra.mxu2 %v8281_v37  ;;  %v8304_v45 = vpack.c.bf16 %v818_v43, %v817_v42  ;;  %v6477_v42 = vor.u32 %v7271_v34, %v6476_v25  ;;  %v7264_v43 = vld [vmem:[%s10319_s3 + $0x4] sm:$0xf] }
  0x68   : > { %1079 = vmatpush.bf16.msrb.mxu0 %v8189_v56  ;;  %1177 = vmatpush.bf16.msrb.mxu3 %v6369_v41  ;;  %v6557_v56 = vor.u32 %v7291_v54, %v6556_v53  ;;  %v7290_v41 = vld [vmem:[%s10319_s3 + $0xcc] sm:$0xf0] }
  0x6c   : > { %1080 = vmatpush.bf16.msrb.mxu0 %v8208_v61  ;;  %v6534_v61 = vld [vmem:[%s10319_s3 + $0xb0] sm:$0xf0] }
  0x6d   : > { %v6537_v1 = vor.u32 %v7284_v60, %v6534_v61  ;;  %v6500_v61 = vld [vmem:[%s10319_s3 + $0x60] sm:$0xf] }
  0x6e   : > { %v6501_v0 = vor.u32 %v7278_v63, %v6500_v61 }
  0x6f   : > { %1464 = vmatpush.bf16.msrb.mxu1 %v6537_v1  ;;  %v6484_v1 = vld [vmem:[%s10319_s3 + $0x40] sm:$0xf] }
  0x70   : > { %1081 = vmatpush.bf16.msrb.mxu0 %v6329_v14  ;;  %v6508_v14 = vld [vmem:[%s10319_s3 + $0x68] sm:$0xf] }
  0x73   : > { %1053 = vmatmul.bf16.gmra.mxu3 %v8304_v45  ;;  %1082 = vmatmul.bf16.vlgmr.msrb.gmra.mxu0 %v8244_v19 }
  0x74   : > { %1123 = vmatpush.bf16.msra.mxu0 %v8053_v8  ;;  %v7295_v8 = vld [vmem:[%s10319_s3 + $0xf4] sm:$0xf0]  ;;  %1465 = vmatpush.bf16.msrb.mxu1 %v6521_v10  ;;  %v6469_v10 = vor.u32 %v7270_v9, %v6468_v6  ;;  %v7302_v6 = vld [vmem:[#allocation2 + $0x30] sm:$0xff] }
  0x75   : > { %1102 = vmatmul.bf16.gmra.mxu1 %v8304_v45  ;;  %1151 = vmatmul.bf16.gmra.mxu2 %v8304_v45  ;;  %v6573_v50 = vor.u32 %v7295_v8, %v6572_v48  ;;  %v6549_v48 = vor.u32 %v7290_v41, %v6548_v39  ;;  %v7273_v41 = vld [vmem:[%s10319_s3 + $0x4c] sm:$0xf]  ;;  %v7310_v9 = vld [vmem:[#allocation2 + $0x70] sm:$0xff] }
  0x77   : > { %1511 = vmatpush.bf16.msrb.mxu2 %v6573_v50  ;;  %v7267_v50 = vld [vmem:[%s10319_s3 + $0x14] sm:$0xf0] }
  0x78   : > { %1124 = vmatpush.bf16.msra.mxu0 %v8077_v17  ;;  %v7237_v17 = vld [vmem:[%s10316_s21 + $0x2c] sm:$0xf]  ;;  %v6461_v53 = vor.u32 %v7267_v50, %v6460_v49 }
  0x79   : > { %v6353_v59 = vor.u32 %v7237_v17, %v6350_v58  ;;  %v7293_v17 = vld [vmem:[%s10319_s3 + $0xec] sm:$0xf]  ;;  %v6574_v58 = vld [vmem:[%s10319_s3 + $0xf8] sm:$0xf0] }
  0x7b   : > { %1178 = vmatpush.bf16.msrb.mxu3 %v6353_v59  ;;  %1512 = vmatpush.bf16.msrb.mxu2 %v6557_v56  ;;  %v7282_v56 = vld [vmem:[%s10319_s3 + $0x8c] sm:$0xf0]  ;;  %v6577_v59 = vor.u32 %v7293_v17, %v6574_v58 }
  0x7c   : > { %1125 = vmatpush.bf16.msra.mxu0 %v8103_v26  ;;  %v7283_v26 = vld [vmem:[%s10319_s3 + $0x94] sm:$0xf0]  ;;  %v6517_v60 = vor.u32 %v7282_v56, %v6516_v55 }
  0x7d   : > { %v6525_v11 = vor.u32 %v7283_v26, %v6524_v5  ;;  %v8486_v26 = vpack.c.bf16 %v824_v4, %v823_v3  ;;  %v6462_v3 = vld [vmem:[%s10319_s3 + $0x18] sm:$0xf0] }
  0x7f   : > { %1513 = vmatpush.bf16.msrb.mxu2 %v6541_v2  ;;  %1179 = vmatpush.bf16.msrb.mxu3 %v6337_v24  ;;  %v7274_v2 = vld [vmem:[%s10319_s3 + $0x4c] sm:$0xf0]  ;;  %10320 = vst [vmem:[#allocation12_spill] sm:$0xff] %v8486_v26  ;;  %v7281_v24 = vld [vmem:[%s10319_s3 + $0x8c] sm:$0xf] }
  0x80   : > { %1126 = vmatpush.bf16.msra.mxu0 %v8127_v35  ;;  %v6502_v35 = vld [vmem:[%s10319_s3 + $0x70] sm:$0xf0]  ;;  %v6485_v5 = vor.u32 %v7274_v2, %v6484_v1  ;;  %v6529_v7 = vor.u32 %v7281_v24, %v6526_v27  ;;  %v7311_v1 = vld [vmem:[#allocation2 + $0x78] sm:$0xff]  ;;  %v7265_v2 = vld [vmem:[%s10319_s3 + $0xc] sm:$0xf] }
  0x81   : > { %v6505_v18 = vor.u32 %v7276_v13, %v6502_v35  ;;  %v7266_v13 = vld [vmem:[%s10319_s3 + $0xc] sm:$0xf0]  ;;  %v7289_v35 = vld [vmem:[%s10319_s3 + $0xcc] sm:$0xf]  ;;  %v6465_v4 = vor.u32 %v7265_v2, %v6462_v3 }
  0x82   : > { %v7297_v2 = vld [vmem:[#allocation2 + $0x8] sm:$0xff] }
  0x83   : > { %1514 = vmatpush.bf16.msrb.mxu2 %v6525_v11  ;;  %1058 = vmatmul.bf16.gmra.mxu3 %v8370_v12  ;;  %v6452_v11 = vld [vmem:[%s10319_s3] sm:$0xf]  ;;  %v7305_v3 = vld [vmem:[#allocation2 + $0x48] sm:$0xff] }
  0x84   : > { %1127 = vmatpush.bf16.msra.mxu0 %v8154_v44  ;;  %v7279_v44 = vld [vmem:[%s10319_s3 + $0x74] sm:$0xf0]  ;;  %1466 = vmatpush.bf16.msrb.mxu1 %v6505_v18  ;;  %v6453_v18 = vor.u32 %v7266_v13, %v6452_v11 }
  0x85   : > { %1087 = vmatmul.bf16.gmra.mxu0 %v8279_v16  ;;  %1107 = vmatmul.bf16.gmra.mxu1 %v8370_v12  ;;  %v6509_v21 = vor.u32 %v7279_v44, %v6508_v14  ;;  %v6558_v14 = vld [vmem:[%s10319_s3 + $0xd8] sm:$0xf0] }
  0x86   : > { %1156 = vmatmul.bf16.gmra.mxu2 %v8370_v12  ;;  %1560 = vmatpush.bf16.msra.mxu3 %v6577_v59  ;;  %v6561_v44 = vor.u32 %v7289_v35, %v6558_v14  ;;  %v7319_v13 = vld [vmem:[#allocation2 + $0xb8] sm:$0xff]  ;;  %v7301_v14 = vld [vmem:[#allocation2 + $0x28] sm:$0xff] }
  0x87   : > { %1515 = vmatpush.bf16.msrb.mxu2 %v6509_v21  ;;  %v7285_v21 = vld [vmem:[%s10319_s3 + $0xac] sm:$0xf] }
  0x88   : > { %1128 = vmatpush.bf16.msra.mxu0 %v8191_v57  ;;  %v6492_v57 = vld [vmem:[%s10319_s3 + $0x48] sm:$0xf]  ;;  %1467 = vmatpush.bf16.msrb.mxu1 %v6489_v29  ;;  %v6545_v23 = vor.u32 %v7285_v21, %v6542_v22  ;;  %v7300_v22 = vld [vmem:[#allocation2 + $0x20] sm:$0xff] }
  0x89   : > { %v6493_v32 = vor.u32 %v7275_v30, %v6492_v57  ;;  %v7277_v57 = vld [vmem:[%s10319_s3 + $0x6c] sm:$0xf]  ;;  %v6510_v30 = vld [vmem:[%s10319_s3 + $0x78] sm:$0xf0] }
  0x8a   : > { %1561 = vmatpush.bf16.msra.mxu3 %v6561_v44  ;;  %v6513_v31 = vor.u32 %v7277_v57, %v6510_v30  ;;  %v7309_v44 = vld [vmem:[#allocation2 + $0x68] sm:$0xff]  ;;  %v7299_v30 = vld [vmem:[#allocation2 + $0x18] sm:$0xff] }
  0x8b   : > { %1516 = vmatpush.bf16.msrb.mxu2 %v6493_v32 }
  0x8c   : > { %1129 = vmatpush.bf16.msra.mxu0 %v8210_v62  ;;  %v6454_v62 = vld [vmem:[%s10319_s3 + $0x10] sm:$0xf0]  ;;  %1468 = vmatpush.bf16.msrb.mxu1 %v6473_v40 }
  0x8d   : > { %v6457_v8 = vor.u32 %v7264_v43, %v6454_v62 }
  0x8e   : > { %1562 = vmatpush.bf16.msra.mxu3 %v6545_v23  ;;  %v7308_v23 = vld [vmem:[#allocation2 + $0x60] sm:$0xff] }
  0x8f   : > { %1517 = vmatpush.bf16.msrb.mxu2 %v6477_v42  ;;  %v6494_v42 = vld [vmem:[%s10319_s3 + $0x58] sm:$0xf0] }
  0x90   : > { %1130 = vmatpush.bf16.msra.mxu0 %v8242_v15  ;;  %v7286_v15 = vld [vmem:[%s10319_s3 + $0xac] sm:$0xf0]  ;;  %1469 = vmatpush.bf16.msrb.mxu1 %v6457_v8  ;;  %v6497_v43 = vor.u32 %v7273_v41, %v6494_v42  ;;  %v7316_v41 = vld [vmem:[#allocation2 + $0xa0] sm:$0xff] }
  0x91   : > { %v6533_v54 = vor.u32 %v7286_v15, %v6532_v52  ;;  %v7269_v15 = vld [vmem:[%s10319_s3 + $0x2c] sm:$0xf] }
  0x92   : > { %1563 = vmatpush.bf16.msra.mxu3 %v6529_v7  ;;  %v7317_v7 = vld [vmem:[#allocation2 + $0xa8] sm:$0xff] }
  0x93   : > { %1063 = vmatmul.bf16.gmra.mxu3 %v8448_v51  ;;  %1518 = vmatpush.bf16.msrb.mxu2 %v6461_v53  ;;  %v6478_v53 = vld [vmem:[%s10319_s3 + $0x38] sm:$0xf0] }
  0x94   : > { %1413 = vmatpush.bf16.msrb.mxu0 %v6565_v38  ;;  %2276 = vmatpush.bf16.msra.mxu1 %v7311_v1 }
  0x95   : > { %1131 = vmatmul.bf16.vlgmr.msra.gmra.mxu0 %v8244_v19  ;;  %1112 = vmatmul.bf16.gmra.mxu1 %v8448_v51 }
  0x96   : > { %1161 = vmatmul.bf16.gmra.mxu2 %v8448_v51  ;;  %1564 = vmatpush.bf16.msra.mxu3 %v6513_v31  ;;  %v7307_v31 = vld [vmem:[#allocation2 + $0x58] sm:$0xff] }
  0x97   : > { %2325 = vmatpush.bf16.msra.mxu2 %v7319_v13  ;;  %v7304_v13 = vld [vmem:[#allocation2 + $0x40] sm:$0xff] }
  0x98   : > { %1414 = vmatpush.bf16.msrb.mxu0 %v6549_v48  ;;  %2277 = vmatpush.bf16.msra.mxu1 %v7310_v9  ;;  %v7296_v9 = vld [vmem:[#allocation2] sm:$0xff] }
  0x9a   : > { %1565 = vmatpush.bf16.msra.mxu3 %v6497_v43  ;;  %v7298_v43 = vld [vmem:[#allocation2 + $0x10] sm:$0xff] }
  0x9c   : > { %1415 = vmatpush.bf16.msrb.mxu0 %v6533_v54  ;;  %v6481_v54 = vor.u32 %v7269_v15, %v6478_v53  ;;  %2278 = vmatpush.bf16.msra.mxu1 %v7309_v44  ;;  %v7306_v15 = vld [vmem:[#allocation2 + $0x50] sm:$0xff] }
  0x9e   : > { %1566 = vmatpush.bf16.msra.mxu3 %v6481_v54 }
  0xa0   : > { %1416 = vmatpush.bf16.msrb.mxu0 %v6517_v60  ;;  %2279 = vmatpush.bf16.msra.mxu1 %v7308_v23  ;;  %v7312_v23 = vld [vmem:[#allocation2 + $0x80] sm:$0xff] }
  0xa2   : > { %1567 = vmatpush.bf16.msra.mxu3 %v6465_v4  ;;  %v7314_v4 = vld [vmem:[#allocation2 + $0x90] sm:$0xff] }
  0xa3   : > { %1068 = vmatmul.bf16.gmra.mxu3 %v8486_v26 }
  0xa4   : > { %1417 = vmatpush.bf16.msrb.mxu0 %v6501_v0  ;;  %v7303_v0 = vld [vmem:[#allocation2 + $0x38] sm:$0xff]  ;;  %2280 = vmatpush.bf16.msra.mxu1 %v7307_v31 }
  0xa5   : > { %1136 = vmatmul.bf16.gmra.mxu0 %v8279_v16  ;;  %1117 = vmatmul.bf16.gmra.mxu1 %v8486_v26 }
  0xa6   : > { %1166 = vmatmul.bf16.gmra.mxu2 %v8486_v26 }
  0xa8   : > { %1418 = vmatpush.bf16.msrb.mxu0 %v6485_v5  ;;  %2281 = vmatpush.bf16.msra.mxu1 %v7306_v15  ;;  %v8675_v15 = vld [vmem:[%s10329_s0] sm:$0xf]  ;;  %s10381_s0 = sld [smem:[#allocation55_spill]] }
  0xa9   : > { %10330 = vst [vmem:[#allocation21_spill] sm:$0xff] %v8675_v15 }
  0xac   : > { %1419 = vmatpush.bf16.msrb.mxu0 %v6469_v10  ;;  %2282 = vmatpush.bf16.msra.mxu1 %v7305_v3 }
  0xb0   : > { %1420 = vmatpush.bf16.msrb.mxu0 %v6453_v18  ;;  %v7318_v18 = vld [vmem:[#allocation2 + $0xb0] sm:$0xff]  ;;  %2283 = vmatpush.bf16.msra.mxu1 %v7304_v13 }
  0xb1   : > { %2326 = vmatpush.bf16.msra.mxu2 %v7318_v18  ;;  %v7313_v18 = vld [vmem:[#allocation2 + $0x88] sm:$0xff] }
  0xb3   : > { %1180 = vmatmul.bf16.vlgmr.msrb.gmra.mxu3 %v8244_v19 }
  0xb4   : > { %2227 = vmatpush.bf16.msra.mxu0 %v7303_v0  ;;  %v7315_v0 = vld [vmem:[#allocation2 + $0x98] sm:$0xff] }
  0xb5   : > { %1421 = vmatmul.bf16.vlgmr.msrb.gmra.mxu0 %v8244_v19  ;;  %1470 = vmatmul.bf16.vlgmr.msrb.gmra.mxu1 %v8244_v19 }
  0xb6   : > { %1519 = vmatmul.bf16.vlgmr.msrb.gmra.mxu2 %v8244_v19 }
  0xb7   : > { %2327 = vmatpush.bf16.msra.mxu2 %v7317_v7 }
  0xb8   : > { %2228 = vmatpush.bf16.msra.mxu0 %v7302_v6 }
  0xbb   : > { %2328 = vmatpush.bf16.msra.mxu2 %v7316_v41 }
  0xbc   : > { %2229 = vmatpush.bf16.msra.mxu0 %v7301_v14 }
  0xbf   : > { %2329 = vmatpush.bf16.msra.mxu2 %v7315_v0  ;;  %v7327_v0 = vld [vmem:[#allocation2 + $0xf8] sm:$0xff] }
  0xc0   : > { %2230 = vmatpush.bf16.msra.mxu0 %v7300_v22  ;;  %2374 = vmatpush.bf16.msrb.mxu3 %v7327_v0 }
  0xc3   : > { %1185 = vmatmul.bf16.gmra.mxu3 %v8279_v16  ;;  %2330 = vmatpush.bf16.msra.mxu2 %v7314_v4 }
  0xc4   : > { %2231 = vmatpush.bf16.msra.mxu0 %v7299_v30 }
  0xc5   : > { %1426 = vmatmul.bf16.gmra.mxu0 %v8279_v16  ;;  %1475 = vmatmul.bf16.gmra.mxu1 %v8279_v16 }
  0xc6   : > { %1524 = vmatmul.bf16.gmra.mxu2 %v8279_v16 }
  0xc7   : > { %2331 = vmatpush.bf16.msra.mxu2 %v7313_v18 }
  0xc8   : > { %2232 = vmatpush.bf16.msra.mxu0 %v7298_v43 }
  0xcb   : > { %2332 = vmatpush.bf16.msra.mxu2 %v7312_v23  ;;  %v8685_v23 = vperm.slane %v8675_v15, 1 }
  0xcc   : > { %2233 = vmatpush.bf16.msra.mxu0 %v7297_v2 }
  0xd0   : > { %v8530_v28 = vpop.f32.mrf.mxu0  ;;  %2234 = vmatpush.bf16.msra.mxu0 %v7296_v9  ;;  %v8681_v9 = vperm.slane %v8675_v15, 0 }
  0xd2   : > { %v8532_v29 = vpop.f32.mrf.mxu1 }
  0xd3   : > { %1190 = vmatmul.bf16.gmra.mxu3 %v8246_v20 }
  0xd5   : > { %1431 = vmatmul.bf16.gmra.mxu0 %v8246_v20  ;;  %1480 = vmatmul.bf16.gmra.mxu1 %v8246_v20 }
  0xd6   : > { %1529 = vmatmul.bf16.gmra.mxu2 %v8246_v20  ;;  %v8544_v32 = vpop.f32.mrf.mxu3 }
  0xd8   : > { %v8546_v33 = vpop.f32.mrf.mxu2  ;;  %v8548_v36 = vpop.f32.mrf.mxu0 }
  0xda   : > { %v8550_v25 = vpop.f32.mrf.mxu1 }
  0xde   : > { %v8552_v34 = vpop.f32.mrf.mxu3 }
  0xe0   : > { %v8554_v38 = vpop.f32.mrf.mxu2  ;;  %v8556_v39 = vpop.f32.mrf.mxu0 }
  0xe2   : > { %v8558_v40 = vpop.f32.mrf.mxu1 }
  0xe3   : > { %1195 = vmatmul.bf16.gmra.mxu3 %v8281_v37 }
  0xe5   : > { %1436 = vmatmul.bf16.gmra.mxu0 %v8281_v37  ;;  %1485 = vmatmul.bf16.gmra.mxu1 %v8281_v37 }
  0xe6   : > { %1534 = vmatmul.bf16.gmra.mxu2 %v8281_v37  ;;  %v8570_v62 = vpop.f32.mrf.mxu3 }
  0xe8   : > { %v8572_v46 = vpop.f32.mrf.mxu2  ;;  %v8574_v47 = vpop.f32.mrf.mxu0 }
  0xea   : > { %v8576_v48 = vpop.f32.mrf.mxu1 }
  0xee   : > { %v8578_v8 = vpop.f32.mrf.mxu3 }
  0xf0   : > { %v8580_v49 = vpop.f32.mrf.mxu2  ;;  %v8582_v50 = vpop.f32.mrf.mxu0 }
  0xf2   : > { %v8584_v52 = vpop.f32.mrf.mxu1 }
  0xf3   : > { %1200 = vmatmul.bf16.gmra.mxu3 %v8304_v45 }
  0xf5   : > { %1441 = vmatmul.bf16.gmra.mxu0 %v8304_v45  ;;  %1490 = vmatmul.bf16.gmra.mxu1 %v8304_v45 }
  0xf6   : > { %1539 = vmatmul.bf16.gmra.mxu2 %v8304_v45  ;;  %v8596_v55 = vpop.f32.mrf.mxu3 }
  0xf8   : > { %v8598_v56 = vpop.f32.mrf.mxu2  ;;  %v8600_v17 = vpop.f32.mrf.mxu0 }
  0xfa   : > { %v8602_v58 = vpop.f32.mrf.mxu1 }
  0xfe   : > { %v8604_v59 = vpop.f32.mrf.mxu3 }
 0x100   : > { %v8606_v60 = vpop.f32.mrf.mxu2 }
 0x102   : > { %v8608_v61 = vpop.f32.mrf.mxu0  ;;  %v8610_v63 = vpop.f32.mrf.mxu1 }
 0x103   : > { %1205 = vmatmul.bf16.gmra.mxu3 %v8370_v12 }
 0x105   : > { %1446 = vmatmul.bf16.gmra.mxu0 %v8370_v12  ;;  %1495 = vmatmul.bf16.gmra.mxu1 %v8370_v12 }
 0x106   : > { %1544 = vmatmul.bf16.gmra.mxu2 %v8370_v12  ;;  %v8622_v5 = vpop.f32.mrf.mxu3 }
 0x109   : > { %v8624_v10 = vpop.f32.mrf.mxu2 }
 0x10a   : > { %v8626_v11 = vpop.f32.mrf.mxu0  ;;  %v8628_v35 = vpop.f32.mrf.mxu1 }
 0x10e   : > { %v8630_v21 = vpop.f32.mrf.mxu3 }
 0x111   : > { %v8632_v24 = vpop.f32.mrf.mxu2 }
 0x112   : > { %v8634_v27 = vpop.f32.mrf.mxu0  ;;  %v8636_v57 = vpop.f32.mrf.mxu1 }
 0x113   : > { %1210 = vmatmul.bf16.gmra.mxu3 %v8448_v51 }
 0x115   : > { %1451 = vmatmul.bf16.gmra.mxu0 %v8448_v51  ;;  %1500 = vmatmul.bf16.gmra.mxu1 %v8448_v51 }
 0x116   : > { %1549 = vmatmul.bf16.gmra.mxu2 %v8448_v51  ;;  %v8642_v42 = vpop.f32.mrf.mxu3 }
 0x119   : > { %v8644_v53 = vpop.f32.mrf.mxu2 }
 0x11a   : > { %10321 = vst [vmem:[#allocation13_spill] sm:$0xff] %v8644_v53  ;;  %v8646_v54 = vpop.f32.mrf.mxu0  ;;  %v8648_v1 = vpop.f32.mrf.mxu1 }
 0x11b   : > { %10322 = vst [vmem:[#allocation14_spill] sm:$0xff] %v8648_v1 }
 0x11e   : > { %v8650_v6 = vpop.f32.mrf.mxu3 }
 0x121   : > { %v8652_v14 = vpop.f32.mrf.mxu2 }
 0x122   : > { %10323 = vst [vmem:[#allocation15_spill] sm:$0xff] %v8652_v14  ;;  %v8654_v44 = vpop.f32.mrf.mxu0  ;;  %v8656_v22 = vpop.f32.mrf.mxu1 }
 0x123   : > { %10324 = vst [vmem:[#allocation16_spill] sm:$0xff] %v8656_v22  ;;  %1215 = vmatmul.bf16.gmra.mxu3 %v8486_v26 }
 0x125   : > { %1456 = vmatmul.bf16.gmra.mxu0 %v8486_v26  ;;  %1505 = vmatmul.bf16.gmra.mxu1 %v8486_v26 }
 0x126   : > { %1554 = vmatmul.bf16.gmra.mxu2 %v8486_v26  ;;  %v8662_v7 = vpop.f32.mrf.mxu3 }
 0x127   : > { %10325 = vst [vmem:[#allocation17_spill] sm:$0xff] %v8662_v7 }
 0x129   : > { %v8664_v30 = vpop.f32.mrf.mxu2 }
 0x12a   : > { %10326 = vst [vmem:[#allocation18_spill] sm:$0xff] %v8664_v30  ;;  %v8666_v31 = vpop.f32.mrf.mxu0  ;;  %v8668_v41 = vpop.f32.mrf.mxu1 }
 0x12b   : > { %10327 = vst [vmem:[#allocation19_spill] sm:$0xff] %v8668_v41 }
 0x12e   : > { %v8670_v43 = vpop.f32.mrf.mxu3 }
 0x12f   : > { %10328 = vst [vmem:[#allocation20_spill] sm:$0xff] %v8670_v43 }
 0x131   : > { %v8677_v2 = vpop.f32.mrf.mxu2 }
 0x132   : > { %10331 = vst [vmem:[#allocation22_spill] sm:$0xff] %v8677_v2  ;;  %v1422_v3 = vpop.f32.mrf.mxu0  ;;  %v1471_v13 = vpop.f32.mrf.mxu1 }
 0x133   : > { %v1609_v4 = vmax.f32 %v8530_v28, %v1422_v3  ;;  %v1610_v18 = vmax.f32 %v8582_v50, %v1471_v13  ;;  %1568 = vmatmul.bf16.vlgmr.msra.gmra.mxu3 %v8244_v19  ;;  %v8694_v3 = vperm.slane %v8675_v15, 2 }
 0x135   : > { %v1683_v41 = vadd.f32 %v8681_v9, %v1609_v4  ;;  %v1684_v30 = vadd.f32 %v8685_v23, %v1610_v18 }
 0x136   : > { %v8690_v2 = vpop.f32.mrf.mxu3 }
 0x137   : > { %10332 = vst [vmem:[#allocation23_spill] sm:$0xff] %v8690_v2  ;;  %v1811_v22 = vmul.f32 0.01, %v1683_v41  ;;  %vm1747_vm0 = vcmp.ge.f32.partialorder %v1683_v41, 0.0  ;;  %v1812_v26 = vmul.f32 0.01, %v1684_v30 }
 0x138   : > { %vm1748_vm1 = vcmp.ge.f32.partialorder %v1684_v30, 0.0 }
 0x139   : > { %v1520_v0 = vpop.f32.mrf.mxu2  ;;  %v1876_v15 = vsel %vm1748_vm1, %v1684_v30, %v1812_v26 }
 0x13a   : > { %v1611_v28 = vmax.f32 %v8634_v27, %v1520_v0  ;;  %v1424_v43 = vpop.f32.mrf.mxu0  ;;  %v1473_v13 = vpop.f32.mrf.mxu1  ;;  %v1875_v27 = vsel %vm1747_vm0, %v1683_v41, %v1811_v22 }
 0x13b   : > { %v1613_v50 = vmax.f32 %v8548_v36, %v1424_v43  ;;  %v1614_v19 = vmax.f32 %v8600_v17, %v1473_v13  ;;  %v7326_v36 = vld [vmem:[#allocation2 + $0xf0] sm:$0xff] }
 0x13c   : > { %v1685_v18 = vadd.f32 %v8694_v3, %v1611_v28  ;;  %2375 = vmatpush.bf16.msrb.mxu3 %v7326_v36 }
 0x13d   : > { %v1687_v4 = vadd.f32 %v8681_v9, %v1613_v50  ;;  %v1688_v2 = vadd.f32 %v8685_v23, %v1614_v19 }
 0x13e   : > { %v8701_v14 = vpop.f32.mrf.mxu3  ;;  %v1813_v53 = vmul.f32 0.01, %v1685_v18  ;;  %vm1749_vm4 = vcmp.ge.f32.partialorder %v1685_v18, 0.0 }
 0x13f   : > { %vm1751_vm2 = vcmp.ge.f32.partialorder %v1687_v4, 0.0  ;;  %v1815_v0 = vmul.f32 0.01, %v1687_v4  ;;  %vm1752_vm3 = vcmp.ge.f32.partialorder %v1688_v2, 0.0  ;;  %v1816_v7 = vmul.f32 0.01, %v1688_v2 }
 0x141   : > { %v1879_v43 = vsel %vm1751_vm2, %v1687_v4, %v1815_v0  ;;  %v1522_v1 = vpop.f32.mrf.mxu2  ;;  %v1880_v13 = vsel %vm1752_vm3, %v1688_v2, %v1816_v7  ;;  %v1877_v7 = vsel %vm1749_vm4, %v1685_v18, %v1813_v53 }
 0x142   : > { %v8703_v17 = vpack.c.bf16 %v1879_v43, %v1875_v27  ;;  %v1615_v50 = vmax.f32 %v8646_v54, %v1522_v1  ;;  %v1427_v28 = vpop.f32.mrf.mxu0  ;;  %v8706_v22 = vpack.c.bf16 %v1880_v13, %v1876_v15  ;;  %v1476_v30 = vpop.f32.mrf.mxu1 }
 0x143   : > { %v1617_v26 = vmax.f32 %v8556_v39, %v1427_v28  ;;  %v1618_v19 = vmax.f32 %v8608_v61, %v1476_v30  ;;  %1573 = vmatmul.bf16.gmra.mxu3 %v8279_v16 }
 0x144   : > { %v1689_v41 = vadd.f32 %v8694_v3, %v1615_v50  ;;  %2235 = vmatmul.bf16.vlgmr.msra.gmra.mxu0 %v8703_v17  ;;  %2284 = vmatmul.bf16.vlgmr.msra.gmra.mxu1 %v8706_v22 }
 0x145   : > { %v1691_v1 = vadd.f32 %v8681_v9, %v1617_v26  ;;  %v1692_v2 = vadd.f32 %v8685_v23, %v1618_v19  ;;  %v7325_v19 = vld [vmem:[#allocation2 + $0xe8] sm:$0xff] }
 0x146   : > { %vm1753_vm5 = vcmp.ge.f32.partialorder %v1689_v41, 0.0  ;;  %v1817_v54 = vmul.f32 0.01, %v1689_v41  ;;  %v8716_v39 = vpop.f32.mrf.mxu3  ;;  %2376 = vmatpush.bf16.msrb.mxu3 %v7325_v19 }
 0x147   : > { %v1819_v36 = vmul.f32 0.01, %v1691_v1  ;;  %vm1755_vm6 = vcmp.ge.f32.partialorder %v1691_v1, 0.0  ;;  %v1820_v53 = vmul.f32 0.01, %v1692_v2  ;;  %vm1756_vm7 = vcmp.ge.f32.partialorder %v1692_v2, 0.0 }
 0x148   : > { %v1881_v15 = vsel %vm1753_vm5, %v1689_v41, %v1817_v54 }
 0x149   : > { %v8718_v4 = vpack.c.bf16 %v1881_v15, %v1877_v7  ;;  %v1525_v27 = vpop.f32.mrf.mxu2 }
 0x14a   : > { %v1619_v61 = vmax.f32 %v8654_v44, %v1525_v27  ;;  %v1429_v0 = vpop.f32.mrf.mxu0  ;;  %v1478_v16 = vpop.f32.mrf.mxu1  ;;  %v1883_v44 = vsel %vm1755_vm6, %v1691_v1, %v1819_v36 }
 0x14b   : > { %v1621_v43 = vmax.f32 %v8574_v47, %v1429_v0  ;;  %2333 = vmatmul.bf16.vlgmr.msra.gmra.mxu2 %v8718_v4  ;;  %v1622_v18 = vmax.f32 %v8626_v11, %v1478_v16  ;;  %v1884_v47 = vsel %vm1756_vm7, %v1692_v2, %v1820_v53 }
 0x14c   : > { %v1693_v50 = vadd.f32 %v8694_v3, %v1619_v61 }
 0x14d   : > { %v1695_v13 = vadd.f32 %v8681_v9, %v1621_v43  ;;  %v1696_v28 = vadd.f32 %v8685_v23, %v1622_v18 }
 0x14e   : > { %v8727_v41 = vpop.f32.mrf.mxu3  ;;  %v1821_v15 = vmul.f32 0.01, %v1693_v50  ;;  %vm1757_vm10 = vcmp.ge.f32.partialorder %v1693_v50, 0.0 }
 0x14f   : > { %v1823_v26 = vmul.f32 0.01, %v1695_v13  ;;  %vm1759_vm8 = vcmp.ge.f32.partialorder %v1695_v13, 0.0  ;;  %v1824_v30 = vmul.f32 0.01, %v1696_v28  ;;  %vm1760_vm9 = vcmp.ge.f32.partialorder %v1696_v28, 0.0 }
 0x150   : > { %v1885_v53 = vsel %vm1757_vm10, %v1693_v50, %v1821_v15 }
 0x151   : > { %v1527_v7 = vpop.f32.mrf.mxu2  ;;  %v1887_v54 = vsel %vm1759_vm8, %v1695_v13, %v1823_v26  ;;  %v1888_v61 = vsel %vm1760_vm9, %v1696_v28, %v1824_v30 }
 0x152   : > { %v1623_v11 = vmax.f32 %v8666_v31, %v1527_v7  ;;  %v1432_v27 = vpop.f32.mrf.mxu0  ;;  %v8730_v0 = vpack.c.bf16 %v1887_v54, %v1883_v44  ;;  %v1481_v43 = vpop.f32.mrf.mxu1  ;;  %v8732_v16 = vpack.c.bf16 %v1888_v61, %v1884_v47 }
 0x153   : > { %v1625_v2 = vmax.f32 %v8544_v32, %v1432_v27  ;;  %1578 = vmatmul.bf16.gmra.mxu3 %v8246_v20  ;;  %v1626_v36 = vmax.f32 %v8532_v29, %v1481_v43  ;;  %v7324_v43 = vld [vmem:[#allocation2 + $0xe0] sm:$0xff] }
 0x154   : > { %v1697_v1 = vadd.f32 %v8694_v3, %v1623_v11  ;;  %2240 = vmatmul.bf16.gmra.mxu0 %v8730_v0  ;;  %2289 = vmatmul.bf16.gmra.mxu1 %v8732_v16 }
 0x155   : > { %v1699_v28 = vadd.f32 %v8681_v9, %v1625_v2  ;;  %v1700_v30 = vadd.f32 %v8685_v23, %v1626_v36  ;;  %2377 = vmatpush.bf16.msrb.mxu3 %v7324_v43 }
 0x156   : > { %v1825_v31 = vmul.f32 0.01, %v1697_v1  ;;  %vm1761_vm11 = vcmp.ge.f32.partialorder %v1697_v1, 0.0  ;;  %v8740_v18 = vpop.f32.mrf.mxu3 }
 0x157   : > { %v1827_v50 = vmul.f32 0.01, %v1699_v28  ;;  %vm1763_vm12 = vcmp.ge.f32.partialorder %v1699_v28, 0.0  ;;  %v1828_v54 = vmul.f32 0.01, %v1700_v30  ;;  %vm1764_vm13 = vcmp.ge.f32.partialorder %v1700_v30, 0.0 }
 0x158   : > { %v1889_v13 = vsel %vm1761_vm11, %v1697_v1, %v1825_v31 }
 0x159   : > { %v1530_v26 = vpop.f32.mrf.mxu2  ;;  %v8743_v44 = vpack.c.bf16 %v1889_v13, %v1885_v53  ;;  %v1891_v1 = vsel %vm1763_vm12, %v1699_v28, %v1827_v50  ;;  %v1892_v53 = vsel %vm1764_vm13, %v1700_v30, %v1828_v54 }
 0x15a   : > { %v1434_v32 = vpop.f32.mrf.mxu0  ;;  %v1483_v19 = vpop.f32.mrf.mxu1  ;;  %v1627_v20 = vmax.f32 %v8546_v33, %v1530_v26 }
 0x15b   : > { %v1629_v47 = vmax.f32 %v8552_v34, %v1434_v32  ;;  %2338 = vmatmul.bf16.gmra.mxu2 %v8743_v44  ;;  %v1630_v29 = vmax.f32 %v8550_v25, %v1483_v19 }
 0x15c   : > { %v1701_v27 = vadd.f32 %v8694_v3, %v1627_v20 }
 0x15d   : > { %v1703_v7 = vadd.f32 %v8681_v9, %v1629_v47  ;;  %v1704_v15 = vadd.f32 %v8685_v23, %v1630_v29 }
 0x15e   : > { %v8753_v61 = vpop.f32.mrf.mxu3  ;;  %v1829_v47 = vmul.f32 0.01, %v1701_v27  ;;  %vm1765_vm0 = vcmp.ge.f32.partialorder %v1701_v27, 0.0 }
 0x15f   : > { %v1831_v11 = vmul.f32 0.01, %v1703_v7  ;;  %vm1767_vm14 = vcmp.ge.f32.partialorder %v1703_v7, 0.0  ;;  %v1832_v34 = vmul.f32 0.01, %v1704_v15  ;;  %vm1768_vm15 = vcmp.ge.f32.partialorder %v1704_v15, 0.0 }
 0x160   : > { %v1893_v29 = vsel %vm1765_vm0, %v1701_v27, %v1829_v47 }
 0x161   : > { %v1532_v33 = vpop.f32.mrf.mxu2  ;;  %v1895_v25 = vsel %vm1767_vm14, %v1703_v7, %v1831_v11  ;;  %v1896_v13 = vsel %vm1768_vm15, %v1704_v15, %v1832_v34 }
 0x162   : > { %v1631_v2 = vmax.f32 %v8554_v38, %v1532_v33  ;;  %v1437_v31 = vpop.f32.mrf.mxu0  ;;  %v8756_v36 = vpack.c.bf16 %v1895_v25, %v1891_v1  ;;  %v1486_v26 = vpop.f32.mrf.mxu1  ;;  %v8758_v32 = vpack.c.bf16 %v1896_v13, %v1892_v53  ;;  %v7323_v13 = vld [vmem:[#allocation2 + $0xd8] sm:$0xff] }
 0x163   : > { %v1633_v28 = vmax.f32 %v8570_v62, %v1437_v31  ;;  %1583 = vmatmul.bf16.gmra.mxu3 %v8281_v37  ;;  %v1634_v30 = vmax.f32 %v8558_v40, %v1486_v26 }
 0x164   : > { %v1705_v19 = vadd.f32 %v8694_v3, %v1631_v2  ;;  %2245 = vmatmul.bf16.gmra.mxu0 %v8756_v36  ;;  %2294 = vmatmul.bf16.gmra.mxu1 %v8758_v32 }
 0x165   : > { %v1707_v7 = vadd.f32 %v8681_v9, %v1633_v28  ;;  %v1708_v11 = vadd.f32 %v8685_v23, %v1634_v30  ;;  %2378 = vmatpush.bf16.msrb.mxu3 %v7323_v13 }
 0x166   : > { %v1833_v38 = vmul.f32 0.01, %v1705_v19  ;;  %vm1769_vm1 = vcmp.ge.f32.partialorder %v1705_v19, 0.0  ;;  %v8766_v20 = vpop.f32.mrf.mxu3 }
 0x167   : > { %v1835_v33 = vmul.f32 0.01, %v1707_v7  ;;  %vm1771_vm2 = vcmp.ge.f32.partialorder %v1707_v7, 0.0  ;;  %v1836_v1 = vmul.f32 0.01, %v1708_v11  ;;  %vm1772_vm3 = vcmp.ge.f32.partialorder %v1708_v11, 0.0 }
 0x168   : > { %v1897_v50 = vsel %vm1769_vm1, %v1705_v19, %v1833_v38 }
 0x169   : > { %v1535_v54 = vpop.f32.mrf.mxu2  ;;  %v8769_v15 = vpack.c.bf16 %v1897_v50, %v1893_v29  ;;  %v1899_v26 = vsel %vm1771_vm2, %v1707_v7, %v1835_v33  ;;  %v1900_v38 = vsel %vm1772_vm3, %v1708_v11, %v1836_v1 }
 0x16a   : > { %v1439_v62 = vpop.f32.mrf.mxu0  ;;  %v1488_v43 = vpop.f32.mrf.mxu1  ;;  %v1635_v37 = vmax.f32 %v8572_v46, %v1535_v54 }
 0x16b   : > { %v1637_v34 = vmax.f32 %v8578_v8, %v1439_v62  ;;  %2343 = vmatmul.bf16.gmra.mxu2 %v8769_v15  ;;  %v1638_v40 = vmax.f32 %v8576_v48, %v1488_v43 }
 0x16c   : > { %v1709_v31 = vadd.f32 %v8694_v3, %v1635_v37 }
 0x16d   : > { %v1711_v27 = vadd.f32 %v8681_v9, %v1637_v34  ;;  %v1712_v25 = vadd.f32 %v8685_v23, %v1638_v40 }
 0x16e   : > { %v8779_v53 = vpop.f32.mrf.mxu3  ;;  %v1837_v54 = vmul.f32 0.01, %v1709_v31  ;;  %vm1773_vm6 = vcmp.ge.f32.partialorder %v1709_v31, 0.0 }
 0x16f   : > { %v1839_v2 = vmul.f32 0.01, %v1711_v27  ;;  %vm1775_vm4 = vcmp.ge.f32.partialorder %v1711_v27, 0.0  ;;  %v1840_v8 = vmul.f32 0.01, %v1712_v25  ;;  %vm1776_vm5 = vcmp.ge.f32.partialorder %v1712_v25, 0.0 }
 0x170   : > { %v1901_v43 = vsel %vm1773_vm6, %v1709_v31, %v1837_v54 }
 0x171   : > { %v1537_v46 = vpop.f32.mrf.mxu2  ;;  %v1903_v48 = vsel %vm1775_vm4, %v1711_v27, %v1839_v2  ;;  %v1904_v30 = vsel %vm1776_vm5, %v1712_v25, %v1840_v8 }
 0x172   : > { %v1639_v47 = vmax.f32 %v8580_v49, %v1537_v46  ;;  %v1442_v19 = vpop.f32.mrf.mxu0  ;;  %v8782_v28 = vpack.c.bf16 %v1903_v48, %v1899_v26  ;;  %v1491_v29 = vpop.f32.mrf.mxu1  ;;  %v8784_v50 = vpack.c.bf16 %v1904_v30, %v1900_v38 }
 0x173   : > { %v1641_v7 = vmax.f32 %v8596_v55, %v1442_v19  ;;  %1588 = vmatmul.bf16.gmra.mxu3 %v8304_v45  ;;  %v1642_v11 = vmax.f32 %v8584_v52, %v1491_v29  ;;  %v7322_v19 = vld [vmem:[#allocation2 + $0xd0] sm:$0xff] }
 0x174   : > { %v1713_v62 = vadd.f32 %v8694_v3, %v1639_v47  ;;  %2250 = vmatmul.bf16.gmra.mxu0 %v8782_v28  ;;  %2299 = vmatmul.bf16.gmra.mxu1 %v8784_v50 }
 0x175   : > { %v1715_v40 = vadd.f32 %v8681_v9, %v1641_v7  ;;  %v1716_v1 = vadd.f32 %v8685_v23, %v1642_v11  ;;  %2379 = vmatpush.bf16.msrb.mxu3 %v7322_v19 }
 0x176   : > { %v1841_v49 = vmul.f32 0.01, %v1713_v62  ;;  %vm1777_vm7 = vcmp.ge.f32.partialorder %v1713_v62, 0.0  ;;  %v8792_v34 = vpop.f32.mrf.mxu3 }
 0x177   : > { %v1843_v8 = vmul.f32 0.01, %v1715_v40  ;;  %vm1779_vm8 = vcmp.ge.f32.partialorder %v1715_v40, 0.0  ;;  %v1844_v13 = vmul.f32 0.01, %v1716_v1  ;;  %vm1780_vm9 = vcmp.ge.f32.partialorder %v1716_v1, 0.0 }
 0x178   : > { %v1905_v37 = vsel %vm1777_vm7, %v1713_v62, %v1841_v49 }
 0x179   : > { %v1540_v33 = vpop.f32.mrf.mxu2  ;;  %v8795_v27 = vpack.c.bf16 %v1905_v37, %v1901_v43  ;;  %v1907_v38 = vsel %vm1779_vm8, %v1715_v40, %v1843_v8  ;;  %v1908_v62 = vsel %vm1780_vm9, %v1716_v1, %v1844_v13  ;;  %v7342_v8 = vld [vmem:[#allocation4 + $0x70] sm:$0xff] }
 0x17a   : > { %v1444_v55 = vpop.f32.mrf.mxu0  ;;  %v1493_v2 = vpop.f32.mrf.mxu1  ;;  %v1643_v45 = vmax.f32 %v8598_v56, %v1540_v33  ;;  %v7335_v33 = vld [vmem:[#allocation4 + $0x38] sm:$0xff] }
 0x17b   : > { %v1645_v25 = vmax.f32 %v8604_v59, %v1444_v55  ;;  %2348 = vmatmul.bf16.gmra.mxu2 %v8795_v27  ;;  %v1646_v52 = vmax.f32 %v8602_v58, %v1493_v2  ;;  %v7343_v55 = vld [vmem:[#allocation4 + $0x78] sm:$0xff]  ;;  %2679 = vmatpush.bf16.msrb.mxu0 %v7335_v33  ;;  %v7340_v33 = vld [vmem:[#allocation4 + $0x60] sm:$0xff] }
 0x17c   : > { %v1717_v48 = vadd.f32 %v8694_v3, %v1643_v45  ;;  %2728 = vmatpush.bf16.msrb.mxu1 %v7343_v55 }
 0x17d   : > { %v1719_v31 = vadd.f32 %v8681_v9, %v1645_v25  ;;  %v1720_v46 = vadd.f32 %v8685_v23, %v1646_v52  ;;  %v7334_v52 = vld [vmem:[#allocation4 + $0x30] sm:$0xff] }
 0x17e   : > { %v8805_v47 = vpop.f32.mrf.mxu3  ;;  %v1845_v43 = vmul.f32 0.01, %v1717_v48  ;;  %vm1781_vm12 = vcmp.ge.f32.partialorder %v1717_v48, 0.0 }
 0x17f   : > { %v1847_v26 = vmul.f32 0.01, %v1719_v31  ;;  %vm1783_vm10 = vcmp.ge.f32.partialorder %v1719_v31, 0.0  ;;  %v1848_v59 = vmul.f32 0.01, %v1720_v46  ;;  %vm1784_vm11 = vcmp.ge.f32.partialorder %v1720_v46, 0.0  ;;  %2680 = vmatpush.bf16.msrb.mxu0 %v7334_v52 }
 0x180   : > { %v1909_v2 = vsel %vm1781_vm12, %v1717_v48, %v1845_v43  ;;  %2729 = vmatpush.bf16.msrb.mxu1 %v7342_v8  ;;  %v7321_v43 = vld [vmem:[#allocation2 + $0xc8] sm:$0xff] }
 0x181   : > { %v1542_v56 = vpop.f32.mrf.mxu2  ;;  %v1911_v58 = vsel %vm1783_vm10, %v1719_v31, %v1847_v26  ;;  %v1912_v7 = vsel %vm1784_vm11, %v1720_v46, %v1848_v59  ;;  %2380 = vmatpush.bf16.msrb.mxu3 %v7321_v43 }
 0x182   : > { %v1647_v30 = vmax.f32 %v8606_v60, %v1542_v56  ;;  %v1447_v29 = vpop.f32.mrf.mxu0  ;;  %v8808_v54 = vpack.c.bf16 %v1911_v58, %v1907_v38  ;;  %v1496_v49 = vpop.f32.mrf.mxu1  ;;  %v8810_v11 = vpack.c.bf16 %v1912_v7, %v1908_v62  ;;  %v7333_v56 = vld [vmem:[#allocation4 + $0x28] sm:$0xff] }
 0x183   : > { %v1649_v40 = vmax.f32 %v8622_v5, %v1447_v29  ;;  %v1650_v60 = vmax.f32 %v8610_v63, %v1496_v49  ;;  %1593 = vmatmul.bf16.gmra.mxu3 %v8370_v12  ;;  %v7351_v12 = vld [vmem:[#allocation4 + $0xb8] sm:$0xff]  ;;  %v7341_v38 = vld [vmem:[#allocation4 + $0x68] sm:$0xff]  ;;  %2681 = vmatpush.bf16.msrb.mxu0 %v7333_v56  ;;  %v7348_v56 = vld [vmem:[#allocation4 + $0xa0] sm:$0xff] }
 0x184   : > { %v1721_v37 = vadd.f32 %v8694_v3, %v1647_v30  ;;  %2255 = vmatmul.bf16.gmra.mxu0 %v8808_v54  ;;  %2304 = vmatmul.bf16.gmra.mxu1 %v8810_v11 }
 0x185   : > { %v1723_v31 = vadd.f32 %v8681_v9, %v1649_v40  ;;  %v1724_v5 = vadd.f32 %v8685_v23, %v1650_v60  ;;  %2777 = vmatpush.bf16.msrb.mxu2 %v7351_v12  ;;  %2730 = vmatpush.bf16.msrb.mxu1 %v7341_v38 }
 0x186   : > { %v1849_v1 = vmul.f32 0.01, %v1721_v37  ;;  %vm1785_vm13 = vcmp.ge.f32.partialorder %v1721_v37, 0.0  ;;  %v8818_v25 = vpop.f32.mrf.mxu3 }
 0x187   : > { %v1851_v58 = vmul.f32 0.01, %v1723_v31  ;;  %v1852_v30 = vmul.f32 0.01, %v1724_v5  ;;  %vm1787_vm14 = vcmp.ge.f32.partialorder %v1723_v31, 0.0  ;;  %vm1788_vm15 = vcmp.ge.f32.partialorder %v1724_v5, 0.0 }
 0x188   : > { %v1913_v45 = vsel %vm1785_vm13, %v1721_v37, %v1849_v1  ;;  %v7332_v37 = vld [vmem:[#allocation4 + $0x20] sm:$0xff] }
 0x189   : > { %v1545_v13 = vpop.f32.mrf.mxu2  ;;  %v8822_v63 = vpack.c.bf16 %v1913_v45, %v1909_v2  ;;  %v1915_v40 = vsel %vm1787_vm14, %v1723_v31, %v1851_v58  ;;  %v1916_v1 = vsel %vm1788_vm15, %v1724_v5, %v1852_v30  ;;  %2682 = vmatpush.bf16.msrb.mxu0 %v7332_v37  ;;  %2731 = vmatpush.bf16.msrb.mxu1 %v7340_v33  ;;  %v7331_v31 = vld [vmem:[#allocation4 + $0x18] sm:$0xff] }
 0x18a   : > { %v1449_v46 = vpop.f32.mrf.mxu0  ;;  %v1498_v59 = vpop.f32.mrf.mxu1  ;;  %v1651_v48 = vmax.f32 %v8624_v10, %v1545_v13  ;;  %v7349_v13 = vld [vmem:[#allocation4 + $0xa8] sm:$0xff]  ;;  %v7339_v5 = vld [vmem:[#allocation4 + $0x58] sm:$0xff] }
 0x18b   : > { %v1653_v26 = vmax.f32 %v8630_v21, %v1449_v46  ;;  %2353 = vmatmul.bf16.gmra.mxu2 %v8822_v63  ;;  %v1654_v19 = vmax.f32 %v8628_v35, %v1498_v59  ;;  %v7350_v21 = vld [vmem:[#allocation4 + $0xb0] sm:$0xff] }
 0x18c   : > { %v1725_v10 = vadd.f32 %v8694_v3, %v1651_v48  ;;  %2778 = vmatpush.bf16.msrb.mxu2 %v7350_v21 }
 0x18d   : > { %v1727_v29 = vadd.f32 %v8681_v9, %v1653_v26  ;;  %v1728_v62 = vadd.f32 %v8685_v23, %v1654_v19  ;;  %2683 = vmatpush.bf16.msrb.mxu0 %v7331_v31  ;;  %2732 = vmatpush.bf16.msrb.mxu1 %v7339_v5 }
 0x18e   : > { %v8831_v35 = vpop.f32.mrf.mxu3  ;;  %v1853_v26 = vmul.f32 0.01, %v1725_v10  ;;  %vm1789_vm2 = vcmp.ge.f32.partialorder %v1725_v10, 0.0 }
 0x18f   : > { %v1855_v7 = vmul.f32 0.01, %v1727_v29  ;;  %vm1791_vm0 = vcmp.ge.f32.partialorder %v1727_v29, 0.0  ;;  %v1856_v49 = vmul.f32 0.01, %v1728_v62  ;;  %vm1792_vm1 = vcmp.ge.f32.partialorder %v1728_v62, 0.0 }
 0x190   : > { %2779 = vmatpush.bf16.msrb.mxu2 %v7349_v13  ;;  %v1917_v58 = vsel %vm1789_vm2, %v1725_v10, %v1853_v26  ;;  %v10333_v10 = vld [vmem:[#allocation13_spill] sm:$0xff]  ;;  %v7320_v26 = vld [vmem:[#allocation2 + $0xc0] sm:$0xff] }
 0x191   : > { %v1547_v55 = vpop.f32.mrf.mxu2  ;;  %v1919_v60 = vsel %vm1791_vm0, %v1727_v29, %v1855_v7  ;;  %v1920_v8 = vsel %vm1792_vm1, %v1728_v62, %v1856_v49  ;;  %v7330_v29 = vld [vmem:[#allocation4 + $0x10] sm:$0xff]  ;;  %2381 = vmatpush.bf16.msrb.mxu3 %v7320_v26 }
 0x192   : > { %v1655_v2 = vmax.f32 %v8632_v24, %v1547_v55  ;;  %v1452_v45 = vpop.f32.mrf.mxu0  ;;  %v8836_v52 = vpack.c.bf16 %v1919_v60, %v1915_v40  ;;  %v1501_v46 = vpop.f32.mrf.mxu1  ;;  %v8838_v12 = vpack.c.bf16 %v1920_v8, %v1916_v1  ;;  %v7338_v62 = vld [vmem:[#allocation4 + $0x50] sm:$0xff]  ;;  %2684 = vmatpush.bf16.msrb.mxu0 %v7330_v29  ;;  %v7329_v60 = vld [vmem:[#allocation4 + $0x8] sm:$0xff] }
 0x193   : > { %v1657_v24 = vmax.f32 %v8642_v42, %v1452_v45  ;;  %1598 = vmatmul.bf16.gmra.mxu3 %v8448_v51  ;;  %v1658_v19 = vmax.f32 %v8636_v57, %v1501_v46  ;;  %v7347_v57 = vld [vmem:[#allocation4 + $0x98] sm:$0xff]  ;;  %2733 = vmatpush.bf16.msrb.mxu1 %v7338_v62  ;;  %v10334_v55 = vld [vmem:[#allocation14_spill] sm:$0xff]  ;;  %v7337_v1 = vld [vmem:[#allocation4 + $0x48] sm:$0xff] }
 0x194   : > { %v1729_v59 = vadd.f32 %v8694_v3, %v1655_v2  ;;  %2260 = vmatmul.bf16.gmra.mxu0 %v8836_v52  ;;  %2309 = vmatmul.bf16.gmra.mxu1 %v8838_v12 }
 0x195   : > { %2780 = vmatpush.bf16.msrb.mxu2 %v7348_v56  ;;  %v1731_v42 = vadd.f32 %v8681_v9, %v1657_v24  ;;  %v1732_v51 = vadd.f32 %v8685_v23, %v1658_v19  ;;  %v7328_v24 = vld [vmem:[#allocation4] sm:$0xff] }
 0x196   : > { %v1857_v48 = vmul.f32 0.01, %v1729_v59  ;;  %vm1793_vm3 = vcmp.ge.f32.partialorder %v1729_v59, 0.0  ;;  %v8846_v38 = vpop.f32.mrf.mxu3  ;;  %2685 = vmatpush.bf16.msrb.mxu0 %v7329_v60  ;;  %v10337_v60 = vld [vmem:[#allocation12_spill] sm:$0xff] }
 0x197   : > { %v1859_v2 = vmul.f32 0.01, %v1731_v42  ;;  %vm1795_vm4 = vcmp.ge.f32.partialorder %v1731_v42, 0.0  ;;  %v1860_v8 = vmul.f32 0.01, %v1732_v51  ;;  %vm1796_vm5 = vcmp.ge.f32.partialorder %v1732_v51, 0.0  ;;  %2734 = vmatpush.bf16.msrb.mxu1 %v7337_v1 }
 0x198   : > { %v1921_v30 = vsel %vm1793_vm3, %v1729_v59, %v1857_v48  ;;  %v7336_v48 = vld [vmem:[#allocation4 + $0x40] sm:$0xff] }
 0x199   : > { %v1550_v21 = vpop.f32.mrf.mxu2  ;;  %v8849_v7 = vpack.c.bf16 %v1921_v30, %v1917_v58  ;;  %2781 = vmatpush.bf16.msrb.mxu2 %v7347_v57  ;;  %v1923_v56 = vsel %vm1795_vm4, %v1731_v42, %v1859_v2  ;;  %v10335_v30 = vld [vmem:[#allocation15_spill] sm:$0xff]  ;;  %v10336_v42 = vld [vmem:[#allocation17_spill] sm:$0xff]  ;;  %v10338_v1 = vld [vmem:[#allocation16_spill] sm:$0xff] }
 0x19a   : > { %v1454_v49 = vpop.f32.mrf.mxu0  ;;  %v1503_v37 = vpop.f32.mrf.mxu1  ;;  %v1659_v33 = vmax.f32 %v10333_v10, %v1550_v21  ;;  %2686 = vmatpush.bf16.msrb.mxu0 %v7328_v24 }
 0x19b   : > { %v1661_v43 = vmax.f32 %v8650_v6, %v1454_v49  ;;  %2358 = vmatmul.bf16.gmra.mxu2 %v8849_v7  ;;  %v1662_v40 = vmax.f32 %v10334_v55, %v1503_v37  ;;  %v7346_v6 = vld [vmem:[#allocation4 + $0x90] sm:$0xff]  ;;  %v1924_v49 = vsel %vm1796_vm5, %v1732_v51, %v1860_v8  ;;  %2735 = vmatpush.bf16.msrb.mxu1 %v7336_v48 }
 0x19c   : > { %v1733_v59 = vadd.f32 %v8694_v3, %v1659_v33 }
 0x19d   : > { %v1735_v45 = vadd.f32 %v8681_v9, %v1661_v43  ;;  %v1736_v13 = vadd.f32 %v8685_v23, %v1662_v40  ;;  %2782 = vmatpush.bf16.msrb.mxu2 %v7346_v6  ;;  %v7345_v43 = vld [vmem:[#allocation4 + $0x88] sm:$0xff] }
 0x19e   : > { %v8859_v5 = vpop.f32.mrf.mxu3  ;;  %v1861_v33 = vmul.f32 0.01, %v1733_v59  ;;  %vm1797_vm8 = vcmp.ge.f32.partialorder %v1733_v59, 0.0 }
 0x19f   : > { %v1863_v46 = vmul.f32 0.01, %v1735_v45  ;;  %vm1799_vm6 = vcmp.ge.f32.partialorder %v1735_v45, 0.0  ;;  %v1864_v31 = vmul.f32 0.01, %v1736_v13  ;;  %vm1800_vm7 = vcmp.ge.f32.partialorder %v1736_v13, 0.0 }
 0x1a1   : > { %v1552_v19 = vpop.f32.mrf.mxu2  ;;  %v1927_v58 = vsel %vm1799_vm6, %v1735_v45, %v1863_v46  ;;  %v1928_v57 = vsel %vm1800_vm7, %v1736_v13, %v1864_v31  ;;  %2783 = vmatpush.bf16.msrb.mxu2 %v7345_v43  ;;  %v7344_v45 = vld [vmem:[#allocation4 + $0x80] sm:$0xff]  ;;  %v1925_v13 = vsel %vm1797_vm8, %v1733_v59, %v1861_v33  ;;  %v7359_v43 = vld [vmem:[#allocation4 + $0xf8] sm:$0xff] }
 0x1a2   : > { %v1663_v29 = vmax.f32 %v10335_v30, %v1552_v19  ;;  %v1457_v62 = vpop.f32.mrf.mxu0  ;;  %v8863_v21 = vpack.c.bf16 %v1927_v58, %v1923_v56  ;;  %v1506_v37 = vpop.f32.mrf.mxu1  ;;  %v8866_v10 = vpack.c.bf16 %v1928_v57, %v1924_v49  ;;  %v10339_v19 = vld [vmem:[#allocation20_spill] sm:$0xff]  ;;  %v10340_v30 = vld [vmem:[#allocation18_spill] sm:$0xff]  ;;  %2826 = vmatpush.bf16.msra.mxu3 %v7359_v43 }
 0x1a3   : > { %v1665_v40 = vmax.f32 %v10336_v42, %v1457_v62  ;;  %1603 = vmatmul.bf16.gmra.mxu3 %v10337_v60  ;;  %v1666_v2 = vmax.f32 %v10338_v1, %v1506_v37  ;;  %v10341_v62 = vld [vmem:[#allocation19_spill] sm:$0xff] }
 0x1a4   : > { %v1737_v55 = vadd.f32 %v8694_v3, %v1663_v29  ;;  %2265 = vmatmul.bf16.gmra.mxu0 %v8863_v21  ;;  %2314 = vmatmul.bf16.gmra.mxu1 %v8866_v10 }
 0x1a5   : > { %2784 = vmatpush.bf16.msrb.mxu2 %v7344_v45  ;;  %v1739_v46 = vadd.f32 %v8681_v9, %v1665_v40  ;;  %v1740_v24 = vadd.f32 %v8685_v23, %v1666_v2  ;;  %v10342_v45 = vld [vmem:[#allocation22_spill] sm:$0xff] }
 0x1a6   : > { %v1865_v51 = vmul.f32 0.01, %v1737_v55  ;;  %vm1801_vm9 = vcmp.ge.f32.partialorder %v1737_v55, 0.0  ;;  %v8874_v8 = vpop.f32.mrf.mxu3 }
 0x1a7   : > { %v1867_v59 = vmul.f32 0.01, %v1739_v46  ;;  %vm1803_vm10 = vcmp.ge.f32.partialorder %v1739_v46, 0.0  ;;  %v1868_v37 = vmul.f32 0.01, %v1740_v24  ;;  %vm1804_vm11 = vcmp.ge.f32.partialorder %v1740_v24, 0.0 }
 0x1a8   : > { %v1929_v6 = vsel %vm1801_vm9, %v1737_v55, %v1865_v51 }
 0x1a9   : > { %v1555_v26 = vpop.f32.mrf.mxu2  ;;  %v8877_v31 = vpack.c.bf16 %v1929_v6, %v1925_v13  ;;  %v1931_v1 = vsel %vm1803_vm10, %v1739_v46, %v1867_v59  ;;  %v1932_v6 = vsel %vm1804_vm11, %v1740_v24, %v1868_v37 }
 0x1aa   : > { %v1459_v48 = vpop.f32.mrf.mxu0  ;;  %v1508_v58 = vpop.f32.mrf.mxu1  ;;  %v1667_v29 = vmax.f32 %v10340_v30, %v1555_v26 }
 0x1ab   : > { %v1669_v56 = vmax.f32 %v10339_v19, %v1459_v48  ;;  %2363 = vmatmul.bf16.gmra.mxu2 %v8877_v31  ;;  %v1670_v49 = vmax.f32 %v10341_v62, %v1508_v58  ;;  %v10343_v62 = vld [vmem:[#allocation23_spill] sm:$0xff] }
 0x1ac   : > { %v1741_v42 = vadd.f32 %v8694_v3, %v1667_v29 }
 0x1ad   : > { %v1743_v57 = vadd.f32 %v8681_v9, %v1669_v56  ;;  %v1744_v33 = vadd.f32 %v8685_v23, %v1670_v49  ;;  %v10344_v49 = vld [vmem:[#allocation21_spill] sm:$0xff] }
 0x1ae   : > { %v8887_v60 = vpop.f32.mrf.mxu3  ;;  %v1869_v48 = vmul.f32 0.01, %v1741_v42  ;;  %vm1805_vm14 = vcmp.ge.f32.partialorder %v1741_v42, 0.0  ;;  %v8901_v59 = vperm.slane %v10344_v49, 3 }
 0x1af   : > { %v1871_v55 = vmul.f32 0.01, %v1743_v57  ;;  %vm1807_vm12 = vcmp.ge.f32.partialorder %v1743_v57, 0.0  ;;  %v1872_v40 = vmul.f32 0.01, %v1744_v33  ;;  %vm1808_vm13 = vcmp.ge.f32.partialorder %v1744_v33, 0.0 }
 0x1b0   : > { %v1933_v58 = vsel %vm1805_vm14, %v1741_v42, %v1869_v48 }
 0x1b1   : > { %v1557_v51 = vpop.f32.mrf.mxu2  ;;  %v1935_v2 = vsel %vm1807_vm12, %v1743_v57, %v1871_v55  ;;  %v1936_v26 = vsel %vm1808_vm13, %v1744_v33, %v1872_v40 }
 0x1b2   : > { %v1671_v9 = vmax.f32 %v10342_v45, %v1557_v51  ;;  %v8890_v13 = vpack.c.bf16 %v1935_v2, %v1931_v1  ;;  %v8892_v23 = vpack.c.bf16 %v1936_v26, %v1932_v6 }
 0x1b4   : > { %v1745_v19 = vadd.f32 %v8694_v3, %v1671_v9  ;;  %2270 = vmatmul.bf16.gmra.mxu0 %v8890_v13  ;;  %2319 = vmatmul.bf16.gmra.mxu1 %v8892_v23  ;;  %v7358_v3 = vld [vmem:[#allocation4 + $0xf0] sm:$0xff] }
 0x1b5   : > { %2827 = vmatpush.bf16.msra.mxu3 %v7358_v3 }
 0x1b6   : > { %v1873_v56 = vmul.f32 0.01, %v1745_v19  ;;  %vm1809_vm15 = vcmp.ge.f32.partialorder %v1745_v19, 0.0  ;;  %v1569_v46 = vpop.f32.mrf.mxu3 }
 0x1b7   : > { %v1612_v24 = vmax.f32 %v10343_v62, %v1569_v46 }
 0x1b8   : > { %v1937_v30 = vsel %vm1809_vm15, %v1745_v19, %v1873_v56  ;;  %v7357_v56 = vld [vmem:[#allocation4 + $0xe8] sm:$0xff] }
 0x1b9   : > { %v8897_v29 = vpack.c.bf16 %v1937_v30, %v1933_v58  ;;  %v1686_v57 = vadd.f32 %v8901_v59, %v1612_v24  ;;  %2828 = vmatpush.bf16.msra.mxu3 %v7357_v56 }
 0x1bb   : > { %2368 = vmatmul.bf16.gmra.mxu2 %v8897_v29  ;;  %v1814_v42 = vmul.f32 0.01, %v1686_v57  ;;  %vm1750_vm0 = vcmp.ge.f32.partialorder %v1686_v57, 0.0 }
 0x1bd   : > { %v1878_v2 = vsel %vm1750_vm0, %v1686_v57, %v1814_v42 }
 0x1be   : > { %v1571_v43 = vpop.f32.mrf.mxu3 }
 0x1bf   : > { %v1616_v37 = vmax.f32 %v8701_v14, %v1571_v43 }
 0x1c1   : > { %v2236_v33 = vpop.f32.mrf.mxu0  ;;  %v2285_v55 = vpop.f32.mrf.mxu1  ;;  %v1690_v40 = vadd.f32 %v8901_v59, %v1616_v37 }
 0x1c2   : > { %v2286_v51 = vadd.f32 %v2285_v55, %v2236_v33 }
 0x1c3   : > { %vm1754_vm1 = vcmp.ge.f32.partialorder %v1690_v40, 0.0  ;;  %v1818_v1 = vmul.f32 0.01, %v1690_v40 }
 0x1c4   : > { %2687 = vmatmul.bf16.vlgmr.msrb.gmra.mxu0 %v8703_v17  ;;  %2736 = vmatmul.bf16.vlgmr.msrb.gmra.mxu1 %v8706_v22 }
 0x1c5   : > { %v1882_v45 = vsel %vm1754_vm1, %v1690_v40, %v1818_v1 }
 0x1c6   : > { %v8909_v9 = vpack.c.bf16 %v1882_v45, %v1878_v2  ;;  %v1574_v6 = vpop.f32.mrf.mxu3 }
 0x1c7   : > { %v1620_v48 = vmax.f32 %v8716_v39, %v1574_v6 }
 0x1c8   : > { %2382 = vmatmul.bf16.vlgmr.msrb.gmra.mxu3 %v8909_v9 }
 0x1c9   : > { %v2238_v26 = vpop.f32.mrf.mxu0  ;;  %v2287_v14 = vpop.f32.mrf.mxu1  ;;  %v1694_v46 = vadd.f32 %v8901_v59, %v1620_v48 }
 0x1ca   : > { %v2288_v19 = vadd.f32 %v2287_v14, %v2238_v26 }
 0x1cb   : > { %2785 = vmatmul.bf16.vlgmr.msrb.gmra.mxu2 %v8718_v4  ;;  %v1822_v49 = vmul.f32 0.01, %v1694_v46  ;;  %vm1758_vm2 = vcmp.ge.f32.partialorder %v1694_v46, 0.0 }
 0x1cd   : > { %v1886_v37 = vsel %vm1758_vm2, %v1694_v46, %v1822_v49 }
 0x1ce   : > { %v2334_v17 = vpop.f32.mrf.mxu2  ;;  %v1576_v22 = vpop.f32.mrf.mxu3 }
 0x1cf   : > { %v8915_v58 = vadd.f32 %v2334_v17, %v2286_v51  ;;  %v1624_v30 = vmax.f32 %v8727_v41, %v1576_v22 }
 0x1d1   : > { %v2241_v62 = vpop.f32.mrf.mxu0  ;;  %v2290_v24 = vpop.f32.mrf.mxu1  ;;  %v1698_v3 = vadd.f32 %v8901_v59, %v1624_v30 }
 0x1d2   : > { %v2291_v57 = vadd.f32 %v2290_v24, %v2241_v62 }
 0x1d3   : > { %v1826_v39 = vmul.f32 0.01, %v1698_v3  ;;  %vm1762_vm3 = vcmp.ge.f32.partialorder %v1698_v3, 0.0 }
 0x1d4   : > { %2692 = vmatmul.bf16.gmra.mxu0 %v8730_v0  ;;  %2741 = vmatmul.bf16.gmra.mxu1 %v8732_v16  ;;  %v7356_v0 = vld [vmem:[#allocation4 + $0xe0] sm:$0xff] }
 0x1d5   : > { %v1890_v33 = vsel %vm1762_vm3, %v1698_v3, %v1826_v39  ;;  %2829 = vmatpush.bf16.msra.mxu3 %v7356_v0 }
 0x1d6   : > { %v2336_v4 = vpop.f32.mrf.mxu2  ;;  %v1579_v55 = vpop.f32.mrf.mxu3  ;;  %v8923_v41 = vpack.c.bf16 %v1890_v33, %v1886_v37 }
 0x1d7   : > { %v8921_v43 = vadd.f32 %v2336_v4, %v2288_v19  ;;  %v1628_v51 = vmax.f32 %v8740_v18, %v1579_v55 }
 0x1d8   : > { %2387 = vmatmul.bf16.gmra.mxu3 %v8923_v41 }
 0x1d9   : > { %v2243_v42 = vpop.f32.mrf.mxu0  ;;  %v2292_v40 = vpop.f32.mrf.mxu1  ;;  %v1702_v2 = vadd.f32 %v8901_v59, %v1628_v51 }
 0x1da   : > { %v2293_v1 = vadd.f32 %v2292_v40, %v2243_v42 }
 0x1db   : > { %2790 = vmatmul.bf16.gmra.mxu2 %v8743_v44  ;;  %v1830_v19 = vmul.f32 0.01, %v1702_v2  ;;  %vm1766_vm4 = vcmp.ge.f32.partialorder %v1702_v2, 0.0 }
 0x1dd   : > { %v1894_v22 = vsel %vm1766_vm4, %v1702_v2, %v1830_v19 }
 0x1de   : > { %v2339_v16 = vpop.f32.mrf.mxu2  ;;  %v1581_v6 = vpop.f32.mrf.mxu3 }
 0x1df   : > { %v8929_v45 = vadd.f32 %v2339_v16, %v2291_v57  ;;  %v1632_v26 = vmax.f32 %v8753_v61, %v1581_v6 }
 0x1e1   : > { %v2246_v14 = vpop.f32.mrf.mxu0  ;;  %v2295_v48 = vpop.f32.mrf.mxu1  ;;  %v1706_v56 = vadd.f32 %v8901_v59, %v1632_v26 }
 0x1e2   : > { %v2296_v17 = vadd.f32 %v2295_v48, %v2246_v14 }
 0x1e3   : > { %v1834_v18 = vmul.f32 0.01, %v1706_v56  ;;  %vm1770_vm5 = vcmp.ge.f32.partialorder %v1706_v56, 0.0 }
 0x1e4   : > { %2697 = vmatmul.bf16.gmra.mxu0 %v8756_v36  ;;  %2746 = vmatmul.bf16.gmra.mxu1 %v8758_v32  ;;  %v7355_v36 = vld [vmem:[#allocation4 + $0xd8] sm:$0xff] }
 0x1e5   : > { %v1898_v30 = vsel %vm1770_vm5, %v1706_v56, %v1834_v18  ;;  %2830 = vmatpush.bf16.msra.mxu3 %v7355_v36 }
 0x1e6   : > { %v2341_v44 = vpop.f32.mrf.mxu2  ;;  %v1584_v62 = vpop.f32.mrf.mxu3  ;;  %v8937_v61 = vpack.c.bf16 %v1898_v30, %v1894_v22 }
 0x1e7   : > { %v8935_v46 = vadd.f32 %v2341_v44, %v2293_v1  ;;  %v1636_v3 = vmax.f32 %v8766_v20, %v1584_v62 }
 0x1e8   : > { %2392 = vmatmul.bf16.gmra.mxu3 %v8937_v61 }
 0x1e9   : > { %v2248_v24 = vpop.f32.mrf.mxu0  ;;  %v2297_v49 = vpop.f32.mrf.mxu1  ;;  %v1710_v39 = vadd.f32 %v8901_v59, %v1636_v3 }
 0x1ea   : > { %v2298_v57 = vadd.f32 %v2297_v49, %v2248_v24 }
 0x1eb   : > { %2795 = vmatmul.bf16.gmra.mxu2 %v8769_v15  ;;  %v1838_v40 = vmul.f32 0.01, %v1710_v39  ;;  %vm1774_vm6 = vcmp.ge.f32.partialorder %v1710_v39, 0.0 }
 0x1ed   : > { %v1902_v16 = vsel %vm1774_vm6, %v1710_v39, %v1838_v40 }
 0x1ee   : > { %v2344_v32 = vpop.f32.mrf.mxu2  ;;  %v1586_v37 = vpop.f32.mrf.mxu3 }
 0x1ef   : > { %v8943_v4 = vadd.f32 %v2344_v32, %v2296_v17  ;;  %v1640_v33 = vmax.f32 %v8779_v53, %v1586_v37 }
 0x1f1   : > { %v2251_v55 = vpop.f32.mrf.mxu0  ;;  %v2300_v42 = vpop.f32.mrf.mxu1  ;;  %v1714_v51 = vadd.f32 %v8901_v59, %v1640_v33 }
 0x1f2   : > { %v2301_v1 = vadd.f32 %v2300_v42, %v2251_v55 }
 0x1f3   : > { %v1842_v20 = vmul.f32 0.01, %v1714_v51  ;;  %vm1778_vm7 = vcmp.ge.f32.partialorder %v1714_v51, 0.0 }
 0x1f4   : > { %2702 = vmatmul.bf16.gmra.mxu0 %v8782_v28  ;;  %2751 = vmatmul.bf16.gmra.mxu1 %v8784_v50  ;;  %v7354_v28 = vld [vmem:[#allocation4 + $0xd0] sm:$0xff] }
 0x1f5   : > { %v1906_v2 = vsel %vm1778_vm7, %v1714_v51, %v1842_v20  ;;  %2831 = vmatpush.bf16.msra.mxu3 %v7354_v28 }
 0x1f6   : > { %v2346_v15 = vpop.f32.mrf.mxu2  ;;  %v1589_v6 = vpop.f32.mrf.mxu3  ;;  %v8951_v53 = vpack.c.bf16 %v1906_v2, %v1902_v16 }
 0x1f7   : > { %v8949_v0 = vadd.f32 %v2346_v15, %v2298_v57  ;;  %v1644_v48 = vmax.f32 %v8792_v34, %v1589_v6 }
 0x1f8   : > { %2397 = vmatmul.bf16.gmra.mxu3 %v8951_v53 }
 0x1f9   : > { %v2253_v26 = vpop.f32.mrf.mxu0  ;;  %v2302_v14 = vpop.f32.mrf.mxu1  ;;  %v1718_v56 = vadd.f32 %v8901_v59, %v1644_v48 }
 0x1fa   : > { %v2303_v19 = vadd.f32 %v2302_v14, %v2253_v26 }
 0x1fb   : > { %2800 = vmatmul.bf16.gmra.mxu2 %v8795_v27  ;;  %v1846_v62 = vmul.f32 0.01, %v1718_v56  ;;  %vm1782_vm8 = vcmp.ge.f32.partialorder %v1718_v56, 0.0 }
 0x1fd   : > { %v1910_v57 = vsel %vm1782_vm8, %v1718_v56, %v1846_v62 }
 0x1fe   : > { %v2349_v50 = vpop.f32.mrf.mxu2  ;;  %v1591_v18 = vpop.f32.mrf.mxu3 }
 0x1ff   : > { %v8957_v17 = vadd.f32 %v2349_v50, %v2301_v1  ;;  %v1648_v44 = vmax.f32 %v8805_v47, %v1591_v18 }
 0x201   : > { %v2256_v22 = vpop.f32.mrf.mxu0  ;;  %v2305_v30 = vpop.f32.mrf.mxu1  ;;  %v1722_v24 = vadd.f32 %v8901_v59, %v1648_v44 }
 0x202   : > { %v2306_v49 = vadd.f32 %v2305_v30, %v2256_v22 }
 0x203   : > { %v1850_v34 = vmul.f32 0.01, %v1722_v24  ;;  %vm1786_vm9 = vcmp.ge.f32.partialorder %v1722_v24, 0.0 }
 0x204   : > { %2707 = vmatmul.bf16.gmra.mxu0 %v8808_v54  ;;  %2756 = vmatmul.bf16.gmra.mxu1 %v8810_v11  ;;  %v7353_v11 = vld [vmem:[#allocation4 + $0xc8] sm:$0xff] }
 0x205   : > { %v1914_v36 = vsel %vm1786_vm9, %v1722_v24, %v1850_v34  ;;  %2832 = vmatpush.bf16.msra.mxu3 %v7353_v11 }
 0x206   : > { %v2351_v27 = vpop.f32.mrf.mxu2  ;;  %v1594_v32 = vpop.f32.mrf.mxu3  ;;  %v8965_v47 = vpack.c.bf16 %v1914_v36, %v1910_v57 }
 0x207   : > { %v8963_v3 = vadd.f32 %v2351_v27, %v2303_v19  ;;  %v1652_v54 = vmax.f32 %v8818_v25, %v1594_v32 }
 0x208   : > { %2402 = vmatmul.bf16.gmra.mxu3 %v8965_v47 }
 0x209   : > { %v8967_v39 = vpop.f32.mrf.mxu0  ;;  %v8969_v37 = vpop.f32.mrf.mxu1  ;;  %v1726_v55 = vadd.f32 %v8901_v59, %v1652_v54 }
 0x20b   : > { %2805 = vmatmul.bf16.gmra.mxu2 %v8822_v63  ;;  %v1854_v15 = vmul.f32 0.01, %v1726_v55  ;;  %vm1790_vm10 = vcmp.ge.f32.partialorder %v1726_v55, 0.0 }
 0x20d   : > { %v1918_v6 = vsel %vm1790_vm10, %v1726_v55, %v1854_v15 }
 0x20e   : > { %v2354_v33 = vpop.f32.mrf.mxu2  ;;  %v1596_v40 = vpop.f32.mrf.mxu3 }
 0x20f   : > { %v8975_v42 = vadd.f32 %v2354_v33, %v2306_v49  ;;  %v1656_v51 = vmax.f32 %v8831_v35, %v1596_v40 }
 0x211   : > { %v2261_v1 = vpop.f32.mrf.mxu0  ;;  %v2310_v20 = vpop.f32.mrf.mxu1  ;;  %v1730_v16 = vadd.f32 %v8901_v59, %v1656_v51 }
 0x212   : > { %v2311_v2 = vadd.f32 %v2310_v20, %v2261_v1 }
 0x213   : > { %v1858_v25 = vmul.f32 0.01, %v1730_v16  ;;  %vm1794_vm11 = vcmp.ge.f32.partialorder %v1730_v16, 0.0 }
 0x214   : > { %2712 = vmatmul.bf16.gmra.mxu0 %v8836_v52  ;;  %2761 = vmatmul.bf16.gmra.mxu1 %v8838_v12  ;;  %v7352_v52 = vld [vmem:[#allocation4 + $0xc0] sm:$0xff] }
 0x215   : > { %v1922_v26 = vsel %vm1794_vm11, %v1730_v16, %v1858_v25  ;;  %2833 = vmatpush.bf16.msra.mxu3 %v7352_v52 }
 0x216   : > { %v8981_v63 = vpop.f32.mrf.mxu2  ;;  %v1599_v14 = vpop.f32.mrf.mxu3  ;;  %v8983_v48 = vpack.c.bf16 %v1922_v26, %v1918_v6 }
 0x217   : > { %v1660_v28 = vmax.f32 %v8846_v38, %v1599_v14  ;;  %v7374_v14 = vld [vmem:[%s10346_s30 + $0x30] sm:$0xff] }
 0x218   : > { %2407 = vmatmul.bf16.gmra.mxu3 %v8983_v48 }
 0x219   : > { %v8985_v35 = vpop.f32.mrf.mxu0  ;;  %v8987_v19 = vpop.f32.mrf.mxu1  ;;  %v1734_v50 = vadd.f32 %v8901_v59, %v1660_v28 }
 0x21b   : > { %2810 = vmatmul.bf16.gmra.mxu2 %v8849_v7  ;;  %v1862_v62 = vmul.f32 0.01, %v1734_v50  ;;  %vm1798_vm12 = vcmp.ge.f32.partialorder %v1734_v50, 0.0 }
 0x21d   : > { %v1926_v34 = vsel %vm1798_vm12, %v1734_v50, %v1862_v62  ;;  %v7373_v50 = vld [vmem:[%s10346_s30 + $0x28] sm:$0xff]  ;;  %v7363_v62 = vld [vmem:[%s10345_s27 + $0x18] sm:$0xff] }
 0x21e   : > { %v2359_v12 = vpop.f32.mrf.mxu2  ;;  %v1601_v18 = vpop.f32.mrf.mxu3 }
 0x21f   : > { %v8993_v56 = vadd.f32 %v2359_v12, %v2311_v2  ;;  %v1664_v44 = vmax.f32 %v8859_v5, %v1601_v18  ;;  %v7365_v12 = vld [vmem:[%s10345_s27 + $0x28] sm:$0xff] }
 0x221   : > { %v2266_v22 = vpop.f32.mrf.mxu0  ;;  %v2315_v30 = vpop.f32.mrf.mxu1  ;;  %v1738_v24 = vadd.f32 %v8901_v59, %v1664_v44  ;;  %v7364_v44 = vld [vmem:[%s10345_s27 + $0x20] sm:$0xff] }
 0x222   : > { %v2316_v49 = vadd.f32 %v2315_v30, %v2266_v22  ;;  %v7372_v22 = vld [vmem:[%s10346_s30 + $0x20] sm:$0xff] }
 0x223   : > { %v1866_v38 = vmul.f32 0.01, %v1738_v24  ;;  %vm1802_vm13 = vcmp.ge.f32.partialorder %v1738_v24, 0.0 }
 0x224   : > { %2717 = vmatmul.bf16.gmra.mxu0 %v8863_v21  ;;  %2766 = vmatmul.bf16.gmra.mxu1 %v8866_v10 }
 0x225   : > { %v1930_v27 = vsel %vm1802_vm13, %v1738_v24, %v1866_v38  ;;  %v7371_v24 = vld [vmem:[%s10346_s30 + $0x18] sm:$0xff]  ;;  %v7362_v38 = vld [vmem:[%s10345_s27 + $0x10] sm:$0xff] }
 0x226   : > { %v8999_v7 = vpop.f32.mrf.mxu2  ;;  %v1604_v57 = vpop.f32.mrf.mxu3  ;;  %v9001_v36 = vpack.c.bf16 %v1930_v27, %v1926_v34  ;;  %v7370_v34 = vld [vmem:[%s10346_s30 + $0x10] sm:$0xff] }
 0x227   : > { %v1668_v54 = vmax.f32 %v8874_v8, %v1604_v57 }
 0x228   : > { %2412 = vmatmul.bf16.gmra.mxu3 %v9001_v36 }
 0x229   : > { %v9003_v5 = vpop.f32.mrf.mxu0  ;;  %v9005_v32 = vpop.f32.mrf.mxu1  ;;  %v1742_v10 = vadd.f32 %v8901_v59, %v1668_v54  ;;  %v7361_v54 = vld [vmem:[%s10345_s27 + $0x8] sm:$0xff] }
 0x22b   : > { %2815 = vmatmul.bf16.gmra.mxu2 %v8877_v31  ;;  %v1870_v1 = vmul.f32 0.01, %v1742_v10  ;;  %vm1806_vm14 = vcmp.ge.f32.partialorder %v1742_v10, 0.0 }
 0x22d   : > { %v1934_v16 = vsel %vm1806_vm14, %v1742_v10, %v1870_v1 }
 0x22e   : > { %v2364_v21 = vpop.f32.mrf.mxu2  ;;  %v1606_v33 = vpop.f32.mrf.mxu3 }
 0x22f   : > { %v9011_v11 = vadd.f32 %v2364_v21, %v2316_v49  ;;  %v1672_v55 = vmax.f32 %v8887_v60, %v1606_v33  ;;  %v7369_v21 = vld [vmem:[%s10346_s30 + $0x8] sm:$0xff] }
 0x231   : > { %v2271_v40 = vpop.f32.mrf.mxu0  ;;  %v2320_v51 = vpop.f32.mrf.mxu1  ;;  %v1746_v20 = vadd.f32 %v8901_v59, %v1672_v55 }
 0x232   : > { %v2321_v15 = vadd.f32 %v2320_v51, %v2271_v40 }
 0x233   : > { %v1874_v8 = vmul.f32 0.01, %v1746_v20  ;;  %vm1810_vm15 = vcmp.ge.f32.partialorder %v1746_v20, 0.0 }
 0x234   : > { %2722 = vmatmul.bf16.gmra.mxu0 %v8890_v13  ;;  %2771 = vmatmul.bf16.gmra.mxu1 %v8892_v23  ;;  %v7367_v13 = vld [vmem:[%s10345_s27 + $0x38] sm:$0xff] }
 0x235   : > { %v1938_v2 = vsel %vm1810_vm15, %v1746_v20, %v1874_v8  ;;  %v7375_v23 = vld [vmem:[%s10346_s30 + $0x38] sm:$0xff]  ;;  %3031 = vmatpush.bf16.msra.mxu0 %v7367_v13 }
 0x236   : > { %v9017_v31 = vpop.f32.mrf.mxu2  ;;  %v9019_v25 = vpack.c.bf16 %v1938_v2, %v1934_v16  ;;  %3144 = vmatpush.bf16.msra.mxu1 %v7375_v23  ;;  %v7360_v16 = vld [vmem:[%s10345_s27] sm:$0xff] }
 0x237   : > { %v7368_v2 = vld [vmem:[%s10346_s30] sm:$0xff] }
 0x238   : > { %2417 = vmatmul.bf16.gmra.mxu3 %v9019_v25 }
 0x239   : > { %v9101_v57 = vpop.f32.mrf.mxu1 }
 0x23a   : > { %3145 = vmatpush.bf16.msra.mxu1 %v7374_v14 }
 0x23b   : > { %2820 = vmatmul.bf16.gmra.mxu2 %v8897_v29  ;;  %v7366_v29 = vld [vmem:[%s10345_s27 + $0x30] sm:$0xff] }
 0x23c   : > { %3032 = vmatpush.bf16.msra.mxu0 %v7366_v29 }
 0x23e   : > { %v2369_v60 = vpop.f32.mrf.mxu2  ;;  %3146 = vmatpush.bf16.msra.mxu1 %v7373_v50 }
 0x23f   : > { %v9023_v59 = vadd.f32 %v2369_v60, %v2321_v15 }
 0x240   : > { %3033 = vmatpush.bf16.msra.mxu0 %v7365_v12 }
 0x241   : > { %v2737_v55 = vpop.f32.mrf.mxu1 }
 0x242   : > { %3147 = vmatpush.bf16.msra.mxu1 %v7372_v22 }
 0x244   : > { %3034 = vmatpush.bf16.msra.mxu0 %v7364_v44 }
 0x246   : > { %3148 = vmatpush.bf16.msra.mxu1 %v7371_v24  ;;  %v9109_v10 = vpop.f32.mrf.mxu2 }
 0x248   : > { %2834 = vmatmul.bf16.vlgmr.msra.gmra.mxu3 %v8909_v9  ;;  %3035 = vmatpush.bf16.msra.mxu0 %v7363_v62  ;;  %v7377_v62 = vld [vmem:[%s10244_s10 + $0x8] sm:$0xff] }
 0x249   : > { %v2739_v20 = vpop.f32.mrf.mxu1  ;;  %3336 = vmatpush.bf16.msra.mxu2 %v7377_v62 }
 0x24a   : > { %3149 = vmatpush.bf16.msra.mxu1 %v7370_v34 }
 0x24b   : > { %v2383_v6 = vpop.f32.mrf.mxu3 }
 0x24c   : > { %v9033_v26 = vadd.f32 %v2383_v6, %v8915_v58  ;;  %3036 = vmatpush.bf16.msra.mxu0 %v7362_v38 }
 0x24e   : > { %3150 = vmatpush.bf16.msra.mxu1 %v7369_v21 }
 0x250   : > { %3037 = vmatpush.bf16.msra.mxu0 %v7361_v54 }
 0x252   : > { %3151 = vmatpush.bf16.msra.mxu1 %v7368_v2 }
 0x253   : > { %v2385_v28 = vpop.f32.mrf.mxu3 }
 0x254   : > { %v9042_v52 = vadd.f32 %v2385_v28, %v8921_v43  ;;  %3038 = vmatpush.bf16.msra.mxu0 %v7360_v16 }
 0x258   : > { %2839 = vmatmul.bf16.gmra.mxu3 %v8923_v41 }
 0x25b   : > { %v2388_v9 = vpop.f32.mrf.mxu3 }
 0x25c   : > { %v9046_v58 = vadd.f32 %v2388_v9, %v8929_v45 }
 0x263   : > { %v2390_v18 = vpop.f32.mrf.mxu3 }
 0x264   : > { %v9055_v43 = vadd.f32 %v2390_v18, %v8935_v46 }
 0x268   : > { %2844 = vmatmul.bf16.gmra.mxu3 %v8937_v61 }
 0x26b   : > { %v2393_v41 = vpop.f32.mrf.mxu3 }
 0x26c   : > { %v9059_v45 = vadd.f32 %v2393_v41, %v8943_v4 }
 0x273   : > { %v2395_v30 = vpop.f32.mrf.mxu3 }
 0x274   : > { %v9068_v46 = vadd.f32 %v2395_v30, %v8949_v0 }
 0x278   : > { %2849 = vmatmul.bf16.gmra.mxu3 %v8951_v53 }
 0x27b   : > { %v2398_v61 = vpop.f32.mrf.mxu3 }
 0x27c   : > { %v9072_v4 = vadd.f32 %v2398_v61, %v8957_v17 }
 0x283   : > { %v2400_v49 = vpop.f32.mrf.mxu3 }
 0x284   : > { %v9081_v0 = vadd.f32 %v2400_v49, %v8963_v3 }
 0x288   : > { %2854 = vmatmul.bf16.gmra.mxu3 %v8965_v47  ;;  %v9096_v47 = vpop.f32.mrf.mxu0 }
 0x28b   : > { %v2403_v53 = vpop.f32.mrf.mxu3 }
 0x28c   : > { %v9085_v17 = vadd.f32 %v2403_v53, %v8975_v42 }
 0x290   : > { %v2688_v33 = vpop.f32.mrf.mxu0 }
 0x291   : > { %v2738_v9 = vadd.f32 %v2737_v55, %v2688_v33 }
 0x293   : > { %v9093_v27 = vpop.f32.mrf.mxu3 }
 0x298   : > { %2859 = vmatmul.bf16.gmra.mxu3 %v8983_v48  ;;  %v2690_v1 = vpop.f32.mrf.mxu0 }
 0x299   : > { %v2740_v22 = vadd.f32 %v2739_v20, %v2690_v1 }
 0x29b   : > { %v2408_v3 = vpop.f32.mrf.mxu3 }
 0x29c   : > { %v9099_v42 = vadd.f32 %v2408_v3, %v8993_v56  ;;  %v2786_v56 = vpop.f32.mrf.mxu2 }
 0x29d   : > { %v2787_v12 = vadd.f32 %v2786_v56, %v2738_v9 }
 0x2a3   : > { %v9111_v48 = vpop.f32.mrf.mxu3 }
 0x2a4   : > { %v2788_v15 = vpop.f32.mrf.mxu2 }
 0x2a5   : > { %v2789_v61 = vadd.f32 %v2788_v15, %v2740_v22 }
 0x2a8   : > { %2864 = vmatmul.bf16.gmra.mxu3 %v9001_v36  ;;  %v2693_v36 = vpop.f32.mrf.mxu0 }
 0x2ab   : > { %v2413_v40 = vpop.f32.mrf.mxu3 }
 0x2ac   : > { %v9115_v51 = vadd.f32 %v2413_v40, %v9011_v11  ;;  %v2742_v11 = vpop.f32.mrf.mxu1  ;;  %v2791_v23 = vpop.f32.mrf.mxu2 }
 0x2ad   : > { %v2743_v34 = vadd.f32 %v2742_v11, %v2693_v36 }
 0x2af   : > { %v2792_v33 = vadd.f32 %v2791_v23, %v2743_v34 }
 0x2b0   : > { %v2695_v29 = vpop.f32.mrf.mxu0 }
 0x2b3   : > { %v9117_v8 = vpop.f32.mrf.mxu3 }
 0x2b4   : > { %v2744_v14 = vpop.f32.mrf.mxu1  ;;  %v2793_v28 = vpop.f32.mrf.mxu2 }
 0x2b5   : > { %v2745_v2 = vadd.f32 %v2744_v14, %v2695_v29 }
 0x2b7   : > { %v2794_v36 = vadd.f32 %v2793_v28, %v2745_v2 }
 0x2b8   : > { %2869 = vmatmul.bf16.gmra.mxu3 %v9019_v25  ;;  %v2698_v41 = vpop.f32.mrf.mxu0 }
 0x2bb   : > { %v2418_v60 = vpop.f32.mrf.mxu3 }
 0x2bc   : > { %v9127_v13 = vadd.f32 %v2418_v60, %v9023_v59  ;;  %v2747_v44 = vpop.f32.mrf.mxu1  ;;  %v9135_v59 = vld [vmem:[%s10347_s19] ss:$0 sm:$0xff]  ;;  %v2796_v30 = vpop.f32.mrf.mxu2  ;;  %s7846_s19 = smov 64  }
 0x2bd   : > { %v2748_v22 = vadd.f32 %v2747_v44, %v2698_v41 }
 0x2bf   : > { %v2797_v62 = vadd.f32 %v2796_v30, %v2748_v22 }
 0x2c3   : > { %v9129_v6 = vpop.f32.mrf.mxu3 }
 0x2c4   : > { %v2749_v21 = vpop.f32.mrf.mxu1  ;;  %v2798_v56 = vpop.f32.mrf.mxu2 }
 0x2cb   : > { %v2835_v50 = vpop.f32.mrf.mxu3 }
 0x2cc   : > { %v2836_v18 = vadd.f32 %v2835_v50, %v2787_v12  ;;  %v2752_v60 = vpop.f32.mrf.mxu1  ;;  %v2801_v50 = vpop.f32.mrf.mxu2 }
 0x2ce   : > { %v2875_v25 = vmax.f32 %v9033_v26, %v2836_v18  ;;  %v2700_v26 = vpop.f32.mrf.mxu0 }
 0x2d0   : > { %v2895_v49 = vadd.f32 %v9135_v59, %v2875_v25 }
 0x2d2   : > { %v2927_v3 = vmul.f32 0.01, %v2895_v49  ;;  %vm2911_vm0 = vcmp.ge.f32.partialorder %v2895_v49, 0.0 }
 0x2d3   : > { %v2837_v24 = vpop.f32.mrf.mxu3 }
 0x2d4   : > { %v2838_v53 = vadd.f32 %v2837_v24, %v2789_v61  ;;  %v2943_v1 = vsel %vm2911_vm0, %v2895_v49, %v2927_v3  ;;  %v2803_v34 = vpop.f32.mrf.mxu2  ;;  %v2750_v3 = vadd.f32 %v2749_v21, %v2700_v26 }
 0x2d6   : > { %v2876_v38 = vmax.f32 %v9042_v52, %v2838_v53  ;;  %v2703_v11 = vpop.f32.mrf.mxu0  ;;  %v2754_v53 = vpop.f32.mrf.mxu1  ;;  %v2799_v41 = vadd.f32 %v2798_v56, %v2750_v3 }
 0x2d8   : > { %v2896_v54 = vadd.f32 %v9135_v59, %v2876_v38 }
 0x2da   : > { %vm2912_vm1 = vcmp.ge.f32.partialorder %v2896_v54, 0.0  ;;  %v2928_v55 = vmul.f32 0.01, %v2896_v54 }
 0x2db   : > { %v2840_v40 = vpop.f32.mrf.mxu3 }
 0x2dc   : > { %v2944_v20 = vsel %vm2912_vm1, %v2896_v54, %v2928_v55  ;;  %v2841_v15 = vadd.f32 %v2840_v40, %v2792_v33 }
 0x2dd   : > { %v2959_v16 = vpack.c.bf16 %v2944_v20, %v2943_v1  ;;  %v2753_v1 = vadd.f32 %v2752_v60, %v2703_v11 }
 0x2de   : > { %v2877_v52 = vmax.f32 %v9046_v58, %v2841_v15  ;;  %v2705_v58 = vpop.f32.mrf.mxu0  ;;  %v2757_v40 = vpop.f32.mrf.mxu1 }
 0x2df   : > { %3039 = vmatmul.bf16.vlgmr.msra.gmra.mxu0 %v2959_v16  ;;  %3152 = vmatmul.bf16.vlgmr.msra.gmra.mxu1 %v2959_v16  ;;  %v2806_v16 = vpop.f32.mrf.mxu2  ;;  %v2802_v2 = vadd.f32 %v2801_v50, %v2753_v1 }
 0x2e0   : > { %v2897_v12 = vadd.f32 %v9135_v59, %v2877_v52 }
 0x2e2   : > { %v2929_v25 = vmul.f32 0.01, %v2897_v12  ;;  %vm2913_vm2 = vcmp.ge.f32.partialorder %v2897_v12, 0.0 }
 0x2e3   : > { %v2842_v9 = vpop.f32.mrf.mxu3 }
 0x2e4   : > { %v2843_v23 = vadd.f32 %v2842_v9, %v2794_v36  ;;  %v2945_v24 = vsel %vm2913_vm2, %v2897_v12, %v2929_v25  ;;  %v2755_v9 = vadd.f32 %v2754_v53, %v2705_v58  ;;  %vm3305_vm2 = vcmask 261120  }
 0x2e6   : > { %v2878_v18 = vmax.f32 %v9055_v43, %v2843_v23  ;;  %v2708_v33 = vpop.f32.mrf.mxu0  ;;  %v2759_v11 = vpop.f32.mrf.mxu1  ;;  %v2804_v60 = vadd.f32 %v2803_v34, %v2755_v9 }
 0x2e7   : > { %v2808_v23 = vpop.f32.mrf.mxu2 }
 0x2e8   : > { %v2898_v61 = vadd.f32 %v9135_v59, %v2878_v18 }
 0x2ea   : > { %vm2914_vm3 = vcmp.ge.f32.partialorder %v2898_v61, 0.0  ;;  %v2930_v29 = vmul.f32 0.01, %v2898_v61 }
 0x2eb   : > { %v2845_v14 = vpop.f32.mrf.mxu3 }
 0x2ec   : > { %v2846_v28 = vadd.f32 %v2845_v14, %v2797_v62  ;;  %v2946_v49 = vsel %vm2914_vm3, %v2898_v61, %v2930_v29  ;;  %v2758_v61 = vadd.f32 %v2757_v40, %v2708_v33 }
 0x2ed   : > { %v2960_v38 = vpack.c.bf16 %v2946_v49, %v2945_v24 }
 0x2ee   : > { %v2879_v43 = vmax.f32 %v9059_v45, %v2846_v28  ;;  %v2710_v12 = vpop.f32.mrf.mxu0  ;;  %v2807_v14 = vadd.f32 %v2806_v16, %v2758_v61  ;;  %v2762_v24 = vpop.f32.mrf.mxu1 }
 0x2ef   : > { %3044 = vmatmul.bf16.gmra.mxu0 %v2960_v38  ;;  %3157 = vmatmul.bf16.gmra.mxu1 %v2960_v38  ;;  %v2811_v34 = vpop.f32.mrf.mxu2 }
 0x2f0   : > { %v2899_v54 = vadd.f32 %v9135_v59, %v2879_v43  ;;  %v2760_v43 = vadd.f32 %v2759_v11, %v2710_v12  ;;  %v2313_v12 = vadd.f32 %v8987_v19, %v8985_v35 }
 0x2f2   : > { %v2931_v20 = vmul.f32 0.01, %v2899_v54  ;;  %vm2915_vm4 = vcmp.ge.f32.partialorder %v2899_v54, 0.0 }
 0x2f3   : > { %v2847_v44 = vpop.f32.mrf.mxu3 }
 0x2f4   : > { %v2848_v30 = vadd.f32 %v2847_v44, %v2799_v41  ;;  %v2947_v56 = vsel %vm2915_vm4, %v2899_v54, %v2931_v20  ;;  %v2809_v54 = vadd.f32 %v2808_v23, %v2760_v43  ;;  %v2362_v23 = vadd.f32 %v8999_v7, %v2313_v12 }
 0x2f6   : > { %v2880_v55 = vmax.f32 %v9068_v46, %v2848_v30  ;;  %v2713_v28 = vpop.f32.mrf.mxu0  ;;  %v7376_v30 = vld [vmem:[%s10244_s10] sm:$0xff] }
 0x2f7   : > { %3337 = vmatpush.bf16.msra.mxu2 %v7376_v30  ;;  %v2763_v16 = vadd.f32 %v2762_v24, %v2713_v28 }
 0x2f8   : > { %v2900_v15 = vadd.f32 %v9135_v59, %v2880_v55 }
 0x2fa   : > { %vm2916_vm5 = vcmp.ge.f32.partialorder %v2900_v15, 0.0  ;;  %v2932_v26 = vmul.f32 0.01, %v2900_v15 }
 0x2fb   : > { %v2850_v21 = vpop.f32.mrf.mxu3 }
 0x2fc   : > { %v2851_v45 = vadd.f32 %v2850_v21, %v2802_v2  ;;  %v2948_v52 = vsel %vm2916_vm5, %v2900_v15, %v2932_v26  ;;  %v2764_v15 = vpop.f32.mrf.mxu1  ;;  %v2812_v2 = vadd.f32 %v2811_v34, %v2763_v16 }
 0x2fd   : > { %v2961_v36 = vpack.c.bf16 %v2948_v52, %v2947_v56 }
 0x2fe   : > { %v2881_v46 = vmax.f32 %v9072_v4, %v2851_v45  ;;  %v2715_v40 = vpop.f32.mrf.mxu0 }
 0x2ff   : > { %3049 = vmatmul.bf16.gmra.mxu0 %v2961_v36  ;;  %3162 = vmatmul.bf16.gmra.mxu1 %v2961_v36 }
 0x300   : > { %v2901_v22 = vadd.f32 %v9135_v59, %v2881_v46  ;;  %v2765_v46 = vadd.f32 %v2764_v15, %v2715_v40 }
 0x302   : > { %v2933_v62 = vmul.f32 0.01, %v2901_v22  ;;  %vm2917_vm6 = vcmp.ge.f32.partialorder %v2901_v22, 0.0 }
 0x303   : > { %v2852_v18 = vpop.f32.mrf.mxu3 }
 0x304   : > { %v2853_v50 = vadd.f32 %v2852_v18, %v2804_v60  ;;  %v2949_v53 = vsel %vm2917_vm6, %v2901_v22, %v2933_v62  ;;  %v2767_v9 = vpop.f32.mrf.mxu1 }
 0x306   : > { %v2882_v25 = vmax.f32 %v9081_v0, %v2853_v50  ;;  %v2308_v0 = vadd.f32 %v8969_v37, %v8967_v39  ;;  %v2813_v37 = vpop.f32.mrf.mxu2  ;;  %v2718_v36 = vpop.f32.mrf.mxu0  ;;  %v2411_v50 = vadd.f32 %v9111_v48, %v2362_v23 }
 0x307   : > { %v2814_v18 = vadd.f32 %v2813_v37, %v2765_v46 }
 0x308   : > { %v2902_v29 = vadd.f32 %v9135_v59, %v2882_v25  ;;  %v2357_v44 = vadd.f32 %v8981_v63, %v2308_v0 }
 0x30a   : > { %vm2918_vm7 = vcmp.ge.f32.partialorder %v2902_v29, 0.0  ;;  %v2934_v58 = vmul.f32 0.01, %v2902_v29  ;;  %v2406_v55 = vadd.f32 %v9093_v27, %v2357_v44 }
 0x30b   : > { %v2855_v4 = vpop.f32.mrf.mxu3 }
 0x30c   : > { %v2856_v49 = vadd.f32 %v2855_v4, %v2807_v14  ;;  %v2950_v38 = vsel %vm2918_vm7, %v2902_v29, %v2934_v58  ;;  %v2768_v29 = vadd.f32 %v2767_v9, %v2718_v36  ;;  %v2769_v35 = vpop.f32.mrf.mxu1 }
 0x30d   : > { %v2962_v3 = vpack.c.bf16 %v2950_v38, %v2949_v53  ;;  %v2318_v38 = vadd.f32 %v9005_v32, %v9003_v5 }
 0x30e   : > { %v2883_v41 = vmax.f32 %v9085_v17, %v2856_v49  ;;  %v2816_v60 = vpop.f32.mrf.mxu2  ;;  %v2720_v14 = vpop.f32.mrf.mxu0 }
 0x30f   : > { %3054 = vmatmul.bf16.gmra.mxu0 %v2962_v3  ;;  %3167 = vmatmul.bf16.gmra.mxu1 %v2962_v3  ;;  %v2817_v19 = vadd.f32 %v2816_v60, %v2768_v29  ;;  %v2770_v34 = vadd.f32 %v2769_v35, %v2720_v14  ;;  %v2367_v0 = vadd.f32 %v9017_v31, %v2318_v38 }
 0x310   : > { %v2903_v1 = vadd.f32 %v9135_v59, %v2883_v41 }
 0x311   : > { %v2416_v30 = vadd.f32 %v9117_v8, %v2367_v0 }
 0x312   : > { %v2935_v17 = vmul.f32 0.01, %v2903_v1  ;;  %vm2919_vm8 = vcmp.ge.f32.partialorder %v2903_v1, 0.0 }
 0x313   : > { %v2857_v33 = vpop.f32.mrf.mxu3 }
 0x314   : > { %v2858_v20 = vadd.f32 %v2857_v33, %v2809_v54  ;;  %v2951_v56 = vsel %vm2919_vm8, %v2903_v1, %v2935_v17  ;;  %v2772_v44 = vpop.f32.mrf.mxu1 }
 0x316   : > { %v2884_v39 = vmax.f32 %v2406_v55, %v2858_v20  ;;  %v2818_v24 = vpop.f32.mrf.mxu2  ;;  %v2723_v43 = vpop.f32.mrf.mxu0 }
 0x317   : > { %v2819_v41 = vadd.f32 %v2818_v24, %v2770_v34  ;;  %v2773_v20 = vadd.f32 %v2772_v44, %v2723_v43 }
 0x318   : > { %v2904_v63 = vadd.f32 %v9135_v59, %v2884_v39 }
 0x31a   : > { %vm2920_vm9 = vcmp.ge.f32.partialorder %v2904_v63, 0.0  ;;  %v2936_v26 = vmul.f32 0.01, %v2904_v63 }
 0x31b   : > { %v2860_v21 = vpop.f32.mrf.mxu3 }
 0x31c   : > { %v2861_v45 = vadd.f32 %v2860_v21, %v2812_v2  ;;  %v2952_v27 = vsel %vm2920_vm9, %v2904_v63, %v2936_v26  ;;  %v2774_v63 = vpop.f32.mrf.mxu1  ;;  %v2323_v26 = vadd.f32 %v9101_v57, %v9096_v47 }
 0x31d   : > { %v2963_v52 = vpack.c.bf16 %v2952_v27, %v2951_v56 }
 0x31e   : > { %v2885_v11 = vmax.f32 %v9099_v42, %v2861_v45  ;;  %v2821_v40 = vpop.f32.mrf.mxu2  ;;  %v2725_v17 = vpop.f32.mrf.mxu0  ;;  %v2372_v56 = vadd.f32 %v9109_v10, %v2323_v26 }
 0x31f   : > { %3059 = vmatmul.bf16.gmra.mxu0 %v2963_v52  ;;  %3172 = vmatmul.bf16.gmra.mxu1 %v2963_v52  ;;  %v2822_v32 = vadd.f32 %v2821_v40, %v2773_v20  ;;  %v2775_v21 = vadd.f32 %v2774_v63, %v2725_v17 }
 0x320   : > { %v2905_v25 = vadd.f32 %v9135_v59, %v2885_v11  ;;  %v2421_v36 = vadd.f32 %v9129_v6, %v2372_v56  ;;  %v9189_v6 = vld [vmem:[%s10243_s9] ss:$0 sm:$0xff] }
 0x322   : > { %v2937_v28 = vmul.f32 0.01, %v2905_v25  ;;  %vm2921_vm10 = vcmp.ge.f32.partialorder %v2905_v25, 0.0 }
 0x323   : > { %v2862_v22 = vpop.f32.mrf.mxu3 }
 0x324   : > { %v2863_v61 = vadd.f32 %v2862_v22, %v2814_v18  ;;  %v2953_v49 = vsel %vm2921_vm10, %v2905_v25, %v2937_v28 }
 0x326   : > { %v2886_v62 = vmax.f32 %v2411_v50, %v2863_v61  ;;  %v2823_v2 = vpop.f32.mrf.mxu2 }
 0x327   : > { %v2824_v27 = vadd.f32 %v2823_v2, %v2775_v21 }
 0x328   : > { %v2906_v58 = vadd.f32 %v9135_v59, %v2886_v62 }
 0x32a   : > { %vm2922_vm11 = vcmp.ge.f32.partialorder %v2906_v58, 0.0  ;;  %v2938_v42 = vmul.f32 0.01, %v2906_v58 }
 0x32b   : > { %v2865_v7 = vpop.f32.mrf.mxu3 }
 0x32c   : > { %v2866_v4 = vadd.f32 %v2865_v7, %v2817_v19  ;;  %v2954_v53 = vsel %vm2922_vm11, %v2906_v58, %v2938_v42 }
 0x32d   : > { %v2964_v48 = vpack.c.bf16 %v2954_v53, %v2953_v49 }
 0x32e   : > { %v2887_v3 = vmax.f32 %v9115_v51, %v2866_v4 }
 0x32f   : > { %3064 = vmatmul.bf16.gmra.mxu0 %v2964_v48  ;;  %3177 = vmatmul.bf16.gmra.mxu1 %v2964_v48 }
 0x330   : > { %v2907_v33 = vadd.f32 %v9135_v59, %v2887_v3 }
 0x332   : > { %v2939_v15 = vmul.f32 0.01, %v2907_v33  ;;  %vm2923_vm12 = vcmp.ge.f32.partialorder %v2907_v33, 0.0 }
 0x333   : > { %v2867_v54 = vpop.f32.mrf.mxu3 }
 0x334   : > { %v2868_v55 = vadd.f32 %v2867_v54, %v2819_v41  ;;  %v2955_v37 = vsel %vm2923_vm12, %v2907_v33, %v2939_v15 }
 0x336   : > { %v2888_v1 = vmax.f32 %v2416_v30, %v2868_v55 }
 0x338   : > { %v2908_v5 = vadd.f32 %v9135_v59, %v2888_v1 }
 0x33a   : > { %vm2924_vm13 = vcmp.ge.f32.partialorder %v2908_v5, 0.0  ;;  %v2940_v51 = vmul.f32 0.01, %v2908_v5 }
 0x33b   : > { %v2870_v31 = vpop.f32.mrf.mxu3 }
 0x33c   : > { %v2871_v39 = vadd.f32 %v2870_v31, %v2822_v32  ;;  %v2956_v16 = vsel %vm2924_vm13, %v2908_v5, %v2940_v51 }
 0x33d   : > { %v2965_v8 = vpack.c.bf16 %v2956_v16, %v2955_v37 }
 0x33e   : > { %v2889_v45 = vmax.f32 %v9127_v13, %v2871_v39 }
 0x33f   : > { %3069 = vmatmul.bf16.gmra.mxu0 %v2965_v8  ;;  %3182 = vmatmul.bf16.gmra.mxu1 %v2965_v8 }
 0x340   : > { %v2909_v9 = vadd.f32 %v9135_v59, %v2889_v45 }
 0x342   : > { %v2941_v11 = vmul.f32 0.01, %v2909_v9  ;;  %vm2925_vm14 = vcmp.ge.f32.partialorder %v2909_v9, 0.0 }
 0x343   : > { %v2872_v52 = vpop.f32.mrf.mxu3 }
 0x344   : > { %v2873_v12 = vadd.f32 %v2872_v52, %v2824_v27  ;;  %v2957_v47 = vsel %vm2925_vm14, %v2909_v9, %v2941_v11  ;;  %v7378_v11 = vld [vmem:[%s10246_s12] sm:$0xff] }
 0x346   : > { %v2890_v46 = vmax.f32 %v2421_v36, %v2873_v12 }
 0x348   : > { %v2910_v60 = vadd.f32 %v9135_v59, %v2890_v46  ;;  %v7379_v59 = vld [vmem:[%s10246_s12 + $0x8] sm:$0xff] }
 0x349   : > { %3485 = vmatpush.bf16.msrb.mxu3 %v7379_v59 }
 0x34a   : > { %vm2926_vm15 = vcmp.ge.f32.partialorder %v2910_v60, 0.0  ;;  %v2942_v23 = vmul.f32 0.01, %v2910_v60 }
 0x34c   : > { %v2958_v57 = vsel %vm2926_vm15, %v2910_v60, %v2942_v23 }
 0x34d   : > { %v2966_v18 = vpack.c.bf16 %v2958_v57, %v2957_v47  ;;  %3486 = vmatpush.bf16.msrb.mxu3 %v7378_v11 }
 0x34f   : > { %3074 = vmatmul.bf16.gmra.mxu0 %v2966_v18  ;;  %3187 = vmatmul.bf16.gmra.mxu1 %v2966_v18 }
 0x35c   : > { %v3040_v10 = vpop.f32.mrf.mxu0  ;;  %v3153_v13 = vpop.f32.mrf.mxu1 }
 0x35d   : > { %v3193_v22 = vmax.f32 %v3040_v10, %v3153_v13 }
 0x35f   : > { %v3213_v50 = vadd.f32 %v9189_v6, %v3193_v22 }
 0x361   : > { %v3245_v29 = vmul.f32 0.01, %v3213_v50  ;;  %vm3229_vm0 = vcmp.ge.f32.partialorder %v3213_v50, 0.0 }
 0x363   : > { %v3261_v58 = vsel %vm3229_vm0, %v3213_v50, %v3245_v29 }
 0x364   : > { %v3042_v25 = vpop.f32.mrf.mxu0  ;;  %v3155_v61 = vpop.f32.mrf.mxu1 }
 0x365   : > { %v3194_v62 = vmax.f32 %v3042_v25, %v3155_v61 }
 0x367   : > { %v3214_v14 = vadd.f32 %v9189_v6, %v3194_v62 }
 0x369   : > { %vm3230_vm1 = vcmp.ge.f32.partialorder %v3214_v14, 0.0  ;;  %v3246_v28 = vmul.f32 0.01, %v3214_v14 }
 0x36b   : > { %v3262_v35 = vsel %vm3230_vm1, %v3214_v14, %v3246_v28 }
 0x36c   : > { %v3277_v19 = vpack.c.bf16 %v3262_v35, %v3261_v58  ;;  %v3045_v42 = vpop.f32.mrf.mxu0  ;;  %v3158_v24 = vpop.f32.mrf.mxu1 }
 0x36d   : > { %v3195_v7 = vmax.f32 %v3045_v42, %v3158_v24 }
 0x36e   : > { %6906 = vmatmul.msk.bf16.vlgmr.msra.gmra.mxu2 %vm3305_vm2, %v3277_v19 }
 0x36f   : > { %v3215_v4 = vadd.f32 %v9189_v6, %v3195_v7 }
 0x371   : > { %v3247_v38 = vmul.f32 0.01, %v3215_v4  ;;  %vm3231_vm3 = vcmp.ge.f32.partialorder %v3215_v4, 0.0 }
 0x373   : > { %v3263_v0 = vsel %vm3231_vm3, %v3215_v4, %v3247_v38 }
 0x374   : > { %v3047_v49 = vpop.f32.mrf.mxu0  ;;  %v3160_v53 = vpop.f32.mrf.mxu1 }
 0x375   : > { %v3196_v48 = vmax.f32 %v3047_v49, %v3160_v53 }
 0x377   : > { %v3216_v34 = vadd.f32 %v9189_v6, %v3196_v48 }
 0x379   : > { %vm3232_vm4 = vcmp.ge.f32.partialorder %v3216_v34, 0.0  ;;  %v3248_v3 = vmul.f32 0.01, %v3216_v34 }
 0x37b   : > { %v3264_v43 = vsel %vm3232_vm4, %v3216_v34, %v3248_v3 }
 0x37c   : > { %v3050_v41 = vpop.f32.mrf.mxu0  ;;  %v3163_v44 = vpop.f32.mrf.mxu1  ;;  %v3278_v54 = vpack.c.bf16 %v3264_v43, %v3263_v0 }
 0x37d   : > { %v3197_v30 = vmax.f32 %v3050_v41, %v3163_v44 }
 0x37e   : > { %6907 = vmatmul.msk.bf16.gmra.mxu2 %vm3305_vm2, %v3278_v54 }
 0x37f   : > { %v3217_v33 = vadd.f32 %v9189_v6, %v3197_v30 }
 0x381   : > { %v3249_v20 = vmul.f32 0.01, %v3217_v33  ;;  %vm3233_vm5 = vcmp.ge.f32.partialorder %v3217_v33, 0.0 }
 0x383   : > { %v3265_v32 = vsel %vm3233_vm5, %v3217_v33, %v3249_v20 }
 0x384   : > { %v3052_v55 = vpop.f32.mrf.mxu0  ;;  %v3165_v40 = vpop.f32.mrf.mxu1 }
 0x385   : > { %v3198_v1 = vmax.f32 %v3052_v55, %v3165_v40 }
 0x387   : > { %v3218_v15 = vadd.f32 %v9189_v6, %v3198_v1 }
 0x389   : > { %vm3234_vm6 = vcmp.ge.f32.partialorder %v3218_v15, 0.0  ;;  %v3250_v5 = vmul.f32 0.01, %v3218_v15 }
 0x38b   : > { %v3266_v51 = vsel %vm3234_vm6, %v3218_v15, %v3250_v5 }
 0x38c   : > { %v3055_v31 = vpop.f32.mrf.mxu0  ;;  %v3168_v39 = vpop.f32.mrf.mxu1  ;;  %v3279_v37 = vpack.c.bf16 %v3266_v51, %v3265_v32 }
 0x38d   : > { %v3199_v16 = vmax.f32 %v3055_v31, %v3168_v39 }
 0x38e   : > { %6908 = vmatmul.msk.bf16.gmra.mxu2 %vm3305_vm2, %v3279_v37 }
 0x38f   : > { %v3219_v17 = vadd.f32 %v9189_v6, %v3199_v16 }
 0x391   : > { %v3251_v26 = vmul.f32 0.01, %v3219_v17  ;;  %vm3235_vm7 = vcmp.ge.f32.partialorder %v3219_v17, 0.0 }
 0x393   : > { %v3267_v56 = vsel %vm3235_vm7, %v3219_v17, %v3251_v26 }
 0x394   : > { %v3057_v63 = vpop.f32.mrf.mxu0  ;;  %v3170_v8 = vpop.f32.mrf.mxu1 }
 0x395   : > { %v3200_v2 = vmax.f32 %v3057_v63, %v3170_v8  ;;  %v9224_v63 = vld [vmem:[%s10245_s11] ss:$0 sm:$0xff] }
 0x397   : > { %v3220_v21 = vadd.f32 %v9189_v6, %v3200_v2 }
 0x399   : > { %vm3236_vm8 = vcmp.ge.f32.partialorder %v3220_v21, 0.0  ;;  %v3252_v45 = vmul.f32 0.01, %v3220_v21 }
 0x39b   : > { %v3268_v27 = vsel %vm3236_vm8, %v3220_v21, %v3252_v45 }
 0x39c   : > { %v3060_v52 = vpop.f32.mrf.mxu0  ;;  %v3173_v36 = vpop.f32.mrf.mxu1  ;;  %v3280_v9 = vpack.c.bf16 %v3268_v27, %v3267_v56 }
 0x39d   : > { %v3201_v12 = vmax.f32 %v3060_v52, %v3173_v36 }
 0x39e   : > { %6909 = vmatmul.msk.bf16.gmra.mxu2 %vm3305_vm2, %v3280_v9 }
 0x39f   : > { %v3221_v46 = vadd.f32 %v9189_v6, %v3201_v12 }
 0x3a1   : > { %v3253_v57 = vmul.f32 0.01, %v3221_v46  ;;  %vm3237_vm9 = vcmp.ge.f32.partialorder %v3221_v46, 0.0 }
 0x3a3   : > { %v3269_v13 = vsel %vm3237_vm9, %v3221_v46, %v3253_v57 }
 0x3a4   : > { %v3062_v60 = vpop.f32.mrf.mxu0  ;;  %v3175_v23 = vpop.f32.mrf.mxu1 }
 0x3a5   : > { %v3202_v47 = vmax.f32 %v3062_v60, %v3175_v23 }
 0x3a7   : > { %v3222_v18 = vadd.f32 %v9189_v6, %v3202_v47 }
 0x3a9   : > { %vm3238_vm10 = vcmp.ge.f32.partialorder %v3222_v18, 0.0  ;;  %v3254_v10 = vmul.f32 0.01, %v3222_v18 }
 0x3ab   : > { %v3270_v22 = vsel %vm3238_vm10, %v3222_v18, %v3254_v10 }
 0x3ac   : > { %v3065_v50 = vpop.f32.mrf.mxu0  ;;  %v3178_v59 = vpop.f32.mrf.mxu1  ;;  %v3281_v25 = vpack.c.bf16 %v3270_v22, %v3269_v13 }
 0x3ad   : > { %v3203_v61 = vmax.f32 %v3065_v50, %v3178_v59 }
 0x3ae   : > { %6910 = vmatmul.msk.bf16.gmra.mxu2 %vm3305_vm2, %v3281_v25 }
 0x3af   : > { %v3223_v62 = vadd.f32 %v9189_v6, %v3203_v61 }
 0x3b1   : > { %v3255_v58 = vmul.f32 0.01, %v3223_v62  ;;  %vm3239_vm11 = vcmp.ge.f32.partialorder %v3223_v62, 0.0 }
 0x3b3   : > { %v3271_v42 = vsel %vm3239_vm11, %v3223_v62, %v3255_v58 }
 0x3b4   : > { %v3067_v29 = vpop.f32.mrf.mxu0  ;;  %v3180_v14 = vpop.f32.mrf.mxu1 }
 0x3b5   : > { %v3204_v28 = vmax.f32 %v3067_v29, %v3180_v14 }
 0x3b7   : > { %v3224_v35 = vadd.f32 %v9189_v6, %v3204_v28 }
 0x3b9   : > { %vm3240_vm12 = vcmp.ge.f32.partialorder %v3224_v35, 0.0  ;;  %v3256_v19 = vmul.f32 0.01, %v3224_v35 }
 0x3bb   : > { %v3272_v24 = vsel %vm3240_vm12, %v3224_v35, %v3256_v19 }
 0x3bc   : > { %v3070_v7 = vpop.f32.mrf.mxu0  ;;  %v3183_v4 = vpop.f32.mrf.mxu1  ;;  %v3282_v49 = vpack.c.bf16 %v3272_v24, %v3271_v42 }
 0x3bd   : > { %v3205_v53 = vmax.f32 %v3070_v7, %v3183_v4 }
 0x3be   : > { %6911 = vmatmul.msk.bf16.gmra.mxu2 %vm3305_vm2, %v3282_v49 }
 0x3bf   : > { %v3225_v48 = vadd.f32 %v9189_v6, %v3205_v53 }
 0x3c1   : > { %v3257_v0 = vmul.f32 0.01, %v3225_v48  ;;  %vm3241_vm13 = vcmp.ge.f32.partialorder %v3225_v48, 0.0 }
 0x3c3   : > { %v3273_v44 = vsel %vm3241_vm13, %v3225_v48, %v3257_v0 }
 0x3c4   : > { %v3072_v38 = vpop.f32.mrf.mxu0  ;;  %v3185_v34 = vpop.f32.mrf.mxu1 }
 0x3c5   : > { %v3206_v3 = vmax.f32 %v3072_v38, %v3185_v34 }
 0x3c7   : > { %v3226_v43 = vadd.f32 %v9189_v6, %v3206_v3 }
 0x3c9   : > { %vm3242_vm14 = vcmp.ge.f32.partialorder %v3226_v43, 0.0  ;;  %v3258_v41 = vmul.f32 0.01, %v3226_v43 }
 0x3cb   : > { %v3274_v54 = vsel %vm3242_vm14, %v3226_v43, %v3258_v41 }
 0x3cc   : > { %v3075_v30 = vpop.f32.mrf.mxu0  ;;  %v3188_v33 = vpop.f32.mrf.mxu1  ;;  %v3283_v55 = vpack.c.bf16 %v3274_v54, %v3273_v44 }
 0x3cd   : > { %v3207_v40 = vmax.f32 %v3075_v30, %v3188_v33 }
 0x3ce   : > { %6912 = vmatmul.msk.bf16.gmra.mxu2 %vm3305_vm2, %v3283_v55 }
 0x3cf   : > { %v3227_v1 = vadd.f32 %v9189_v6, %v3207_v40 }
 0x3d1   : > { %v3259_v32 = vmul.f32 0.01, %v3227_v1  ;;  %vm3243_vm15 = vcmp.ge.f32.partialorder %v3227_v1, 0.0 }
 0x3d3   : > { %v3275_v39 = vsel %vm3243_vm15, %v3227_v1, %v3259_v32 }
 0x3d4   : > { %v3077_v20 = vpop.f32.mrf.mxu0  ;;  %v3190_v15 = vpop.f32.mrf.mxu1 }
 0x3d5   : > { %v3208_v5 = vmax.f32 %v3077_v20, %v3190_v15 }
 0x3d7   : > { %v3228_v51 = vadd.f32 %v9189_v6, %v3208_v5  ;;  %v7380_v6 = vld [vmem:[%s10248_s14] sm:$0xff] }
 0x3d8   : > { %3628 = vmatpush.bf16.msrb.mxu0 %v7380_v6 }
 0x3d9   : > { %vm3244_vm0 = vcmp.ge.f32.partialorder %v3228_v51, 0.0  ;;  %v3260_v31 = vmul.f32 0.01, %v3228_v51 }
 0x3db   : > { %v3276_v37 = vsel %vm3244_vm0, %v3228_v51, %v3260_v31 }
 0x3dc   : > { %v3284_v16 = vpack.c.bf16 %v3276_v37, %v3275_v39 }
 0x3de   : > { %6913 = vmatmul.msk.bf16.gmra.mxu2 %vm3305_vm2, %v3284_v16 }
 0x3f1   : > { %v3339_v17 = vpop.f32.mrf.mxu2 }
 0x3f2   : > { %v3340_v8 = vadd.f32 %v9224_v63, %v3339_v17 }
 0x3f4   : > { %v3395_v26 = vmul.f32 0.01, %v3340_v8  ;;  %vm3379_vm1 = vcmp.ge.f32.partialorder %v3340_v8, 0.0 }
 0x3f6   : > { %v3411_v56 = vsel %vm3379_vm1, %v3340_v8, %v3395_v26 }
 0x3f9   : > { %v3341_v2 = vpop.f32.mrf.mxu2 }
 0x3fa   : > { %v3342_v21 = vadd.f32 %v9224_v63, %v3341_v2 }
 0x3fc   : > { %vm3380_vm3 = vcmp.ge.f32.partialorder %v3342_v21, 0.0  ;;  %v3396_v45 = vmul.f32 0.01, %v3342_v21 }
 0x3fe   : > { %v3412_v27 = vsel %vm3380_vm3, %v3342_v21, %v3396_v45 }
 0x3ff   : > { %v3427_v52 = vpack.c.bf16 %v3412_v27, %v3411_v56 }
 0x401   : > { %v3344_v36 = vpop.f32.mrf.mxu2  ;;  %6922 = vmatmul.msk.bf16.vlgmr.msrb.gmra.mxu3 %vm3305_vm2, %v3427_v52 }
 0x402   : > { %v3345_v9 = vadd.f32 %v9224_v63, %v3344_v36  ;;  %v7382_v36 = vld [vmem:[%s10250_s16 + $0x8] sm:$0xff] }
 0x403   : > { %3776 = vmatpush.bf16.msrb.mxu1 %v7382_v36 }
 0x404   : > { %v3397_v46 = vmul.f32 0.01, %v3345_v9  ;;  %vm3381_vm4 = vcmp.ge.f32.partialorder %v3345_v9, 0.0 }
 0x406   : > { %v3413_v23 = vsel %vm3381_vm4, %v3345_v9, %v3397_v46 }
 0x409   : > { %v3346_v12 = vpop.f32.mrf.mxu2 }
 0x40a   : > { %v3347_v11 = vadd.f32 %v9224_v63, %v3346_v12  ;;  %v9259_v12 = vld [vmem:[%s10247_s13] ss:$0 sm:$0xff] }
 0x40c   : > { %vm3382_vm5 = vcmp.ge.f32.partialorder %v3347_v11, 0.0  ;;  %v3398_v60 = vmul.f32 0.01, %v3347_v11 }
 0x40e   : > { %v3414_v47 = vsel %vm3382_vm5, %v3347_v11, %v3398_v60  ;;  %vm3596_vm5 = vcmask 130048  }
 0x40f   : > { %v3428_v57 = vpack.c.bf16 %v3414_v47, %v3413_v23 }
 0x411   : > { %v3349_v18 = vpop.f32.mrf.mxu2  ;;  %6923 = vmatmul.msk.bf16.gmra.mxu3 %vm3305_vm2, %v3428_v57 }
 0x412   : > { %v3350_v10 = vadd.f32 %v9224_v63, %v3349_v18 }
 0x414   : > { %v3399_v22 = vmul.f32 0.01, %v3350_v10  ;;  %vm3383_vm6 = vcmp.ge.f32.partialorder %v3350_v10, 0.0 }
 0x416   : > { %v3415_v25 = vsel %vm3383_vm6, %v3350_v10, %v3399_v22 }
 0x419   : > { %v3351_v13 = vpop.f32.mrf.mxu2 }
 0x41a   : > { %v3352_v50 = vadd.f32 %v9224_v63, %v3351_v13 }
 0x41c   : > { %vm3384_vm7 = vcmp.ge.f32.partialorder %v3352_v50, 0.0  ;;  %v3400_v59 = vmul.f32 0.01, %v3352_v50 }
 0x41e   : > { %v3416_v61 = vsel %vm3384_vm7, %v3352_v50, %v3400_v59 }
 0x41f   : > { %v3429_v62 = vpack.c.bf16 %v3416_v61, %v3415_v25 }
 0x421   : > { %v3354_v29 = vpop.f32.mrf.mxu2  ;;  %6924 = vmatmul.msk.bf16.gmra.mxu3 %vm3305_vm2, %v3429_v62 }
 0x422   : > { %v3355_v14 = vadd.f32 %v9224_v63, %v3354_v29 }
 0x424   : > { %v3401_v58 = vmul.f32 0.01, %v3355_v14  ;;  %vm3385_vm8 = vcmp.ge.f32.partialorder %v3355_v14, 0.0 }
 0x426   : > { %v3417_v42 = vsel %vm3385_vm8, %v3355_v14, %v3401_v58 }
 0x429   : > { %v3356_v28 = vpop.f32.mrf.mxu2 }
 0x42a   : > { %v3357_v35 = vadd.f32 %v9224_v63, %v3356_v28 }
 0x42c   : > { %vm3386_vm9 = vcmp.ge.f32.partialorder %v3357_v35, 0.0  ;;  %v3402_v19 = vmul.f32 0.01, %v3357_v35 }
 0x42e   : > { %v3418_v24 = vsel %vm3386_vm9, %v3357_v35, %v3402_v19 }
 0x42f   : > { %v3430_v7 = vpack.c.bf16 %v3418_v24, %v3417_v42 }
 0x431   : > { %v3359_v4 = vpop.f32.mrf.mxu2  ;;  %6925 = vmatmul.msk.bf16.gmra.mxu3 %vm3305_vm2, %v3430_v7 }
 0x432   : > { %v3360_v49 = vadd.f32 %v9224_v63, %v3359_v4 }
 0x434   : > { %v3403_v48 = vmul.f32 0.01, %v3360_v49  ;;  %vm3387_vm10 = vcmp.ge.f32.partialorder %v3360_v49, 0.0 }
 0x436   : > { %v3419_v3 = vsel %vm3387_vm10, %v3360_v49, %v3403_v48 }
 0x439   : > { %v3361_v53 = vpop.f32.mrf.mxu2 }
 0x43a   : > { %v3362_v38 = vadd.f32 %v9224_v63, %v3361_v53 }
 0x43c   : > { %vm3388_vm11 = vcmp.ge.f32.partialorder %v3362_v38, 0.0  ;;  %v3404_v34 = vmul.f32 0.01, %v3362_v38 }
 0x43e   : > { %v3420_v0 = vsel %vm3388_vm11, %v3362_v38, %v3404_v34 }
 0x43f   : > { %v3431_v43 = vpack.c.bf16 %v3420_v0, %v3419_v3 }
 0x441   : > { %v3364_v41 = vpop.f32.mrf.mxu2  ;;  %6926 = vmatmul.msk.bf16.gmra.mxu3 %vm3305_vm2, %v3431_v43 }
 0x442   : > { %v3365_v44 = vadd.f32 %v9224_v63, %v3364_v41 }
 0x444   : > { %v3405_v30 = vmul.f32 0.01, %v3365_v44  ;;  %vm3389_vm12 = vcmp.ge.f32.partialorder %v3365_v44, 0.0 }
 0x446   : > { %v3421_v40 = vsel %vm3389_vm12, %v3365_v44, %v3405_v30  ;;  %v7381_v44 = vld [vmem:[%s10250_s16] sm:$0xff] }
 0x447   : > { %3777 = vmatpush.bf16.msrb.mxu1 %v7381_v44 }
 0x449   : > { %v3366_v54 = vpop.f32.mrf.mxu2 }
 0x44a   : > { %v3367_v33 = vadd.f32 %v9224_v63, %v3366_v54 }
 0x44c   : > { %vm3390_vm13 = vcmp.ge.f32.partialorder %v3367_v33, 0.0  ;;  %v3406_v55 = vmul.f32 0.01, %v3367_v33 }
 0x44e   : > { %v3422_v1 = vsel %vm3390_vm13, %v3367_v33, %v3406_v55 }
 0x44f   : > { %v3432_v20 = vpack.c.bf16 %v3422_v1, %v3421_v40 }
 0x451   : > { %v3369_v15 = vpop.f32.mrf.mxu2  ;;  %6927 = vmatmul.msk.bf16.gmra.mxu3 %vm3305_vm2, %v3432_v20 }
 0x452   : > { %v3370_v5 = vadd.f32 %v9224_v63, %v3369_v15 }
 0x454   : > { %v3407_v51 = vmul.f32 0.01, %v3370_v5  ;;  %vm3391_vm14 = vcmp.ge.f32.partialorder %v3370_v5, 0.0 }
 0x456   : > { %v3423_v37 = vsel %vm3391_vm14, %v3370_v5, %v3407_v51 }
 0x459   : > { %v3371_v32 = vpop.f32.mrf.mxu2 }
 0x45a   : > { %v3372_v31 = vadd.f32 %v9224_v63, %v3371_v32 }
 0x45c   : > { %vm3392_vm15 = vcmp.ge.f32.partialorder %v3372_v31, 0.0  ;;  %v3408_v39 = vmul.f32 0.01, %v3372_v31 }
 0x45e   : > { %v3424_v16 = vsel %vm3392_vm15, %v3372_v31, %v3408_v39 }
 0x45f   : > { %v3433_v17 = vpack.c.bf16 %v3424_v16, %v3423_v37 }
 0x461   : > { %v3374_v8 = vpop.f32.mrf.mxu2  ;;  %6928 = vmatmul.msk.bf16.gmra.mxu3 %vm3305_vm2, %v3433_v17 }
 0x462   : > { %v3375_v6 = vadd.f32 %v9224_v63, %v3374_v8 }
 0x464   : > { %v3409_v26 = vmul.f32 0.01, %v3375_v6  ;;  %vm3393_vm0 = vcmp.ge.f32.partialorder %v3375_v6, 0.0 }
 0x466   : > { %v3425_v56 = vsel %vm3393_vm0, %v3375_v6, %v3409_v26 }
 0x469   : > { %v3376_v2 = vpop.f32.mrf.mxu2 }
 0x46a   : > { %v3377_v21 = vadd.f32 %v9224_v63, %v3376_v2 }
 0x46c   : > { %vm3394_vm1 = vcmp.ge.f32.partialorder %v3377_v21, 0.0  ;;  %v3410_v45 = vmul.f32 0.01, %v3377_v21 }
 0x46e   : > { %v3426_v27 = vsel %vm3394_vm1, %v3377_v21, %v3410_v45 }
 0x46f   : > { %v3434_v52 = vpack.c.bf16 %v3426_v27, %v3425_v56 }
 0x471   : > { %6929 = vmatmul.msk.bf16.gmra.mxu3 %vm3305_vm2, %v3434_v52 }
 0x484   : > { %v3488_v9 = vpop.f32.mrf.mxu3 }
 0x485   : > { %v3489_v63 = vadd.f32 %v9259_v12, %v3488_v9 }
 0x487   : > { %v3544_v11 = vmul.f32 0.01, %v3489_v63  ;;  %vm3528_vm3 = vcmp.ge.f32.partialorder %v3489_v63, 0.0 }
 0x489   : > { %v3560_v47 = vsel %vm3528_vm3, %v3489_v63, %v3544_v11 }
 0x48c   : > { %v3490_v46 = vpop.f32.mrf.mxu3 }
 0x48d   : > { %v3491_v60 = vadd.f32 %v9259_v12, %v3490_v46 }
 0x48f   : > { %vm3529_vm4 = vcmp.ge.f32.partialorder %v3491_v60, 0.0  ;;  %v3545_v23 = vmul.f32 0.01, %v3491_v60 }
 0x491   : > { %v3561_v57 = vsel %vm3529_vm4, %v3491_v60, %v3545_v23 }
 0x492   : > { %v3576_v18 = vpack.c.bf16 %v3561_v57, %v3560_v47 }
 0x494   : > { %v3493_v10 = vpop.f32.mrf.mxu3  ;;  %6934 = vmatmul.msk.bf16.vlgmr.msrb.gmra.mxu0 %vm3596_vm5, %v3576_v18 }
 0x495   : > { %v3494_v13 = vadd.f32 %v9259_v12, %v3493_v10 }
 0x497   : > { %v3546_v50 = vmul.f32 0.01, %v3494_v13  ;;  %vm3530_vm6 = vcmp.ge.f32.partialorder %v3494_v13, 0.0 }
 0x499   : > { %v3562_v61 = vsel %vm3530_vm6, %v3494_v13, %v3546_v50  ;;  %v7384_v13 = vld [vmem:[%s10252_s18 + $0x8] sm:$0xff]  ;;  %v9294_v50 = vld [vmem:[%s10249_s15] ss:$0 sm:$0xff] }
 0x49a   : > { %3925 = vmatpush.bf16.msrb.mxu2 %v7384_v13 }
 0x49c   : > { %v3495_v22 = vpop.f32.mrf.mxu3 }
 0x49d   : > { %v3496_v59 = vadd.f32 %v9259_v12, %v3495_v22 }
 0x49f   : > { %vm3531_vm7 = vcmp.ge.f32.partialorder %v3496_v59, 0.0  ;;  %v3547_v25 = vmul.f32 0.01, %v3496_v59 }
 0x4a1   : > { %v3563_v62 = vsel %vm3531_vm7, %v3496_v59, %v3547_v25 }
 0x4a2   : > { %v3577_v29 = vpack.c.bf16 %v3563_v62, %v3562_v61 }
 0x4a4   : > { %v3498_v14 = vpop.f32.mrf.mxu3  ;;  %6935 = vmatmul.msk.bf16.gmra.mxu0 %vm3596_vm5, %v3577_v29 }
 0x4a5   : > { %v3499_v28 = vadd.f32 %v9259_v12, %v3498_v14 }
 0x4a7   : > { %v3548_v35 = vmul.f32 0.01, %v3499_v28  ;;  %vm3532_vm8 = vcmp.ge.f32.partialorder %v3499_v28, 0.0 }
 0x4a9   : > { %v3564_v24 = vsel %vm3532_vm8, %v3499_v28, %v3548_v35 }
 0x4ac   : > { %v3500_v58 = vpop.f32.mrf.mxu3 }
 0x4ad   : > { %v3501_v19 = vadd.f32 %v9259_v12, %v3500_v58 }
 0x4af   : > { %vm3533_vm9 = vcmp.ge.f32.partialorder %v3501_v19, 0.0  ;;  %v3549_v42 = vmul.f32 0.01, %v3501_v19 }
 0x4b1   : > { %v3565_v7 = vsel %vm3533_vm9, %v3501_v19, %v3549_v42 }
 0x4b2   : > { %v3578_v4 = vpack.c.bf16 %v3565_v7, %v3564_v24 }
 0x4b4   : > { %v3503_v49 = vpop.f32.mrf.mxu3  ;;  %6936 = vmatmul.msk.bf16.gmra.mxu0 %vm3596_vm5, %v3578_v4 }
 0x4b5   : > { %v3504_v53 = vadd.f32 %v9259_v12, %v3503_v49 }
 0x4b7   : > { %v3550_v38 = vmul.f32 0.01, %v3504_v53  ;;  %vm3534_vm10 = vcmp.ge.f32.partialorder %v3504_v53, 0.0 }
 0x4b9   : > { %v3566_v0 = vsel %vm3534_vm10, %v3504_v53, %v3550_v38 }
 0x4bc   : > { %v3505_v48 = vpop.f32.mrf.mxu3 }
 0x4bd   : > { %v3506_v34 = vadd.f32 %v9259_v12, %v3505_v48 }
 0x4bf   : > { %vm3535_vm11 = vcmp.ge.f32.partialorder %v3506_v34, 0.0  ;;  %v3551_v3 = vmul.f32 0.01, %v3506_v34 }
 0x4c1   : > { %v3567_v43 = vsel %vm3535_vm11, %v3506_v34, %v3551_v3 }
 0x4c2   : > { %v3579_v41 = vpack.c.bf16 %v3567_v43, %v3566_v0 }
 0x4c4   : > { %v3508_v54 = vpop.f32.mrf.mxu3  ;;  %6937 = vmatmul.msk.bf16.gmra.mxu0 %vm3596_vm5, %v3579_v41 }
 0x4c5   : > { %v3509_v30 = vadd.f32 %v9259_v12, %v3508_v54 }
 0x4c7   : > { %v3552_v55 = vmul.f32 0.01, %v3509_v30  ;;  %vm3536_vm12 = vcmp.ge.f32.partialorder %v3509_v30, 0.0 }
 0x4c9   : > { %v3568_v20 = vsel %vm3536_vm12, %v3509_v30, %v3552_v55 }
 0x4cc   : > { %v3510_v33 = vpop.f32.mrf.mxu3 }
 0x4cd   : > { %v3511_v40 = vadd.f32 %v9259_v12, %v3510_v33 }
 0x4cf   : > { %vm3537_vm13 = vcmp.ge.f32.partialorder %v3511_v40, 0.0  ;;  %v3553_v1 = vmul.f32 0.01, %v3511_v40 }
 0x4d1   : > { %v3569_v15 = vsel %vm3537_vm13, %v3511_v40, %v3553_v1 }
 0x4d2   : > { %v3580_v5 = vpack.c.bf16 %v3569_v15, %v3568_v20 }
 0x4d4   : > { %v3513_v32 = vpop.f32.mrf.mxu3  ;;  %6938 = vmatmul.msk.bf16.gmra.mxu0 %vm3596_vm5, %v3580_v5 }
 0x4d5   : > { %v3514_v51 = vadd.f32 %v9259_v12, %v3513_v32 }
 0x4d7   : > { %v3554_v39 = vmul.f32 0.01, %v3514_v51  ;;  %vm3538_vm14 = vcmp.ge.f32.partialorder %v3514_v51, 0.0 }
 0x4d9   : > { %v3570_v17 = vsel %vm3538_vm14, %v3514_v51, %v3554_v39  ;;  %v7383_v51 = vld [vmem:[%s10252_s18] sm:$0xff] }
 0x4da   : > { %3926 = vmatpush.bf16.msrb.mxu2 %v7383_v51 }
 0x4dc   : > { %v3515_v31 = vpop.f32.mrf.mxu3 }
 0x4dd   : > { %v3516_v37 = vadd.f32 %v9259_v12, %v3515_v31 }
 0x4df   : > { %vm3539_vm15 = vcmp.ge.f32.partialorder %v3516_v37, 0.0  ;;  %v3555_v16 = vmul.f32 0.01, %v3516_v37 }
 0x4e1   : > { %v3571_v8 = vsel %vm3539_vm15, %v3516_v37, %v3555_v16 }
 0x4e2   : > { %v3581_v6 = vpack.c.bf16 %v3571_v8, %v3570_v17 }
 0x4e4   : > { %v3518_v2 = vpop.f32.mrf.mxu3  ;;  %6939 = vmatmul.msk.bf16.gmra.mxu0 %vm3596_vm5, %v3581_v6 }
 0x4e5   : > { %v3519_v26 = vadd.f32 %v9259_v12, %v3518_v2 }
 0x4e7   : > { %v3556_v45 = vmul.f32 0.01, %v3519_v26  ;;  %vm3540_vm0 = vcmp.ge.f32.partialorder %v3519_v26, 0.0 }
 0x4e9   : > { %v3572_v52 = vsel %vm3540_vm0, %v3519_v26, %v3556_v45 }
 0x4ec   : > { %v3520_v21 = vpop.f32.mrf.mxu3 }
 0x4ed   : > { %v3521_v56 = vadd.f32 %v9259_v12, %v3520_v21 }
 0x4ef   : > { %vm3541_vm1 = vcmp.ge.f32.partialorder %v3521_v56, 0.0  ;;  %v3557_v27 = vmul.f32 0.01, %v3521_v56 }
 0x4f1   : > { %v3573_v36 = vsel %vm3541_vm1, %v3521_v56, %v3557_v27 }
 0x4f2   : > { %v3582_v9 = vpack.c.bf16 %v3573_v36, %v3572_v52 }
 0x4f4   : > { %v3523_v63 = vpop.f32.mrf.mxu3  ;;  %6940 = vmatmul.msk.bf16.gmra.mxu0 %vm3596_vm5, %v3582_v9 }
 0x4f5   : > { %v3524_v46 = vadd.f32 %v9259_v12, %v3523_v63 }
 0x4f7   : > { %v3558_v60 = vmul.f32 0.01, %v3524_v46  ;;  %vm3542_vm3 = vcmp.ge.f32.partialorder %v3524_v46, 0.0 }
 0x4f9   : > { %v3574_v57 = vsel %vm3542_vm3, %v3524_v46, %v3558_v60 }
 0x4fc   : > { %v3525_v11 = vpop.f32.mrf.mxu3 }
 0x4fd   : > { %v3526_v23 = vadd.f32 %v9259_v12, %v3525_v11 }
 0x4ff   : > { %vm3543_vm4 = vcmp.ge.f32.partialorder %v3526_v23, 0.0  ;;  %v3559_v47 = vmul.f32 0.01, %v3526_v23 }
 0x501   : > { %v3575_v18 = vsel %vm3543_vm4, %v3526_v23, %v3559_v47 }
 0x502   : > { %v3583_v10 = vpack.c.bf16 %v3575_v18, %v3574_v57 }
 0x504   : > { %6941 = vmatmul.msk.bf16.gmra.mxu0 %vm3596_vm5, %v3583_v10 }
 0x511   : > { %v3630_v22 = vpop.f32.mrf.mxu0 }
 0x512   : > { %v3631_v12 = vadd.f32 %v9294_v50, %v3630_v22 }
 0x514   : > { %v3686_v25 = vmul.f32 0.01, %v3631_v12  ;;  %vm3670_vm6 = vcmp.ge.f32.partialorder %v3631_v12, 0.0 }
 0x516   : > { %v3702_v29 = vsel %vm3670_vm6, %v3631_v12, %v3686_v25 }
 0x519   : > { %v3632_v59 = vpop.f32.mrf.mxu0 }
 0x51a   : > { %v3633_v61 = vadd.f32 %v9294_v50, %v3632_v59 }
 0x51c   : > { %vm3671_vm7 = vcmp.ge.f32.partialorder %v3633_v61, 0.0  ;;  %v3687_v62 = vmul.f32 0.01, %v3633_v61 }
 0x51e   : > { %v3703_v14 = vsel %vm3671_vm7, %v3633_v61, %v3687_v62 }
 0x51f   : > { %v3718_v28 = vpack.c.bf16 %v3703_v14, %v3702_v29 }
 0x521   : > { %v3635_v58 = vpop.f32.mrf.mxu0  ;;  %6950 = vmatmul.msk.bf16.vlgmr.msrb.gmra.mxu1 %vm3305_vm2, %v3718_v28 }
 0x522   : > { %v3636_v35 = vadd.f32 %v9294_v50, %v3635_v58 }
 0x524   : > { %v3688_v42 = vmul.f32 0.01, %v3636_v35  ;;  %vm3672_vm5 = vcmp.ge.f32.partialorder %v3636_v35, 0.0 }
 0x526   : > { %v3704_v4 = vsel %vm3672_vm5, %v3636_v35, %v3688_v42 }
 0x529   : > { %v3637_v19 = vpop.f32.mrf.mxu0 }
 0x52a   : > { %v3638_v24 = vadd.f32 %v9294_v50, %v3637_v19  ;;  %v9326_v19 = vld [vmem:[%s10251_s17] ss:$0 sm:$0xff] }
 0x52c   : > { %vm3673_vm8 = vcmp.ge.f32.partialorder %v3638_v24, 0.0  ;;  %v3689_v7 = vmul.f32 0.01, %v3638_v24 }
 0x52e   : > { %v3705_v49 = vsel %vm3673_vm8, %v3638_v24, %v3689_v7  ;;  %v7088_v24 = vld [vmem:[#allocation6 + $0xe0] sm:$0xf]  ;;  %v7415_v7 = vld [vmem:[#allocation6 + $0xec] sm:$0xf0] }
 0x52f   : > { %v3719_v53 = vpack.c.bf16 %v3705_v49, %v3704_v4  ;;  %v7089_v4 = vor.u32 %v7415_v7, %v7088_v24  ;;  %v7408_v24 = vld [vmem:[#allocation6 + $0xb4] sm:$0xf0] }
 0x531   : > { %v3640_v48 = vpop.f32.mrf.mxu0  ;;  %6951 = vmatmul.msk.bf16.gmra.mxu1 %vm3305_vm2, %v3719_v53  ;;  %4226 = vmatpush.bf16.msra.mxu3 %v7089_v4 }
 0x532   : > { %v3641_v38 = vadd.f32 %v9294_v50, %v3640_v48 }
 0x534   : > { %v3690_v3 = vmul.f32 0.01, %v3641_v38  ;;  %vm3674_vm9 = vcmp.ge.f32.partialorder %v3641_v38, 0.0 }
 0x536   : > { %v3706_v41 = vsel %vm3674_vm9, %v3641_v38, %v3690_v3 }
 0x539   : > { %v3642_v34 = vpop.f32.mrf.mxu0 }
 0x53a   : > { %v3643_v0 = vadd.f32 %v9294_v50, %v3642_v34 }
 0x53c   : > { %vm3675_vm10 = vcmp.ge.f32.partialorder %v3643_v0, 0.0  ;;  %v3691_v43 = vmul.f32 0.01, %v3643_v0 }
 0x53e   : > { %v3707_v44 = vsel %vm3675_vm10, %v3643_v0, %v3691_v43  ;;  %v7414_v0 = vld [vmem:[#allocation6 + $0xec] sm:$0xf]  ;;  %v7098_v43 = vld [vmem:[#allocation6 + $0xf8] sm:$0xf0] }
 0x53f   : > { %v3720_v54 = vpack.c.bf16 %v3707_v44, %v3706_v41  ;;  %v7101_v41 = vor.u32 %v7414_v0, %v7098_v43  ;;  %v7402_v0 = vld [vmem:[#allocation6 + $0x8c] sm:$0xf]  ;;  %v7050_v43 = vld [vmem:[#allocation6 + $0x98] sm:$0xf0] }
 0x541   : > { %v3645_v30 = vpop.f32.mrf.mxu0  ;;  %6952 = vmatmul.msk.bf16.gmra.mxu1 %vm3305_vm2, %v3720_v54  ;;  %4373 = vmatpush.bf16.msra.mxu2 %v7101_v41  ;;  %v7053_v41 = vor.u32 %v7402_v0, %v7050_v43 }
 0x542   : > { %v3646_v33 = vadd.f32 %v9294_v50, %v3645_v30  ;;  %v7413_v30 = vld [vmem:[#allocation6 + $0xe4] sm:$0xf] }
 0x544   : > { %v3692_v40 = vmul.f32 0.01, %v3646_v33  ;;  %vm3676_vm11 = vcmp.ge.f32.partialorder %v3646_v33, 0.0 }
 0x546   : > { %v3708_v15 = vsel %vm3676_vm11, %v3646_v33, %v3692_v40  ;;  %v7090_v33 = vld [vmem:[#allocation6 + $0xf0] sm:$0xf0] }
 0x547   : > { %v7093_v40 = vor.u32 %v7413_v30, %v7090_v33  ;;  %v7401_v30 = vld [vmem:[#allocation6 + $0x84] sm:$0xf]  ;;  %v7042_v33 = vld [vmem:[#allocation6 + $0x90] sm:$0xf0] }
 0x549   : > { %v3647_v55 = vpop.f32.mrf.mxu0  ;;  %4275 = vmatpush.bf16.msra.mxu0 %v7093_v40  ;;  %v7045_v40 = vor.u32 %v7401_v30, %v7042_v33 }
 0x54a   : > { %v3648_v1 = vadd.f32 %v9294_v50, %v3647_v55  ;;  %v7072_v55 = vld [vmem:[#allocation6 + $0xc0] sm:$0xf] }
 0x54c   : > { %vm3677_vm12 = vcmp.ge.f32.partialorder %v3648_v1, 0.0  ;;  %v3693_v20 = vmul.f32 0.01, %v3648_v1 }
 0x54e   : > { %v3709_v5 = vsel %vm3677_vm12, %v3648_v1, %v3693_v20  ;;  %v7411_v1 = vld [vmem:[#allocation6 + $0xcc] sm:$0xf0]  ;;  %v7096_v20 = vld [vmem:[#allocation6 + $0xe8] sm:$0xf] }
 0x54f   : > { %v3721_v32 = vpack.c.bf16 %v3709_v5, %v3708_v15  ;;  %v7416_v15 = vld [vmem:[#allocation6 + $0xf4] sm:$0xf0]  ;;  %v7073_v5 = vor.u32 %v7411_v1, %v7072_v55  ;;  %v7024_v55 = vld [vmem:[#allocation6 + $0x60] sm:$0xf]  ;;  %v7399_v1 = vld [vmem:[#allocation6 + $0x6c] sm:$0xf0] }
 0x551   : > { %v3650_v31 = vpop.f32.mrf.mxu0  ;;  %6953 = vmatmul.msk.bf16.gmra.mxu1 %vm3305_vm2, %v3721_v32  ;;  %v7097_v32 = vor.u32 %v7416_v15, %v7096_v20  ;;  %4227 = vmatpush.bf16.msra.mxu3 %v7073_v5  ;;  %v7048_v20 = vld [vmem:[#allocation6 + $0x88] sm:$0xf]  ;;  %v7404_v15 = vld [vmem:[#allocation6 + $0x94] sm:$0xf0]  ;;  %v7025_v5 = vor.u32 %v7399_v1, %v7024_v55 }
 0x552   : > { %v3651_v39 = vadd.f32 %v9294_v50, %v3650_v31 }
 0x553   : > { %4324 = vmatpush.bf16.msra.mxu1 %v7097_v32  ;;  %v7049_v32 = vor.u32 %v7404_v15, %v7048_v20  ;;  %v6976_v20 = vld [vmem:[#allocation6] sm:$0xf]  ;;  %v7387_v15 = vld [vmem:[#allocation6 + $0xc] sm:$0xf0] }
 0x554   : > { %v3694_v16 = vmul.f32 0.01, %v3651_v39  ;;  %vm3678_vm13 = vcmp.ge.f32.partialorder %v3651_v39, 0.0 }
 0x556   : > { %v3710_v6 = vsel %vm3678_vm13, %v3651_v39, %v3694_v16 }
 0x559   : > { %v3652_v37 = vpop.f32.mrf.mxu0 }
 0x55a   : > { %v3653_v17 = vadd.f32 %v9294_v50, %v3652_v37 }
 0x55c   : > { %vm3679_vm14 = vcmp.ge.f32.partialorder %v3653_v17, 0.0  ;;  %v3695_v8 = vmul.f32 0.01, %v3653_v17 }
 0x55e   : > { %v3711_v2 = vsel %vm3679_vm14, %v3653_v17, %v3695_v8 }
 0x55f   : > { %v3722_v26 = vpack.c.bf16 %v3711_v2, %v3710_v6  ;;  %v7410_v6 = vld [vmem:[#allocation6 + $0xcc] sm:$0xf]  ;;  %v7082_v2 = vld [vmem:[#allocation6 + $0xd8] sm:$0xf0] }
 0x561   : > { %v3655_v21 = vpop.f32.mrf.mxu0  ;;  %6954 = vmatmul.msk.bf16.gmra.mxu1 %vm3305_vm2, %v3722_v26  ;;  %v7085_v26 = vor.u32 %v7410_v6, %v7082_v2  ;;  %v7398_v6 = vld [vmem:[#allocation6 + $0x6c] sm:$0xf]  ;;  %v7034_v2 = vld [vmem:[#allocation6 + $0x78] sm:$0xf0] }
 0x562   : > { %v3656_v45 = vadd.f32 %v9294_v50, %v3655_v21 }
 0x563   : > { %4374 = vmatpush.bf16.msra.mxu2 %v7085_v26  ;;  %v7037_v26 = vor.u32 %v7398_v6, %v7034_v2 }
 0x564   : > { %v3696_v27 = vmul.f32 0.01, %v3656_v45  ;;  %vm3680_vm15 = vcmp.ge.f32.partialorder %v3656_v45, 0.0 }
 0x566   : > { %v3712_v9 = vsel %vm3680_vm15, %v3656_v45, %v3696_v27  ;;  %v7074_v27 = vld [vmem:[#allocation6 + $0xd0] sm:$0xf0] }
 0x569   : > { %v3657_v56 = vpop.f32.mrf.mxu0 }
 0x56a   : > { %v3658_v52 = vadd.f32 %v9294_v50, %v3657_v56  ;;  %v7409_v56 = vld [vmem:[#allocation6 + $0xc4] sm:$0xf] }
 0x56c   : > { %vm3681_vm0 = vcmp.ge.f32.partialorder %v3658_v52, 0.0  ;;  %v3697_v36 = vmul.f32 0.01, %v3658_v52 }
 0x56e   : > { %v3713_v63 = vsel %vm3681_vm0, %v3658_v52, %v3697_v36  ;;  %v7056_v52 = vld [vmem:[#allocation6 + $0xa0] sm:$0xf]  ;;  %v7077_v36 = vor.u32 %v7409_v56, %v7074_v27  ;;  %v7397_v56 = vld [vmem:[#allocation6 + $0x64] sm:$0xf]  ;;  %v7026_v27 = vld [vmem:[#allocation6 + $0x70] sm:$0xf0] }
 0x56f   : > { %v3723_v46 = vpack.c.bf16 %v3713_v63, %v3712_v9  ;;  %v7407_v9 = vld [vmem:[#allocation6 + $0xac] sm:$0xf0]  ;;  %v7080_v63 = vld [vmem:[#allocation6 + $0xc8] sm:$0xf] }
 0x570   : > { %4276 = vmatpush.bf16.msra.mxu0 %v7077_v36  ;;  %v7029_v36 = vor.u32 %v7397_v56, %v7026_v27  ;;  %v6984_v56 = vld [vmem:[#allocation6 + $0x8] sm:$0xf] }
 0x571   : > { %v3660_v11 = vpop.f32.mrf.mxu0  ;;  %6955 = vmatmul.msk.bf16.gmra.mxu1 %vm3305_vm2, %v3723_v46  ;;  %v7412_v46 = vld [vmem:[#allocation6 + $0xd4] sm:$0xf0] }
 0x572   : > { %v3661_v60 = vadd.f32 %v9294_v50, %v3660_v11  ;;  %v7057_v11 = vor.u32 %v7407_v9, %v7056_v52  ;;  %v7008_v52 = vld [vmem:[#allocation6 + $0x40] sm:$0xf]  ;;  %v7395_v9 = vld [vmem:[#allocation6 + $0x4c] sm:$0xf0] }
 0x574   : > { %v3698_v47 = vmul.f32 0.01, %v3661_v60  ;;  %vm3682_vm1 = vcmp.ge.f32.partialorder %v3661_v60, 0.0  ;;  %4228 = vmatpush.bf16.msra.mxu3 %v7057_v11  ;;  %v7009_v11 = vor.u32 %v7395_v9, %v7008_v52  ;;  %v9355_v9 = vld [vmem:[%s10348_s4] ss:$0 sm:$0xff]  ;;  %s10099_s4 = scalar_lea.vmem %s10381_s0, %s6319_s25 }
 0x576   : > { %v3714_v10 = vsel %vm3682_vm1, %v3661_v60, %v3698_v47  ;;  %v7081_v60 = vor.u32 %v7412_v46, %v7080_v63  ;;  %v7032_v63 = vld [vmem:[#allocation6 + $0x68] sm:$0xf]  ;;  %v7400_v46 = vld [vmem:[#allocation6 + $0x74] sm:$0xf0] }
 0x578   : > { %4325 = vmatpush.bf16.msra.mxu1 %v7081_v60  ;;  %v7033_v60 = vor.u32 %v7400_v46, %v7032_v63  ;;  %v7424_v46 = vld [vmem:[#allocation7 + $0x38] sm:$0xff] }
 0x579   : > { %v3662_v23 = vpop.f32.mrf.mxu0 }
 0x57a   : > { %v3663_v57 = vadd.f32 %v9294_v50, %v3662_v23 }
 0x57c   : > { %vm3683_vm3 = vcmp.ge.f32.partialorder %v3663_v57, 0.0  ;;  %v3699_v18 = vmul.f32 0.01, %v3663_v57 }
 0x57e   : > { %v3715_v13 = vsel %vm3683_vm3, %v3663_v57, %v3699_v18 }
 0x57f   : > { %v3724_v22 = vpack.c.bf16 %v3715_v13, %v3714_v10 }
 0x581   : > { %v3665_v12 = vpop.f32.mrf.mxu0  ;;  %6956 = vmatmul.msk.bf16.gmra.mxu1 %vm3305_vm2, %v3724_v22 }
 0x582   : > { %v3666_v59 = vadd.f32 %v9294_v50, %v3665_v12  ;;  %v7406_v12 = vld [vmem:[#allocation6 + $0xac] sm:$0xf] }
 0x584   : > { %v3700_v61 = vmul.f32 0.01, %v3666_v59  ;;  %vm3684_vm4 = vcmp.ge.f32.partialorder %v3666_v59, 0.0 }
 0x586   : > { %v3716_v14 = vsel %vm3684_vm4, %v3666_v59, %v3700_v61  ;;  %v7066_v59 = vld [vmem:[#allocation6 + $0xb8] sm:$0xf0] }
 0x589   : > { %v3667_v25 = vpop.f32.mrf.mxu0 }
 0x58a   : > { %v3668_v62 = vadd.f32 %v9294_v50, %v3667_v25  ;;  %v7069_v25 = vor.u32 %v7406_v12, %v7066_v59  ;;  %v7394_v12 = vld [vmem:[#allocation6 + $0x4c] sm:$0xf]  ;;  %v7018_v59 = vld [vmem:[#allocation6 + $0x58] sm:$0xf0] }
 0x58c   : > { %vm3685_vm6 = vcmp.ge.f32.partialorder %v3668_v62, 0.0  ;;  %v3701_v29 = vmul.f32 0.01, %v3668_v62  ;;  %4375 = vmatpush.bf16.msra.mxu2 %v7069_v25  ;;  %v7021_v25 = vor.u32 %v7394_v12, %v7018_v59  ;;  %v7440_v12 = vld [vmem:[#allocation7 + $0xb8] sm:$0xff] }
 0x58e   : > { %v3717_v28 = vsel %vm3685_vm6, %v3668_v62, %v3701_v29  ;;  %v7405_v29 = vld [vmem:[#allocation6 + $0xa4] sm:$0xf] }
 0x58f   : > { %v3725_v58 = vpack.c.bf16 %v3717_v28, %v3716_v14  ;;  %v7058_v14 = vld [vmem:[#allocation6 + $0xb0] sm:$0xf0]  ;;  %v7040_v28 = vld [vmem:[#allocation6 + $0x80] sm:$0xf] }
 0x590   : > { %4376 = vmatpush.bf16.msra.mxu2 %v7053_v41 }
 0x591   : > { %6957 = vmatmul.msk.bf16.gmra.mxu1 %vm3305_vm2, %v3725_v58  ;;  %v7061_v58 = vor.u32 %v7405_v29, %v7058_v14  ;;  %v7010_v29 = vld [vmem:[#allocation6 + $0x50] sm:$0xf0]  ;;  %v6992_v14 = vld [vmem:[#allocation6 + $0x20] sm:$0xf] }
 0x593   : > { %4277 = vmatpush.bf16.msra.mxu0 %v7061_v58  ;;  %v7391_v58 = vld [vmem:[#allocation6 + $0x2c] sm:$0xf0] }
 0x594   : > { %4377 = vmatpush.bf16.msra.mxu2 %v7037_v26 }
 0x597   : > { %4278 = vmatpush.bf16.msra.mxu0 %v7045_v40 }
 0x598   : > { %4378 = vmatpush.bf16.msra.mxu2 %v7021_v25 }
 0x59b   : > { %4279 = vmatpush.bf16.msra.mxu0 %v7029_v36 }
 0x59e   : > { %v3779_v35 = vpop.f32.mrf.mxu1 }
 0x59f   : > { %v3780_v42 = vadd.f32 %v9326_v19, %v3779_v35  ;;  %v7403_v35 = vld [vmem:[#allocation6 + $0x8c] sm:$0xf0] }
 0x5a0   : > { %v7041_v7 = vor.u32 %v7403_v35, %v7040_v28  ;;  %v7016_v35 = vld [vmem:[#allocation6 + $0x48] sm:$0xf] }
 0x5a1   : > { %v3835_v49 = vmul.f32 0.01, %v3780_v42  ;;  %vm3819_vm7 = vcmp.ge.f32.partialorder %v3780_v42, 0.0 }
 0x5a2   : > { %4229 = vmatpush.bf16.msra.mxu3 %v7041_v7 }
 0x5a3   : > { %v3851_v38 = vsel %vm3819_vm7, %v3780_v42, %v3835_v49  ;;  %v7064_v42 = vld [vmem:[#allocation6 + $0xa8] sm:$0xf] }
 0x5a4   : > { %v7065_v4 = vor.u32 %v7408_v24, %v7064_v42  ;;  %v7396_v42 = vld [vmem:[#allocation6 + $0x54] sm:$0xf0]  ;;  %v6993_v24 = vor.u32 %v7391_v58, %v6992_v14 }
 0x5a5   : > { %v7017_v7 = vor.u32 %v7396_v42, %v7016_v35 }
 0x5a6   : > { %v3781_v50 = vpop.f32.mrf.mxu1  ;;  %4326 = vmatpush.bf16.msra.mxu1 %v7065_v4  ;;  %4230 = vmatpush.bf16.msra.mxu3 %v7025_v5  ;;  %v7390_v4 = vld [vmem:[#allocation6 + $0x2c] sm:$0xf]  ;;  %v7000_v5 = vld [vmem:[#allocation6 + $0x28] sm:$0xf] }
 0x5a7   : > { %v3782_v53 = vadd.f32 %v9326_v19, %v3781_v50 }
 0x5a9   : > { %vm3820_vm5 = vcmp.ge.f32.partialorder %v3782_v53, 0.0  ;;  %v3836_v48 = vmul.f32 0.01, %v3782_v53 }
 0x5aa   : > { %4327 = vmatpush.bf16.msra.mxu1 %v7049_v32  ;;  %4231 = vmatpush.bf16.msra.mxu3 %v7009_v11 }
 0x5ab   : > { %v3852_v34 = vsel %vm3820_vm5, %v3782_v53, %v3836_v48 }
 0x5ac   : > { %v3867_v3 = vpack.c.bf16 %v3852_v34, %v3851_v38 }
 0x5ae   : > { %v3784_v44 = vpop.f32.mrf.mxu1  ;;  %6966 = vmatmul.msk.bf16.vlgmr.msrb.gmra.mxu2 %vm3305_vm2, %v3867_v3  ;;  %4328 = vmatpush.bf16.msra.mxu1 %v7033_v60 }
 0x5af   : > { %v3785_v54 = vadd.f32 %v9326_v19, %v3784_v44  ;;  %4232 = vmatpush.bf16.msra.mxu3 %v6993_v24  ;;  %v7447_v24 = vld [vmem:[#allocation7 + $0xf0] sm:$0xff] }
 0x5b1   : > { %v3837_v31 = vmul.f32 0.01, %v3785_v54  ;;  %vm3821_vm8 = vcmp.ge.f32.partialorder %v3785_v54, 0.0 }
 0x5b2   : > { %4329 = vmatpush.bf16.msra.mxu1 %v7017_v7  ;;  %v7431_v7 = vld [vmem:[#allocation7 + $0x70] sm:$0xff] }
 0x5b3   : > { %v3853_v16 = vsel %vm3821_vm8, %v3785_v54, %v3837_v31 }
 0x5b6   : > { %v3786_v51 = vpop.f32.mrf.mxu1 }
 0x5b7   : > { %v3787_v39 = vadd.f32 %v9326_v19, %v3786_v51 }
 0x5b9   : > { %vm3822_vm9 = vcmp.ge.f32.partialorder %v3787_v39, 0.0  ;;  %v3838_v37 = vmul.f32 0.01, %v3787_v39 }
 0x5bb   : > { %v3854_v17 = vsel %vm3822_vm9, %v3787_v39, %v3838_v37 }
 0x5bc   : > { %v3868_v8 = vpack.c.bf16 %v3854_v17, %v3853_v16 }
 0x5be   : > { %v3789_v21 = vpop.f32.mrf.mxu1  ;;  %6967 = vmatmul.msk.bf16.gmra.mxu2 %vm3305_vm2, %v3868_v8 }
 0x5bf   : > { %v3790_v45 = vadd.f32 %v9326_v19, %v3789_v21 }
 0x5c1   : > { %v3839_v47 = vmul.f32 0.01, %v3790_v45  ;;  %vm3823_vm10 = vcmp.ge.f32.partialorder %v3790_v45, 0.0 }
 0x5c3   : > { %v3855_v10 = vsel %vm3823_vm10, %v3790_v45, %v3839_v47 }
 0x5c6   : > { %v3791_v23 = vpop.f32.mrf.mxu1 }
 0x5c7   : > { %v3792_v57 = vadd.f32 %v9326_v19, %v3791_v23 }
 0x5c9   : > { %vm3824_vm11 = vcmp.ge.f32.partialorder %v3792_v57, 0.0  ;;  %v3840_v18 = vmul.f32 0.01, %v3792_v57 }
 0x5cb   : > { %v3856_v13 = vsel %vm3824_vm11, %v3792_v57, %v3840_v18 }
 0x5cc   : > { %v3869_v22 = vpack.c.bf16 %v3856_v13, %v3855_v10 }
 0x5ce   : > { %v3794_v61 = vpop.f32.mrf.mxu1  ;;  %6968 = vmatmul.msk.bf16.gmra.mxu2 %vm3305_vm2, %v3869_v22 }
 0x5cf   : > { %v3795_v62 = vadd.f32 %v9326_v19, %v3794_v61 }
 0x5d1   : > { %v3841_v49 = vmul.f32 0.01, %v3795_v62  ;;  %vm3825_vm12 = vcmp.ge.f32.partialorder %v3795_v62, 0.0 }
 0x5d3   : > { %v3857_v38 = vsel %vm3825_vm12, %v3795_v62, %v3841_v49  ;;  %v7393_v62 = vld [vmem:[#allocation6 + $0x44] sm:$0xf] }
 0x5d4   : > { %v7013_v28 = vor.u32 %v7393_v62, %v7010_v29  ;;  %v7389_v49 = vld [vmem:[#allocation6 + $0x24] sm:$0xf] }
 0x5d6   : > { %v3796_v50 = vpop.f32.mrf.mxu1  ;;  %4280 = vmatpush.bf16.msra.mxu0 %v7013_v28 }
 0x5d7   : > { %v3797_v53 = vadd.f32 %v9326_v19, %v3796_v50  ;;  %v7002_v50 = vld [vmem:[#allocation6 + $0x38] sm:$0xf0] }
 0x5d9   : > { %vm3826_vm13 = vcmp.ge.f32.partialorder %v3797_v53, 0.0  ;;  %v3842_v48 = vmul.f32 0.01, %v3797_v53 }
 0x5db   : > { %v3858_v34 = vsel %vm3826_vm13, %v3797_v53, %v3842_v48  ;;  %v7005_v53 = vor.u32 %v7390_v4, %v7002_v50  ;;  %v6994_v48 = vld [vmem:[#allocation6 + $0x30] sm:$0xf0] }
 0x5dc   : > { %v3870_v3 = vpack.c.bf16 %v3858_v34, %v3857_v38  ;;  %v6997_v38 = vor.u32 %v7389_v49, %v6994_v48  ;;  %v7439_v4 = vld [vmem:[#allocation7 + $0xb0] sm:$0xff] }
 0x5dd   : > { %4379 = vmatpush.bf16.msra.mxu2 %v7005_v53  ;;  %v7422_v53 = vld [vmem:[#allocation7 + $0x28] sm:$0xff] }
 0x5de   : > { %v3799_v44 = vpop.f32.mrf.mxu1  ;;  %6969 = vmatmul.msk.bf16.gmra.mxu2 %vm3305_vm2, %v3870_v3  ;;  %4281 = vmatpush.bf16.msra.mxu0 %v6997_v38 }
 0x5df   : > { %v3800_v54 = vadd.f32 %v9326_v19, %v3799_v44 }
 0x5e1   : > { %v3843_v31 = vmul.f32 0.01, %v3800_v54  ;;  %vm3827_vm14 = vcmp.ge.f32.partialorder %v3800_v54, 0.0 }
 0x5e3   : > { %v3859_v16 = vsel %vm3827_vm14, %v3800_v54, %v3843_v31  ;;  %v7392_v31 = vld [vmem:[#allocation6 + $0x34] sm:$0xf0] }
 0x5e6   : > { %v3801_v51 = vpop.f32.mrf.mxu1 }
 0x5e7   : > { %v3802_v39 = vadd.f32 %v9326_v19, %v3801_v51  ;;  %v6977_v51 = vor.u32 %v7387_v15, %v6976_v20 }
 0x5e9   : > { %vm3828_vm15 = vcmp.ge.f32.partialorder %v3802_v39, 0.0  ;;  %v3844_v37 = vmul.f32 0.01, %v3802_v39  ;;  %4233 = vmatpush.bf16.msra.mxu3 %v6977_v51 }
 0x5eb   : > { %v3860_v17 = vsel %vm3828_vm15, %v3802_v39, %v3844_v37  ;;  %v7386_v39 = vld [vmem:[#allocation6 + $0xc] sm:$0xf]  ;;  %v6986_v37 = vld [vmem:[#allocation6 + $0x18] sm:$0xf0] }
 0x5ec   : > { %v3871_v8 = vpack.c.bf16 %v3860_v17, %v3859_v16  ;;  %v7001_v16 = vor.u32 %v7392_v31, %v7000_v5  ;;  %v6989_v17 = vor.u32 %v7386_v39, %v6986_v37  ;;  %v7445_v39 = vld [vmem:[#allocation7 + $0xe0] sm:$0xff] }
 0x5ed   : > { %4906 = vmatpush.bf16.msrb.mxu3 %v7424_v46  ;;  %v7429_v37 = vld [vmem:[#allocation7 + $0x60] sm:$0xff] }
 0x5ee   : > { %v3804_v21 = vpop.f32.mrf.mxu1  ;;  %6970 = vmatmul.msk.bf16.gmra.mxu2 %vm3305_vm2, %v3871_v8  ;;  %4330 = vmatpush.bf16.msra.mxu1 %v7001_v16  ;;  %v7437_v16 = vld [vmem:[#allocation7 + $0xa0] sm:$0xff] }
 0x5ef   : > { %v3805_v45 = vadd.f32 %v9326_v19, %v3804_v21  ;;  %4380 = vmatpush.bf16.msra.mxu2 %v6989_v17  ;;  %v7385_v21 = vld [vmem:[#allocation6 + $0x4] sm:$0xf] }
 0x5f1   : > { %v3845_v47 = vmul.f32 0.01, %v3805_v45  ;;  %vm3829_vm0 = vcmp.ge.f32.partialorder %v3805_v45, 0.0 }
 0x5f3   : > { %v3861_v10 = vsel %vm3829_vm0, %v3805_v45, %v3845_v47  ;;  %v6978_v45 = vld [vmem:[#allocation6 + $0x10] sm:$0xf0] }
 0x5f4   : > { %v6981_v27 = vor.u32 %v7385_v21, %v6978_v45 }
 0x5f6   : > { %v3806_v23 = vpop.f32.mrf.mxu1  ;;  %4282 = vmatpush.bf16.msra.mxu0 %v6981_v27 }
 0x5f7   : > { %v3807_v57 = vadd.f32 %v9326_v19, %v3806_v23 }
 0x5f9   : > { %vm3830_vm1 = vcmp.ge.f32.partialorder %v3807_v57, 0.0  ;;  %v3846_v18 = vmul.f32 0.01, %v3807_v57 }
 0x5fb   : > { %v3862_v13 = vsel %vm3830_vm1, %v3807_v57, %v3846_v18 }
 0x5fc   : > { %v3872_v22 = vpack.c.bf16 %v3862_v13, %v3861_v10  ;;  %v7448_v13 = vld [vmem:[#allocation7 + $0xf8] sm:$0xff] }
 0x5fd   : > { %5053 = vmatpush.bf16.msrb.mxu2 %v7448_v13 }
 0x5fe   : > { %v3809_v61 = vpop.f32.mrf.mxu1  ;;  %6971 = vmatmul.msk.bf16.gmra.mxu2 %vm3305_vm2, %v3872_v22  ;;  %v7432_v22 = vld [vmem:[#allocation7 + $0x78] sm:$0xff] }
 0x5ff   : > { %v3810_v34 = vadd.f32 %v9326_v19, %v3809_v61  ;;  %4955 = vmatpush.bf16.msrb.mxu0 %v7432_v22  ;;  %v7423_v61 = vld [vmem:[#allocation7 + $0x30] sm:$0xff] }
 0x600   : > { %4907 = vmatpush.bf16.msrb.mxu3 %v7423_v61 }
 0x601   : > { %v3847_v0 = vmul.f32 0.01, %v3810_v34  ;;  %vm3831_vm3 = vcmp.ge.f32.partialorder %v3810_v34, 0.0  ;;  %5054 = vmatpush.bf16.msrb.mxu2 %v7447_v24 }
 0x603   : > { %v3863_v44 = vsel %vm3831_vm3, %v3810_v34, %v3847_v0  ;;  %4956 = vmatpush.bf16.msrb.mxu0 %v7431_v7 }
 0x604   : > { %4908 = vmatpush.bf16.msrb.mxu3 %v7422_v53  ;;  %v7434_v53 = vld [vmem:[#allocation7 + $0x88] sm:$0xff] }
 0x606   : > { %v3811_v3 = vpop.f32.mrf.mxu1 }
 0x607   : > { %v3812_v43 = vadd.f32 %v9326_v19, %v3811_v3 }
 0x609   : > { %vm3832_vm4 = vcmp.ge.f32.partialorder %v3812_v43, 0.0  ;;  %v3848_v41 = vmul.f32 0.01, %v3812_v43 }
 0x60b   : > { %v3864_v54 = vsel %vm3832_vm4, %v3812_v43, %v3848_v41 }
 0x60c   : > { %v3873_v30 = vpack.c.bf16 %v3864_v54, %v3863_v44  ;;  %v7446_v44 = vld [vmem:[#allocation7 + $0xe8] sm:$0xff] }
 0x60d   : > { %v7430_v54 = vld [vmem:[#allocation7 + $0x68] sm:$0xff]  ;;  %5055 = vmatpush.bf16.msrb.mxu2 %v7446_v44 }
 0x60e   : > { %v3814_v33 = vpop.f32.mrf.mxu1  ;;  %6972 = vmatmul.msk.bf16.gmra.mxu2 %vm3305_vm2, %v3873_v30  ;;  %v7438_v30 = vld [vmem:[#allocation7 + $0xa8] sm:$0xff]  ;;  %4957 = vmatpush.bf16.msrb.mxu0 %v7430_v54  ;;  %v7441_v54 = vld [vmem:[#allocation7 + $0xc0] sm:$0xff] }
 0x60f   : > { %v3815_v55 = vadd.f32 %v9326_v19, %v3814_v33 }
 0x611   : > { %v3849_v40 = vmul.f32 0.01, %v3815_v55  ;;  %vm3833_vm6 = vcmp.ge.f32.partialorder %v3815_v55, 0.0  ;;  %5056 = vmatpush.bf16.msrb.mxu2 %v7445_v39 }
 0x612   : > { %4958 = vmatpush.bf16.msrb.mxu0 %v7429_v37 }
 0x613   : > { %v3865_v6 = vsel %vm3833_vm6, %v3815_v55, %v3849_v40  ;;  %v7421_v40 = vld [vmem:[#allocation7 + $0x20] sm:$0xff] }
 0x614   : > { %4909 = vmatpush.bf16.msrb.mxu3 %v7421_v40 }
 0x616   : > { %v3816_v1 = vpop.f32.mrf.mxu1 }
 0x617   : > { %v3817_v32 = vadd.f32 %v9326_v19, %v3816_v1  ;;  %v7388_v19 = vld [vmem:[#allocation6 + $0x14] sm:$0xf0] }
 0x618   : > { %v6985_v52 = vor.u32 %v7388_v19, %v6984_v56 }
 0x619   : > { %vm3834_vm7 = vcmp.ge.f32.partialorder %v3817_v32, 0.0  ;;  %v3850_v8 = vmul.f32 0.01, %v3817_v32 }
 0x61a   : > { %4331 = vmatpush.bf16.msra.mxu1 %v6985_v52  ;;  %v7444_v52 = vld [vmem:[#allocation7 + $0xd8] sm:$0xff] }
 0x61b   : > { %v3866_v2 = vsel %vm3834_vm7, %v3817_v32, %v3850_v8  ;;  %5057 = vmatpush.bf16.msrb.mxu2 %v7444_v52 }
 0x61c   : > { %v3874_v26 = vpack.c.bf16 %v3866_v2, %v3865_v6  ;;  %v7420_v6 = vld [vmem:[#allocation7 + $0x18] sm:$0xff] }
 0x61d   : > { %4910 = vmatpush.bf16.msrb.mxu3 %v7420_v6 }
 0x61e   : > { %6973 = vmatmul.msk.bf16.gmra.mxu2 %vm3305_vm2, %v3874_v26  ;;  %5004 = vmatpush.bf16.msrb.mxu1 %v7440_v12  ;;  %v7443_v12 = vld [vmem:[#allocation7 + $0xd0] sm:$0xff] }
 0x61f   : > { %5058 = vmatpush.bf16.msrb.mxu2 %v7443_v12 }
 0x622   : > { %5005 = vmatpush.bf16.msrb.mxu1 %v7439_v4 }
 0x626   : > { %5006 = vmatpush.bf16.msrb.mxu1 %v7438_v30 }
 0x62a   : > { %5007 = vmatpush.bf16.msrb.mxu1 %v7437_v16 }
 0x631   : > { %v3928_v36 = vpop.f32.mrf.mxu2 }
 0x632   : > { %v3929_v63 = vadd.f32 %v9355_v9, %v3928_v36  ;;  %v7428_v36 = vld [vmem:[#allocation7 + $0x58] sm:$0xff] }
 0x633   : > { %4959 = vmatpush.bf16.msrb.mxu0 %v7428_v36 }
 0x634   : > { %v3984_v60 = vmul.f32 0.01, %v3929_v63  ;;  %vm3968_vm5 = vcmp.ge.f32.partialorder %v3929_v63, 0.0 }
 0x636   : > { %v4000_v57 = vsel %vm3968_vm5, %v3929_v63, %v3984_v60  ;;  %v7436_v63 = vld [vmem:[#allocation7 + $0x98] sm:$0xff]  ;;  %v7419_v60 = vld [vmem:[#allocation7 + $0x10] sm:$0xff] }
 0x637   : > { %5008 = vmatpush.bf16.msrb.mxu1 %v7436_v63  ;;  %4911 = vmatpush.bf16.msrb.mxu3 %v7419_v60 }
 0x639   : > { %v3930_v11 = vpop.f32.mrf.mxu2 }
 0x63a   : > { %v3931_v23 = vadd.f32 %v9355_v9, %v3930_v11 }
 0x63c   : > { %vm3969_vm8 = vcmp.ge.f32.partialorder %v3931_v23, 0.0  ;;  %v3985_v47 = vmul.f32 0.01, %v3931_v23 }
 0x63e   : > { %v4001_v18 = vsel %vm3969_vm8, %v3931_v23, %v3985_v47 }
 0x63f   : > { %v4016_v10 = vpack.c.bf16 %v4001_v18, %v4000_v57 }
 0x641   : > { %v3933_v59 = vpop.f32.mrf.mxu2  ;;  %4234 = vmatmul.bf16.vlgmr.msra.gmra.mxu3 %v4016_v10  ;;  %4283 = vmatmul.bf16.vlgmr.msra.gmra.mxu0 %v4016_v10 }
 0x642   : > { %4332 = vmatmul.bf16.vlgmr.msra.gmra.mxu1 %v4016_v10  ;;  %4381 = vmatmul.bf16.vlgmr.msra.gmra.mxu2 %v4016_v10  ;;  %v3934_v25 = vadd.f32 %v9355_v9, %v3933_v59  ;;  %v7427_v59 = vld [vmem:[#allocation7 + $0x50] sm:$0xff] }
 0x643   : > { %4960 = vmatpush.bf16.msrb.mxu0 %v7427_v59 }
 0x644   : > { %v3986_v29 = vmul.f32 0.01, %v3934_v25  ;;  %vm3970_vm9 = vcmp.ge.f32.partialorder %v3934_v25, 0.0 }
 0x646   : > { %v4002_v58 = vsel %vm3970_vm9, %v3934_v25, %v3986_v29  ;;  %v7435_v25 = vld [vmem:[#allocation7 + $0x90] sm:$0xff]  ;;  %v7442_v29 = vld [vmem:[#allocation7 + $0xc8] sm:$0xff] }
 0x647   : > { %5009 = vmatpush.bf16.msrb.mxu1 %v7435_v25  ;;  %5059 = vmatpush.bf16.msrb.mxu2 %v7442_v29 }
 0x649   : > { %v3935_v62 = vpop.f32.mrf.mxu2 }
 0x64a   : > { %v3936_v14 = vadd.f32 %v9355_v9, %v3935_v62  ;;  %v7418_v62 = vld [vmem:[#allocation7 + $0x8] sm:$0xff] }
 0x64b   : > { %4912 = vmatpush.bf16.msrb.mxu3 %v7418_v62  ;;  %5010 = vmatpush.bf16.msrb.mxu1 %v7434_v53 }
 0x64c   : > { %vm3971_vm10 = vcmp.ge.f32.partialorder %v3936_v14, 0.0  ;;  %v3987_v28 = vmul.f32 0.01, %v3936_v14  ;;  %5060 = vmatpush.bf16.msrb.mxu2 %v7441_v54 }
 0x64e   : > { %v4003_v35 = vsel %vm3971_vm10, %v3936_v14, %v3987_v28  ;;  %v7426_v14 = vld [vmem:[#allocation7 + $0x48] sm:$0xff] }
 0x64f   : > { %v4017_v42 = vpack.c.bf16 %v4003_v35, %v4002_v58  ;;  %4961 = vmatpush.bf16.msrb.mxu0 %v7426_v14 }
 0x651   : > { %v3938_v50 = vpop.f32.mrf.mxu2  ;;  %4239 = vmatmul.bf16.gmra.mxu3 %v4017_v42  ;;  %4288 = vmatmul.bf16.gmra.mxu0 %v4017_v42 }
 0x652   : > { %4337 = vmatmul.bf16.gmra.mxu1 %v4017_v42  ;;  %4386 = vmatmul.bf16.gmra.mxu2 %v4017_v42  ;;  %v3939_v49 = vadd.f32 %v9355_v9, %v3938_v50 }
 0x654   : > { %v3988_v38 = vmul.f32 0.01, %v3939_v49  ;;  %vm3972_vm11 = vcmp.ge.f32.partialorder %v3939_v49, 0.0 }
 0x656   : > { %v4004_v0 = vsel %vm3972_vm11, %v3939_v49, %v3988_v38 }
 0x659   : > { %v3940_v48 = vpop.f32.mrf.mxu2 }
 0x65a   : > { %v3941_v34 = vadd.f32 %v9355_v9, %v3940_v48 }
 0x65c   : > { %vm3973_vm12 = vcmp.ge.f32.partialorder %v3941_v34, 0.0  ;;  %v3989_v3 = vmul.f32 0.01, %v3941_v34 }
 0x65e   : > { %v4005_v43 = vsel %vm3973_vm12, %v3941_v34, %v3989_v3 }
 0x65f   : > { %v4018_v41 = vpack.c.bf16 %v4005_v43, %v4004_v0  ;;  %v7417_v0 = vld [vmem:[#allocation7] sm:$0xff] }
 0x660   : > { %v7425_v43 = vld [vmem:[#allocation7 + $0x40] sm:$0xff]  ;;  %4913 = vmatpush.bf16.msrb.mxu3 %v7417_v0 }
 0x661   : > { %v3943_v33 = vpop.f32.mrf.mxu2  ;;  %4244 = vmatmul.bf16.gmra.mxu3 %v4018_v41  ;;  %4293 = vmatmul.bf16.gmra.mxu0 %v4018_v41 }
 0x662   : > { %4342 = vmatmul.bf16.gmra.mxu1 %v4018_v41  ;;  %4391 = vmatmul.bf16.gmra.mxu2 %v4018_v41  ;;  %v3944_v55 = vadd.f32 %v9355_v9, %v3943_v33  ;;  %v7433_v41 = vld [vmem:[#allocation7 + $0x80] sm:$0xff] }
 0x663   : > { %4962 = vmatpush.bf16.msrb.mxu0 %v7425_v43  ;;  %5011 = vmatpush.bf16.msrb.mxu1 %v7433_v41 }
 0x664   : > { %v3990_v20 = vmul.f32 0.01, %v3944_v55  ;;  %vm3974_vm13 = vcmp.ge.f32.partialorder %v3944_v55, 0.0 }
 0x666   : > { %v4006_v32 = vsel %vm3974_vm13, %v3944_v55, %v3990_v20 }
 0x669   : > { %v3945_v1 = vpop.f32.mrf.mxu2 }
 0x66a   : > { %v3946_v15 = vadd.f32 %v9355_v9, %v3945_v1 }
 0x66c   : > { %vm3975_vm14 = vcmp.ge.f32.partialorder %v3946_v15, 0.0  ;;  %v3991_v5 = vmul.f32 0.01, %v3946_v15 }
 0x66e   : > { %v4007_v51 = vsel %vm3975_vm14, %v3946_v15, %v3991_v5 }
 0x66f   : > { %v4019_v31 = vpack.c.bf16 %v4007_v51, %v4006_v32 }
 0x671   : > { %v3948_v17 = vpop.f32.mrf.mxu2  ;;  %4249 = vmatmul.bf16.gmra.mxu3 %v4019_v31  ;;  %4298 = vmatmul.bf16.gmra.mxu0 %v4019_v31 }
 0x672   : > { %4347 = vmatmul.bf16.gmra.mxu1 %v4019_v31  ;;  %4396 = vmatmul.bf16.gmra.mxu2 %v4019_v31  ;;  %v3949_v8 = vadd.f32 %v9355_v9, %v3948_v17 }
 0x674   : > { %v3992_v26 = vmul.f32 0.01, %v3949_v8  ;;  %vm3976_vm15 = vcmp.ge.f32.partialorder %v3949_v8, 0.0 }
 0x676   : > { %v4008_v56 = vsel %vm3976_vm15, %v3949_v8, %v3992_v26 }
 0x679   : > { %v3950_v2 = vpop.f32.mrf.mxu2 }
 0x67a   : > { %v3951_v21 = vadd.f32 %v9355_v9, %v3950_v2 }
 0x67c   : > { %vm3977_vm0 = vcmp.ge.f32.partialorder %v3951_v21, 0.0  ;;  %v3993_v45 = vmul.f32 0.01, %v3951_v21 }
 0x67e   : > { %v4009_v27 = vsel %vm3977_vm0, %v3951_v21, %v3993_v45 }
 0x67f   : > { %v4020_v19 = vpack.c.bf16 %v4009_v27, %v4008_v56 }
 0x681   : > { %v3953_v46 = vpop.f32.mrf.mxu2  ;;  %4254 = vmatmul.bf16.gmra.mxu3 %v4020_v19  ;;  %4303 = vmatmul.bf16.gmra.mxu0 %v4020_v19 }
 0x682   : > { %4352 = vmatmul.bf16.gmra.mxu1 %v4020_v19  ;;  %4401 = vmatmul.bf16.gmra.mxu2 %v4020_v19  ;;  %v3954_v11 = vadd.f32 %v9355_v9, %v3953_v46 }
 0x684   : > { %v3994_v47 = vmul.f32 0.01, %v3954_v11  ;;  %vm3978_vm1 = vcmp.ge.f32.partialorder %v3954_v11, 0.0 }
 0x686   : > { %v4010_v10 = vsel %vm3978_vm1, %v3954_v11, %v3994_v47 }
 0x689   : > { %v3955_v23 = vpop.f32.mrf.mxu2 }
 0x68a   : > { %v3956_v57 = vadd.f32 %v9355_v9, %v3955_v23 }
 0x68c   : > { %vm3979_vm3 = vcmp.ge.f32.partialorder %v3956_v57, 0.0  ;;  %v3995_v18 = vmul.f32 0.01, %v3956_v57 }
 0x68e   : > { %v4011_v13 = vsel %vm3979_vm3, %v3956_v57, %v3995_v18 }
 0x68f   : > { %v4021_v22 = vpack.c.bf16 %v4011_v13, %v4010_v10 }
 0x691   : > { %v3958_v61 = vpop.f32.mrf.mxu2  ;;  %4259 = vmatmul.bf16.gmra.mxu3 %v4021_v22  ;;  %4308 = vmatmul.bf16.gmra.mxu0 %v4021_v22 }
 0x692   : > { %4357 = vmatmul.bf16.gmra.mxu1 %v4021_v22  ;;  %4406 = vmatmul.bf16.gmra.mxu2 %v4021_v22  ;;  %v3959_v28 = vadd.f32 %v9355_v9, %v3958_v61 }
 0x694   : > { %v3996_v35 = vmul.f32 0.01, %v3959_v28  ;;  %vm3980_vm4 = vcmp.ge.f32.partialorder %v3959_v28, 0.0 }
 0x696   : > { %v4012_v7 = vsel %vm3980_vm4, %v3959_v28, %v3996_v35 }
 0x699   : > { %v3960_v58 = vpop.f32.mrf.mxu2 }
 0x69a   : > { %v3961_v42 = vadd.f32 %v9355_v9, %v3960_v58 }
 0x69c   : > { %vm3981_vm6 = vcmp.ge.f32.partialorder %v3961_v42, 0.0  ;;  %v3997_v24 = vmul.f32 0.01, %v3961_v42 }
 0x69e   : > { %v4013_v4 = vsel %vm3981_vm6, %v3961_v42, %v3997_v24 }
 0x69f   : > { %v4022_v50 = vpack.c.bf16 %v4013_v4, %v4012_v7 }
 0x6a1   : > { %v3963_v49 = vpop.f32.mrf.mxu2  ;;  %4264 = vmatmul.bf16.gmra.mxu3 %v4022_v50  ;;  %4313 = vmatmul.bf16.gmra.mxu0 %v4022_v50 }
 0x6a2   : > { %4362 = vmatmul.bf16.gmra.mxu1 %v4022_v50  ;;  %4411 = vmatmul.bf16.gmra.mxu2 %v4022_v50  ;;  %v3964_v48 = vadd.f32 %v9355_v9, %v3963_v49 }
 0x6a4   : > { %v3998_v34 = vmul.f32 0.01, %v3964_v48  ;;  %vm3982_vm7 = vcmp.ge.f32.partialorder %v3964_v48, 0.0 }
 0x6a6   : > { %v4014_v30 = vsel %vm3982_vm7, %v3964_v48, %v3998_v34 }
 0x6a9   : > { %v3965_v38 = vpop.f32.mrf.mxu2 }
 0x6aa   : > { %v3966_v3 = vadd.f32 %v9355_v9, %v3965_v38  ;;  %v4056_v9 = vld [vmem:[%s10349_s7] sm:$0xf] }
 0x6ab   : > { %v9376_v1 = vperm.slane %v4056_v9, 1  ;;  %v9378_v15 = vperm.slane %v4056_v9, 2  ;;  %v9382_v31 = vperm.slane %v4056_v9, 0  ;;  %v9384_v37 = vperm.slane %v4056_v9, 3 }
 0x6ac   : > { %vm3983_vm5 = vcmp.ge.f32.partialorder %v3966_v3, 0.0  ;;  %v3999_v44 = vmul.f32 0.01, %v3966_v3 }
 0x6ae   : > { %v4015_v33 = vsel %vm3983_vm5, %v3966_v3, %v3999_v44 }
 0x6af   : > { %v4023_v55 = vpack.c.bf16 %v4015_v33, %v4014_v30 }
 0x6b1   : > { %4269 = vmatmul.bf16.gmra.mxu3 %v4023_v55  ;;  %4318 = vmatmul.bf16.gmra.mxu0 %v4023_v55 }
 0x6b2   : > { %4367 = vmatmul.bf16.gmra.mxu1 %v4023_v55  ;;  %4416 = vmatmul.bf16.gmra.mxu2 %v4023_v55 }
 0x6be   : > { %v4284_v40 = vpop.f32.mrf.mxu0 }
 0x6bf   : > { %v4333_v20 = vpop.f32.mrf.mxu1  ;;  %v4285_v5 = vadd.f32 %v4284_v40, %v9376_v1 }
 0x6c0   : > { %v4334_v32 = vadd.f32 %v4333_v20, %v9378_v15 }
 0x6c1   : > { %v4487_v17 = vmul.f32 0.01, %v4285_v5  ;;  %vm4423_vm8 = vcmp.ge.f32.partialorder %v4285_v5, 0.0 }
 0x6c2   : > { %v4488_v2 = vmul.f32 0.01, %v4334_v32  ;;  %vm4424_vm9 = vcmp.ge.f32.partialorder %v4334_v32, 0.0 }
 0x6c3   : > { %v4551_v19 = vsel %vm4423_vm8, %v4285_v5, %v4487_v17 }
 0x6c4   : > { %v4235_v51 = vpop.f32.mrf.mxu3  ;;  %v4552_v36 = vsel %vm4424_vm9, %v4334_v32, %v4488_v2 }
 0x6c5   : > { %v4382_v39 = vpop.f32.mrf.mxu2  ;;  %v4236_v21 = vadd.f32 %v4235_v51, %v9382_v31 }
 0x6c6   : > { %v4286_v16 = vpop.f32.mrf.mxu0  ;;  %v4383_v56 = vadd.f32 %v4382_v39, %v9384_v37 }
 0x6c7   : > { %v4287_v8 = vadd.f32 %v4286_v16, %v9376_v1  ;;  %v4335_v6 = vpop.f32.mrf.mxu1  ;;  %v4486_v60 = vmul.f32 0.01, %v4236_v21  ;;  %vm4422_vm12 = vcmp.ge.f32.partialorder %v4236_v21, 0.0 }
 0x6c8   : > { %v4336_v26 = vadd.f32 %v4335_v6, %v9378_v15  ;;  %v4489_v18 = vmul.f32 0.01, %v4383_v56  ;;  %vm4425_vm13 = vcmp.ge.f32.partialorder %v4383_v56, 0.0 }
 0x6c9   : > { %vm4427_vm10 = vcmp.ge.f32.partialorder %v4287_v8, 0.0  ;;  %v4491_v45 = vmul.f32 0.01, %v4287_v8  ;;  %v4550_v25 = vsel %vm4422_vm12, %v4236_v21, %v4486_v60 }
 0x6ca   : > { %vm4428_vm11 = vcmp.ge.f32.partialorder %v4336_v26, 0.0  ;;  %v4492_v27 = vmul.f32 0.01, %v4336_v26  ;;  %v4553_v62 = vsel %vm4425_vm13, %v4383_v56, %v4489_v18 }
 0x6cb   : > { %v4555_v52 = vsel %vm4427_vm10, %v4287_v8, %v4491_v45 }
 0x6cc   : > { %v4615_v63 = vpack.c.bf16 %v4555_v52, %v4551_v19  ;;  %v4556_v46 = vsel %vm4428_vm11, %v4336_v26, %v4492_v27  ;;  %v4237_v11 = vpop.f32.mrf.mxu3 }
 0x6cd   : > { %v4616_v23 = vpack.c.bf16 %v4556_v46, %v4552_v36  ;;  %v4238_v47 = vadd.f32 %v4237_v11, %v9382_v31  ;;  %v4384_v57 = vpop.f32.mrf.mxu2 }
 0x6ce   : > { %v4385_v10 = vadd.f32 %v4384_v57, %v9384_v37  ;;  %v4289_v13 = vpop.f32.mrf.mxu0  ;;  %4963 = vmatmul.bf16.vlgmr.msrb.gmra.mxu0 %v4615_v63 }
 0x6cf   : > { %vm4426_vm14 = vcmp.ge.f32.partialorder %v4238_v47, 0.0  ;;  %v4490_v22 = vmul.f32 0.01, %v4238_v47  ;;  %v4338_v12 = vpop.f32.mrf.mxu1  ;;  %5012 = vmatmul.bf16.vlgmr.msrb.gmra.mxu1 %v4616_v23  ;;  %v4290_v58 = vadd.f32 %v4289_v13, %v9376_v1 }
 0x6d0   : > { %vm4429_vm15 = vcmp.ge.f32.partialorder %v4385_v10, 0.0  ;;  %v4493_v59 = vmul.f32 0.01, %v4385_v10  ;;  %v4339_v35 = vadd.f32 %v4338_v12, %v9378_v15 }
 0x6d1   : > { %v4554_v61 = vsel %vm4426_vm14, %v4238_v47, %v4490_v22  ;;  %v4495_v4 = vmul.f32 0.01, %v4290_v58  ;;  %vm4431_vm0 = vcmp.ge.f32.partialorder %v4290_v58, 0.0 }
 0x6d2   : > { %v4614_v29 = vpack.c.bf16 %v4554_v61, %v4550_v25  ;;  %v4557_v14 = vsel %vm4429_vm15, %v4385_v10, %v4493_v59  ;;  %v4496_v53 = vmul.f32 0.01, %v4339_v35  ;;  %vm4432_vm1 = vcmp.ge.f32.partialorder %v4339_v35, 0.0 }
 0x6d3   : > { %v4617_v28 = vpack.c.bf16 %v4557_v14, %v4553_v62  ;;  %v4559_v43 = vsel %vm4431_vm0, %v4290_v58, %v4495_v4 }
 0x6d4   : > { %v4240_v42 = vpop.f32.mrf.mxu3  ;;  %4914 = vmatmul.bf16.vlgmr.msrb.gmra.mxu3 %v4614_v29  ;;  %v4560_v30 = vsel %vm4432_vm1, %v4339_v35, %v4496_v53 }
 0x6d5   : > { %v4387_v24 = vpop.f32.mrf.mxu2  ;;  %5061 = vmatmul.bf16.vlgmr.msrb.gmra.mxu2 %v4617_v28  ;;  %v4241_v38 = vadd.f32 %v4240_v42, %v9382_v31 }
 0x6d6   : > { %v4291_v7 = vpop.f32.mrf.mxu0  ;;  %v4388_v3 = vadd.f32 %v4387_v24, %v9384_v37 }
 0x6d7   : > { %v4292_v50 = vadd.f32 %v4291_v7, %v9376_v1  ;;  %v4340_v49 = vpop.f32.mrf.mxu1  ;;  %v4494_v55 = vmul.f32 0.01, %v4241_v38  ;;  %vm4430_vm6 = vcmp.ge.f32.partialorder %v4241_v38, 0.0 }
 0x6d8   : > { %v4341_v48 = vadd.f32 %v4340_v49, %v9378_v15  ;;  %v4497_v5 = vmul.f32 0.01, %v4388_v3  ;;  %vm4433_vm7 = vcmp.ge.f32.partialorder %v4388_v3, 0.0 }
 0x6d9   : > { %vm4435_vm3 = vcmp.ge.f32.partialorder %v4292_v50, 0.0  ;;  %v4499_v34 = vmul.f32 0.01, %v4292_v50  ;;  %v4558_v8 = vsel %vm4430_vm6, %v4241_v38, %v4494_v55 }
 0x6da   : > { %vm4436_vm4 = vcmp.ge.f32.partialorder %v4341_v48, 0.0  ;;  %v4500_v0 = vmul.f32 0.01, %v4341_v48  ;;  %v4561_v26 = vsel %vm4433_vm7, %v4388_v3, %v4497_v5 }
 0x6db   : > { %v4563_v41 = vsel %vm4435_vm3, %v4292_v50, %v4499_v34 }
 0x6dc   : > { %v4242_v44 = vpop.f32.mrf.mxu3  ;;  %v4619_v54 = vpack.c.bf16 %v4563_v41, %v4559_v43  ;;  %v4564_v33 = vsel %vm4436_vm4, %v4341_v48, %v4500_v0 }
 0x6dd   : > { %v4243_v9 = vadd.f32 %v4242_v44, %v9382_v31  ;;  %v4389_v40 = vpop.f32.mrf.mxu2  ;;  %v4620_v20 = vpack.c.bf16 %v4564_v33, %v4560_v30 }
 0x6de   : > { %v4390_v32 = vadd.f32 %v4389_v40, %v9384_v37  ;;  %v4294_v51 = vpop.f32.mrf.mxu0  ;;  %4968 = vmatmul.bf16.gmra.mxu0 %v4619_v54 }
 0x6df   : > { %vm4434_vm5 = vcmp.ge.f32.partialorder %v4243_v9, 0.0  ;;  %v4498_v39 = vmul.f32 0.01, %v4243_v9  ;;  %v4343_v16 = vpop.f32.mrf.mxu1  ;;  %5017 = vmatmul.bf16.gmra.mxu1 %v4620_v20  ;;  %v4295_v45 = vadd.f32 %v4294_v51, %v9376_v1 }
 0x6e0   : > { %vm4437_vm8 = vcmp.ge.f32.partialorder %v4390_v32, 0.0  ;;  %v4501_v17 = vmul.f32 0.01, %v4390_v32  ;;  %v4344_v27 = vadd.f32 %v4343_v16, %v9378_v15 }
 0x6e1   : > { %v4562_v6 = vsel %vm4434_vm5, %v4243_v9, %v4498_v39  ;;  %v4503_v63 = vmul.f32 0.01, %v4295_v45  ;;  %vm4439_vm9 = vcmp.ge.f32.partialorder %v4295_v45, 0.0 }
 0x6e2   : > { %v4618_v2 = vpack.c.bf16 %v4562_v6, %v4558_v8  ;;  %v4565_v21 = vsel %vm4437_vm8, %v4390_v32, %v4501_v17  ;;  %v4504_v60 = vmul.f32 0.01, %v4344_v27  ;;  %vm4440_vm10 = vcmp.ge.f32.partialorder %v4344_v27, 0.0 }
 0x6e3   : > { %v4621_v56 = vpack.c.bf16 %v4565_v21, %v4561_v26  ;;  %v4567_v13 = vsel %vm4439_vm9, %v4295_v45, %v4503_v63 }
 0x6e4   : > { %v4245_v19 = vpop.f32.mrf.mxu3  ;;  %4919 = vmatmul.bf16.gmra.mxu3 %v4618_v2  ;;  %v4568_v25 = vsel %vm4440_vm10, %v4344_v27, %v4504_v60 }
 0x6e5   : > { %v4392_v52 = vpop.f32.mrf.mxu2  ;;  %5066 = vmatmul.bf16.gmra.mxu2 %v4621_v56  ;;  %v4246_v47 = vadd.f32 %v4245_v19, %v9382_v31 }
 0x6e6   : > { %v4296_v36 = vpop.f32.mrf.mxu0  ;;  %v4393_v18 = vadd.f32 %v4392_v52, %v9384_v37 }
 0x6e7   : > { %v4297_v46 = vadd.f32 %v4296_v36, %v9376_v1  ;;  %v4345_v11 = vpop.f32.mrf.mxu1  ;;  %v4502_v62 = vmul.f32 0.01, %v4246_v47  ;;  %vm4438_vm13 = vcmp.ge.f32.partialorder %v4246_v47, 0.0 }
 0x6e8   : > { %v4346_v23 = vadd.f32 %v4345_v11, %v9378_v15  ;;  %v4505_v58 = vmul.f32 0.01, %v4393_v18  ;;  %vm4441_vm14 = vcmp.ge.f32.partialorder %v4393_v18, 0.0 }
 0x6e9   : > { %vm4443_vm11 = vcmp.ge.f32.partialorder %v4297_v46, 0.0  ;;  %v4507_v57 = vmul.f32 0.01, %v4297_v46  ;;  %v4566_v50 = vsel %vm4438_vm13, %v4246_v47, %v4502_v62 }
 0x6ea   : > { %vm4444_vm12 = vcmp.ge.f32.partialorder %v4346_v23, 0.0  ;;  %v4508_v10 = vmul.f32 0.01, %v4346_v23  ;;  %v4569_v48 = vsel %vm4441_vm14, %v4393_v18, %v4505_v58 }
 0x6eb   : > { %v4571_v22 = vsel %vm4443_vm11, %v4297_v46, %v4507_v57 }
 0x6ec   : > { %v4247_v12 = vpop.f32.mrf.mxu3  ;;  %v4623_v59 = vpack.c.bf16 %v4571_v22, %v4567_v13  ;;  %v4572_v61 = vsel %vm4444_vm12, %v4346_v23, %v4508_v10 }
 0x6ed   : > { %v4248_v29 = vadd.f32 %v4247_v12, %v9382_v31  ;;  %v4394_v14 = vpop.f32.mrf.mxu2  ;;  %v4624_v28 = vpack.c.bf16 %v4572_v61, %v4568_v25 }
 0x6ee   : > { %v4395_v35 = vadd.f32 %v4394_v14, %v9384_v37  ;;  %v4299_v42 = vpop.f32.mrf.mxu0  ;;  %4973 = vmatmul.bf16.gmra.mxu0 %v4623_v59 }
 0x6ef   : > { %vm4442_vm15 = vcmp.ge.f32.partialorder %v4248_v29, 0.0  ;;  %v4506_v24 = vmul.f32 0.01, %v4248_v29  ;;  %v4348_v7 = vpop.f32.mrf.mxu1  ;;  %5022 = vmatmul.bf16.gmra.mxu1 %v4624_v28  ;;  %v4300_v34 = vadd.f32 %v4299_v42, %v9376_v1 }
 0x6f0   : > { %vm4445_vm0 = vcmp.ge.f32.partialorder %v4395_v35, 0.0  ;;  %v4509_v4 = vmul.f32 0.01, %v4395_v35  ;;  %v4349_v0 = vadd.f32 %v4348_v7, %v9378_v15 }
 0x6f1   : > { %v4570_v49 = vsel %vm4442_vm15, %v4248_v29, %v4506_v24  ;;  %v4511_v54 = vmul.f32 0.01, %v4300_v34  ;;  %vm4447_vm1 = vcmp.ge.f32.partialorder %v4300_v34, 0.0 }
 0x6f2   : > { %v4622_v53 = vpack.c.bf16 %v4570_v49, %v4566_v50  ;;  %v4573_v38 = vsel %vm4445_vm0, %v4395_v35, %v4509_v4  ;;  %v4512_v55 = vmul.f32 0.01, %v4349_v0  ;;  %vm4448_vm3 = vcmp.ge.f32.partialorder %v4349_v0, 0.0 }
 0x6f3   : > { %v4625_v3 = vpack.c.bf16 %v4573_v38, %v4569_v48  ;;  %v4575_v51 = vsel %vm4447_vm1, %v4300_v34, %v4511_v54 }
 0x6f4   : > { %v4250_v43 = vpop.f32.mrf.mxu3  ;;  %4924 = vmatmul.bf16.gmra.mxu3 %v4622_v53  ;;  %v4576_v8 = vsel %vm4448_vm3, %v4349_v0, %v4512_v55 }
 0x6f5   : > { %v4397_v41 = vpop.f32.mrf.mxu2  ;;  %5071 = vmatmul.bf16.gmra.mxu2 %v4625_v3  ;;  %v4251_v40 = vadd.f32 %v4250_v43, %v9382_v31 }
 0x6f6   : > { %v4301_v44 = vpop.f32.mrf.mxu0  ;;  %v4398_v5 = vadd.f32 %v4397_v41, %v9384_v37 }
 0x6f7   : > { %v4302_v30 = vadd.f32 %v4301_v44, %v9376_v1  ;;  %v4350_v33 = vpop.f32.mrf.mxu1  ;;  %v4510_v2 = vmul.f32 0.01, %v4251_v40  ;;  %vm4446_vm7 = vcmp.ge.f32.partialorder %v4251_v40, 0.0 }
 0x6f8   : > { %v4351_v9 = vadd.f32 %v4350_v33, %v9378_v15  ;;  %v4513_v56 = vmul.f32 0.01, %v4398_v5  ;;  %vm4449_vm5 = vcmp.ge.f32.partialorder %v4398_v5, 0.0 }
 0x6f9   : > { %vm4451_vm4 = vcmp.ge.f32.partialorder %v4302_v30, 0.0  ;;  %v4515_v20 = vmul.f32 0.01, %v4302_v30  ;;  %v4574_v46 = vsel %vm4446_vm7, %v4251_v40, %v4510_v2 }
 0x6fa   : > { %vm4452_vm6 = vcmp.ge.f32.partialorder %v4351_v9, 0.0  ;;  %v4516_v32 = vmul.f32 0.01, %v4351_v9  ;;  %v4577_v23 = vsel %vm4449_vm5, %v4398_v5, %v4513_v56 }
 0x6fb   : > { %v4579_v39 = vsel %vm4451_vm4, %v4302_v30, %v4515_v20 }
 0x6fc   : > { %v4252_v16 = vpop.f32.mrf.mxu3  ;;  %v4627_v17 = vpack.c.bf16 %v4579_v39, %v4575_v51  ;;  %v4580_v6 = vsel %vm4452_vm6, %v4351_v9, %v4516_v32 }
 0x6fd   : > { %v4253_v26 = vadd.f32 %v4252_v16, %v9382_v31  ;;  %v4399_v21 = vpop.f32.mrf.mxu2  ;;  %v4628_v45 = vpack.c.bf16 %v4580_v6, %v4576_v8 }
 0x6fe   : > { %v4400_v27 = vadd.f32 %v4399_v21, %v9384_v37  ;;  %v4304_v19 = vpop.f32.mrf.mxu0  ;;  %4978 = vmatmul.bf16.gmra.mxu0 %v4627_v17 }
 0x6ff   : > { %vm4450_vm8 = vcmp.ge.f32.partialorder %v4253_v26, 0.0  ;;  %v4514_v52 = vmul.f32 0.01, %v4253_v26  ;;  %v4353_v36 = vpop.f32.mrf.mxu1  ;;  %5027 = vmatmul.bf16.gmra.mxu1 %v4628_v45  ;;  %v4305_v57 = vadd.f32 %v4304_v19, %v9376_v1 }
 0x700   : > { %vm4453_vm9 = vcmp.ge.f32.partialorder %v4400_v27, 0.0  ;;  %v4517_v63 = vmul.f32 0.01, %v4400_v27  ;;  %v4354_v10 = vadd.f32 %v4353_v36, %v9378_v15 }
 0x701   : > { %v4578_v11 = vsel %vm4450_vm8, %v4253_v26, %v4514_v52  ;;  %v4519_v59 = vmul.f32 0.01, %v4305_v57  ;;  %vm4455_vm10 = vcmp.ge.f32.partialorder %v4305_v57, 0.0 }
 0x702   : > { %v4626_v60 = vpack.c.bf16 %v4578_v11, %v4574_v46  ;;  %v4581_v47 = vsel %vm4453_vm9, %v4400_v27, %v4517_v63  ;;  %v4520_v62 = vmul.f32 0.01, %v4354_v10  ;;  %vm4456_vm11 = vcmp.ge.f32.partialorder %v4354_v10, 0.0 }
 0x703   : > { %v4629_v18 = vpack.c.bf16 %v4581_v47, %v4577_v23  ;;  %v4583_v42 = vsel %vm4455_vm10, %v4305_v57, %v4519_v59 }
 0x704   : > { %v4255_v13 = vpop.f32.mrf.mxu3  ;;  %4929 = vmatmul.bf16.gmra.mxu3 %v4626_v60  ;;  %v4584_v50 = vsel %vm4456_vm11, %v4354_v10, %v4520_v62 }
 0x705   : > { %v4402_v22 = vpop.f32.mrf.mxu2  ;;  %5076 = vmatmul.bf16.gmra.mxu2 %v4629_v18  ;;  %v4256_v14 = vadd.f32 %v4255_v13, %v9382_v31 }
 0x706   : > { %v4306_v12 = vpop.f32.mrf.mxu0  ;;  %v4403_v58 = vadd.f32 %v4402_v22, %v9384_v37 }
 0x707   : > { %v4307_v25 = vadd.f32 %v4306_v12, %v9376_v1  ;;  %v4355_v61 = vpop.f32.mrf.mxu1  ;;  %v4518_v53 = vmul.f32 0.01, %v4256_v14  ;;  %vm4454_vm14 = vcmp.ge.f32.partialorder %v4256_v14, 0.0 }
 0x708   : > { %v4356_v29 = vadd.f32 %v4355_v61, %v9378_v15  ;;  %v4521_v3 = vmul.f32 0.01, %v4403_v58  ;;  %vm4457_vm15 = vcmp.ge.f32.partialorder %v4403_v58, 0.0 }
 0x709   : > { %vm4459_vm12 = vcmp.ge.f32.partialorder %v4307_v25, 0.0  ;;  %v4523_v28 = vmul.f32 0.01, %v4307_v25  ;;  %v4582_v30 = vsel %vm4454_vm14, %v4256_v14, %v4518_v53 }
 0x70a   : > { %vm4460_vm13 = vcmp.ge.f32.partialorder %v4356_v29, 0.0  ;;  %v4524_v35 = vmul.f32 0.01, %v4356_v29  ;;  %v4585_v9 = vsel %vm4457_vm15, %v4403_v58, %v4521_v3 }
 0x70b   : > { %v4587_v24 = vsel %vm4459_vm12, %v4307_v25, %v4523_v28 }
 0x70c   : > { %v4257_v7 = vpop.f32.mrf.mxu3  ;;  %v4631_v4 = vpack.c.bf16 %v4587_v24, %v4583_v42  ;;  %v4588_v49 = vsel %vm4460_vm13, %v4356_v29, %v4524_v35 }
 0x70d   : > { %v4258_v48 = vadd.f32 %v4257_v7, %v9382_v31  ;;  %v4404_v38 = vpop.f32.mrf.mxu2  ;;  %v4632_v34 = vpack.c.bf16 %v4588_v49, %v4584_v50 }
 0x70e   : > { %v4405_v0 = vadd.f32 %v4404_v38, %v9384_v37  ;;  %v4309_v43 = vpop.f32.mrf.mxu0  ;;  %4983 = vmatmul.bf16.gmra.mxu0 %v4631_v4 }
 0x70f   : > { %vm4458_vm0 = vcmp.ge.f32.partialorder %v4258_v48, 0.0  ;;  %v4522_v41 = vmul.f32 0.01, %v4258_v48  ;;  %v4358_v44 = vpop.f32.mrf.mxu1  ;;  %5032 = vmatmul.bf16.gmra.mxu1 %v4632_v34  ;;  %v4310_v20 = vadd.f32 %v4309_v43, %v9376_v1 }
 0x710   : > { %vm4461_vm1 = vcmp.ge.f32.partialorder %v4405_v0, 0.0  ;;  %v4525_v54 = vmul.f32 0.01, %v4405_v0  ;;  %v4359_v32 = vadd.f32 %v4358_v44, %v9378_v15 }
 0x711   : > { %v4586_v33 = vsel %vm4458_vm0, %v4258_v48, %v4522_v41  ;;  %v4527_v17 = vmul.f32 0.01, %v4310_v20  ;;  %vm4463_vm3 = vcmp.ge.f32.partialorder %v4310_v20, 0.0 }
 0x712   : > { %v4630_v55 = vpack.c.bf16 %v4586_v33, %v4582_v30  ;;  %v4589_v40 = vsel %vm4461_vm1, %v4405_v0, %v4525_v54  ;;  %v4528_v2 = vmul.f32 0.01, %v4359_v32  ;;  %vm4464_vm4 = vcmp.ge.f32.partialorder %v4359_v32, 0.0 }
 0x713   : > { %v4633_v5 = vpack.c.bf16 %v4589_v40, %v4585_v9  ;;  %v4591_v19 = vsel %vm4463_vm3, %v4310_v20, %v4527_v17 }
 0x714   : > { %v4260_v51 = vpop.f32.mrf.mxu3  ;;  %4934 = vmatmul.bf16.gmra.mxu3 %v4630_v55  ;;  %v4592_v46 = vsel %vm4464_vm4, %v4359_v32, %v4528_v2 }
 0x715   : > { %v4407_v39 = vpop.f32.mrf.mxu2  ;;  %5081 = vmatmul.bf16.gmra.mxu2 %v4633_v5  ;;  %v4261_v21 = vadd.f32 %v4260_v51, %v9382_v31 }
 0x716   : > { %v4311_v16 = vpop.f32.mrf.mxu0  ;;  %v4408_v56 = vadd.f32 %v4407_v39, %v9384_v37 }
 0x717   : > { %v4312_v8 = vadd.f32 %v4311_v16, %v9376_v1  ;;  %v4360_v6 = vpop.f32.mrf.mxu1  ;;  %v4526_v60 = vmul.f32 0.01, %v4261_v21  ;;  %vm4462_vm5 = vcmp.ge.f32.partialorder %v4261_v21, 0.0 }
 0x718   : > { %v4361_v26 = vadd.f32 %v4360_v6, %v9378_v15  ;;  %v4529_v18 = vmul.f32 0.01, %v4408_v56  ;;  %vm4465_vm8 = vcmp.ge.f32.partialorder %v4408_v56, 0.0 }
 0x719   : > { %vm4467_vm6 = vcmp.ge.f32.partialorder %v4312_v8, 0.0  ;;  %v4531_v45 = vmul.f32 0.01, %v4312_v8  ;;  %v4590_v25 = vsel %vm4462_vm5, %v4261_v21, %v4526_v60 }
 0x71a   : > { %vm4468_vm7 = vcmp.ge.f32.partialorder %v4361_v26, 0.0  ;;  %v4532_v27 = vmul.f32 0.01, %v4361_v26  ;;  %v4593_v29 = vsel %vm4465_vm8, %v4408_v56, %v4529_v18 }
 0x71b   : > { %v4595_v52 = vsel %vm4467_vm6, %v4312_v8, %v4531_v45 }
 0x71c   : > { %v4262_v36 = vpop.f32.mrf.mxu3  ;;  %v4635_v63 = vpack.c.bf16 %v4595_v52, %v4591_v19  ;;  %v4596_v11 = vsel %vm4468_vm7, %v4361_v26, %v4532_v27 }
 0x71d   : > { %v4263_v23 = vadd.f32 %v4262_v36, %v9382_v31  ;;  %v4409_v47 = vpop.f32.mrf.mxu2  ;;  %v4636_v57 = vpack.c.bf16 %v4596_v11, %v4592_v46 }
 0x71e   : > { %v4410_v10 = vadd.f32 %v4409_v47, %v9384_v37  ;;  %v4314_v13 = vpop.f32.mrf.mxu0  ;;  %4988 = vmatmul.bf16.gmra.mxu0 %v4635_v63 }
 0x71f   : > { %vm4466_vm9 = vcmp.ge.f32.partialorder %v4263_v23, 0.0  ;;  %v4530_v22 = vmul.f32 0.01, %v4263_v23  ;;  %v4363_v12 = vpop.f32.mrf.mxu1  ;;  %5037 = vmatmul.bf16.gmra.mxu1 %v4636_v57  ;;  %v4315_v28 = vadd.f32 %v4314_v13, %v9376_v1 }
 0x720   : > { %vm4469_vm10 = vcmp.ge.f32.partialorder %v4410_v10, 0.0  ;;  %v4533_v59 = vmul.f32 0.01, %v4410_v10  ;;  %v4364_v35 = vadd.f32 %v4363_v12, %v9378_v15 }
 0x721   : > { %v4594_v61 = vsel %vm4466_vm9, %v4263_v23, %v4530_v22  ;;  %v4535_v4 = vmul.f32 0.01, %v4315_v28  ;;  %vm4471_vm11 = vcmp.ge.f32.partialorder %v4315_v28, 0.0 }
 0x722   : > { %v4634_v62 = vpack.c.bf16 %v4594_v61, %v4590_v25  ;;  %v4597_v14 = vsel %vm4469_vm10, %v4410_v10, %v4533_v59  ;;  %v4536_v53 = vmul.f32 0.01, %v4364_v35  ;;  %vm4472_vm12 = vcmp.ge.f32.partialorder %v4364_v35, 0.0 }
 0x723   : > { %v4637_v58 = vpack.c.bf16 %v4597_v14, %v4593_v29  ;;  %v4599_v43 = vsel %vm4471_vm11, %v4315_v28, %v4535_v4 }
 0x724   : > { %v4265_v42 = vpop.f32.mrf.mxu3  ;;  %4939 = vmatmul.bf16.gmra.mxu3 %v4634_v62  ;;  %v4600_v30 = vsel %vm4472_vm12, %v4364_v35, %v4536_v53  ;;  %vm6158_vm12 = vcmask 523264  }
 0x725   : > { %v4412_v24 = vpop.f32.mrf.mxu2  ;;  %5086 = vmatmul.bf16.gmra.mxu2 %v4637_v58  ;;  %v4266_v38 = vadd.f32 %v4265_v42, %v9382_v31 }
 0x726   : > { %v4316_v7 = vpop.f32.mrf.mxu0  ;;  %v4413_v3 = vadd.f32 %v4412_v24, %v9384_v37 }
 0x727   : > { %v4317_v50 = vadd.f32 %v4316_v7, %v9376_v1  ;;  %v4365_v49 = vpop.f32.mrf.mxu1  ;;  %v4534_v55 = vmul.f32 0.01, %v4266_v38  ;;  %vm4470_vm15 = vcmp.ge.f32.partialorder %v4266_v38, 0.0 }
 0x728   : > { %v4366_v48 = vadd.f32 %v4365_v49, %v9378_v15  ;;  %v4537_v5 = vmul.f32 0.01, %v4413_v3  ;;  %vm4473_vm0 = vcmp.ge.f32.partialorder %v4413_v3, 0.0 }
 0x729   : > { %vm4475_vm13 = vcmp.ge.f32.partialorder %v4317_v50, 0.0  ;;  %v4539_v34 = vmul.f32 0.01, %v4317_v50  ;;  %v4598_v8 = vsel %vm4470_vm15, %v4266_v38, %v4534_v55 }
 0x72a   : > { %vm4476_vm14 = vcmp.ge.f32.partialorder %v4366_v48, 0.0  ;;  %v4540_v0 = vmul.f32 0.01, %v4366_v48  ;;  %v4601_v26 = vsel %vm4473_vm0, %v4413_v3, %v4537_v5 }
 0x72b   : > { %v4603_v41 = vsel %vm4475_vm13, %v4317_v50, %v4539_v34  ;;  %vm6175_vm13 = vcmask 785408  }
 0x72c   : > { %v4267_v44 = vpop.f32.mrf.mxu3  ;;  %v4639_v54 = vpack.c.bf16 %v4603_v41, %v4599_v43  ;;  %v4604_v33 = vsel %vm4476_vm14, %v4366_v48, %v4540_v0 }
 0x72d   : > { %v4268_v9 = vadd.f32 %v4267_v44, %v9382_v31  ;;  %v4414_v40 = vpop.f32.mrf.mxu2  ;;  %v4640_v20 = vpack.c.bf16 %v4604_v33, %v4600_v30 }
 0x72e   : > { %v4415_v32 = vadd.f32 %v4414_v40, %v9384_v37  ;;  %v4319_v51 = vpop.f32.mrf.mxu0  ;;  %4993 = vmatmul.bf16.gmra.mxu0 %v4639_v54 }
 0x72f   : > { %vm4474_vm1 = vcmp.ge.f32.partialorder %v4268_v9, 0.0  ;;  %v4538_v39 = vmul.f32 0.01, %v4268_v9  ;;  %v4368_v16 = vpop.f32.mrf.mxu1  ;;  %5042 = vmatmul.bf16.gmra.mxu1 %v4640_v20  ;;  %v4320_v45 = vadd.f32 %v4319_v51, %v9376_v1 }
 0x730   : > { %vm4477_vm3 = vcmp.ge.f32.partialorder %v4415_v32, 0.0  ;;  %v4541_v17 = vmul.f32 0.01, %v4415_v32  ;;  %v4369_v27 = vadd.f32 %v4368_v16, %v9378_v15 }
 0x731   : > { %v4602_v6 = vsel %vm4474_vm1, %v4268_v9, %v4538_v39  ;;  %v4543_v63 = vmul.f32 0.01, %v4320_v45  ;;  %vm4479_vm4 = vcmp.ge.f32.partialorder %v4320_v45, 0.0 }
 0x732   : > { %v4638_v2 = vpack.c.bf16 %v4602_v6, %v4598_v8  ;;  %v4605_v21 = vsel %vm4477_vm3, %v4415_v32, %v4541_v17  ;;  %v4544_v60 = vmul.f32 0.01, %v4369_v27  ;;  %vm4480_vm6 = vcmp.ge.f32.partialorder %v4369_v27, 0.0 }
 0x733   : > { %v4641_v56 = vpack.c.bf16 %v4605_v21, %v4601_v26  ;;  %v4607_v13 = vsel %vm4479_vm4, %v4320_v45, %v4543_v63 }
 0x734   : > { %v4270_v19 = vpop.f32.mrf.mxu3  ;;  %4944 = vmatmul.bf16.gmra.mxu3 %v4638_v2  ;;  %v4608_v25 = vsel %vm4480_vm6, %v4369_v27, %v4544_v60 }
 0x735   : > { %v4417_v52 = vpop.f32.mrf.mxu2  ;;  %5091 = vmatmul.bf16.gmra.mxu2 %v4641_v56  ;;  %v4271_v47 = vadd.f32 %v4270_v19, %v9382_v31 }
 0x736   : > { %v4321_v36 = vpop.f32.mrf.mxu0  ;;  %v4418_v18 = vadd.f32 %v4417_v52, %v9384_v37 }
 0x737   : > { %v4322_v46 = vadd.f32 %v4321_v36, %v9376_v1  ;;  %v4370_v11 = vpop.f32.mrf.mxu1  ;;  %v4542_v61 = vmul.f32 0.01, %v4271_v47  ;;  %vm4478_vm8 = vcmp.ge.f32.partialorder %v4271_v47, 0.0 }
 0x738   : > { %v4371_v23 = vadd.f32 %v4370_v11, %v9378_v15  ;;  %v4545_v14 = vmul.f32 0.01, %v4418_v18  ;;  %vm4481_vm9 = vcmp.ge.f32.partialorder %v4418_v18, 0.0 }
 0x739   : > { %vm4483_vm7 = vcmp.ge.f32.partialorder %v4322_v46, 0.0  ;;  %v4547_v57 = vmul.f32 0.01, %v4322_v46  ;;  %v4606_v42 = vsel %vm4478_vm8, %v4271_v47, %v4542_v61 }
 0x73a   : > { %vm4484_vm5 = vcmp.ge.f32.partialorder %v4371_v23, 0.0  ;;  %v4548_v10 = vmul.f32 0.01, %v4371_v23  ;;  %v4609_v4 = vsel %vm4481_vm9, %v4418_v18, %v4545_v14 }
 0x73b   : > { %v4611_v22 = vsel %vm4483_vm7, %v4322_v46, %v4547_v57 }
 0x73c   : > { %v4272_v12 = vpop.f32.mrf.mxu3  ;;  %v4643_v59 = vpack.c.bf16 %v4611_v22, %v4607_v13  ;;  %v4612_v1 = vsel %vm4484_vm5, %v4371_v23, %v4548_v10 }
 0x73d   : > { %v4273_v62 = vadd.f32 %v4272_v12, %v9382_v31  ;;  %v4419_v29 = vpop.f32.mrf.mxu2  ;;  %v4644_v15 = vpack.c.bf16 %v4612_v1, %v4608_v25 }
 0x73e   : > { %v4420_v28 = vadd.f32 %v4419_v29, %v9384_v37  ;;  %4998 = vmatmul.bf16.gmra.mxu0 %v4643_v59  ;;  %v9451_v37 = vld [vmem:[%s10350_s26] ss:$0 sm:$0xff] }
 0x73f   : > { %vm4482_vm10 = vcmp.ge.f32.partialorder %v4273_v62, 0.0  ;;  %v4546_v58 = vmul.f32 0.01, %v4273_v62  ;;  %5047 = vmatmul.bf16.gmra.mxu1 %v4644_v15 }
 0x740   : > { %vm4485_vm11 = vcmp.ge.f32.partialorder %v4420_v28, 0.0  ;;  %v4549_v35 = vmul.f32 0.01, %v4420_v28 }
 0x741   : > { %v4610_v24 = vsel %vm4482_vm10, %v4273_v62, %v4546_v58 }
 0x742   : > { %v4642_v7 = vpack.c.bf16 %v4610_v24, %v4606_v42  ;;  %v4613_v50 = vsel %vm4485_vm11, %v4420_v28, %v4549_v35 }
 0x743   : > { %v4645_v49 = vpack.c.bf16 %v4613_v50, %v4609_v4 }
 0x744   : > { %4949 = vmatmul.bf16.gmra.mxu3 %v4642_v7 }
 0x745   : > { %5096 = vmatmul.bf16.gmra.mxu2 %v4645_v49 }
 0x74b   : > { %v4964_v31 = vpop.f32.mrf.mxu0 }
 0x74c   : > { %v5013_v53 = vpop.f32.mrf.mxu1 }
 0x753   : > { %v4966_v48 = vpop.f32.mrf.mxu0 }
 0x754   : > { %v5015_v38 = vpop.f32.mrf.mxu1 }
 0x757   : > { %v4915_v34 = vpop.f32.mrf.mxu3 }
 0x758   : > { %v4916_v3 = vadd.f32 %v9451_v37, %v4915_v34  ;;  %v5062_v0 = vpop.f32.mrf.mxu2 }
 0x75a   : > { %v4965_v43 = vadd.f32 %v4964_v31, %v4916_v3 }
 0x75b   : > { %v4969_v41 = vpop.f32.mrf.mxu0 }
 0x75c   : > { %v5014_v44 = vadd.f32 %v5013_v53, %v4965_v43  ;;  %v5018_v54 = vpop.f32.mrf.mxu1 }
 0x75e   : > { %v9454_v30 = vadd.f32 %v5062_v0, %v5014_v44 }
 0x75f   : > { %v4917_v33 = vpop.f32.mrf.mxu3 }
 0x760   : > { %v4918_v55 = vadd.f32 %v9451_v37, %v4917_v33  ;;  %v5064_v9 = vpop.f32.mrf.mxu2  ;;  %5246 = vrot.lane.b32.xlu2 %v9454_v30, %s7845_s2  ;;  %5182 = vrot.lane.b32.xlu1 %v9454_v30, %s7846_s19 }
 0x761   : > { %5118 = vrot.lane.b32.xlu0 %v9454_v30, %s7847_s24 }
 0x762   : > { %v4967_v40 = vadd.f32 %v4966_v48, %v4918_v55 }
 0x763   : > { %v4971_v20 = vpop.f32.mrf.mxu0 }
 0x764   : > { %v5016_v5 = vadd.f32 %v5015_v38, %v4967_v40  ;;  %v5020_v32 = vpop.f32.mrf.mxu1 }
 0x766   : > { %v9463_v51 = vadd.f32 %v5064_v9, %v5016_v5 }
 0x767   : > { %v4920_v39 = vpop.f32.mrf.mxu3 }
 0x768   : > { %v4921_v16 = vadd.f32 %v9451_v37, %v4920_v39  ;;  %v5067_v17 = vpop.f32.mrf.mxu2  ;;  %5184 = vrot.lane.b32.xlu2 %v9463_v51, %s7846_s19 }
 0x769   : > { %5120 = vrot.lane.b32.xlu0 %v9463_v51, %s7847_s24 }
 0x76a   : > { %v4970_v8 = vadd.f32 %v4969_v41, %v4921_v16 }
 0x76b   : > { %v4974_v6 = vpop.f32.mrf.mxu0 }
 0x76c   : > { %v5019_v2 = vadd.f32 %v5018_v54, %v4970_v8  ;;  %v5023_v26 = vpop.f32.mrf.mxu1 }
 0x76e   : > { %v9470_v21 = vadd.f32 %v5067_v17, %v5019_v2 }
 0x76f   : > { %v4922_v45 = vpop.f32.mrf.mxu3 }
 0x770   : > { %v4923_v56 = vadd.f32 %v9451_v37, %v4922_v45  ;;  %v5069_v27 = vpop.f32.mrf.mxu2  ;;  %5122 = vrot.lane.b32.xlu1 %v9470_v21, %s7847_s24 }
 0x771   : > { %5248 = vrot.lane.b32.xlu0 %v9463_v51, %s7845_s2 }
 0x772   : > { %v4972_v19 = vadd.f32 %v4971_v20, %v4923_v56 }
 0x773   : > { %v4976_v52 = vpop.f32.mrf.mxu0 }
 0x774   : > { %v5021_v36 = vadd.f32 %v5020_v32, %v4972_v19  ;;  %v5025_v63 = vpop.f32.mrf.mxu1 }
 0x776   : > { %v9477_v46 = vadd.f32 %v5069_v27, %v5021_v36 }
 0x777   : > { %v4925_v11 = vpop.f32.mrf.mxu3 }
 0x778   : > { %v4926_v60 = vadd.f32 %v9451_v37, %v4925_v11  ;;  %v5072_v23 = vpop.f32.mrf.mxu2  ;;  %5252 = vrot.lane.b32.xlu2 %v9477_v46, %s7845_s2  ;;  %5250 = vrot.lane.b32.xlu1 %v9470_v21, %s7845_s2 }
 0x779   : > { %5186 = vrot.lane.b32.xlu0 %v9470_v21, %s7846_s19 }
 0x77a   : > { %v4975_v47 = vadd.f32 %v4974_v6, %v4926_v60 }
 0x77b   : > { %v4979_v57 = vpop.f32.mrf.mxu0 }
 0x77c   : > { %v5024_v18 = vadd.f32 %v5023_v26, %v4975_v47  ;;  %v5028_v10 = vpop.f32.mrf.mxu1 }
 0x77e   : > { %v9486_v13 = vadd.f32 %v5072_v23, %v5024_v18 }
 0x77f   : > { %v4927_v22 = vpop.f32.mrf.mxu3 }
 0x780   : > { %v4928_v12 = vadd.f32 %v9451_v37, %v4927_v22  ;;  %v5074_v59 = vpop.f32.mrf.mxu2  ;;  %5126 = vrot.lane.b32.xlu2 %v9486_v13, %s7847_s24  ;;  %5124 = vrot.lane.b32.xlu1 %v9477_v46, %s7847_s24 }
 0x781   : > { %5254 = vrot.lane.b32.xlu0 %v9486_v13, %s7845_s2 }
 0x782   : > { %v4977_v25 = vadd.f32 %v4976_v52, %v4928_v12 }
 0x783   : > { %v4981_v1 = vpop.f32.mrf.mxu0 }
 0x784   : > { %v5026_v61 = vadd.f32 %v5025_v63, %v4977_v25  ;;  %v5030_v62 = vpop.f32.mrf.mxu1 }
 0x786   : > { %v9495_v29 = vadd.f32 %v5074_v59, %v5026_v61 }
 0x787   : > { %v4930_v15 = vpop.f32.mrf.mxu3 }
 0x788   : > { %v4931_v14 = vadd.f32 %v9451_v37, %v4930_v15  ;;  %v5077_v28 = vpop.f32.mrf.mxu2  ;;  %5190 = vrot.lane.b32.xlu2 %v9486_v13, %s7846_s19  ;;  %5188 = vrot.lane.b32.xlu1 %v9477_v46, %s7846_s19 }
 0x789   : > { %5192 = vrot.lane.b32.xlu0 %v9495_v29, %s7846_s19 }
 0x78a   : > { %v4980_v58 = vadd.f32 %v4979_v57, %v4931_v14 }
 0x78b   : > { %v4984_v35 = vpop.f32.mrf.mxu0 }
 0x78c   : > { %v5029_v42 = vadd.f32 %v5028_v10, %v4980_v58  ;;  %v5033_v24 = vpop.f32.mrf.mxu1 }
 0x78e   : > { %v9504_v7 = vadd.f32 %v5077_v28, %v5029_v42 }
 0x78f   : > { %v4932_v4 = vpop.f32.mrf.mxu3 }
 0x790   : > { %v4933_v50 = vadd.f32 %v9451_v37, %v4932_v4  ;;  %v5079_v49 = vpop.f32.mrf.mxu2  ;;  %5128 = vrot.lane.b32.xlu2 %v9495_v29, %s7847_s24  ;;  %5256 = vrot.lane.b32.xlu1 %v9495_v29, %s7845_s2 }
 0x791   : > { %5130 = vrot.lane.b32.xlu0 %v9504_v7, %s7847_s24 }
 0x792   : > { %v4982_v31 = vadd.f32 %v4981_v1, %v4933_v50 }
 0x793   : > { %v4986_v48 = vpop.f32.mrf.mxu0 }
 0x794   : > { %v5031_v53 = vadd.f32 %v5030_v62, %v4982_v31  ;;  %v5035_v34 = vpop.f32.mrf.mxu1 }
 0x796   : > { %v9513_v38 = vadd.f32 %v5079_v49, %v5031_v53 }
 0x797   : > { %v4935_v3 = vpop.f32.mrf.mxu3 }
 0x798   : > { %v4936_v0 = vadd.f32 %v9451_v37, %v4935_v3  ;;  %v5082_v43 = vpop.f32.mrf.mxu2  ;;  %5258 = vrot.lane.b32.xlu2 %v9504_v7, %s7845_s2  ;;  %5194 = vrot.lane.b32.xlu1 %v9504_v7, %s7846_s19 }
 0x799   : > { %5260 = vrot.lane.b32.xlu0 %v9513_v38, %s7845_s2 }
 0x79a   : > { %v4985_v41 = vadd.f32 %v4984_v35, %v4936_v0 }
 0x79b   : > { %v4989_v33 = vpop.f32.mrf.mxu0 }
 0x79c   : > { %v5034_v44 = vadd.f32 %v5033_v24, %v4985_v41  ;;  %v5038_v20 = vpop.f32.mrf.mxu1 }
 0x79e   : > { %v9522_v54 = vadd.f32 %v5082_v43, %v5034_v44 }
 0x79f   : > { %v4937_v55 = vpop.f32.mrf.mxu3 }
 0x7a0   : > { %v4938_v9 = vadd.f32 %v9451_v37, %v4937_v55  ;;  %v5084_v40 = vpop.f32.mrf.mxu2  ;;  %5196 = vrot.lane.b32.xlu2 %v9513_v38, %s7846_s19  ;;  %5132 = vrot.lane.b32.xlu1 %v9513_v38, %s7847_s24 }
 0x7a1   : > { %5198 = vrot.lane.b32.xlu0 %v9522_v54, %s7846_s19 }
 0x7a2   : > { %v4987_v5 = vadd.f32 %v4986_v48, %v4938_v9 }
 0x7a3   : > { %v4991_v6 = vpop.f32.mrf.mxu0 }
 0x7a4   : > { %v5036_v32 = vadd.f32 %v5035_v34, %v4987_v5  ;;  %v5040_v26 = vpop.f32.mrf.mxu1 }
 0x7a6   : > { %v9531_v39 = vadd.f32 %v5084_v40, %v5036_v32 }
 0x7a7   : > { %v4940_v16 = vpop.f32.mrf.mxu3 }
 0x7a8   : > { %v4941_v17 = vadd.f32 %v9451_v37, %v4940_v16  ;;  %v5087_v8 = vpop.f32.mrf.mxu2  ;;  %5134 = vrot.lane.b32.xlu2 %v9522_v54, %s7847_s24  ;;  %5262 = vrot.lane.b32.xlu1 %v9522_v54, %s7845_s2 }
 0x7a9   : > { %5136 = vrot.lane.b32.xlu0 %v9531_v39, %s7847_s24 }
 0x7aa   : > { %v4990_v2 = vadd.f32 %v4989_v33, %v4941_v17 }
 0x7ab   : > { %v4994_v63 = vpop.f32.mrf.mxu0 }
 0x7ac   : > { %v5039_v45 = vadd.f32 %v5038_v20, %v4990_v2  ;;  %v5043_v60 = vpop.f32.mrf.mxu1 }
 0x7ae   : > { %v9540_v56 = vadd.f32 %v5087_v8, %v5039_v45 }
 0x7af   : > { %v4942_v27 = vpop.f32.mrf.mxu3 }
 0x7b0   : > { %v4943_v19 = vadd.f32 %v9451_v37, %v4942_v27  ;;  %v5089_v52 = vpop.f32.mrf.mxu2  ;;  %5264 = vrot.lane.b32.xlu2 %v9531_v39, %s7845_s2  ;;  %5200 = vrot.lane.b32.xlu1 %v9531_v39, %s7846_s19 }
 0x7b1   : > { %5266 = vrot.lane.b32.xlu0 %v9540_v56, %s7845_s2 }
 0x7b2   : > { %v4992_v36 = vadd.f32 %v4991_v6, %v4943_v19 }
 0x7b3   : > { %v4996_v12 = vpop.f32.mrf.mxu0 }
 0x7b4   : > { %v5041_v11 = vadd.f32 %v5040_v26, %v4992_v36  ;;  %v5045_v25 = vpop.f32.mrf.mxu1 }
 0x7b6   : > { %v9549_v23 = vadd.f32 %v5089_v52, %v5041_v11 }
 0x7b7   : > { %v4945_v47 = vpop.f32.mrf.mxu3 }
 0x7b8   : > { %v4946_v57 = vadd.f32 %v9451_v37, %v4945_v47  ;;  %v5092_v18 = vpop.f32.mrf.mxu2  ;;  %5202 = vrot.lane.b32.xlu2 %v9540_v56, %s7846_s19  ;;  %5138 = vrot.lane.b32.xlu1 %v9540_v56, %s7847_s24 }
 0x7b9   : > { %5204 = vrot.lane.b32.xlu0 %v9549_v23, %s7846_s19 }
 0x7ba   : > { %v4995_v10 = vadd.f32 %v4994_v63, %v4946_v57  ;;  %v5247_v61 = vpop.permute.xlu2 %5246 }
 0x7bb   : > { %v4999_v35 = vpop.f32.mrf.mxu0 }
 0x7bc   : > { %v5044_v22 = vadd.f32 %v5043_v60, %v4995_v10  ;;  %v5048_v4 = vpop.f32.mrf.mxu1 }
 0x7be   : > { %v9558_v59 = vadd.f32 %v5092_v18, %v5044_v22 }
 0x7bf   : > { %v4947_v1 = vpop.f32.mrf.mxu3 }
 0x7c0   : > { %v4948_v62 = vadd.f32 %v9451_v37, %v4947_v1  ;;  %5140 = vrot.lane.b32.xlu2 %v9549_v23, %s7847_s24  ;;  %5268 = vrot.lane.b32.xlu1 %v9549_v23, %s7845_s2  ;;  %v5094_v15 = vpop.f32.mrf.mxu2 }
 0x7c1   : > { %5142 = vrot.lane.b32.xlu0 %v9558_v59, %s7847_s24 }
 0x7c2   : > { %v4997_v14 = vadd.f32 %v4996_v12, %v4948_v62  ;;  %v5185_v50 = vpop.permute.xlu2 %5184 }
 0x7c3   : > { %v5001_v0 = vpop.f32.mrf.mxu0 }
 0x7c4   : > { %v5046_v28 = vadd.f32 %v5045_v25, %v4997_v14  ;;  %v5050_v44 = vpop.f32.mrf.mxu1 }
 0x7c6   : > { %v9567_v58 = vadd.f32 %v5094_v15, %v5046_v28 }
 0x7c7   : > { %v4950_v42 = vpop.f32.mrf.mxu3 }
 0x7c8   : > { %v4951_v24 = vadd.f32 %v9451_v37, %v4950_v42  ;;  %5270 = vrot.lane.b32.xlu2 %v9558_v59, %s7845_s2  ;;  %5206 = vrot.lane.b32.xlu1 %v9558_v59, %s7846_s19  ;;  %v5097_v31 = vpop.f32.mrf.mxu2 }
 0x7c9   : > { %5272 = vrot.lane.b32.xlu0 %v9567_v58, %s7845_s2 }
 0x7ca   : > { %v5000_v49 = vadd.f32 %v4999_v35, %v4951_v24 }
 0x7cc   : > { %v5049_v53 = vadd.f32 %v5048_v4, %v5000_v49 }
 0x7ce   : > { %v9576_v48 = vadd.f32 %v5097_v31, %v5049_v53 }
 0x7cf   : > { %v4952_v34 = vpop.f32.mrf.mxu3 }
 0x7d0   : > { %v4953_v3 = vadd.f32 %v9451_v37, %v4952_v34  ;;  %5208 = vrot.lane.b32.xlu2 %v9567_v58, %s7846_s19  ;;  %5144 = vrot.lane.b32.xlu1 %v9567_v58, %s7847_s24  ;;  %v5099_v9 = vpop.f32.mrf.mxu2 }
 0x7d1   : > { %5210 = vrot.lane.b32.xlu0 %v9576_v48, %s7846_s19 }
 0x7d2   : > { %v5002_v43 = vadd.f32 %v5001_v0, %v4953_v3  ;;  %v5253_v41 = vpop.permute.xlu2 %5252  ;;  %v5183_v20 = vpop.permute.xlu1 %5182 }
 0x7d3   : > { %v5119_v33 = vpop.permute.xlu0 %5118 }
 0x7d4   : > { %v5051_v55 = vadd.f32 %v5050_v44, %v5002_v43  ;;  %v5166_v37 = vmax.f32 %v9454_v30, %v5119_v33 }
 0x7d6   : > { %v9585_v40 = vadd.f32 %v5099_v9, %v5051_v55  ;;  %v5230_v32 = vmax.f32 %v5166_v37, %v5183_v20 }
 0x7d8   : > { %5274 = vrot.lane.b32.xlu1 %v9576_v48, %s7845_s2  ;;  %5146 = vrot.lane.b32.xlu2 %v9576_v48, %s7847_s24  ;;  %v9594_v17 = vmax.f32 %v5230_v32, %v5247_v61 }
 0x7d9   : > { %5148 = vrot.lane.b32.xlu0 %v9585_v40, %s7847_s24 }
 0x7da   : > { %v5127_v5 = vpop.permute.xlu2 %5126 }
 0x7db   : > { %v5121_v16 = vpop.permute.xlu0 %5120  ;;  %v5170_v62 = vmax.f32 %v9486_v13, %v5127_v5 }
 0x7dc   : > { %v5167_v8 = vmax.f32 %v9463_v51, %v5121_v16 }
 0x7de   : > { %v5231_v45 = vmax.f32 %v5167_v8, %v5185_v50 }
 0x7e0   : > { %5212 = vrot.lane.b32.xlu1 %v9585_v40, %s7846_s19  ;;  %5276 = vrot.lane.b32.xlu2 %v9585_v40, %s7845_s2 }
 0x7e1   : > { %5374 = vrot.lane.b32.xlu0 %v9594_v17, %s7845_s2 }
 0x7e2   : > { %v5191_v6 = vpop.permute.xlu2 %5190  ;;  %v5123_v2 = vpop.permute.xlu1 %5122 }
 0x7e3   : > { %v5249_v26 = vpop.permute.xlu0 %5248  ;;  %v5168_v19 = vmax.f32 %v9470_v21, %v5123_v2  ;;  %v5234_v28 = vmax.f32 %v5170_v62, %v5191_v6 }
 0x7e4   : > { %v9603_v27 = vmax.f32 %v5231_v45, %v5249_v26 }
 0x7e8   : > { %5470 = vrot.lane.b32.xlu1 %v9594_v17, %s7846_s19  ;;  %5566 = vrot.lane.b32.xlu2 %v9594_v17, %s7847_s24 }
 0x7e9   : > { %5568 = vrot.lane.b32.xlu0 %v9603_v27, %s7847_s24 }
 0x7ea   : > { %v5129_v52 = vpop.permute.xlu2 %5128  ;;  %v5251_v36 = vpop.permute.xlu1 %5250 }
 0x7eb   : > { %v5187_v63 = vpop.permute.xlu0 %5186  ;;  %v5171_v24 = vmax.f32 %v9495_v29, %v5129_v52 }
 0x7ec   : > { %v5232_v11 = vmax.f32 %v5168_v19, %v5187_v63 }
 0x7ee   : > { %v9612_v60 = vmax.f32 %v5232_v11, %v5251_v36 }
 0x7f0   : > { %5376 = vrot.lane.b32.xlu1 %v9603_v27, %s7845_s2  ;;  %5472 = vrot.lane.b32.xlu2 %v9603_v27, %s7846_s19 }
 0x7f1   : > { %5474 = vrot.lane.b32.xlu0 %v9612_v60, %s7846_s19 }
 0x7f2   : > { %v5259_v47 = vpop.permute.xlu2 %5258  ;;  %v5125_v57 = vpop.permute.xlu1 %5124 }
 0x7f3   : > { %v5255_v18 = vpop.permute.xlu0 %5254  ;;  %v5169_v10 = vmax.f32 %v9477_v46, %v5125_v57 }
 0x7f4   : > { %v9634_v42 = vmax.f32 %v5234_v28, %v5255_v18 }
 0x7f8   : > { %5570 = vrot.lane.b32.xlu1 %v9612_v60, %s7847_s24  ;;  %5378 = vrot.lane.b32.xlu2 %v9612_v60, %s7845_s2 }
 0x7fa   : > { %v5197_v22 = vpop.permute.xlu2 %5196  ;;  %v5189_v12 = vpop.permute.xlu1 %5188 }
 0x7fb   : > { %v5233_v25 = vmax.f32 %v5169_v10, %v5189_v12  ;;  %v5193_v1 = vpop.permute.xlu0 %5192 }
 0x7fc   : > { %v5235_v49 = vmax.f32 %v5171_v24, %v5193_v1 }
 0x7fd   : > { %v9625_v61 = vmax.f32 %v5233_v25, %v5253_v41 }
 0x7ff   : > { %5380 = vrot.lane.b32.xlu0 %v9625_v61, %s7845_s2 }
 0x800   : > { %5476 = vrot.lane.b32.xlu1 %v9625_v61, %s7846_s19  ;;  %5572 = vrot.lane.b32.xlu2 %v9625_v61, %s7847_s24 }
 0x802   : > { %v5135_v15 = vpop.permute.xlu2 %5134  ;;  %v5257_v14 = vpop.permute.xlu1 %5256 }
 0x803   : > { %v5131_v35 = vpop.permute.xlu0 %5130  ;;  %v9643_v53 = vmax.f32 %v5235_v49, %v5257_v14  ;;  %v5174_v32 = vmax.f32 %v9522_v54, %v5135_v15 }
 0x804   : > { %v5172_v34 = vmax.f32 %v9504_v7, %v5131_v35 }
 0x807   : > { %5574 = vrot.lane.b32.xlu0 %v9634_v42, %s7847_s24 }
 0x808   : > { %5382 = vrot.lane.b32.xlu1 %v9634_v42, %s7845_s2  ;;  %5478 = vrot.lane.b32.xlu2 %v9634_v42, %s7846_s19 }
 0x80a   : > { %v5265_v4 = vpop.permute.xlu2 %5264  ;;  %v5195_v50 = vpop.permute.xlu1 %5194 }
 0x80b   : > { %v5261_v31 = vpop.permute.xlu0 %5260  ;;  %v5236_v3 = vmax.f32 %v5172_v34, %v5195_v50 }
 0x80d   : > { %v9652_v44 = vmax.f32 %v5236_v3, %v5259_v47 }
 0x80f   : > { %5480 = vrot.lane.b32.xlu0 %v9643_v53, %s7846_s19 }
 0x810   : > { %5576 = vrot.lane.b32.xlu1 %v9643_v53, %s7847_s24  ;;  %5384 = vrot.lane.b32.xlu2 %v9643_v53, %s7845_s2 }
 0x812   : > { %v5203_v0 = vpop.permute.xlu2 %5202  ;;  %v5133_v43 = vpop.permute.xlu1 %5132 }
 0x813   : > { %v5199_v41 = vpop.permute.xlu0 %5198  ;;  %v5173_v33 = vmax.f32 %v9513_v38, %v5133_v43 }
 0x814   : > { %v5238_v6 = vmax.f32 %v5174_v32, %v5199_v41 }
 0x815   : > { %v5237_v55 = vmax.f32 %v5173_v33, %v5197_v22 }
 0x817   : > { %5386 = vrot.lane.b32.xlu0 %v9652_v44, %s7845_s2  ;;  %v9661_v5 = vmax.f32 %v5237_v55, %v5261_v31 }
 0x818   : > { %5482 = vrot.lane.b32.xlu1 %v9652_v44, %s7846_s19  ;;  %5578 = vrot.lane.b32.xlu2 %v9652_v44, %s7847_s24 }
 0x81a   : > { %v5141_v9 = vpop.permute.xlu2 %5140  ;;  %v5263_v37 = vpop.permute.xlu1 %5262 }
 0x81b   : > { %v5137_v20 = vpop.permute.xlu0 %5136  ;;  %v9670_v26 = vmax.f32 %v5238_v6, %v5263_v37  ;;  %v5177_v25 = vmax.f32 %v9549_v23, %v5141_v9 }
 0x81c   : > { %v5175_v45 = vmax.f32 %v9531_v39, %v5137_v20 }
 0x81f   : > { %5580 = vrot.lane.b32.xlu0 %v9661_v5, %s7847_s24 }
 0x820   : > { %5388 = vrot.lane.b32.xlu1 %v9661_v5, %s7845_s2  ;;  %5484 = vrot.lane.b32.xlu2 %v9661_v5, %s7846_s19 }
 0x822   : > { %v5271_v16 = vpop.permute.xlu2 %5270  ;;  %v5201_v8 = vpop.permute.xlu1 %5200 }
 0x823   : > { %v5267_v2 = vpop.permute.xlu0 %5266  ;;  %v5239_v19 = vmax.f32 %v5175_v45, %v5201_v8 }
 0x825   : > { %v9679_v11 = vmax.f32 %v5239_v19, %v5265_v4 }
 0x827   : > { %5486 = vrot.lane.b32.xlu0 %v9670_v26, %s7846_s19 }
 0x828   : > { %5582 = vrot.lane.b32.xlu1 %v9670_v26, %s7847_s24  ;;  %5390 = vrot.lane.b32.xlu2 %v9670_v26, %s7845_s2 }
 0x82a   : > { %v5209_v52 = vpop.permute.xlu2 %5208  ;;  %v5139_v36 = vpop.permute.xlu1 %5138 }
 0x82b   : > { %v5205_v63 = vpop.permute.xlu0 %5204  ;;  %v5176_v47 = vmax.f32 %v9540_v56, %v5139_v36 }
 0x82c   : > { %v5241_v15 = vmax.f32 %v5177_v25, %v5205_v63 }
 0x82d   : > { %v5240_v57 = vmax.f32 %v5176_v47, %v5203_v0 }
 0x82f   : > { %5392 = vrot.lane.b32.xlu0 %v9679_v11, %s7845_s2  ;;  %v9688_v12 = vmax.f32 %v5240_v57, %v5267_v2 }
 0x830   : > { %5488 = vrot.lane.b32.xlu1 %v9679_v11, %s7846_s19  ;;  %5584 = vrot.lane.b32.xlu2 %v9679_v11, %s7847_s24 }
 0x832   : > { %v5269_v18 = vpop.permute.xlu1 %5268  ;;  %v5147_v10 = vpop.permute.xlu2 %5146 }
 0x833   : > { %v5143_v22 = vpop.permute.xlu0 %5142  ;;  %v9697_v28 = vmax.f32 %v5241_v15, %v5269_v18  ;;  %v5180_v55 = vmax.f32 %v9576_v48, %v5147_v10 }
 0x834   : > { %v5178_v35 = vmax.f32 %v9558_v59, %v5143_v22 }
 0x837   : > { %5586 = vrot.lane.b32.xlu0 %v9688_v12, %s7847_s24 }
 0x838   : > { %5394 = vrot.lane.b32.xlu1 %v9688_v12, %s7845_s2  ;;  %5490 = vrot.lane.b32.xlu2 %v9688_v12, %s7846_s19 }
 0x83a   : > { %v5207_v1 = vpop.permute.xlu1 %5206  ;;  %v5277_v62 = vpop.permute.xlu2 %5276 }
 0x83b   : > { %v5273_v14 = vpop.permute.xlu0 %5272  ;;  %v5242_v24 = vmax.f32 %v5178_v35, %v5207_v1 }
 0x83d   : > { %v9706_v31 = vmax.f32 %v5242_v24, %v5271_v16 }
 0x83f   : > { %5492 = vrot.lane.b32.xlu0 %v9697_v28, %s7846_s19 }
 0x840   : > { %5588 = vrot.lane.b32.xlu1 %v9697_v28, %s7847_s24  ;;  %5396 = vrot.lane.b32.xlu2 %v9697_v28, %s7845_s2 }
 0x842   : > { %v5145_v4 = vpop.permute.xlu1 %5144  ;;  %v5567_v50 = vpop.permute.xlu2 %5566 }
 0x843   : > { %v5211_v49 = vpop.permute.xlu0 %5210  ;;  %v5179_v34 = vmax.f32 %v9567_v58, %v5145_v4  ;;  %v5614_v8 = vsub.f32 %v9454_v30, %v5567_v50 }
 0x844   : > { %v5244_v20 = vmax.f32 %v5180_v55, %v5211_v49 }
 0x845   : > { %v5243_v3 = vmax.f32 %v5179_v34, %v5209_v52  ;;  %v5630_v36 = vmul.f32 1.442695, %v5614_v8 }
 0x847   : > { %5398 = vrot.lane.b32.xlu0 %v9706_v31, %s7845_s2  ;;  %v9715_v33 = vmax.f32 %v5243_v3, %v5273_v14  ;;  %7537 = vpow2.f32 %v5630_v36 }
 0x848   : > { %5494 = vrot.lane.b32.xlu1 %v9706_v31, %s7846_s19  ;;  %5590 = vrot.lane.b32.xlu2 %v9706_v31, %s7847_s24 }
 0x84a   : > { %v5275_v0 = vpop.permute.xlu1 %5274  ;;  %v5473_v43 = vpop.permute.xlu2 %5472 }
 0x84b   : > { %v5149_v41 = vpop.permute.xlu0 %5148  ;;  %v9724_v16 = vmax.f32 %v5244_v20, %v5275_v0  ;;  %v5519_v22 = vsub.f32 %v9463_v51, %v5473_v43 }
 0x84c   : > { %v5181_v6 = vmax.f32 %v9585_v40, %v5149_v41 }
 0x84d   : > { %v5536_v15 = vmul.f32 1.442695, %v5519_v22  ;;  %v9747_v24 = vpop.eup %7537 }
 0x84f   : > { %5592 = vrot.lane.b32.xlu0 %v9715_v33, %s7847_s24 }
 0x850   : > { %5400 = vrot.lane.b32.xlu1 %v9715_v33, %s7845_s2  ;;  %5496 = vrot.lane.b32.xlu2 %v9715_v33, %s7846_s19 }
 0x852   : > { %v5213_v9 = vpop.permute.xlu1 %5212  ;;  %v5379_v37 = vpop.permute.xlu2 %5378 }
 0x853   : > { %v5375_v32 = vpop.permute.xlu0 %5374  ;;  %v5245_v45 = vmax.f32 %v5181_v6, %v5213_v9  ;;  %v5424_v3 = vsub.f32 %v9470_v21, %v5379_v37 }
 0x854   : > { %v5422_v2 = vsub.f32 %v9454_v30, %v5375_v32 }
 0x855   : > { %v9736_v18 = vmax.f32 %v5245_v45, %v5277_v62  ;;  %v5442_v55 = vmul.f32 1.442695, %v5424_v3 }
 0x856   : > { %v5438_v57 = vmul.f32 1.442695, %v5422_v2 }
 0x857   : > { %5498 = vrot.lane.b32.xlu0 %v9724_v16, %s7846_s19 }
 0x858   : > { %5594 = vrot.lane.b32.xlu1 %v9724_v16, %s7847_s24  ;;  %5402 = vrot.lane.b32.xlu2 %v9724_v16, %s7845_s2  ;;  %7539 = vpow2.f32 %v5438_v57 }
 0x85a   : > { %v5471_v19 = vpop.permute.xlu1 %5470  ;;  %v5573_v52 = vpop.permute.xlu2 %5572 }
 0x85b   : > { %v5518_v63 = vsub.f32 %v9454_v30, %v5471_v19  ;;  %v5569_v47 = vpop.permute.xlu0 %5568  ;;  %v5617_v2 = vsub.f32 %v9477_v46, %v5573_v52 }
 0x85c   : > { %v5615_v25 = vsub.f32 %v9463_v51, %v5569_v47 }
 0x85d   : > { %v5534_v10 = vmul.f32 1.442695, %v5518_v63  ;;  %v5636_v47 = vmul.f32 1.442695, %v5617_v2 }
 0x85e   : > { %v5632_v35 = vmul.f32 1.442695, %v5615_v25  ;;  %v9749_v49 = vpop.eup %7539 }
 0x85f   : > { %5404 = vrot.lane.b32.xlu0 %v9736_v18, %s7845_s2  ;;  %7541 = vpow2.f32 %v5534_v10 }
 0x860   : > { %5596 = vrot.lane.b32.xlu2 %v9736_v18, %s7847_s24  ;;  %5500 = vrot.lane.b32.xlu1 %v9736_v18, %s7846_s19  ;;  %7543 = vpow2.f32 %v5536_v15 }
 0x861   : > { %7545 = vpow2.f32 %v5632_v35 }
 0x862   : > { %v5377_v1 = vpop.permute.xlu1 %5376  ;;  %v5479_v62 = vpop.permute.xlu2 %5478 }
 0x863   : > { %v5423_v14 = vsub.f32 %v9463_v51, %v5377_v1  ;;  %v5475_v50 = vpop.permute.xlu0 %5474  ;;  %v5522_v15 = vsub.f32 %v9486_v13, %v5479_v62 }
 0x864   : > { %v5520_v0 = vsub.f32 %v9470_v21, %v5475_v50 }
 0x865   : > { %v5440_v4 = vmul.f32 1.442695, %v5423_v14  ;;  %v9751_v34 = vpop.eup %7541  ;;  %v5542_v3 = vmul.f32 1.442695, %v5522_v15 }
 0x866   : > { %v5538_v20 = vmul.f32 1.442695, %v5520_v0  ;;  %v9762_v37 = vpop.eup %7543 }
 0x867   : > { %5678 = vrot.lane.b32.xlu0 %v9749_v49, %s7847_s24  ;;  %7547 = vpow2.f32 %v5440_v4  ;;  %v9764_v8 = vpop.eup %7545 }
 0x868   : > { %5758 = vrot.lane.b32.xlu1 %v9751_v34, %s7846_s19  ;;  %5838 = vrot.lane.b32.xlu2 %v9747_v24, %s7845_s2  ;;  %7549 = vpow2.f32 %v5442_v55 }
 0x869   : > { %7551 = vpow2.f32 %v5538_v20 }
 0x86a   : > { %v5571_v43 = vpop.permute.xlu1 %5570  ;;  %v5385_v41 = vpop.permute.xlu2 %5384 }
 0x86b   : > { %v5616_v9 = vsub.f32 %v9470_v21, %v5571_v43 }
 0x86d   : > { %v5634_v32 = vmul.f32 1.442695, %v5616_v9  ;;  %v9766_v6 = vpop.eup %7547 }
 0x86e   : > { %v9777_v10 = vpop.eup %7549 }
 0x86f   : > { %5840 = vrot.lane.b32.xlu0 %v9764_v8, %s7845_s2  ;;  %7553 = vpow2.f32 %v5634_v32  ;;  %v9779_v25 = vpop.eup %7551  ;;  %v5427_v32 = vsub.f32 %v9495_v29, %v5385_v41 }
 0x870   : > { %5680 = vrot.lane.b32.xlu1 %v9766_v6, %s7847_s24  ;;  %5760 = vrot.lane.b32.xlu2 %v9762_v37, %s7846_s19  ;;  %7555 = vpow2.f32 %v5636_v47 }
 0x871   : > { %v5381_v45 = vpop.permute.xlu0 %5380  ;;  %v5448_v47 = vmul.f32 1.442695, %v5427_v32 }
 0x872   : > { %v5425_v19 = vsub.f32 %v9477_v46, %v5381_v45  ;;  %v5477_v36 = vpop.permute.xlu1 %5476  ;;  %v5579_v63 = vpop.permute.xlu2 %5578 }
 0x873   : > { %v5521_v57 = vsub.f32 %v9477_v46, %v5477_v36 }
 0x874   : > { %v5444_v52 = vmul.f32 1.442695, %v5425_v19 }
 0x875   : > { %v5540_v22 = vmul.f32 1.442695, %v5521_v57  ;;  %v9781_v1 = vpop.eup %7553 }
 0x876   : > { %7557 = vpow2.f32 %v5444_v52  ;;  %v9792_v43 = vpop.eup %7555 }
 0x877   : > { %5762 = vrot.lane.b32.xlu0 %v9779_v25, %s7846_s19  ;;  %7559 = vpow2.f32 %v5540_v22 }
 0x878   : > { %5842 = vrot.lane.b32.xlu1 %v9781_v1, %s7845_s2  ;;  %5682 = vrot.lane.b32.xlu2 %v9777_v10, %s7847_s24  ;;  %7561 = vpow2.f32 %v5542_v3 }
 0x879   : > { %v5575_v14 = vpop.permute.xlu0 %5574 }
 0x87a   : > { %v5618_v35 = vsub.f32 %v9486_v13, %v5575_v14  ;;  %v5383_v4 = vpop.permute.xlu1 %5382  ;;  %v5485_v50 = vpop.permute.xlu2 %5484 }
 0x87b   : > { %v5426_v0 = vsub.f32 %v9486_v13, %v5383_v4 }
 0x87c   : > { %v5638_v62 = vmul.f32 1.442695, %v5618_v35  ;;  %v9794_v9 = vpop.eup %7557  ;;  %v5620_v35 = vsub.f32 %v9504_v7, %v5579_v63 }
 0x87d   : > { %v5446_v55 = vmul.f32 1.442695, %v5426_v0  ;;  %v9796_v20 = vpop.eup %7559 }
 0x87e   : > { %7563 = vpow2.f32 %v5638_v62  ;;  %v9807_v52 = vpop.eup %7561 }
 0x87f   : > { %5684 = vrot.lane.b32.xlu0 %v9794_v9, %s7847_s24  ;;  %7565 = vpow2.f32 %v5446_v55  ;;  %v5642_v55 = vmul.f32 1.442695, %v5620_v35 }
 0x880   : > { %5764 = vrot.lane.b32.xlu1 %v9796_v20, %s7846_s19  ;;  %5844 = vrot.lane.b32.xlu2 %v9792_v43, %s7845_s2  ;;  %7567 = vpow2.f32 %v5448_v47 }
 0x881   : > { %v5481_v2 = vpop.permute.xlu0 %5480 }
 0x882   : > { %v5523_v45 = vsub.f32 %v9495_v29, %v5481_v2  ;;  %v5577_v19 = vpop.permute.xlu1 %5576  ;;  %v5391_v36 = vpop.permute.xlu2 %5390 }
 0x883   : > { %v5619_v57 = vsub.f32 %v9495_v29, %v5577_v19 }
 0x884   : > { %v5544_v41 = vmul.f32 1.442695, %v5523_v45  ;;  %v9809_v15 = vpop.eup %7563 }
 0x885   : > { %v5640_v22 = vmul.f32 1.442695, %v5619_v57  ;;  %v9811_v14 = vpop.eup %7565  ;;  %v5525_v57 = vsub.f32 %v9513_v38, %v5485_v50 }
 0x886   : > { %7569 = vpow2.f32 %v5544_v41  ;;  %v9822_v2 = vpop.eup %7567 }
 0x887   : > { %5846 = vrot.lane.b32.xlu0 %v9809_v15, %s7845_s2  ;;  %7571 = vpow2.f32 %v5640_v22  ;;  %10351 = vst [vmem:[#allocation13_spill] sm:$0xff] %v9822_v2 }
 0x888   : > { %5686 = vrot.lane.b32.xlu1 %v9811_v14, %s7847_s24  ;;  %5766 = vrot.lane.b32.xlu2 %v9807_v52, %s7846_s19  ;;  %7573 = vpow2.f32 %v5642_v55 }
 0x889   : > { %v5387_v4 = vpop.permute.xlu0 %5386 }
 0x88a   : > { %v5428_v3 = vsub.f32 %v9504_v7, %v5387_v4  ;;  %v5483_v0 = vpop.permute.xlu1 %5482  ;;  %v5585_v62 = vpop.permute.xlu2 %5584 }
 0x88b   : > { %v5524_v32 = vsub.f32 %v9504_v7, %v5483_v0 }
 0x88c   : > { %v5450_v63 = vmul.f32 1.442695, %v5428_v3  ;;  %v9824_v19 = vpop.eup %7569  ;;  %v5548_v3 = vmul.f32 1.442695, %v5525_v57 }
 0x88d   : > { %v5546_v45 = vmul.f32 1.442695, %v5524_v32  ;;  %10352 = vst [vmem:[#allocation14_spill] sm:$0xff] %v9824_v19  ;;  %v9826_v47 = vpop.eup %7571 }
 0x88e   : > { %10353 = vst [vmem:[#allocation15_spill] sm:$0xff] %v9826_v47  ;;  %7575 = vpow2.f32 %v5450_v63  ;;  %v9837_v55 = vpop.eup %7573 }
 0x88f   : > { %5768 = vrot.lane.b32.xlu0 %v9824_v19, %s7846_s19  ;;  %7577 = vpow2.f32 %v5546_v45  ;;  %10354 = vst [vmem:[#allocation17_spill] sm:$0xff] %v9837_v55 }
 0x890   : > { %5848 = vrot.lane.b32.xlu1 %v9826_v47, %s7845_s2  ;;  %5688 = vrot.lane.b32.xlu2 %v9822_v2, %s7847_s24  ;;  %7579 = vpow2.f32 %v5548_v3  ;;  %v5430_v47 = vsub.f32 %v9522_v54, %v5391_v36 }
 0x891   : > { %v5581_v41 = vpop.permute.xlu0 %5580 }
 0x892   : > { %v5621_v22 = vsub.f32 %v9513_v38, %v5581_v41  ;;  %v5389_v35 = vpop.permute.xlu1 %5388  ;;  %v5491_v4 = vpop.permute.xlu2 %5490 }
 0x893   : > { %v5429_v0 = vsub.f32 %v9513_v38, %v5389_v35  ;;  %v5454_v35 = vmul.f32 1.442695, %v5430_v47 }
 0x894   : > { %v5644_v50 = vmul.f32 1.442695, %v5621_v22  ;;  %v9839_v63 = vpop.eup %7575 }
 0x895   : > { %v5452_v32 = vmul.f32 1.442695, %v5429_v0  ;;  %10355 = vst [vmem:[#allocation12_spill] sm:$0xff] %v9839_v63  ;;  %v9841_v19 = vpop.eup %7577 }
 0x896   : > { %10356 = vst [vmem:[#allocation16_spill] sm:$0xff] %v9841_v19  ;;  %7581 = vpow2.f32 %v5644_v50  ;;  %v9852_v0 = vpop.eup %7579 }
 0x897   : > { %5690 = vrot.lane.b32.xlu0 %v9839_v63, %s7847_s24  ;;  %7583 = vpow2.f32 %v5452_v32  ;;  %10357 = vst [vmem:[#allocation20_spill] sm:$0xff] %v9852_v0 }
 0x898   : > { %5770 = vrot.lane.b32.xlu1 %v9841_v19, %s7846_s19  ;;  %5850 = vrot.lane.b32.xlu2 %v9837_v55, %s7845_s2  ;;  %7585 = vpow2.f32 %v5454_v35  ;;  %v5623_v55 = vsub.f32 %v9531_v39, %v5585_v62 }
 0x899   : > { %v5487_v45 = vpop.permute.xlu0 %5486 }
 0x89a   : > { %v5526_v57 = vsub.f32 %v9522_v54, %v5487_v45  ;;  %v5583_v41 = vpop.permute.xlu1 %5582  ;;  %v5397_v22 = vpop.permute.xlu2 %5396 }
 0x89b   : > { %v5622_v3 = vsub.f32 %v9522_v54, %v5583_v41  ;;  %v5648_v41 = vmul.f32 1.442695, %v5623_v55 }
 0x89c   : > { %v5550_v36 = vmul.f32 1.442695, %v5526_v57  ;;  %v9854_v50 = vpop.eup %7581 }
 0x89d   : > { %v5646_v63 = vmul.f32 1.442695, %v5622_v3  ;;  %10358 = vst [vmem:[#allocation18_spill] sm:$0xff] %v9854_v50  ;;  %v9856_v2 = vpop.eup %7583 }
 0x89e   : > { %10359 = vst [vmem:[#allocation19_spill] sm:$0xff] %v9856_v2  ;;  %7587 = vpow2.f32 %v5550_v36  ;;  %v9867_v3 = vpop.eup %7585 }
 0x89f   : > { %5852 = vrot.lane.b32.xlu0 %v9854_v50, %s7845_s2  ;;  %7589 = vpow2.f32 %v5646_v63  ;;  %10360 = vst [vmem:[#allocation22_spill] sm:$0xff] %v9867_v3 }
 0x8a0   : > { %5692 = vrot.lane.b32.xlu1 %v9856_v2, %s7847_s24  ;;  %5772 = vrot.lane.b32.xlu2 %v9852_v0, %s7846_s19  ;;  %7591 = vpow2.f32 %v5648_v41  ;;  %v5528_v0 = vsub.f32 %v9540_v56, %v5491_v4 }
 0x8a1   : > { %v5393_v47 = vpop.permute.xlu0 %5392 }
 0x8a2   : > { %v5431_v32 = vsub.f32 %v9531_v39, %v5393_v47  ;;  %v5489_v45 = vpop.permute.xlu1 %5488  ;;  %v5591_v57 = vpop.permute.xlu2 %5590 }
 0x8a3   : > { %v5527_v35 = vsub.f32 %v9531_v39, %v5489_v45  ;;  %v5554_v45 = vmul.f32 1.442695, %v5528_v0 }
 0x8a4   : > { %v5456_v62 = vmul.f32 1.442695, %v5431_v32  ;;  %v9869_v36 = vpop.eup %7587 }
 0x8a5   : > { %v5552_v50 = vmul.f32 1.442695, %v5527_v35  ;;  %10361 = vst [vmem:[#allocation23_spill] sm:$0xff] %v9869_v36  ;;  %v9871_v19 = vpop.eup %7589 }
 0x8a6   : > { %10362 = vst [vmem:[#allocation21_spill] sm:$0xff] %v9871_v19  ;;  %7593 = vpow2.f32 %v5456_v62  ;;  %v9882_v35 = vpop.eup %7591 }
 0x8a7   : > { %5774 = vrot.lane.b32.xlu0 %v9869_v36, %s7846_s19  ;;  %7595 = vpow2.f32 %v5552_v50  ;;  %10363 = vst [vmem:[#allocation24_spill] sm:$0xff] %v9882_v35 }
 0x8a8   : > { %5854 = vrot.lane.b32.xlu1 %v9871_v19, %s7845_s2  ;;  %5694 = vrot.lane.b32.xlu2 %v9867_v3, %s7847_s24  ;;  %7597 = vpow2.f32 %v5554_v45  ;;  %v5433_v19 = vsub.f32 %v9549_v23, %v5397_v22 }
 0x8a9   : > { %v5587_v55 = vpop.permute.xlu0 %5586 }
 0x8aa   : > { %v5624_v63 = vsub.f32 %v9540_v56, %v5587_v55  ;;  %v5395_v47 = vpop.permute.xlu1 %5394  ;;  %v5497_v32 = vpop.permute.xlu2 %5496 }
 0x8ab   : > { %v5432_v41 = vsub.f32 %v9540_v56, %v5395_v47  ;;  %v5460_v47 = vmul.f32 1.442695, %v5433_v19 }
 0x8ac   : > { %v5650_v4 = vmul.f32 1.442695, %v5624_v63  ;;  %v9884_v62 = vpop.eup %7593 }
 0x8ad   : > { %v5458_v36 = vmul.f32 1.442695, %v5432_v41  ;;  %10364 = vst [vmem:[#allocation25_spill] sm:$0xff] %v9884_v62  ;;  %v9886_v2 = vpop.eup %7595 }
 0x8ae   : > { %10365 = vst [vmem:[#allocation26_spill] sm:$0xff] %v9886_v2  ;;  %7599 = vpow2.f32 %v5650_v4  ;;  %v9897_v41 = vpop.eup %7597 }
 0x8af   : > { %5696 = vrot.lane.b32.xlu0 %v9884_v62, %s7847_s24  ;;  %7601 = vpow2.f32 %v5458_v36  ;;  %10366 = vst [vmem:[#allocation27_spill] sm:$0xff] %v9897_v41 }
 0x8b0   : > { %5776 = vrot.lane.b32.xlu1 %v9886_v2, %s7846_s19  ;;  %5856 = vrot.lane.b32.xlu2 %v9882_v35, %s7845_s2  ;;  %7603 = vpow2.f32 %v5460_v47  ;;  %v5626_v35 = vsub.f32 %v9558_v59, %v5591_v57 }
 0x8b1   : > { %v5493_v0 = vpop.permute.xlu0 %5492 }
 0x8b2   : > { %v5529_v50 = vsub.f32 %v9549_v23, %v5493_v0  ;;  %v5589_v55 = vpop.permute.xlu1 %5588  ;;  %v5403_v63 = vpop.permute.xlu2 %5402 }
 0x8b3   : > { %v5625_v45 = vsub.f32 %v9549_v23, %v5589_v55  ;;  %v5654_v55 = vmul.f32 1.442695, %v5626_v35 }
 0x8b4   : > { %v5556_v22 = vmul.f32 1.442695, %v5529_v50  ;;  %v9899_v4 = vpop.eup %7599 }
 0x8b5   : > { %v5652_v62 = vmul.f32 1.442695, %v5625_v45  ;;  %10367 = vst [vmem:[#allocation28_spill] sm:$0xff] %v9899_v4  ;;  %v9901_v3 = vpop.eup %7601 }
 0x8b6   : > { %10368 = vst [vmem:[#allocation29_spill] sm:$0xff] %v9901_v3  ;;  %7605 = vpow2.f32 %v5556_v22  ;;  %v9912_v45 = vpop.eup %7603 }
 0x8b7   : > { %5858 = vrot.lane.b32.xlu0 %v9899_v4, %s7845_s2  ;;  %7607 = vpow2.f32 %v5652_v62  ;;  %10369 = vst [vmem:[#allocation30_spill] sm:$0xff] %v9912_v45 }
 0x8b8   : > { %5698 = vrot.lane.b32.xlu1 %v9901_v3, %s7847_s24  ;;  %5778 = vrot.lane.b32.xlu2 %v9897_v41, %s7846_s19  ;;  %7609 = vpow2.f32 %v5654_v55  ;;  %v5531_v41 = vsub.f32 %v9567_v58, %v5497_v32 }
 0x8b9   : > { %v5399_v19 = vpop.permute.xlu0 %5398 }
 0x8ba   : > { %v5434_v36 = vsub.f32 %v9558_v59, %v5399_v19  ;;  %v5495_v0 = vpop.permute.xlu1 %5494  ;;  %v5597_v50 = vpop.permute.xlu2 %5596 }
 0x8bb   : > { %v5530_v47 = vsub.f32 %v9558_v59, %v5495_v0  ;;  %v5560_v0 = vmul.f32 1.442695, %v5531_v41 }
 0x8bc   : > { %v5462_v57 = vmul.f32 1.442695, %v5434_v36  ;;  %v9914_v22 = vpop.eup %7605 }
 0x8bd   : > { %v5558_v4 = vmul.f32 1.442695, %v5530_v47  ;;  %10370 = vst [vmem:[#allocation31_spill] sm:$0xff] %v9914_v22  ;;  %v9916_v2 = vpop.eup %7607 }
 0x8be   : > { %10371 = vst [vmem:[#allocation32_spill] sm:$0xff] %v9916_v2  ;;  %7611 = vpow2.f32 %v5462_v57  ;;  %v9929_v47 = vpop.eup %7609 }
 0x8bf   : > { %5780 = vrot.lane.b32.xlu0 %v9914_v22, %s7846_s19  ;;  %7613 = vpow2.f32 %v5558_v4  ;;  %v5436_v4 = vsub.f32 %v9576_v48, %v5403_v63  ;;  %v5310_v63 = vsub.f32 %v9454_v30, %v9594_v17 }
 0x8c0   : > { %5860 = vrot.lane.b32.xlu1 %v9916_v2, %s7845_s2  ;;  %5700 = vrot.lane.b32.xlu2 %v9912_v45, %s7847_s24  ;;  %7615 = vpow2.f32 %v5560_v0 }
 0x8c1   : > { %v5593_v35 = vpop.permute.xlu0 %5592 }
 0x8c2   : > { %v5627_v62 = vsub.f32 %v9567_v58, %v5593_v35  ;;  %v5401_v19 = vpop.permute.xlu1 %5400  ;;  %v9926_v36 = vpop.permute.xlu2 %5838 }
 0x8c3   : > { %v5435_v32 = vsub.f32 %v9567_v58, %v5401_v19 }
 0x8c4   : > { %v5656_v55 = vmul.f32 1.442695, %v5627_v62  ;;  %v9931_v22 = vpop.eup %7611 }
 0x8c5   : > { %v5464_v57 = vmul.f32 1.442695, %v5435_v32  ;;  %10372 = vst [vmem:[#allocation33_spill] sm:$0xff] %v9931_v22  ;;  %v9933_v2 = vpop.eup %7613  ;;  %v5466_v32 = vmul.f32 1.442695, %v5436_v4 }
 0x8c6   : > { %10373 = vst [vmem:[#allocation34_spill] sm:$0xff] %v9933_v2  ;;  %7617 = vpow2.f32 %v5656_v55  ;;  %v9946_v55 = vpop.eup %7615  ;;  %v5326_v4 = vmul.f32 1.442695, %v5310_v63 }
 0x8c7   : > { %5702 = vrot.lane.b32.xlu0 %v9931_v22, %s7847_s24  ;;  %7619 = vpow2.f32 %v5464_v57  ;;  %10374 = vst [vmem:[#allocation35_spill] sm:$0xff] %v9946_v55  ;;  %v5629_v57 = vsub.f32 %v9585_v40, %v5597_v50 }
 0x8c8   : > { %5782 = vrot.lane.b32.xlu1 %v9933_v2, %s7846_s19  ;;  %5862 = vrot.lane.b32.xlu2 %v9929_v47, %s7845_s2  ;;  %7621 = vpow2.f32 %v5466_v32 }
 0x8c9   : > { %v5499_v41 = vpop.permute.xlu0 %5498 }
 0x8ca   : > { %v5532_v35 = vsub.f32 %v9576_v48, %v5499_v41  ;;  %v5595_v62 = vpop.permute.xlu1 %5594  ;;  %v5761_v19 = vpop.permute.xlu2 %5760 }
 0x8cb   : > { %v5628_v0 = vsub.f32 %v9576_v48, %v5595_v62  ;;  %v5660_v62 = vmul.f32 1.442695, %v5629_v57 }
 0x8cc   : > { %v5562_v22 = vmul.f32 1.442695, %v5532_v35  ;;  %v9948_v2 = vpop.eup %7617 }
 0x8cd   : > { %v5658_v45 = vmul.f32 1.442695, %v5628_v0  ;;  %10375 = vst [vmem:[#allocation36_spill] sm:$0xff] %v9948_v2  ;;  %v9950_v3 = vpop.eup %7619 }
 0x8ce   : > { %10376 = vst [vmem:[#allocation37_spill] sm:$0xff] %v9950_v3  ;;  %7623 = vpow2.f32 %v5562_v22  ;;  %v5311_v22 = vsub.f32 %v9463_v51, %v9603_v27  ;;  %v9963_v0 = vpop.eup %7621  ;;  %v5312_v27 = vsub.f32 %v9470_v21, %v9612_v60 }
 0x8cf   : > { %5864 = vrot.lane.b32.xlu0 %v9948_v2, %s7845_s2  ;;  %7625 = vpow2.f32 %v5658_v45  ;;  %10377 = vst [vmem:[#allocation38_spill] sm:$0xff] %v9963_v0 }
 0x8d0   : > { %5704 = vrot.lane.b32.xlu1 %v9950_v3, %s7847_s24  ;;  %5784 = vrot.lane.b32.xlu2 %v9946_v55, %s7846_s19  ;;  %7627 = vpow2.f32 %v5326_v4  ;;  %v5328_v45 = vmul.f32 1.442695, %v5311_v22 }
 0x8d1   : > { %v5405_v30 = vpop.permute.xlu0 %5404  ;;  %7629 = vpow2.f32 %v5660_v62 }
 0x8d2   : > { %v5437_v17 = vsub.f32 %v9585_v40, %v5405_v30  ;;  %v5501_v41 = vpop.permute.xlu1 %5500  ;;  %v5683_v35 = vpop.permute.xlu2 %5682 }
 0x8d3   : > { %v5533_v50 = vsub.f32 %v9585_v40, %v5501_v41 }
 0x8d4   : > { %v5468_v32 = vmul.f32 1.442695, %v5437_v17  ;;  %v9965_v2 = vpop.eup %7623 }
 0x8d5   : > { %v5564_v63 = vmul.f32 1.442695, %v5533_v50  ;;  %10378 = vst [vmem:[#allocation39_spill] sm:$0xff] %v9965_v2  ;;  %v9967_v55 = vpop.eup %7625  ;;  %v5330_v50 = vmul.f32 1.442695, %v5312_v27 }
 0x8d6   : > { %10379 = vst [vmem:[#allocation40_spill] sm:$0xff] %v9967_v55  ;;  %7631 = vpow2.f32 %v5468_v32  ;;  %v7628_v51 = vpop.eup %7627 }
 0x8d7   : > { %5786 = vrot.lane.b32.xlu0 %v9965_v2, %s7846_s19  ;;  %7633 = vpow2.f32 %v5564_v63  ;;  %v9977_v62 = vpop.eup %7629 }
 0x8d8   : > { %5866 = vrot.lane.b32.xlu1 %v9967_v55, %s7845_s2  ;;  %5706 = vrot.lane.b32.xlu2 %v9963_v0, %s7847_s24  ;;  %7635 = vpow2.f32 %v5328_v45  ;;  %10380 = vst [vmem:[#allocation41_spill] sm:$0xff] %v9977_v62 }
 0x8d9   : > { %v5679_v57 = vpop.permute.xlu0 %5678 }
 0x8da   : > { %v5726_v4 = vadd.f32 %v7628_v51, %v5679_v57  ;;  %v5759_v30 = vpop.permute.xlu1 %5758  ;;  %v5845_v17 = vpop.permute.xlu2 %5844 }
 0x8dc   : > { %v5806_v41 = vadd.f32 %v5759_v30, %v5726_v4  ;;  %v9979_v32 = vpop.eup %7631 }
 0x8dd   : > { %v9982_v2 = vpop.eup %7633 }
 0x8de   : > { %v5886_v55 = vadd.f32 %v9926_v36, %v5806_v41  ;;  %v7636_v60 = vpop.eup %7635  ;;  %v5313_v36 = vsub.f32 %v9477_v46, %v9625_v61  ;;  %v5314_v61 = vsub.f32 %v9486_v13, %v9634_v42 }
 0x8df   : > { %5708 = vrot.lane.b32.xlu0 %v9979_v32, %s7847_s24 }
 0x8e0   : > { %7637 = vrcp.f32 %v5886_v55  ;;  %5788 = vrot.lane.b32.xlu1 %v9982_v2, %s7846_s19  ;;  %5868 = vrot.lane.b32.xlu2 %v9977_v62, %s7845_s2  ;;  %v5332_v55 = vmul.f32 1.442695, %v5313_v36 }
 0x8e1   : > { %7639 = vpow2.f32 %v5330_v50  ;;  %v5841_v21 = vpop.permute.xlu0 %5840 }
 0x8e2   : > { %v5681_v22 = vpop.permute.xlu1 %5680  ;;  %v5767_v63 = vpop.permute.xlu2 %5766 }
 0x8e3   : > { %v5727_v45 = vadd.f32 %v7636_v60, %v5681_v22 }
 0x8e5   : > { %v5807_v27 = vadd.f32 %v5761_v19, %v5727_v45 }
 0x8e6   : > { %v7638_v57 = vpop.eup %7637 }
 0x8e7   : > { %v7640_v4 = vpop.eup %7639  ;;  %v5887_v30 = vadd.f32 %v5841_v21, %v5807_v27  ;;  %5950 = vrot.lane.b32.xlu0 %v7638_v57, %s7845_s2  ;;  %v9993_v41 = vmul.f32 %v7638_v57, %v7628_v51 }
 0x8e8   : > { %v5728_v0 = vadd.f32 %v7640_v4, %v5683_v35  ;;  %6078 = vrot.lane.b32.xlu2 %v7638_v57, %s7847_s24  ;;  %6014 = vrot.lane.b32.xlu1 %v7638_v57, %s7846_s19  ;;  %v5334_v35 = vmul.f32 1.442695, %v5314_v61 }
 0x8e9   : > { %7641 = vrcp.f32 %v5887_v30  ;;  %v5763_v50 = vpop.permute.xlu0 %5762 }
 0x8ea   : > { %v5808_v22 = vadd.f32 %v5763_v50, %v5728_v0  ;;  %v5843_v3 = vpop.permute.xlu1 %5842  ;;  %v5689_v62 = vpop.permute.xlu2 %5688  ;;  %7643 = vpow2.f32 %v5332_v55  ;;  %v5315_v0 = vsub.f32 %v9495_v29, %v9643_v53 }
 0x8ec   : > { %v5888_v46 = vadd.f32 %v5843_v3, %v5808_v22  ;;  %v5336_v57 = vmul.f32 1.442695, %v5315_v0 }
 0x8ee   : > { %7645 = vrcp.f32 %v5888_v46  ;;  %v5316_v46 = vsub.f32 %v9504_v7, %v9652_v44  ;;  %v5317_v44 = vsub.f32 %v9513_v38, %v9661_v5 }
 0x8ef   : > { %v7642_v19 = vpop.eup %7641  ;;  %7647 = vpow2.f32 %v5334_v35 }
 0x8f0   : > { %6080 = vrot.lane.b32.xlu0 %v7642_v19, %s7847_s24  ;;  %6016 = vrot.lane.b32.xlu2 %v7642_v19, %s7846_s19  ;;  %v10001_v51 = vmul.f32 %v7642_v19, %v7636_v60  ;;  %v7644_v21 = vpop.eup %7643  ;;  %v5338_v35 = vmul.f32 1.442695, %v5316_v46 }
 0x8f1   : > { %5952 = vrot.lane.b32.xlu1 %v7642_v19, %s7845_s2  ;;  %v5685_v45 = vpop.permute.xlu0 %5684 }
 0x8f2   : > { %v5729_v3 = vadd.f32 %v7644_v21, %v5685_v45  ;;  %v5765_v36 = vpop.permute.xlu1 %5764  ;;  %v5851_v27 = vpop.permute.xlu2 %5850 }
 0x8f4   : > { %v7646_v13 = vpop.eup %7645  ;;  %v5809_v42 = vadd.f32 %v5765_v36, %v5729_v3 }
 0x8f5   : > { %v10006_v30 = vmul.f32 %v7646_v13, %v7640_v4  ;;  %v7648_v53 = vpop.eup %7647 }
 0x8f6   : > { %v5889_v55 = vadd.f32 %v5845_v17, %v5809_v42 }
 0x8f8   : > { %7649 = vrcp.f32 %v5889_v55  ;;  %6018 = vrot.lane.b32.xlu0 %v7646_v13, %s7846_s19  ;;  %5954 = vrot.lane.b32.xlu2 %v7646_v13, %s7845_s2  ;;  %v5318_v55 = vsub.f32 %v9522_v54, %v9670_v26 }
 0x8f9   : > { %7651 = vpow2.f32 %v5336_v57  ;;  %6082 = vrot.lane.b32.xlu1 %v7646_v13, %s7847_s24  ;;  %v5847_v29 = vpop.permute.xlu0 %5846 }
 0x8fa   : > { %v5687_v60 = vpop.permute.xlu1 %5686  ;;  %v5773_v50 = vpop.permute.xlu2 %5772 }
 0x8fb   : > { %v5730_v22 = vadd.f32 %v7648_v53, %v5687_v60 }
 0x8fd   : > { %v5810_v61 = vadd.f32 %v5767_v63, %v5730_v22 }
 0x8fe   : > { %v7650_v4 = vpop.eup %7649 }
 0x8ff   : > { %v7652_v19 = vpop.eup %7651  ;;  %v5890_v17 = vadd.f32 %v5847_v29, %v5810_v61  ;;  %v10013_v0 = vmul.f32 %v7650_v4, %v7644_v21  ;;  %v5342_v61 = vmul.f32 1.442695, %v5318_v55 }
 0x900   : > { %v5731_v45 = vadd.f32 %v7652_v19, %v5689_v62  ;;  %6084 = vrot.lane.b32.xlu2 %v7650_v4, %s7847_s24  ;;  %5956 = vrot.lane.b32.xlu0 %v7650_v4, %s7845_s2  ;;  %v5340_v62 = vmul.f32 1.442695, %v5317_v44 }
 0x901   : > { %7653 = vrcp.f32 %v5890_v17  ;;  %6020 = vrot.lane.b32.xlu1 %v7650_v4, %s7846_s19  ;;  %v5769_v3 = vpop.permute.xlu0 %5768 }
 0x902   : > { %v5811_v36 = vadd.f32 %v5769_v3, %v5731_v45  ;;  %v5849_v13 = vpop.permute.xlu1 %5848  ;;  %v5695_v42 = vpop.permute.xlu2 %5694  ;;  %7655 = vpow2.f32 %v5338_v35  ;;  %v5319_v3 = vsub.f32 %v9531_v39, %v9679_v11  ;;  %v5320_v11 = vsub.f32 %v9540_v56, %v9688_v12 }
 0x904   : > { %v5891_v7 = vadd.f32 %v5849_v13, %v5811_v36 }
 0x906   : > { %7657 = vrcp.f32 %v5891_v7  ;;  %v5344_v7 = vmul.f32 1.442695, %v5319_v3 }
 0x907   : > { %v7654_v63 = vpop.eup %7653  ;;  %7659 = vpow2.f32 %v5340_v62 }
 0x908   : > { %6086 = vrot.lane.b32.xlu0 %v7654_v63, %s7847_s24  ;;  %6022 = vrot.lane.b32.xlu2 %v7654_v63, %s7846_s19  ;;  %v10022_v21 = vmul.f32 %v7654_v63, %v7648_v53  ;;  %v7656_v57 = vpop.eup %7655 }
 0x909   : > { %5958 = vrot.lane.b32.xlu1 %v7654_v63, %s7845_s2  ;;  %v5691_v29 = vpop.permute.xlu0 %5690 }
 0x90a   : > { %v5732_v60 = vadd.f32 %v7656_v57, %v5691_v29  ;;  %v5771_v22 = vpop.permute.xlu1 %5770  ;;  %v5857_v46 = vpop.permute.xlu2 %5856 }
 0x90c   : > { %v7658_v38 = vpop.eup %7657  ;;  %v5812_v5 = vadd.f32 %v5771_v22, %v5732_v60 }
 0x90d   : > { %v10027_v4 = vmul.f32 %v7658_v38, %v7652_v19  ;;  %v7660_v26 = vpop.eup %7659 }
 0x90e   : > { %v5892_v17 = vadd.f32 %v5851_v27, %v5812_v5 }
 0x910   : > { %7661 = vrcp.f32 %v5892_v17  ;;  %6024 = vrot.lane.b32.xlu0 %v7658_v38, %s7846_s19  ;;  %5960 = vrot.lane.b32.xlu2 %v7658_v38, %s7845_s2 }
 0x911   : > { %7663 = vpow2.f32 %v5342_v61  ;;  %6088 = vrot.lane.b32.xlu1 %v7658_v38, %s7847_s24  ;;  %v5853_v54 = vpop.permute.xlu0 %5852  ;;  %v5321_v38 = vsub.f32 %v9549_v23, %v9697_v28 }
 0x912   : > { %v5693_v53 = vpop.permute.xlu1 %5692  ;;  %v5779_v35 = vpop.permute.xlu2 %5778 }
 0x913   : > { %v5733_v45 = vadd.f32 %v7660_v26, %v5693_v53  ;;  %v5348_v53 = vmul.f32 1.442695, %v5321_v38 }
 0x915   : > { %v5813_v36 = vadd.f32 %v5773_v50, %v5733_v45 }
 0x916   : > { %v7662_v19 = vpop.eup %7661 }
 0x917   : > { %v7664_v13 = vpop.eup %7663  ;;  %v5893_v27 = vadd.f32 %v5853_v54, %v5813_v36  ;;  %v10034_v44 = vmul.f32 %v7662_v19, %v7656_v57 }
 0x918   : > { %v5734_v63 = vadd.f32 %v7664_v13, %v5695_v42  ;;  %6090 = vrot.lane.b32.xlu2 %v7662_v19, %s7847_s24  ;;  %5962 = vrot.lane.b32.xlu0 %v7662_v19, %s7845_s2  ;;  %v5346_v42 = vmul.f32 1.442695, %v5320_v11 }
 0x919   : > { %7665 = vrcp.f32 %v5893_v27  ;;  %6026 = vrot.lane.b32.xlu1 %v7662_v19, %s7846_s19  ;;  %v5775_v62 = vpop.permute.xlu0 %5774  ;;  %v5322_v27 = vsub.f32 %v9558_v59, %v9706_v31  ;;  %v5323_v31 = vsub.f32 %v9567_v58, %v9715_v33 }
 0x91a   : > { %v5814_v55 = vadd.f32 %v5775_v62, %v5734_v63  ;;  %v5855_v29 = vpop.permute.xlu1 %5854  ;;  %v5701_v60 = vpop.permute.xlu2 %5700  ;;  %7667 = vpow2.f32 %v5344_v7 }
 0x91b   : > { %v5350_v62 = vmul.f32 1.442695, %v5322_v27  ;;  %v5325_v27 = vsub.f32 %v9585_v40, %v9736_v18 }
 0x91c   : > { %v5894_v39 = vadd.f32 %v5855_v29, %v5814_v55 }
 0x91e   : > { %7669 = vrcp.f32 %v5894_v39 }
 0x91f   : > { %v7666_v50 = vpop.eup %7665  ;;  %7671 = vpow2.f32 %v5346_v42 }
 0x920   : > { %6092 = vrot.lane.b32.xlu0 %v7666_v50, %s7847_s24  ;;  %6028 = vrot.lane.b32.xlu2 %v7666_v50, %s7846_s19  ;;  %v10043_v57 = vmul.f32 %v7666_v50, %v7660_v26  ;;  %v7668_v22 = vpop.eup %7667 }
 0x921   : > { %5964 = vrot.lane.b32.xlu1 %v7666_v50, %s7845_s2  ;;  %v5697_v5 = vpop.permute.xlu0 %5696 }
 0x922   : > { %v5735_v61 = vadd.f32 %v7668_v22, %v5697_v5  ;;  %v5777_v17 = vpop.permute.xlu1 %5776  ;;  %v5863_v54 = vpop.permute.xlu2 %5862  ;;  %v5324_v5 = vsub.f32 %v9576_v48, %v9724_v16 }
 0x924   : > { %v7670_v56 = vpop.eup %7669  ;;  %v5815_v12 = vadd.f32 %v5777_v17, %v5735_v61 }
 0x925   : > { %v10048_v45 = vmul.f32 %v7670_v56, %v7664_v13  ;;  %v7672_v28 = vpop.eup %7671 }
 0x926   : > { %v5895_v3 = vadd.f32 %v5857_v46, %v5815_v12 }
 0x928   : > { %7673 = vrcp.f32 %v5895_v3  ;;  %6030 = vrot.lane.b32.xlu0 %v7670_v56, %s7846_s19  ;;  %5966 = vrot.lane.b32.xlu2 %v7670_v56, %s7845_s2 }
 0x929   : > { %7675 = vpow2.f32 %v5348_v53  ;;  %6094 = vrot.lane.b32.xlu1 %v7670_v56, %s7847_s24  ;;  %v5859_v23 = vpop.permute.xlu0 %5858  ;;  %v5354_v53 = vmul.f32 1.442695, %v5324_v5 }
 0x92a   : > { %v5699_v26 = vpop.permute.xlu1 %5698  ;;  %v5785_v36 = vpop.permute.xlu2 %5784 }
 0x92b   : > { %v5736_v19 = vadd.f32 %v7672_v28, %v5699_v26 }
 0x92d   : > { %v5816_v7 = vadd.f32 %v5779_v35, %v5736_v19 }
 0x92e   : > { %v7674_v13 = vpop.eup %7673 }
 0x92f   : > { %v7676_v63 = vpop.eup %7675  ;;  %v5896_v46 = vadd.f32 %v5859_v23, %v5816_v7  ;;  %v10055_v55 = vmul.f32 %v7674_v13, %v7668_v22 }
 0x930   : > { %v5737_v29 = vadd.f32 %v7676_v63, %v5701_v60  ;;  %6096 = vrot.lane.b32.xlu2 %v7674_v13, %s7847_s24  ;;  %5968 = vrot.lane.b32.xlu0 %v7674_v13, %s7845_s2  ;;  %v5352_v60 = vmul.f32 1.442695, %v5323_v31 }
 0x931   : > { %7677 = vrcp.f32 %v5896_v46  ;;  %6032 = vrot.lane.b32.xlu1 %v7674_v13, %s7846_s19  ;;  %v5781_v39 = vpop.permute.xlu0 %5780  ;;  %v5356_v46 = vmul.f32 1.442695, %v5325_v27 }
 0x932   : > { %v5817_v11 = vadd.f32 %v5781_v39, %v5737_v29  ;;  %v5861_v50 = vpop.permute.xlu1 %5860  ;;  %v5707_v42 = vpop.permute.xlu2 %5706  ;;  %7679 = vpow2.f32 %v5350_v62 }
 0x934   : > { %v5897_v59 = vadd.f32 %v5861_v50, %v5817_v11 }
 0x936   : > { %7681 = vrcp.f32 %v5897_v59 }
 0x937   : > { %v7678_v35 = vpop.eup %7677  ;;  %7683 = vpow2.f32 %v5352_v60 }
 0x938   : > { %6098 = vrot.lane.b32.xlu0 %v7678_v35, %s7847_s24  ;;  %6034 = vrot.lane.b32.xlu2 %v7678_v35, %s7846_s19  ;;  %v10064_v22 = vmul.f32 %v7678_v35, %v7672_v28  ;;  %v7680_v38 = vpop.eup %7679 }
 0x939   : > { %5970 = vrot.lane.b32.xlu1 %v7678_v35, %s7845_s2  ;;  %v5703_v61 = vpop.permute.xlu0 %5702 }
 0x93a   : > { %v5738_v17 = vadd.f32 %v7680_v38, %v5703_v61  ;;  %v5783_v56 = vpop.permute.xlu1 %5782  ;;  %v5869_v12 = vpop.permute.xlu2 %5868 }
 0x93c   : > { %v7682_v58 = vpop.eup %7681  ;;  %v5818_v33 = vadd.f32 %v5783_v56, %v5738_v17 }
 0x93d   : > { %v10069_v3 = vmul.f32 %v7682_v58, %v7676_v63  ;;  %v7684_v16 = vpop.eup %7683 }
 0x93e   : > { %v5898_v23 = vadd.f32 %v5863_v54, %v5818_v33 }
 0x940   : > { %7685 = vrcp.f32 %v5898_v23  ;;  %6036 = vrot.lane.b32.xlu0 %v7682_v58, %s7846_s19  ;;  %5972 = vrot.lane.b32.xlu2 %v7682_v58, %s7845_s2 }
 0x941   : > { %7687 = vpow2.f32 %v5354_v53  ;;  %6100 = vrot.lane.b32.xlu1 %v7682_v58, %s7847_s24  ;;  %v5865_v48 = vpop.permute.xlu0 %5864 }
 0x942   : > { %v5705_v28 = vpop.permute.xlu1 %5704  ;;  %v6079_v26 = vpop.permute.xlu2 %6078 }
 0x943   : > { %v5739_v19 = vadd.f32 %v7684_v16, %v5705_v28 }
 0x945   : > { %v5819_v7 = vadd.f32 %v5785_v36, %v5739_v19 }
 0x946   : > { %v7686_v13 = vpop.eup %7685 }
 0x947   : > { %v7688_v63 = vpop.eup %7687  ;;  %v5899_v54 = vadd.f32 %v5865_v48, %v5819_v7  ;;  %v10076_v62 = vmul.f32 %v7686_v13, %v7680_v38 }
 0x948   : > { %v5740_v29 = vadd.f32 %v7688_v63, %v5707_v42  ;;  %6102 = vrot.lane.b32.xlu2 %v7686_v13, %s7847_s24  ;;  %5974 = vrot.lane.b32.xlu0 %v7686_v13, %s7845_s2 }
 0x949   : > { %7689 = vrcp.f32 %v5899_v54  ;;  %6038 = vrot.lane.b32.xlu1 %v7686_v13, %s7846_s19  ;;  %v5787_v39 = vpop.permute.xlu0 %5786 }
 0x94a   : > { %v5820_v11 = vadd.f32 %v5787_v39, %v5740_v29  ;;  %v5867_v50 = vpop.permute.xlu1 %5866  ;;  %v6017_v59 = vpop.permute.xlu2 %6016  ;;  %7691 = vpow2.f32 %v5356_v46 }
 0x94b   : > { %v6063_v7 = vmul.f32 %v9762_v37, %v6017_v59 }
 0x94c   : > { %v5900_v40 = vadd.f32 %v5867_v50, %v5820_v11 }
 0x94e   : > { %7693 = vrcp.f32 %v5900_v40 }
 0x94f   : > { %v7690_v18 = vpop.eup %7689 }
 0x950   : > { %6040 = vrot.lane.b32.xlu2 %v7690_v18, %s7846_s19  ;;  %v10082_v36 = vmul.f32 %v7690_v18, %v7684_v16  ;;  %v7692_v42 = vpop.eup %7691  ;;  %v6126_v16 = vmul.f32 %v9747_v24, %v6079_v26 }
 0x951   : > { %5976 = vrot.lane.b32.xlu1 %v7690_v18, %s7845_s2  ;;  %v5709_v31 = vpop.permute.xlu0 %5708 }
 0x952   : > { %v5741_v35 = vadd.f32 %v7692_v42, %v5709_v31  ;;  %v5789_v60 = vpop.permute.xlu1 %5788  ;;  %v5955_v38 = vpop.permute.xlu2 %5954 }
 0x953   : > { %v6000_v46 = vmul.f32 %v9777_v10, %v5955_v38 }
 0x954   : > { %v7694_v5 = vpop.eup %7693  ;;  %v5821_v61 = vadd.f32 %v5789_v60, %v5741_v35 }
 0x955   : > { %6042 = vrot.lane.b32.xlu0 %v7694_v5, %s7846_s19  ;;  %v10086_v17 = vmul.f32 %v7694_v5, %v7688_v63 }
 0x956   : > { %v5901_v56 = vadd.f32 %v5869_v12, %v5821_v61  ;;  %v10382_v61 = vld [vmem:[#allocation13_spill] sm:$0xff] }
 0x958   : > { %7695 = vrcp.f32 %v5901_v56  ;;  %5978 = vrot.lane.b32.xlu2 %v7694_v5, %s7845_s2 }
 0x959   : > { %v5951_v58 = vpop.permute.xlu0 %5950 }
 0x95a   : > { %v5998_v33 = vmul.f32 %v9749_v49, %v5951_v58  ;;  %v6015_v53 = vpop.permute.xlu1 %6014  ;;  %v6085_v23 = vpop.permute.xlu2 %6084 }
 0x95b   : > { %v6062_v48 = vmul.f32 %v9751_v34, %v6015_v53 }
 0x95c   : > { %v6142_v28 = vsel %vm3305_vm2, %v9993_v41, %v5998_v33 }
 0x95d   : > { %v6159_v49 = vsel %vm6158_vm12, %v6142_v28, %v6062_v48  ;;  %v10383_v48 = vld [vmem:[#allocation14_spill] sm:$0xff] }
 0x95e   : > { %v7696_v12 = vpop.eup %7695  ;;  %v6176_v19 = vsel %vm6175_vm13, %v6159_v49, %v6126_v16 }
 0x95f   : > { %6192 = vst [vmem:[%s10099_s4] sm:$0xff] %v6176_v19  ;;  %6044 = vrot.lane.b32.xlu1 %v7696_v12, %s7846_s19  ;;  %5980 = vrot.lane.b32.xlu0 %v7696_v12, %s7845_s2  ;;  %v10106_v24 = vmul.f32 %v7696_v12, %v7692_v42 }
 0x960   : > { %6108 = vrot.lane.b32.xlu2 %v7696_v12, %s7847_s24 }
 0x962   : > { %v6081_v34 = vpop.permute.xlu0 %6080  ;;  %v6023_v41 = vpop.permute.xlu2 %6022 }
 0x963   : > { %v5953_v26 = vpop.permute.xlu1 %5952  ;;  %v6127_v13 = vmul.f32 %v9764_v8, %v6081_v34  ;;  %v6144_v8 = vsel %vm3305_vm2, %v10006_v30, %v6000_v46  ;;  %v10385_v34 = vld [vmem:[#allocation12_spill] sm:$0xff] }
 0x964   : > { %v5999_v27 = vmul.f32 %v9766_v6, %v5953_v26  ;;  %v10386_v26 = vld [vmem:[#allocation16_spill] sm:$0xff] }
 0x966   : > { %v6143_v63 = vsel %vm3305_vm2, %v10001_v51, %v5999_v27 }
 0x967   : > { %v6160_v54 = vsel %vm6158_vm12, %v6143_v63, %v6063_v7  ;;  %6106 = vrot.lane.b32.xlu1 %v7694_v5, %s7847_s24  ;;  %6104 = vrot.lane.b32.xlu0 %v7690_v18, %s7847_s24  ;;  %v10387_v7 = vld [vmem:[#allocation17_spill] sm:$0xff] }
 0x968   : > { %v6177_v29 = vsel %vm6175_vm13, %v6160_v54, %v6127_v13 }
 0x969   : > { %6193 = vst [vmem:[%s10099_s4 + $0x8] sm:$0xff] %v6177_v29 }
 0x96a   : > { %v6019_v6 = vpop.permute.xlu0 %6018  ;;  %v5961_v11 = vpop.permute.xlu2 %5960 }
 0x96b   : > { %v6083_v39 = vpop.permute.xlu1 %6082  ;;  %v6064_v37 = vmul.f32 %v9779_v25, %v6019_v6  ;;  %v6129_v25 = vmul.f32 %v9792_v43, %v6085_v23  ;;  %v6003_v56 = vmul.f32 %v10382_v61, %v5961_v11  ;;  %v10390_v11 = vld [vmem:[#allocation18_spill] sm:$0xff] }
 0x96c   : > { %v6128_v51 = vmul.f32 %v9781_v1, %v6083_v39  ;;  %v10388_v39 = vld [vmem:[#allocation19_spill] sm:$0xff]  ;;  %v10395_v61 = vld [vmem:[#allocation26_spill] sm:$0xff] }
 0x96d   : > { %v6161_v50 = vsel %vm6158_vm12, %v6144_v8, %v6064_v37  ;;  %v10389_v8 = vld [vmem:[#allocation20_spill] sm:$0xff] }
 0x96e   : > { %v6178_v59 = vsel %vm6175_vm13, %v6161_v50, %v6128_v51 }
 0x96f   : > { %6194 = vst [vmem:[%s10099_s4 + $0x10] sm:$0xff] %v6178_v59 }
 0x972   : > { %v5957_v10 = vpop.permute.xlu0 %5956  ;;  %v6091_v31 = vpop.permute.xlu2 %6090 }
 0x973   : > { %v6021_v40 = vpop.permute.xlu1 %6020  ;;  %v6001_v18 = vmul.f32 %v9794_v9, %v5957_v10  ;;  %v6066_v9 = vmul.f32 %v9807_v52, %v6023_v41  ;;  %v6147_v52 = vsel %vm3305_vm2, %v10027_v4, %v6003_v56  ;;  %v6132_v13 = vmul.f32 %v10387_v7, %v6091_v31  ;;  %v10391_v10 = vld [vmem:[#allocation22_spill] sm:$0xff] }
 0x974   : > { %v6065_v42 = vmul.f32 %v9796_v20, %v6021_v40 }
 0x975   : > { %v6145_v30 = vsel %vm3305_vm2, %v10013_v0, %v6001_v18 }
 0x976   : > { %v6162_v1 = vsel %vm6158_vm12, %v6145_v30, %v6065_v42  ;;  %v10392_v30 = vld [vmem:[#allocation23_spill] sm:$0xff] }
 0x977   : > { %v6179_v35 = vsel %vm6175_vm13, %v6162_v1, %v6129_v25 }
 0x978   : > { %6195 = vst [vmem:[%s10099_s4 + $0x18] sm:$0xff] %v6179_v35  ;;  %v10393_v35 = vld [vmem:[#allocation21_spill] sm:$0xff] }
 0x97a   : > { %v6087_v60 = vpop.permute.xlu0 %6086  ;;  %v6029_v33 = vpop.permute.xlu2 %6028 }
 0x97b   : > { %v5959_v38 = vpop.permute.xlu1 %5958  ;;  %v6130_v20 = vmul.f32 %v9809_v15, %v6087_v60  ;;  %v10384_v15 = vld [vmem:[#allocation15_spill] sm:$0xff]  ;;  %v6069_v51 = vmul.f32 %v10389_v8, %v6029_v33  ;;  %v10403_v8 = vld [vmem:[#allocation33_spill] sm:$0xff] }
 0x97c   : > { %v6002_v5 = vmul.f32 %v9811_v14, %v5959_v38 }
 0x97e   : > { %v6146_v43 = vsel %vm3305_vm2, %v10022_v21, %v6002_v5 }
 0x97f   : > { %v6163_v0 = vsel %vm6158_vm12, %v6146_v43, %v6066_v9  ;;  %v10394_v43 = vld [vmem:[#allocation25_spill] sm:$0xff] }
 0x980   : > { %v6180_v58 = vsel %vm6175_vm13, %v6163_v0, %v6130_v20 }
 0x981   : > { %6196 = vst [vmem:[%s10099_s4 + $0x20] sm:$0xff] %v6180_v58  ;;  %v10396_v58 = vld [vmem:[#allocation24_spill] sm:$0xff] }
 0x982   : > { %v6025_v53 = vpop.permute.xlu0 %6024  ;;  %v5967_v49 = vpop.permute.xlu2 %5966 }
 0x983   : > { %v6089_v23 = vpop.permute.xlu1 %6088  ;;  %v6067_v14 = vmul.f32 %v10383_v48, %v6025_v53  ;;  %v6006_v40 = vmul.f32 %v10391_v10, %v5967_v49  ;;  %v10399_v49 = vld [vmem:[#allocation28_spill] sm:$0xff] }
 0x984   : > { %v6131_v16 = vmul.f32 %v10384_v15, %v6089_v23  ;;  %v10397_v15 = vld [vmem:[#allocation29_spill] sm:$0xff] }
 0x985   : > { %v6164_v21 = vsel %vm6158_vm12, %v6147_v52, %v6067_v14  ;;  %v6150_v31 = vsel %vm3305_vm2, %v10048_v45, %v6006_v40 }
 0x986   : > { %v6181_v28 = vsel %vm6175_vm13, %v6164_v21, %v6131_v16  ;;  %v10398_v21 = vld [vmem:[#allocation27_spill] sm:$0xff] }
 0x987   : > { %6197 = vst [vmem:[%s10099_s4 + $0x28] sm:$0xff] %v6181_v28 }
 0x98a   : > { %v5963_v12 = vpop.permute.xlu0 %5962  ;;  %v6097_v6 = vpop.permute.xlu2 %6096 }
 0x98b   : > { %v6027_v19 = vpop.permute.xlu1 %6026  ;;  %v6004_v41 = vmul.f32 %v10385_v34, %v5963_v12  ;;  %v6135_v33 = vmul.f32 %v10396_v58, %v6097_v6  ;;  %v10400_v34 = vld [vmem:[#allocation30_spill] sm:$0xff] }
 0x98c   : > { %v6068_v27 = vmul.f32 %v10386_v26, %v6027_v19 }
 0x98d   : > { %v6148_v4 = vsel %vm3305_vm2, %v10034_v44, %v6004_v41 }
 0x98e   : > { %v6165_v63 = vsel %vm6158_vm12, %v6148_v4, %v6068_v27  ;;  %v10401_v4 = vld [vmem:[#allocation31_spill] sm:$0xff] }
 0x98f   : > { %v6182_v54 = vsel %vm6175_vm13, %v6165_v63, %v6132_v13 }
 0x990   : > { %6198 = vst [vmem:[%s10099_s4 + $0x30] sm:$0xff] %v6182_v54 }
 0x992   : > { %v6093_v46 = vpop.permute.xlu0 %6092 }
 0x993   : > { %v5965_v29 = vpop.permute.xlu1 %5964  ;;  %v6133_v50 = vmul.f32 %v10390_v11, %v6093_v46  ;;  %v10402_v46 = vld [vmem:[#allocation32_spill] sm:$0xff] }
 0x994   : > { %v6005_v37 = vmul.f32 %v10388_v39, %v5965_v29 }
 0x996   : > { %v6149_v59 = vsel %vm3305_vm2, %v10043_v57, %v6005_v37  ;;  %v6035_v57 = vpop.permute.xlu2 %6034 }
 0x997   : > { %v6166_v44 = vsel %vm6158_vm12, %v6149_v59, %v6069_v51  ;;  %v6072_v28 = vmul.f32 %v10398_v21, %v6035_v57  ;;  %v10406_v57 = vld [vmem:[#allocation37_spill] sm:$0xff] }
 0x998   : > { %v6183_v18 = vsel %vm6175_vm13, %v6166_v44, %v6133_v50  ;;  %v10404_v50 = vld [vmem:[#allocation34_spill] sm:$0xff] }
 0x999   : > { %6199 = vst [vmem:[%s10099_s4 + $0x38] sm:$0xff] %v6183_v18 }
 0x99a   : > { %v6031_v42 = vpop.permute.xlu0 %6030 }
 0x99b   : > { %v6095_v25 = vpop.permute.xlu1 %6094  ;;  %v6070_v1 = vmul.f32 %v10392_v30, %v6031_v42 }
 0x99c   : > { %v6134_v60 = vmul.f32 %v10393_v35, %v6095_v25 }
 0x99d   : > { %v6167_v38 = vsel %vm6158_vm12, %v6150_v31, %v6070_v1 }
 0x99e   : > { %v6184_v5 = vsel %vm6175_vm13, %v6167_v38, %v6134_v60  ;;  %v5973_v48 = vpop.permute.xlu2 %5972 }
 0x99f   : > { %6200 = vst [vmem:[%s10099_s4 + $0x40] sm:$0xff] %v6184_v5  ;;  %v6009_v41 = vmul.f32 %v10400_v34, %v5973_v48  ;;  %v10411_v48 = vld [vmem:[#allocation36_spill] sm:$0xff] }
 0x9a1   : > { %v6153_v54 = vsel %vm3305_vm2, %v10069_v3, %v6009_v41 }
 0x9a2   : > { %v5969_v9 = vpop.permute.xlu0 %5968 }
 0x9a3   : > { %v6033_v20 = vpop.permute.xlu1 %6032  ;;  %v6007_v0 = vmul.f32 %v10394_v43, %v5969_v9 }
 0x9a4   : > { %v6071_v56 = vmul.f32 %v10395_v61, %v6033_v20  ;;  %v10407_v20 = vld [vmem:[#allocation38_spill] sm:$0xff]  ;;  %v10408_v61 = vld [vmem:[#allocation39_spill] sm:$0xff] }
 0x9a5   : > { %v6151_v45 = vsel %vm3305_vm2, %v10055_v55, %v6007_v0 }
 0x9a6   : > { %v6168_v53 = vsel %vm6158_vm12, %v6151_v45, %v6071_v56  ;;  %v6103_v27 = vpop.permute.xlu2 %6102 }
 0x9a7   : > { %v6185_v23 = vsel %vm6175_vm13, %v6168_v53, %v6135_v33  ;;  %v6138_v44 = vmul.f32 %v9929_v47, %v6103_v27  ;;  %v10405_v47 = vld [vmem:[#allocation41_spill] sm:$0xff]  ;;  %v10410_v53 = vld [vmem:[#allocation40_spill] sm:$0xff] }
 0x9a8   : > { %6201 = vst [vmem:[%s10099_s4 + $0x48] sm:$0xff] %v6185_v23 }
 0x9aa   : > { %v6099_v14 = vpop.permute.xlu0 %6098 }
 0x9ab   : > { %v5971_v52 = vpop.permute.xlu1 %5970  ;;  %v6136_v12 = vmul.f32 %v10399_v49, %v6099_v14 }
 0x9ac   : > { %v6008_v16 = vmul.f32 %v10397_v15, %v5971_v52 }
 0x9ae   : > { %v6152_v19 = vsel %vm3305_vm2, %v10064_v22, %v6008_v16  ;;  %v6041_v11 = vpop.permute.xlu2 %6040 }
 0x9af   : > { %v6169_v55 = vsel %vm6158_vm12, %v6152_v19, %v6072_v28 }
 0x9b0   : > { %v6186_v26 = vsel %vm6175_vm13, %v6169_v55, %v6136_v12 }
 0x9b1   : > { %6202 = vst [vmem:[%s10099_s4 + $0x50] sm:$0xff] %v6186_v26 }
 0x9b2   : > { %v6037_v7 = vpop.permute.xlu0 %6036 }
 0x9b3   : > { %v6101_v13 = vpop.permute.xlu1 %6100  ;;  %v6073_v63 = vmul.f32 %v10401_v4, %v6037_v7 }
 0x9b4   : > { %v6137_v29 = vmul.f32 %v10402_v46, %v6101_v13 }
 0x9b5   : > { %v6170_v22 = vsel %vm6158_vm12, %v6153_v54, %v6073_v63 }
 0x9b6   : > { %v6187_v6 = vsel %vm6175_vm13, %v6170_v22, %v6137_v29  ;;  %v5979_v18 = vpop.permute.xlu2 %5978 }
 0x9b7   : > { %6203 = vst [vmem:[%s10099_s4 + $0x58] sm:$0xff] %v6187_v6  ;;  %v6012_v43 = vmul.f32 %v10407_v20, %v5979_v18 }
 0x9ba   : > { %v5975_v39 = vpop.permute.xlu0 %5974 }
 0x9bb   : > { %v6039_v37 = vpop.permute.xlu1 %6038  ;;  %v6010_v51 = vmul.f32 %v10403_v8, %v5975_v39 }
 0x9bc   : > { %v6074_v59 = vmul.f32 %v10404_v50, %v6039_v37 }
 0x9bd   : > { %v6154_v10 = vsel %vm3305_vm2, %v10076_v62, %v6010_v51 }
 0x9be   : > { %v6171_v3 = vsel %vm6158_vm12, %v6154_v10, %v6074_v59  ;;  %v6109_v30 = vpop.permute.xlu2 %6108 }
 0x9bf   : > { %v6188_v40 = vsel %vm6175_vm13, %v6171_v3, %v6138_v44  ;;  %v6141_v38 = vmul.f32 %v10405_v47, %v6109_v30 }
 0x9c0   : > { %6204 = vst [vmem:[%s10099_s4 + $0x60] sm:$0xff] %v6188_v40 }
 0x9c3   : > { %v5977_v42 = vpop.permute.xlu1 %5976 }
 0x9c4   : > { %v6011_v62 = vmul.f32 %v10406_v57, %v5977_v42 }
 0x9c7   : > { %v6043_v25 = vpop.permute.xlu0 %6042 }
 0x9c8   : > { %v6076_v56 = vmul.f32 %v10408_v61, %v6043_v25 }
 0x9d1   : > { %v6045_v1 = vpop.permute.xlu1 %6044  ;;  %v5981_v31 = vpop.permute.xlu0 %5980 }
 0x9d2   : > { %v6077_v35 = vmul.f32 %v9982_v2, %v6045_v1  ;;  %v6013_v60 = vmul.f32 %v9979_v32, %v5981_v31  ;;  %v6155_v2 = vsel %vm3305_vm2, %v10082_v36, %v6011_v62  ;;  %v10409_v32 = vld [vmem:[#allocation35_spill] sm:$0xff] }
 0x9d3   : > { %v6075_v58 = vmul.f32 %v10409_v32, %v6041_v11 }
 0x9d4   : > { %v6157_v5 = vsel %vm3305_vm2, %v10106_v24, %v6013_v60  ;;  %v6156_v24 = vsel %vm3305_vm2, %v10086_v17, %v6012_v43 }
 0x9d5   : > { %v6174_v9 = vsel %vm6158_vm12, %v6157_v5, %v6077_v35  ;;  %v6173_v52 = vsel %vm6158_vm12, %v6156_v24, %v6076_v56  ;;  %v6172_v15 = vsel %vm6158_vm12, %v6155_v2, %v6075_v58 }
 0x9d6   : > { %v6191_v0 = vsel %vm6175_vm13, %v6174_v9, %v6141_v38 }
 0x9d7   : > { %6207 = vst [vmem:[%s10099_s4 + $0x78] sm:$0xff] %v6191_v0 }
 0x9d9   : > { %v6107_v33 = vpop.permute.xlu1 %6106  ;;  %v6105_v45 = vpop.permute.xlu0 %6104 }
 0x9da   : > { %v6140_v23 = vmul.f32 %v10410_v53, %v6107_v33  ;;  %v6139_v14 = vmul.f32 %v10411_v48, %v6105_v45 }
 0x9dc   : > { %v6190_v16 = vsel %vm6175_vm13, %v6173_v52, %v6140_v23  ;;  %v6189_v21 = vsel %vm6175_vm13, %v6172_v15, %v6139_v14 }
 0x9dd   : > { %6206 = vst [vmem:[%s10099_s4 + $0x70] sm:$0xff] %v6190_v16 }
 0x9de   : > { %6205 = vst [vmem:[%s10099_s4 + $0x68] sm:$0xff] %v6189_v21 }
 0x9df PF: > { %s37_s5 = sadd.s32 1, %s7835_s5  }
 0x9e0   : > { %p34_p7 = scmp.ge.s32.totalorder %s37_s5, 4  }
 0x9e2   :  { %36 = sbr.rel (!%p34_p7) target bundleno = 18 (0x12), region = 163 }
 0x9e7   :  { %6230 = vsyncpa [#allocation3], 1 }
 0x9e8   :  { %6232 = vsyncpa [#allocation3 + $0x1], 1 }
 0x9e9   :  { %6233 = vsyncpa [#allocation5], 1 }
 0x9ea   :  { %6234 = vsyncpa [#allocation8], 1 }

</bundles_post_ra>
